<compile_context>
chip_gen: v7x
topology: tpu7x:2x2x1
jax: 0.10.0
libtpu: 0.0.40
codegen_flags: <defaults>
</compile_context>

<pallas_src>
import jax
import jax.numpy as jnp
from jax.experimental import pallas as pl
from jax.experimental.pallas import tpu as pltpu

ATTN = 2048  # self.attn in the PyTorch module (== input channels)


def _fre_kernel(x_ref, wspa_ref, bspa_ref, w1_ref, w2_ref, out_ref):
    # x_ref:    (B, C, P)    bf16  batch-block of NCHW activations (spatial flattened)
    # wspa_ref: (P, C)       bf16  1x1-conv weight (natural PyTorch layout)
    # bspa_ref: (P, 1)       f32   1x1-conv bias as a column (indexed by out-channel)
    # w1_ref:   (P, P)       bf16  fc1 / fc11 weight
    # w2_ref:   (ATTN, P)    bf16  fc2 / fc22 weight
    # out_ref:  (B, P, ATTN) f32   per-batch transposed bmm output (lane-dense store)
    wspa = wspa_ref[...]
    bspa = bspa_ref[...]
    w1 = w1_ref[...]
    w2 = w2_ref[...]

    bb = x_ref.shape[0]
    for b in range(bb):  # static unroll over the small batch block
        xb = x_ref[b]                                                        # (C, P)

        # 1x1 conv over channels: embT[q, s] = sum_c wspa[q, c] * x[c, s] + bias[q]
        embT = jnp.dot(wspa, xb,
                       preferred_element_type=jnp.float32) + bspa            # (P, P) f32
        embT_bf = embT.astype(jnp.bfloat16)   # cast once; reused by fc path and bmm

        # TODO(synk): nn.Dropout(p=0.5) is identity in eval mode; training-mode RNG
        # dropout is not implemented here.
        hbaT = jnp.maximum(
            jnp.dot(w1, embT_bf, preferred_element_type=jnp.float32), 0.0)   # (P, P)
        imgT = jnp.dot(w2, hbaT.astype(jnp.bfloat16),
                       preferred_element_type=jnp.float32)                   # (ATTN, P)

        # torch.bmm(_img, emb):  out[a, c] = sum_s img[s, a] * emb[s, c]
        # computed transposed (lane-dense):  outT[c, a] = sum_s embT[c, s] * imgT[a, s]
        outT = jax.lax.dot_general(embT_bf, imgT.astype(jnp.bfloat16),
                                   (((1,), (1,)), ((), ())),
                                   preferred_element_type=jnp.float32)       # (P, ATTN)
        out_ref[b] = outT


def _pick_block_batch(n, p):
    """Batch elements per grid step: amortize per-step overhead, but keep >= 2 grid
    steps when possible so ("parallel",) can shard across v7x's two TensorCores."""
    max_b = 4 if p >= 196 else 8
    cands = [b for b in range(1, max_b + 1) if n % b == 0 and n // b >= 2]
    return max(cands) if cands else 1


def fre_forward(x, params):
    """x: (N, 2048, H, W) float32, NCHW.  Returns (N, 2048, H, W) float32."""
    N, C, H, W = x.shape
    P = H * W
    if H == 14:
        wspa, bspa, w1, w2 = (params["spa_w"], params["spa_b"],
                              params["fc1_w"], params["fc2_w"])
    else:
        wspa, bspa, w1, w2 = (params["spa1_w"], params["spa1_b"],
                              params["fc11_w"], params["fc22_w"])

    B = _pick_block_batch(N, P)

    # NCHW -> (N, C, P) is a free view (no XLA transpose / extra HBM round trip);
    # the kernel works channel-major so no activation transpose is needed at all.
    x_ncp = x.reshape(N, C, P).astype(jnp.bfloat16)
    wspa_bf = wspa.astype(jnp.bfloat16)              # (P, C)
    w1_bf = w1.astype(jnp.bfloat16)                  # (P, P)
    w2_bf = w2.astype(jnp.bfloat16)                  # (ATTN, P)
    bspa_col = bspa.reshape(P, 1).astype(jnp.float32)

    def build(single_buffer_weights):
        def wspec(shape):
            kw = {}
            if single_buffer_weights:
                # Weights are grid-invariant: no need for a second pipeline buffer.
                kw["pipeline_mode"] = pl.Buffered(1)
            return pl.BlockSpec(shape, lambda i: (0,) * len(shape), **kw)

        return pl.pallas_call(
            _fre_kernel,
            out_shape=jax.ShapeDtypeStruct((N, P, ATTN), jnp.float32),
            grid_spec=pltpu.PrefetchScalarGridSpec(
                num_scalar_prefetch=0,
                grid=(N // B,),
                in_specs=[
                    pl.BlockSpec((B, C, P), lambda i: (i, 0, 0)),
                    wspec((P, C)),
                    wspec((P, 1)),
                    wspec((P, P)),
                    wspec((ATTN, P)),
                ],
                out_specs=pl.BlockSpec((B, P, ATTN), lambda i: (i, 0, 0)),
            ),
            compiler_params=pltpu.CompilerParams(
                dimension_semantics=("parallel",),
                vmem_limit_bytes=48 * 1024 * 1024,
            ),
        )

    try:
        out_pa = build(True)(x_ncp, wspa_bf, bspa_col, w1_bf, w2_bf)
    except Exception:
        # Fallback if this JAX build rejects pl.Buffered(1) on pallas_call inputs.
        out_pa = build(False)(x_ncp, wspa_bf, bspa_col, w1_bf, w2_bf)

    # Lane-dense (N, P, ATTN) kernel output -> NCHW; cheap XLA transpose outside kernel.
    return jnp.transpose(out_pa, (0, 2, 1)).reshape(N, ATTN, H, W)


def fre_reference(x, params):
    """Pure-JAX f32 reference of the PyTorch forward (dropout in eval mode)."""
    N, C, H, W = x.shape
    P = H * W
    if H == 14:
        wspa, bspa, w1, w2 = (params["spa_w"], params["spa_b"],
                              params["fc1_w"], params["fc2_w"])
    else:
        wspa, bspa, w1, w2 = (params["spa1_w"], params["spa1_b"],
                              params["fc11_w"], params["fc22_w"])
    hi = jax.lax.Precision.HIGHEST
    xt = jnp.transpose(x.reshape(N, C, P), (0, 2, 1))                 # (N, P, C)
    emb = jnp.einsum("npc,qc->npq", xt, wspa, precision=hi) + bspa    # (N, P, P)
    hba = jax.nn.relu(jnp.einsum("npq,rq->npr", emb, w1, precision=hi))
    img = jnp.einsum("npr,ar->npa", hba, w2, precision=hi)            # (N, P, ATTN)
    out = jnp.einsum("npa,npc->nac", img, emb, precision=hi)          # (N, ATTN, P)
    return out.reshape(N, ATTN, H, W)


def init_params(key, scale=0.02):
    ks = jax.random.split(key, 8)
    f32 = jnp.float32
    return {
        # 14x14 branch parameters
        "spa_w":  scale * jax.random.normal(ks[0], (196, 2048), f32),
        "spa_b":  scale * jax.random.normal(ks[1], (196,), f32),
        "fc1_w":  scale * jax.random.normal(ks[2], (196, 196), f32),
        "fc2_w":  scale * jax.random.normal(ks[3], (2048, 196), f32),
        # 7x7 branch parameters
        "spa1_w": scale * jax.random.normal(ks[4], (49, 2048), f32),
        "spa1_b": scale * jax.random.normal(ks[5], (49,), f32),
        "fc11_w": scale * jax.random.normal(ks[6], (49, 49), f32),
        "fc22_w": scale * jax.random.normal(ks[7], (2048, 49), f32),
    }


if __name__ == "__main__":
    key = jax.random.PRNGKey(0)
    kp, kx = jax.random.split(key)
    params = init_params(kp)

    # Smallest shapes consistent with the module: else-branch (7x7 spatial),
    # channels must be 2048 for the 1x1 conv.
    x = jax.random.normal(kx, (2, 2048, 7, 7), jnp.float32)

    out = jax.block_until_ready(fre_forward(x, params))
    ref = jax.block_until_ready(fre_reference(x, params))

    assert out.shape == (2, 2048, 7, 7), out.shape
    assert bool(jnp.all(jnp.isfinite(out)))
    max_err = float(jnp.max(jnp.abs(out - ref)))
    assert bool(jnp.allclose(out, ref, rtol=2e-2, atol=5e-3)), max_err

    print("KERNEL_OK")
</pallas_src>

<mosaic_0001>
module attributes {stable_mosaic.version = 11 : i64} {
  func.func @_fre_kernel(%arg0: i32, %arg1: memref<1x2048x49xbf16, #tpu.memory_space<vmem>>, %arg2: memref<49x2048xbf16, #tpu.memory_space<vmem>>, %arg3: memref<49x1xf32, #tpu.memory_space<vmem>>, %arg4: memref<49x49xbf16, #tpu.memory_space<vmem>>, %arg5: memref<2048x49xbf16, #tpu.memory_space<vmem>>, %arg6: memref<1x49x2048xf32, #tpu.memory_space<vmem>>) attributes {dimension_semantics = [#tpu.dimension_semantics<parallel>], iteration_bounds = array<i64: 2>, scalar_prefetch = 0 : i64, scratch_operands = 0 : i64, tpu.core_type = #tpu.core_type<tc>, window_params = [{transform_indices = @transform_0, window_bounds = array<i64: 1, 2048, 49>}, {pipeline_mode = #tpu.pipeline_mode<synchronous>, transform_indices = @transform_1, window_bounds = array<i64: 49, 2048>}, {pipeline_mode = #tpu.pipeline_mode<synchronous>, transform_indices = @transform_2, window_bounds = array<i64: 49, 1>}, {pipeline_mode = #tpu.pipeline_mode<synchronous>, transform_indices = @transform_3, window_bounds = array<i64: 49, 49>}, {pipeline_mode = #tpu.pipeline_mode<synchronous>, transform_indices = @transform_4, window_bounds = array<i64: 2048, 49>}, {transform_indices = @transform_5, window_bounds = array<i64: 1, 49, 2048>}]} {
    %c0 = arith.constant 0 : index
    %c0_0 = arith.constant 0 : index
    %0 = vector.load %arg2[%c0, %c0_0] : memref<49x2048xbf16, #tpu.memory_space<vmem>>, vector<49x2048xbf16>
    %c0_1 = arith.constant 0 : index
    %c0_2 = arith.constant 0 : index
    %1 = vector.load %arg3[%c0_1, %c0_2] : memref<49x1xf32, #tpu.memory_space<vmem>>, vector<49x1xf32>
    %c0_3 = arith.constant 0 : index
    %c0_4 = arith.constant 0 : index
    %2 = vector.load %arg4[%c0_3, %c0_4] : memref<49x49xbf16, #tpu.memory_space<vmem>>, vector<49x49xbf16>
    %c0_5 = arith.constant 0 : index
    %c0_6 = arith.constant 0 : index
    %3 = vector.load %arg5[%c0_5, %c0_6] : memref<2048x49xbf16, #tpu.memory_space<vmem>>, vector<2048x49xbf16>
    %c0_7 = arith.constant 0 : index
    %c0_8 = arith.constant 0 : index
    %c0_9 = arith.constant 0 : index
    %4 = vector.load %arg1[%c0_7, %c0_8, %c0_9] : memref<1x2048x49xbf16, #tpu.memory_space<vmem>>, vector<1x2048x49xbf16>
    %5 = vector.shape_cast %4 : vector<1x2048x49xbf16> to vector<2048x49xbf16>
    %cst = arith.constant dense<0.000000e+00> : vector<49x49xf32>
    %6 = tpu.matmul %0, %5, %cst {dimension_numbers = #tpu.dot_dimension_numbers<[1], [0], [0], [1], [0, 0, 1, 1], [], []>} : vector<49x2048xbf16>, vector<2048x49xbf16>, vector<49x49xf32> -> vector<49x49xf32>
    %7 = vector.broadcast %1 : vector<49x1xf32> to vector<49x49xf32>
    %8 = arith.addf %6, %7 : vector<49x49xf32>
    %9 = arith.truncf %8 : vector<49x49xf32> to vector<49x49xbf16>
    %cst_10 = arith.constant dense<0.000000e+00> : vector<49x49xf32>
    %10 = tpu.matmul %2, %9, %cst_10 {dimension_numbers = #tpu.dot_dimension_numbers<[1], [0], [0], [1], [0, 0, 1, 1], [], []>} : vector<49x49xbf16>, vector<49x49xbf16>, vector<49x49xf32> -> vector<49x49xf32>
    %cst_11 = arith.constant 0.000000e+00 : f32
    %11 = vector.broadcast %cst_11 : f32 to vector<49x49xf32>
    %12 = arith.maximumf %10, %11 : vector<49x49xf32>
    %13 = arith.truncf %12 : vector<49x49xf32> to vector<49x49xbf16>
    %cst_12 = arith.constant dense<0.000000e+00> : vector<2048x49xf32>
    %14 = tpu.matmul %3, %13, %cst_12 {dimension_numbers = #tpu.dot_dimension_numbers<[1], [0], [0], [1], [0, 0, 1, 1], [], []>} : vector<2048x49xbf16>, vector<49x49xbf16>, vector<2048x49xf32> -> vector<2048x49xf32>
    %15 = arith.truncf %14 : vector<2048x49xf32> to vector<2048x49xbf16>
    %cst_13 = arith.constant dense<0.000000e+00> : vector<49x2048xf32>
    %16 = tpu.matmul %9, %15, %cst_13 {dimension_numbers = #tpu.dot_dimension_numbers<[1], [1], [0], [0], [0, 0, 1, 0], [], []>} : vector<49x49xbf16>, vector<2048x49xbf16>, vector<49x2048xf32> -> vector<49x2048xf32>
    %c0_14 = arith.constant 0 : index
    %c0_15 = arith.constant 0 : index
    %c0_16 = arith.constant 0 : index
    %17 = vector.load %arg6[%c0_14, %c0_15, %c0_16] : memref<1x49x2048xf32, #tpu.memory_space<vmem>>, vector<1x49x2048xf32>
    %18 = vector.shape_cast %17 : vector<1x49x2048xf32> to vector<49x2048xf32>
    %19 = vector.shape_cast %16 : vector<49x2048xf32> to vector<1x49x2048xf32>
    tpu.vector_store %arg6[%c0_14, %c0_15, %c0_16], %19 {strides = array<i32>} : memref<1x49x2048xf32, #tpu.memory_space<vmem>>, vector<1x49x2048xf32>,
    return
  }
  func.func @transform_0(%arg0: i32) -> (i32, i32, i32) {
    %c0_i32 = arith.constant 0 : i32
    %c0_i32_0 = arith.constant 0 : i32
    %c0_i32_1 = arith.constant 0 : i32
    return %arg0, %c0_i32, %c0_i32_0 : i32, i32, i32
  }
  func.func @transform_1(%arg0: i32) -> (i32, i32) {
    %c0_i32 = arith.constant 0 : i32
    %c0_i32_0 = arith.constant 0 : i32
    %c0_i32_1 = arith.constant 0 : i32
    return %c0_i32, %c0_i32_0 : i32, i32
  }
  func.func @transform_2(%arg0: i32) -> (i32, i32) {
    %c0_i32 = arith.constant 0 : i32
    %c0_i32_0 = arith.constant 0 : i32
    %c0_i32_1 = arith.constant 0 : i32
    return %c0_i32, %c0_i32_0 : i32, i32
  }
  func.func @transform_3(%arg0: i32) -> (i32, i32) {
    %c0_i32 = arith.constant 0 : i32
    %c0_i32_0 = arith.constant 0 : i32
    %c0_i32_1 = arith.constant 0 : i32
    return %c0_i32, %c0_i32_0 : i32, i32
  }
  func.func @transform_4(%arg0: i32) -> (i32, i32) {
    %c0_i32 = arith.constant 0 : i32
    %c0_i32_0 = arith.constant 0 : i32
    %c0_i32_1 = arith.constant 0 : i32
    return %c0_i32, %c0_i32_0 : i32, i32
  }
  func.func @transform_5(%arg0: i32) -> (i32, i32, i32) {
    %c0_i32 = arith.constant 0 : i32
    %c0_i32_0 = arith.constant 0 : i32
    %c0_i32_1 = arith.constant 0 : i32
    return %arg0, %c0_i32, %c0_i32_0 : i32, i32, i32
  }
}

module attributes {stable_mosaic.version = 11 : i64} {
  func.func @_fre_kernel(%arg0: i32, %arg1: memref<1x2048x49xbf16, #tpu.memory_space<vmem>>, %arg2: memref<49x2048xbf16, #tpu.memory_space<vmem>>, %arg3: memref<49x1xf32, #tpu.memory_space<vmem>>, %arg4: memref<49x49xbf16, #tpu.memory_space<vmem>>, %arg5: memref<2048x49xbf16, #tpu.memory_space<vmem>>, %arg6: memref<1x49x2048xf32, #tpu.memory_space<vmem>>) attributes {dimension_semantics = [#tpu.dimension_semantics<parallel>], iteration_bounds = array<i64: 2>, scalar_prefetch = 0 : i64, scratch_operands = 0 : i64, tpu.core_type = #tpu.core_type<tc>, window_params = [{transform_indices = @transform_0, window_bounds = array<i64: 1, 2048, 49>}, {pipeline_mode = #tpu.pipeline_mode<synchronous>, transform_indices = @transform_1, window_bounds = array<i64: 49, 2048>}, {pipeline_mode = #tpu.pipeline_mode<synchronous>, transform_indices = @transform_2, window_bounds = array<i64: 49, 1>}, {pipeline_mode = #tpu.pipeline_mode<synchronous>, transform_indices = @transform_3, window_bounds = array<i64: 49, 49>}, {pipeline_mode = #tpu.pipeline_mode<synchronous>, transform_indices = @transform_4, window_bounds = array<i64: 2048, 49>}, {transform_indices = @transform_5, window_bounds = array<i64: 1, 49, 2048>}]} {
    %c0 = arith.constant 0 : index
    %c0_0 = arith.constant 0 : index
    %0 = vector.load %arg2[%c0, %c0_0] : memref<49x2048xbf16, #tpu.memory_space<vmem>>, vector<49x2048xbf16>
    %c0_1 = arith.constant 0 : index
    %c0_2 = arith.constant 0 : index
    %1 = vector.load %arg3[%c0_1, %c0_2] : memref<49x1xf32, #tpu.memory_space<vmem>>, vector<49x1xf32>
    %c0_3 = arith.constant 0 : index
    %c0_4 = arith.constant 0 : index
    %2 = vector.load %arg4[%c0_3, %c0_4] : memref<49x49xbf16, #tpu.memory_space<vmem>>, vector<49x49xbf16>
    %c0_5 = arith.constant 0 : index
    %c0_6 = arith.constant 0 : index
    %3 = vector.load %arg5[%c0_5, %c0_6] : memref<2048x49xbf16, #tpu.memory_space<vmem>>, vector<2048x49xbf16>
    %c0_7 = arith.constant 0 : index
    %c0_8 = arith.constant 0 : index
    %c0_9 = arith.constant 0 : index
    %4 = vector.load %arg1[%c0_7, %c0_8, %c0_9] : memref<1x2048x49xbf16, #tpu.memory_space<vmem>>, vector<1x2048x49xbf16>
    %5 = vector.shape_cast %4 : vector<1x2048x49xbf16> to vector<2048x49xbf16>
    %cst = arith.constant dense<0.000000e+00> : vector<49x49xf32>
    %6 = tpu.matmul %0, %5, %cst {dimension_numbers = #tpu.dot_dimension_numbers<[1], [0], [0], [1], [0, 0, 1, 1], [], []>} : vector<49x2048xbf16>, vector<2048x49xbf16>, vector<49x49xf32> -> vector<49x49xf32>
    %7 = vector.broadcast %1 : vector<49x1xf32> to vector<49x49xf32>
    %8 = arith.addf %6, %7 : vector<49x49xf32>
    %9 = arith.truncf %8 : vector<49x49xf32> to vector<49x49xbf16>
    %cst_10 = arith.constant dense<0.000000e+00> : vector<49x49xf32>
    %10 = tpu.matmul %2, %9, %cst_10 {dimension_numbers = #tpu.dot_dimension_numbers<[1], [0], [0], [1], [0, 0, 1, 1], [], []>} : vector<49x49xbf16>, vector<49x49xbf16>, vector<49x49xf32> -> vector<49x49xf32>
    %cst_11 = arith.constant 0.000000e+00 : f32
    %11 = vector.broadcast %cst_11 : f32 to vector<49x49xf32>
    %12 = arith.maximumf %10, %11 : vector<49x49xf32>
    %13 = arith.truncf %12 : vector<49x49xf32> to vector<49x49xbf16>
    %cst_12 = arith.constant dense<0.000000e+00> : vector<2048x49xf32>
    %14 = tpu.matmul %3, %13, %cst_12 {dimension_numbers = #tpu.dot_dimension_numbers<[1], [0], [0], [1], [0, 0, 1, 1], [], []>} : vector<2048x49xbf16>, vector<49x49xbf16>, vector<2048x49xf32> -> vector<2048x49xf32>
    %15 = arith.truncf %14 : vector<2048x49xf32> to vector<2048x49xbf16>
    %cst_13 = arith.constant dense<0.000000e+00> : vector<49x2048xf32>
    %16 = tpu.matmul %9, %15, %cst_13 {dimension_numbers = #tpu.dot_dimension_numbers<[1], [1], [0], [0], [0, 0, 1, 0], [], []>} : vector<49x49xbf16>, vector<2048x49xbf16>, vector<49x2048xf32> -> vector<49x2048xf32>
    %c0_14 = arith.constant 0 : index
    %c0_15 = arith.constant 0 : index
    %c0_16 = arith.constant 0 : index
    %17 = vector.load %arg6[%c0_14, %c0_15, %c0_16] : memref<1x49x2048xf32, #tpu.memory_space<vmem>>, vector<1x49x2048xf32>
    %18 = vector.shape_cast %17 : vector<1x49x2048xf32> to vector<49x2048xf32>
    %19 = vector.shape_cast %16 : vector<49x2048xf32> to vector<1x49x2048xf32>
    tpu.vector_store %arg6[%c0_14, %c0_15, %c0_16], %19 {strides = array<i32>} : memref<1x49x2048xf32, #tpu.memory_space<vmem>>, vector<1x49x2048xf32>,
    return
  }
  func.func @transform_0(%arg0: i32) -> (i32, i32, i32) {
    %c0_i32 = arith.constant 0 : i32
    %c0_i32_0 = arith.constant 0 : i32
    %c0_i32_1 = arith.constant 0 : i32
    return %arg0, %c0_i32, %c0_i32_0 : i32, i32, i32
  }
  func.func @transform_1(%arg0: i32) -> (i32, i32) {
    %c0_i32 = arith.constant 0 : i32
    %c0_i32_0 = arith.constant 0 : i32
    %c0_i32_1 = arith.constant 0 : i32
    return %c0_i32, %c0_i32_0 : i32, i32
  }
  func.func @transform_2(%arg0: i32) -> (i32, i32) {
    %c0_i32 = arith.constant 0 : i32
    %c0_i32_0 = arith.constant 0 : i32
    %c0_i32_1 = arith.constant 0 : i32
    return %c0_i32, %c0_i32_0 : i32, i32
  }
  func.func @transform_3(%arg0: i32) -> (i32, i32) {
    %c0_i32 = arith.constant 0 : i32
    %c0_i32_0 = arith.constant 0 : i32
    %c0_i32_1 = arith.constant 0 : i32
    return %c0_i32, %c0_i32_0 : i32, i32
  }
  func.func @transform_4(%arg0: i32) -> (i32, i32) {
    %c0_i32 = arith.constant 0 : i32
    %c0_i32_0 = arith.constant 0 : i32
    %c0_i32_1 = arith.constant 0 : i32
    return %c0_i32, %c0_i32_0 : i32, i32
  }
  func.func @transform_5(%arg0: i32) -> (i32, i32, i32) {
    %c0_i32 = arith.constant 0 : i32
    %c0_i32_0 = arith.constant 0 : i32
    %c0_i32_1 = arith.constant 0 : i32
    return %arg0, %c0_i32, %c0_i32_0 : i32, i32, i32
  }
}

</mosaic_0001>

<bundles_post_ra>
// kernel: tpu_custom_call.1
= control target key start
LH: loop header
LB: loop body
LE: loop exit
PB: predicated region body
PF: predicated region fallthrough
CT: control target
= control target key end

     0   :  { %s7699_s18 = smov 0   ;;  %s9472_s0 = inlined_call_operand.vmem [shape: bf16[2,2048,49], index: 0, kind: input, shape index: {}]   ;;  %s9473_s1 = inlined_call_operand.vmem [shape: bf16[49,2048], index: 1, kind: input, shape index: {}]   ;;  %s9474_s2 = inlined_call_operand.vmem [shape: f32[49,1], index: 2, kind: input, shape index: {}]   ;;  %s9475_s3 = inlined_call_operand.vmem [shape: bf16[49,49], index: 3, kind: input, shape index: {}]   ;;  %s9476_s4 = inlined_call_operand.vmem [shape: bf16[2048,49], index: 4, kind: input, shape index: {}]   ;;  %s9477_s5 = inlined_call_operand.vmem [shape: f32[2,49,2048], index: 5, kind: output, shape index: {}]  }
   0x1 LB: > { %s5877_s19 = sadd.s32 4294967295, %s7666_s18   ;;  %p5881_p0 = scmp.ge.s32.totalorder %s7666_s18, 1  ;;  %s7666_s18 = sphi %s7699_s18, %s15_s18  }
   0x2   : > { %p187_p1 = scmp.lt.s32.totalorder %s7666_s18, 3 }
   0x4   : > { %p188_p2 = pnand %p5881_p0, %p187_p1 }
   0x5   : > { %p215_p3 = scmp.lt.s32.totalorder (!%p188_p2), %s5877_s19, 1  ;;  %v7710_v0 = vld [vmem:[%s9473_s1] sm:$0xff] (!%p188_p2)  ;;  %v7720_v2 = vld [vmem:[%s9473_s1 + $0x8] sm:$0xff] (!%p188_p2)  ;;  %v7668_v6 = vmov (!%p188_p2), 0   ;;  %vm2441_vm0 = vcmask (!%p188_p2), 400384   ;;  %vm2454_vm1 = vcmask (!%p188_p2), 1040384  }
   0x6   : > { %191 = sbr.rel (%p188_p2) target bundleno = 1632 (0x660), region = 40  ;;  %v7715_v1 = vld [vmem:[%s9473_s1 + $0x40] sm:$0xff] (!%p188_p2)  ;;  %v7727_v4 = vld [vmem:[%s9473_s1 + $0x48] sm:$0xff] (!%p188_p2)  ;;  %7382 = vset.pattern.permute.xlu0 (!%p188_p2), %v7668_v6  ;;  %7383 = vset.pattern.permute.xlu1 (!%p188_p2), %v7668_v6 }
   0x7   : > { %v5886_v3 = vcombine.high (!%p188_p2), %v7710_v0, %v7715_v1  ;;  %v5888_v5 = vcombine.high (!%p188_p2), %v7720_v2, %v7727_v4  ;;  %v242_v36 = vld [vmem:[%s9473_s1 + $0x80] sm:$0xff] (!%p188_p2)  ;;  %v243_v39 = vld [vmem:[%s9473_s1 + $0x88] sm:$0xff] (!%p188_p2)  ;;  %v5885_v43 = vcombine.low (!%p188_p2), %v7710_v0, %v7715_v1  ;;  %v5887_v44 = vcombine.low (!%p188_p2), %v7720_v2, %v7727_v4 }
   0x8   : > { %v250_v37 = vld [vmem:[%s9473_s1 + $0xc0] sm:$0xff] (!%p188_p2)  ;;  %v251_v40 = vld [vmem:[%s9473_s1 + $0xc8] sm:$0xff] (!%p188_p2) }
   0x9   : > { %1939 = vmatprep.mubr.bf16.mxu0 (!%p188_p2), %v5886_v3  ;;  %2003 = vmatprep.mubr.bf16.mxu1 (!%p188_p2), %v5888_v5  ;;  %v5902_v47 = vcombine.high (!%p188_p2), %v242_v36, %v250_v37  ;;  %v5904_v49 = vcombine.high (!%p188_p2), %v243_v39, %v251_v40  ;;  %v258_v52 = vld [vmem:[%s9473_s1 + $0x100] sm:$0xff] (!%p188_p2)  ;;  %v259_v55 = vld [vmem:[%s9473_s1 + $0x108] sm:$0xff] (!%p188_p2)  ;;  %v5901_v59 = vcombine.low (!%p188_p2), %v242_v36, %v250_v37 }
   0xa   : > { %v266_v53 = vld [vmem:[%s9473_s1 + $0x140] sm:$0xff] (!%p188_p2)  ;;  %v267_v56 = vld [vmem:[%s9473_s1 + $0x148] sm:$0xff] (!%p188_p2)  ;;  %v5903_v60 = vcombine.low (!%p188_p2), %v243_v39, %v251_v40 }
   0xb   : > { %v5918_v63 = vcombine.high (!%p188_p2), %v258_v52, %v266_v53  ;;  %v5920_v1 = vcombine.high (!%p188_p2), %v259_v55, %v267_v56  ;;  %v274_v4 = vld [vmem:[%s9473_s1 + $0x180] sm:$0x11] (!%p188_p2) }
   0xd   : > { %s9479_s19 = smov (!%p215_p3, %s5877_s19), 1 }
   0xe   : > { %s6375_s28 = sshll.u32 %s9479_s19, 10  ;;  %s7372_s26 = smul.u32 896, %s9479_s19 }
   0xf   : > { %s7737_s6 = scalar_lea.vmem %s9472_s0, %s6375_s28 }
  0x10   : > { %v7384_v7 = vld [vmem:[%s7737_s6 + $0x40] sm:$0xff]   ;;  %v7388_v11 = vld [vmem:[%s7737_s6 + $0x48] sm:$0xff]   ;;  %v7392_v15 = vld [vmem:[%s7737_s6 + $0x50] sm:$0xff]   ;;  %s9027_s29 = scalar_lea.vmem %s9477_s5, %s7372_s26 }
  0x11   : > { %v7385_v8 = vld [vmem:[%s7737_s6 + $0xc0] sm:$0xff]   ;;  %6376 = vmatprep.subr.bf16.mxu0 %v7384_v7  ;;  %v7389_v12 = vld [vmem:[%s7737_s6 + $0xc8] sm:$0xff]   ;;  %v7393_v16 = vld [vmem:[%s7737_s6 + $0xd0] sm:$0xff]  }
  0x12   : > { %v7386_v9 = vld [vmem:[%s7737_s6] sm:$0xff]   ;;  %6416 = vmatprep.subr.bf16.mxu1 %v7385_v8  ;;  %v7390_v13 = vld [vmem:[%s7737_s6 + $0x8] sm:$0xff]   ;;  %v7394_v17 = vld [vmem:[%s7737_s6 + $0x10] sm:$0xff]  }
  0x13   : > { %v7387_v10 = vld [vmem:[%s7737_s6 + $0x80] sm:$0xff]   ;;  %6377 = vmatpush3.bf16.msra.mxu0 %v7386_v9  ;;  %v7391_v14 = vld [vmem:[%s7737_s6 + $0x88] sm:$0xff]   ;;  %v7395_v18 = vld [vmem:[%s7737_s6 + $0x90] sm:$0xff]  }
  0x14   : > { %6417 = vmatpush3.bf16.msra.mxu1 %v7387_v10  ;;  %6378 = vmatprep.subr.bf16.mxu0 %v7388_v11  ;;  %v7396_v19 = vld [vmem:[%s7737_s6 + $0x58] sm:$0xff]   ;;  %v7400_v23 = vld [vmem:[%s7737_s6 + $0x60] sm:$0xff]   ;;  %v7404_v27 = vld [vmem:[%s7737_s6 + $0x68] sm:$0xff]   ;;  %v5917_v10 = vcombine.low %v258_v52, %v266_v53  ;;  %v5919_v11 = vcombine.low %v259_v55, %v267_v56 }
  0x15   : > { %6418 = vmatprep.subr.bf16.mxu1 %v7389_v12  ;;  %v7397_v20 = vld [vmem:[%s7737_s6 + $0xd8] sm:$0xff]   ;;  %v7401_v24 = vld [vmem:[%s7737_s6 + $0xe0] sm:$0xff]   ;;  %v7405_v28 = vld [vmem:[%s7737_s6 + $0xe8] sm:$0xff]  }
  0x16   : > { %v7398_v21 = vld [vmem:[%s7737_s6 + $0x18] sm:$0xff]   ;;  %v7402_v25 = vld [vmem:[%s7737_s6 + $0x20] sm:$0xff]   ;;  %v7406_v29 = vld [vmem:[%s7737_s6 + $0x28] sm:$0xff]  }
  0x17   : > { %6379 = vmatpush3.bf16.msra.mxu0 %v7390_v13  ;;  %v7399_v22 = vld [vmem:[%s7737_s6 + $0x98] sm:$0xff]   ;;  %v7403_v26 = vld [vmem:[%s7737_s6 + $0xa0] sm:$0xff]   ;;  %v7407_v30 = vld [vmem:[%s7737_s6 + $0xa8] sm:$0xff]  }
  0x18   : > { %6419 = vmatpush3.bf16.msra.mxu1 %v7391_v14  ;;  %6380 = vmatprep.subr.bf16.mxu0 %v7392_v15  ;;  %v7408_v31 = vld [vmem:[%s7737_s6 + $0x70] sm:$0xff]   ;;  %v7412_v35 = vld [vmem:[%s7737_s6 + $0x78] sm:$0xff]   ;;  %v7416_v45 = vld [vmem:[%s7737_s6 + $0x140] sm:$0xff]   ;;  %v5934_v14 = vcombine.high %v274_v4, %v274_v4 }
  0x19   : > { %6420 = vmatprep.subr.bf16.mxu1 %v7393_v16  ;;  %v7409_v32 = vld [vmem:[%s7737_s6 + $0xf0] sm:$0xff]   ;;  %v7413_v38 = vld [vmem:[%s7737_s6 + $0xf8] sm:$0xff]   ;;  %v7417_v46 = vld [vmem:[%s7737_s6 + $0x1c0] sm:$0xff]  }
  0x1a   : > { %v7410_v33 = vld [vmem:[%s7737_s6 + $0x30] sm:$0xff]   ;;  %v7414_v41 = vld [vmem:[%s7737_s6 + $0x38] sm:$0xff]   ;;  %v7418_v48 = vld [vmem:[%s7737_s6 + $0x100] sm:$0xff]  }
  0x1b   : > { %6381 = vmatpush3.bf16.msra.mxu0 %v7394_v17  ;;  %v7411_v34 = vld [vmem:[%s7737_s6 + $0xb0] sm:$0xff]   ;;  %v7415_v42 = vld [vmem:[%s7737_s6 + $0xb8] sm:$0xff]   ;;  %v7419_v50 = vld [vmem:[%s7737_s6 + $0x180] sm:$0xff]  }
  0x1c   : > { %6421 = vmatpush3.bf16.msra.mxu1 %v7395_v18  ;;  %6382 = vmatprep.subr.bf16.mxu0 %v7396_v19  ;;  %v7420_v51 = vld [vmem:[%s7737_s6 + $0x148] sm:$0xff]   ;;  %v7424_v61 = vld [vmem:[%s7737_s6 + $0x150] sm:$0xff]   ;;  %v7428_v3 = vld [vmem:[%s7737_s6 + $0x158] sm:$0xff]  }
  0x1d   : > { %6422 = vmatprep.subr.bf16.mxu1 %v7397_v20  ;;  %v7421_v54 = vld [vmem:[%s7737_s6 + $0x1c8] sm:$0xff]   ;;  %v7425_v62 = vld [vmem:[%s7737_s6 + $0x1d0] sm:$0xff]   ;;  %v7429_v5 = vld [vmem:[%s7737_s6 + $0x1d8] sm:$0xff]  }
  0x1e   : > { %v7422_v57 = vld [vmem:[%s7737_s6 + $0x108] sm:$0xff]   ;;  %v7426_v0 = vld [vmem:[%s7737_s6 + $0x110] sm:$0xff]   ;;  %v7430_v8 = vld [vmem:[%s7737_s6 + $0x118] sm:$0xff]  }
  0x1f   : > { %6383 = vmatpush3.bf16.msra.mxu0 %v7398_v21  ;;  %v7423_v58 = vld [vmem:[%s7737_s6 + $0x188] sm:$0xff]   ;;  %v7427_v2 = vld [vmem:[%s7737_s6 + $0x190] sm:$0xff]   ;;  %v7431_v9 = vld [vmem:[%s7737_s6 + $0x198] sm:$0xff]  }
  0x20   : > { %6423 = vmatpush3.bf16.msra.mxu1 %v7399_v22  ;;  %6384 = vmatprep.subr.bf16.mxu0 %v7400_v23  ;;  %v275_v7 = vld [vmem:[%s9473_s1 + $0x188] sm:$0x11]  ;;  %v7432_v12 = vld [vmem:[%s7737_s6 + $0x160] sm:$0xff]   ;;  %v228_v19 = vld [vmem:[%s9473_s1 + $0x10] sm:$0xff] }
  0x21   : > { %6424 = vmatprep.subr.bf16.mxu1 %v7401_v24  ;;  %v7433_v13 = vld [vmem:[%s7737_s6 + $0x1e0] sm:$0xff]   ;;  %v5936_v16 = vcombine.high %v275_v7, %v275_v7  ;;  %v7436_v18 = vld [vmem:[%s7737_s6 + $0x168] sm:$0xff]   ;;  %v236_v20 = vld [vmem:[%s9473_s1 + $0x50] sm:$0xff] }
  0x22   : > { %v7434_v15 = vld [vmem:[%s7737_s6 + $0x120] sm:$0xff]   ;;  %v7437_v21 = vld [vmem:[%s7737_s6 + $0x1e8] sm:$0xff]   ;;  %v229_v22 = vld [vmem:[%s9473_s1 + $0x18] sm:$0xff] }
  0x23   : > { %6385 = vmatpush3.bf16.msra.mxu0 %v7402_v25  ;;  %v7435_v17 = vld [vmem:[%s7737_s6 + $0x1a0] sm:$0xff]   ;;  %v237_v23 = vld [vmem:[%s9473_s1 + $0x58] sm:$0xff]  ;;  %v7438_v24 = vld [vmem:[%s7737_s6 + $0x128] sm:$0xff]  }
  0x24   : > { %6425 = vmatpush3.bf16.msra.mxu1 %v7403_v26  ;;  %6386 = vmatprep.subr.bf16.mxu0 %v7404_v27  ;;  %v7439_v25 = vld [vmem:[%s7737_s6 + $0x1a8] sm:$0xff]   ;;  %v5933_v26 = vcombine.low %v274_v4, %v274_v4  ;;  %v5935_v27 = vcombine.low %v275_v7, %v275_v7  ;;  %v7450_v36 = vld [vmem:[%s7737_s6 + $0x138] sm:$0xff]   ;;  %v5891_v39 = vcombine.low %v229_v22, %v237_v23  ;;  %v7452_v40 = vld [vmem:[%s7737_s6 + $0x240] sm:$0xff]  }
  0x25   : > { %6426 = vmatprep.subr.bf16.mxu1 %v7405_v28  ;;  %v7444_v28 = vld [vmem:[%s7737_s6 + $0x170] sm:$0xff]   ;;  %v7451_v37 = vld [vmem:[%s7737_s6 + $0x1b8] sm:$0xff]  }
  0x26   : > { %v253_v52 = vld [vmem:[%s9473_s1 + $0xd8] sm:$0xff]  ;;  %v7460_v56 = vld [vmem:[%s7737_s6 + $0x250] sm:$0xff]  }
  0x27   : > { %6387 = vmatpush3.bf16.msra.mxu0 %v7406_v29  ;;  %v7445_v29 = vld [vmem:[%s7737_s6 + $0x1f0] sm:$0xff]   ;;  %v269_v4 = vld [vmem:[%s9473_s1 + $0x158] sm:$0xff] }
  0x28   : > { %6427 = vmatpush3.bf16.msra.mxu1 %v7407_v30  ;;  %6388 = vmatprep.subr.bf16.mxu0 %v7408_v31  ;;  %v5890_v30 = vcombine.high %v228_v19, %v236_v20  ;;  %v7446_v31 = vld [vmem:[%s7737_s6 + $0x130] sm:$0xff]  }
  0x29   : > { %6428 = vmatprep.subr.bf16.mxu1 %v7409_v32  ;;  %v5892_v32 = vcombine.high %v229_v22, %v237_v23  ;;  %v7480_v23 = vld [vmem:[%s7737_s6 + $0x270] sm:$0xff]  }
  0x2b   : > { %6389 = vmatpush3.bf16.msra.mxu0 %v7410_v33  ;;  %v7447_v33 = vld [vmem:[%s7737_s6 + $0x1b0] sm:$0xff]  }
  0x2c   : > { %6429 = vmatpush3.bf16.msra.mxu1 %v7411_v34  ;;  %6390 = vmatprep.subr.bf16.mxu0 %v7412_v35  ;;  %v7448_v34 = vld [vmem:[%s7737_s6 + $0x178] sm:$0xff]  }
  0x2d   : > { %6430 = vmatprep.subr.bf16.mxu1 %v7413_v38  ;;  %v7449_v35 = vld [vmem:[%s7737_s6 + $0x1f8] sm:$0xff]   ;;  %v5889_v38 = vcombine.low %v228_v19, %v236_v20 }
  0x2e   : > { %v277_v19 = vld [vmem:[%s9473_s1 + $0x198] sm:$0x11] }
  0x2f   : > { %6391 = vmatpush3.bf16.msra.mxu0 %v7414_v41  ;;  %v7453_v41 = vld [vmem:[%s7737_s6 + $0x2c0] sm:$0xff]   ;;  %v5939_v22 = vcombine.low %v277_v19, %v277_v19 }
  0x30   : > { %6431 = vmatpush3.bf16.msra.mxu1 %v7415_v42  ;;  %6456 = vmatprep.subr.bf16.mxu0 %v7416_v45  ;;  %v7454_v42 = vld [vmem:[%s7737_s6 + $0x200] sm:$0xff]   ;;  %v7457_v45 = vld [vmem:[%s7737_s6 + $0x2c8] sm:$0xff]  }
  0x31   : > { %6496 = vmatprep.subr.bf16.mxu1 %v7417_v46  ;;  %v7458_v46 = vld [vmem:[%s7737_s6 + $0x208] sm:$0xff]  }
  0x32   : > { %1940 = vmatmul.mubr.bf16.vlgmr.msra.gmra.mrb[0].mxu0 %v5885_v43  ;;  %v7455_v43 = vld [vmem:[%s7737_s6 + $0x280] sm:$0xff]  }
  0x33   : > { %2004 = vmatmul.mubr.bf16.vlgmr.msra.gmra.mrb[0].mxu1 %v5887_v44  ;;  %6457 = vmatpush3.bf16.msra.mxu0 %v7418_v48  ;;  %v7456_v44 = vld [vmem:[%s7737_s6 + $0x248] sm:$0xff]   ;;  %v244_v48 = vld [vmem:[%s9473_s1 + $0x90] sm:$0xff] }
  0x34   : > { %6497 = vmatpush3.bf16.msra.mxu1 %v7419_v50  ;;  %1947 = vmatprep.mubr.bf16.mxu0 %v5902_v47  ;;  %v7459_v47 = vld [vmem:[%s7737_s6 + $0x288] sm:$0xff]   ;;  %v245_v50 = vld [vmem:[%s9473_s1 + $0x98] sm:$0xff] }
  0x35   : > { %6458 = vmatprep.subr.bf16.mxu0 %v7420_v51  ;;  %2011 = vmatprep.mubr.bf16.mxu1 %v5904_v49  ;;  %v252_v49 = vld [vmem:[%s9473_s1 + $0xd0] sm:$0xff]  ;;  %v5907_v55 = vcombine.low %v245_v50, %v253_v52 }
  0x36   : > { %6498 = vmatprep.subr.bf16.mxu1 %v7421_v54  ;;  %v5906_v51 = vcombine.high %v244_v48, %v252_v49  ;;  %v5905_v53 = vcombine.low %v244_v48, %v252_v49  ;;  %v5908_v54 = vcombine.high %v245_v50, %v253_v52  ;;  %v254_v48 = vld [vmem:[%s9473_s1 + $0xe0] sm:$0xff]  ;;  %v247_v49 = vld [vmem:[%s9473_s1 + $0xa8] sm:$0xff] }
  0x37   : > { %6459 = vmatpush3.bf16.msra.mxu0 %v7422_v57  ;;  %v7461_v57 = vld [vmem:[%s7737_s6 + $0x2d0] sm:$0xff]   ;;  %v255_v50 = vld [vmem:[%s9473_s1 + $0xe8] sm:$0xff] }
  0x38   : > { %6499 = vmatpush3.bf16.msra.mxu1 %v7423_v58  ;;  %6460 = vmatprep.subr.bf16.mxu0 %v7424_v61  ;;  %v7462_v58 = vld [vmem:[%s7737_s6 + $0x210] sm:$0xff]   ;;  %v7465_v61 = vld [vmem:[%s7737_s6 + $0x2d8] sm:$0xff]   ;;  %v5912_v52 = vcombine.high %v247_v49, %v255_v50 }
  0x39   : > { %6500 = vmatprep.subr.bf16.mxu1 %v7425_v62  ;;  %v7466_v62 = vld [vmem:[%s7737_s6 + $0x218] sm:$0xff]  }
  0x3a   : > { %1948 = vmatmul.mubr.bf16.gmra.mrb[4].mxu0 %v5901_v59  ;;  %v7463_v59 = vld [vmem:[%s7737_s6 + $0x290] sm:$0xff]  }
  0x3b   : > { %2012 = vmatmul.mubr.bf16.gmra.mrb[4].mxu1 %v5903_v60  ;;  %6461 = vmatpush3.bf16.msra.mxu0 %v7426_v0  ;;  %v7464_v60 = vld [vmem:[%s7737_s6 + $0x258] sm:$0xff]   ;;  %v260_v0 = vld [vmem:[%s9473_s1 + $0x110] sm:$0xff] }
  0x3c   : > { %6501 = vmatpush3.bf16.msra.mxu1 %v7427_v2  ;;  %1955 = vmatprep.mubr.bf16.mxu0 %v5918_v63  ;;  %v7467_v63 = vld [vmem:[%s7737_s6 + $0x298] sm:$0xff]  }
  0x3d   : > { %6462 = vmatprep.subr.bf16.mxu0 %v7428_v3  ;;  %2019 = vmatprep.mubr.bf16.mxu1 %v5920_v1  ;;  %v268_v1 = vld [vmem:[%s9473_s1 + $0x150] sm:$0xff]  ;;  %v261_v3 = vld [vmem:[%s9473_s1 + $0x118] sm:$0xff] }
  0x3e   : > { %6502 = vmatprep.subr.bf16.mxu1 %v7429_v5  ;;  %v5922_v2 = vcombine.high %v260_v0, %v268_v1  ;;  %v5921_v5 = vcombine.low %v260_v0, %v268_v1  ;;  %v5924_v7 = vcombine.high %v261_v3, %v269_v4  ;;  %v270_v0 = vld [vmem:[%s9473_s1 + $0x160] sm:$0xff]  ;;  %v263_v1 = vld [vmem:[%s9473_s1 + $0x128] sm:$0xff] }
  0x3f   : > { %6463 = vmatpush3.bf16.msra.mxu0 %v7430_v8  ;;  %v5923_v8 = vcombine.low %v261_v3, %v269_v4  ;;  %v271_v3 = vld [vmem:[%s9473_s1 + $0x168] sm:$0xff] }
  0x40   : > { %6503 = vmatpush3.bf16.msra.mxu1 %v7431_v9  ;;  %6464 = vmatprep.subr.bf16.mxu0 %v7432_v12  ;;  %v7468_v9 = vld [vmem:[%s7737_s6 + $0x260] sm:$0xff]  }
  0x41   : > { %6504 = vmatprep.subr.bf16.mxu1 %v7433_v13  ;;  %v7471_v12 = vld [vmem:[%s7737_s6 + $0x2a0] sm:$0xff]   ;;  %v7472_v13 = vld [vmem:[%s7737_s6 + $0x268] sm:$0xff]  }
  0x42   : > { %1956 = vmatmul.mubr.bf16.gmra.mrb[8].mxu0 %v5917_v10  ;;  %v7469_v10 = vld [vmem:[%s7737_s6 + $0x2e0] sm:$0xff]  }
  0x43   : > { %2020 = vmatmul.mubr.bf16.gmra.mrb[8].mxu1 %v5919_v11  ;;  %6465 = vmatpush3.bf16.msra.mxu0 %v7434_v15  ;;  %v7470_v11 = vld [vmem:[%s7737_s6 + $0x220] sm:$0xff]   ;;  %v7474_v15 = vld [vmem:[%s7737_s6 + $0x228] sm:$0xff]  }
  0x44   : > { %6505 = vmatpush3.bf16.msra.mxu1 %v7435_v17  ;;  %1963 = vmatprep.mubr.bf16.mxu0 %v5934_v14  ;;  %v7473_v14 = vld [vmem:[%s7737_s6 + $0x2e8] sm:$0xff]   ;;  %v276_v17 = vld [vmem:[%s9473_s1 + $0x190] sm:$0x11] }
  0x45   : > { %6466 = vmatprep.subr.bf16.mxu0 %v7436_v18  ;;  %2027 = vmatprep.mubr.bf16.mxu1 %v5936_v16  ;;  %v7475_v16 = vld [vmem:[%s7737_s6 + $0x2a8] sm:$0xff]   ;;  %v5938_v18 = vcombine.high %v276_v17, %v276_v17  ;;  %v5937_v20 = vcombine.low %v276_v17, %v276_v17  ;;  %v278_v17 = vld [vmem:[%s9473_s1 + $0x1a0] sm:$0x11] }
  0x46   : > { %6506 = vmatprep.subr.bf16.mxu1 %v7437_v21  ;;  %v5940_v21 = vcombine.high %v277_v19, %v277_v19  ;;  %v279_v19 = vld [vmem:[%s9473_s1 + $0x1a8] sm:$0x11] }
  0x47   : > { %6467 = vmatpush3.bf16.msra.mxu0 %v7438_v24  ;;  %v7481_v24 = vld [vmem:[%s7737_s6 + $0x2f0] sm:$0xff]  }
  0x48   : > { %6507 = vmatpush3.bf16.msra.mxu1 %v7439_v25  ;;  %6468 = vmatprep.subr.bf16.mxu0 %v7444_v28  ;;  %v7482_v25 = vld [vmem:[%s7737_s6 + $0x230] sm:$0xff]   ;;  %v7485_v28 = vld [vmem:[%s7737_s6 + $0x2f8] sm:$0xff]  }
  0x49   : > { %6508 = vmatprep.subr.bf16.mxu1 %v7445_v29  ;;  %v7486_v29 = vld [vmem:[%s7737_s6 + $0x238] sm:$0xff]  }
  0x4a   : > { %1964 = vmatmul.mubr.bf16.gmra.mrb[12].mxu0 %v5933_v26  ;;  %v7483_v26 = vld [vmem:[%s7737_s6 + $0x2b0] sm:$0xff]  }
  0x4b   : > { %2028 = vmatmul.mubr.bf16.gmra.mrb[12].mxu1 %v5935_v27  ;;  %6469 = vmatpush3.bf16.msra.mxu0 %v7446_v31  ;;  %v7484_v27 = vld [vmem:[%s7737_s6 + $0x278] sm:$0xff]   ;;  %v230_v31 = vld [vmem:[%s9473_s1 + $0x20] sm:$0xff] }
  0x4c   : > { %6509 = vmatpush3.bf16.msra.mxu1 %v7447_v33  ;;  %2067 = vmatprep.mubr.bf16.mxu0 %v5890_v30  ;;  %v7487_v30 = vld [vmem:[%s7737_s6 + $0x2b8] sm:$0xff]  }
  0x4d   : > { %6470 = vmatprep.subr.bf16.mxu0 %v7448_v34  ;;  %2131 = vmatprep.mubr.bf16.mxu1 %v5892_v32  ;;  %v238_v32 = vld [vmem:[%s9473_s1 + $0x60] sm:$0xff] }
  0x4e   : > { %6510 = vmatprep.subr.bf16.mxu1 %v7449_v35  ;;  %v5893_v33 = vcombine.low %v230_v31, %v238_v32  ;;  %v5894_v34 = vcombine.high %v230_v31, %v238_v32  ;;  %v231_v35 = vld [vmem:[%s9473_s1 + $0x28] sm:$0xff]  ;;  %v7522_v31 = vld [vmem:[%s7737_s6 + $0x338] sm:$0xff]  }
  0x4f   : > { %6471 = vmatpush3.bf16.msra.mxu0 %v7450_v36  ;;  %v239_v36 = vld [vmem:[%s9473_s1 + $0x68] sm:$0xff]  ;;  %v7523_v32 = vld [vmem:[%s7737_s6 + $0x3b8] sm:$0xff]  }
  0x50   : > { %6511 = vmatpush3.bf16.msra.mxu1 %v7451_v37  ;;  %6536 = vmatprep.subr.bf16.mxu0 %v7452_v40  ;;  %v5895_v37 = vcombine.low %v231_v35, %v239_v36  ;;  %v7489_v40 = vld [vmem:[%s7737_s6 + $0x3c0] sm:$0xff]  }
  0x51   : > { %6576 = vmatprep.subr.bf16.mxu1 %v7453_v41  ;;  %v7490_v41 = vld [vmem:[%s7737_s6 + $0x300] sm:$0xff]  }
  0x52   : > { %2068 = vmatmul.mubr.bf16.vlgmr.msra.gmra.mrb[16].mxu0 %v5889_v38  ;;  %v5896_v38 = vcombine.high %v231_v35, %v239_v36  ;;  %v233_v35 = vld [vmem:[%s9473_s1 + $0x38] sm:$0xff] }
  0x53   : > { %2132 = vmatmul.mubr.bf16.vlgmr.msra.gmra.mrb[16].mxu1 %v5891_v39  ;;  %6537 = vmatpush3.bf16.msra.mxu0 %v7454_v42  ;;  %v7488_v39 = vld [vmem:[%s7737_s6 + $0x340] sm:$0xff]  }
  0x54   : > { %6577 = vmatpush3.bf16.msra.mxu1 %v7455_v43  ;;  %6538 = vmatprep.subr.bf16.mxu0 %v7456_v44  ;;  %v7491_v42 = vld [vmem:[%s7737_s6 + $0x380] sm:$0xff]   ;;  %v7492_v43 = vld [vmem:[%s7737_s6 + $0x348] sm:$0xff]  }
  0x55   : > { %6578 = vmatprep.subr.bf16.mxu1 %v7457_v45  ;;  %2075 = vmatprep.mubr.bf16.mxu0 %v5906_v51  ;;  %v7493_v44 = vld [vmem:[%s7737_s6 + $0x3c8] sm:$0xff]  }
  0x56   : > { %2139 = vmatprep.mubr.bf16.mxu1 %v5908_v54  ;;  %v7494_v45 = vld [vmem:[%s7737_s6 + $0x308] sm:$0xff]   ;;  %v5911_v54 = vcombine.low %v247_v49, %v255_v50  ;;  %v288_v50 = vld [vmem:[%s9474_s2 + $0x30] sm:$0x1] }
  0x57   : > { %6539 = vmatpush3.bf16.msra.mxu0 %v7458_v46  ;;  %v7495_v46 = vld [vmem:[%s7737_s6 + $0x388] sm:$0xff]  }
  0x58   : > { %6579 = vmatpush3.bf16.msra.mxu1 %v7459_v47  ;;  %6540 = vmatprep.subr.bf16.mxu0 %v7460_v56  ;;  %v246_v47 = vld [vmem:[%s9473_s1 + $0xa0] sm:$0xff]  ;;  %v7497_v56 = vld [vmem:[%s7737_s6 + $0x3d0] sm:$0xff]  }
  0x59   : > { %6580 = vmatprep.subr.bf16.mxu1 %v7461_v57  ;;  %v5910_v51 = vcombine.high %v246_v47, %v254_v48  ;;  %v7498_v57 = vld [vmem:[%s7737_s6 + $0x310] sm:$0xff]  }
  0x5a   : > { %2076 = vmatmul.mubr.bf16.gmra.mrb[20].mxu0 %v5905_v53  ;;  %v5909_v53 = vcombine.low %v246_v47, %v254_v48  ;;  %v257_v47 = vld [vmem:[%s9473_s1 + $0xf8] sm:$0xff]  ;;  %v287_v48 = vld [vmem:[%s9474_s2 + $0x28] sm:$0xff] }
  0x5b   : > { %2140 = vmatmul.mubr.bf16.gmra.mrb[20].mxu1 %v5907_v55  ;;  %6541 = vmatpush3.bf16.msra.mxu0 %v7462_v58  ;;  %v7496_v55 = vld [vmem:[%s7737_s6 + $0x350] sm:$0xff]  }
  0x5c   : > { %6581 = vmatpush3.bf16.msra.mxu1 %v7463_v59  ;;  %6542 = vmatprep.subr.bf16.mxu0 %v7464_v60  ;;  %v7499_v58 = vld [vmem:[%s7737_s6 + $0x390] sm:$0xff]   ;;  %v7500_v59 = vld [vmem:[%s7737_s6 + $0x358] sm:$0xff]  }
  0x5d   : > { %6582 = vmatprep.subr.bf16.mxu1 %v7465_v61  ;;  %2083 = vmatprep.mubr.bf16.mxu0 %v5922_v2  ;;  %v7501_v60 = vld [vmem:[%s7737_s6 + $0x3d8] sm:$0xff]  }
  0x5e   : > { %2147 = vmatprep.mubr.bf16.mxu1 %v5924_v7  ;;  %v7502_v61 = vld [vmem:[%s7737_s6 + $0x318] sm:$0xff]   ;;  %v5927_v7 = vcombine.low %v263_v1, %v271_v3 }
  0x5f   : > { %6543 = vmatpush3.bf16.msra.mxu0 %v7466_v62  ;;  %v7503_v62 = vld [vmem:[%s7737_s6 + $0x398] sm:$0xff]  }
  0x60   : > { %6583 = vmatpush3.bf16.msra.mxu1 %v7467_v63  ;;  %6544 = vmatprep.subr.bf16.mxu0 %v7468_v9  ;;  %v262_v63 = vld [vmem:[%s9473_s1 + $0x120] sm:$0xff] }
  0x61   : > { %6584 = vmatprep.subr.bf16.mxu1 %v7469_v10  ;;  %v5926_v2 = vcombine.high %v262_v63, %v270_v0  ;;  %v5925_v4 = vcombine.low %v262_v63, %v270_v0  ;;  %v7505_v9 = vld [vmem:[%s7737_s6 + $0x3e0] sm:$0xff]  }
  0x62   : > { %2084 = vmatmul.mubr.bf16.gmra.mrb[24].mxu0 %v5921_v5  ;;  %v5928_v5 = vcombine.high %v263_v1, %v271_v3  ;;  %v7506_v10 = vld [vmem:[%s7737_s6 + $0x320] sm:$0xff]  }
  0x63   : > { %2148 = vmatmul.mubr.bf16.gmra.mrb[24].mxu1 %v5923_v8  ;;  %6545 = vmatpush3.bf16.msra.mxu0 %v7470_v11  ;;  %v7504_v8 = vld [vmem:[%s7737_s6 + $0x360] sm:$0xff]  }
  0x64   : > { %6585 = vmatpush3.bf16.msra.mxu1 %v7471_v12  ;;  %6546 = vmatprep.subr.bf16.mxu0 %v7472_v13  ;;  %v7507_v11 = vld [vmem:[%s7737_s6 + $0x3a0] sm:$0xff]   ;;  %v7508_v12 = vld [vmem:[%s7737_s6 + $0x368] sm:$0xff]  }
  0x65   : > { %6586 = vmatprep.subr.bf16.mxu1 %v7473_v14  ;;  %2091 = vmatprep.mubr.bf16.mxu0 %v5938_v18  ;;  %v7509_v13 = vld [vmem:[%s7737_s6 + $0x3e8] sm:$0xff]   ;;  %v282_v14 = vld [vmem:[%s9474_s2] sm:$0xff]  ;;  %v5942_v18 = vcombine.high %v278_v17, %v278_v17 }
  0x66   : > { %2155 = vmatprep.mubr.bf16.mxu1 %v5940_v21  ;;  %810 = vperm.xlu0 %7382, %v282_v14   ;;  %v5944_v21 = vcombine.high %v279_v19, %v279_v19 }
  0x67   : > { %6547 = vmatpush3.bf16.msra.mxu0 %v7474_v15  ;;  %v7510_v15 = vld [vmem:[%s7737_s6 + $0x328] sm:$0xff]  }
  0x68   : > { %6587 = vmatpush3.bf16.msra.mxu1 %v7475_v16  ;;  %6548 = vmatprep.subr.bf16.mxu0 %v7480_v23  ;;  %v7511_v16 = vld [vmem:[%s7737_s6 + $0x3a8] sm:$0xff]   ;;  %v7516_v23 = vld [vmem:[%s7737_s6 + $0x370] sm:$0xff]  }
  0x69   : > { %6588 = vmatprep.subr.bf16.mxu1 %v7481_v24  ;;  %v7517_v24 = vld [vmem:[%s7737_s6 + $0x3f0] sm:$0xff]  }
  0x6a   : > { %2092 = vmatmul.mubr.bf16.gmra.mrb[28].mxu0 %v5937_v20  ;;  %v5941_v20 = vcombine.low %v278_v17, %v278_v17 }
  0x6b   : > { %2156 = vmatmul.mubr.bf16.gmra.mrb[28].mxu1 %v5939_v22  ;;  %6549 = vmatpush3.bf16.msra.mxu0 %v7482_v25  ;;  %v5943_v22 = vcombine.low %v279_v19, %v279_v19  ;;  %v283_v25 = vld [vmem:[%s9474_s2 + $0x8] sm:$0xff] }
  0x6c   : > { %6589 = vmatpush3.bf16.msra.mxu1 %v7483_v26  ;;  %6550 = vmatprep.subr.bf16.mxu0 %v7484_v27  ;;  %v7518_v26 = vld [vmem:[%s7737_s6 + $0x330] sm:$0xff]  }
  0x6d   : > { %6590 = vmatprep.subr.bf16.mxu1 %v7485_v28  ;;  %2195 = vmatprep.mubr.bf16.mxu0 %v5894_v34  ;;  %v7519_v27 = vld [vmem:[%s7737_s6 + $0x3b0] sm:$0xff]   ;;  %v7520_v28 = vld [vmem:[%s7737_s6 + $0x378] sm:$0xff]  }
  0x6e   : > { %2259 = vmatprep.mubr.bf16.mxu1 %v5896_v38  ;;  %815 = vperm.xlu0 %7382, %v283_v25   ;;  %v240_v34 = vld [vmem:[%s9473_s1 + $0x70] sm:$0xff]  ;;  %v241_v38 = vld [vmem:[%s9473_s1 + $0x78] sm:$0xff] }
  0x6f   : > { %6551 = vmatpush3.bf16.msra.mxu0 %v7486_v29  ;;  %v7521_v29 = vld [vmem:[%s7737_s6 + $0x3f8] sm:$0xff]  }
  0x70   : > { %6591 = vmatpush3.bf16.msra.mxu1 %v7487_v30  ;;  %6616 = vmatprep.subr.bf16.mxu0 %v7488_v39  ;;  %v284_v30 = vld [vmem:[%s9474_s2 + $0x10] sm:$0xff]  ;;  %v285_v39 = vld [vmem:[%s9474_s2 + $0x18] sm:$0xff] }
  0x71   : > { %6656 = vmatprep.subr.bf16.mxu1 %v7489_v40  ;;  %820 = vperm.xlu1 %7383, %v284_v30   ;;  %v286_v40 = vld [vmem:[%s9474_s2 + $0x20] sm:$0xff] }
  0x72   : > { %2196 = vmatmul.mubr.bf16.vlgmr.msra.gmra.mrb[32].mxu0 %v5893_v33  ;;  %v232_v33 = vld [vmem:[%s9473_s1 + $0x30] sm:$0xff]  ;;  %830 = vperm.xlu0 %7382, %v286_v40  }
  0x73   : > { %2260 = vmatmul.mubr.bf16.vlgmr.msra.gmra.mrb[32].mxu1 %v5895_v37  ;;  %6617 = vmatpush3.bf16.msra.mxu0 %v7490_v41  ;;  %v5897_v36 = vcombine.low %v232_v33, %v240_v34  ;;  %v5898_v37 = vcombine.high %v232_v33, %v240_v34  ;;  %v5899_v41 = vcombine.low %v233_v35, %v241_v38  ;;  %v7528_v33 = vld [vmem:[%s9475_s3] sm:$0xff]  }
  0x74   : > { %6657 = vmatpush3.bf16.msra.mxu1 %v7491_v42  ;;  %6618 = vmatprep.subr.bf16.mxu0 %v7492_v43  ;;  %v5900_v42 = vcombine.high %v233_v35, %v241_v38  ;;  %v248_v43 = vld [vmem:[%s9473_s1 + $0xb0] sm:$0xff] }
  0x75   : > { %6658 = vmatprep.subr.bf16.mxu1 %v7493_v44  ;;  %2203 = vmatprep.mubr.bf16.mxu0 %v5910_v51  ;;  %v256_v44 = vld [vmem:[%s9473_s1 + $0xf0] sm:$0xff] }
  0x76   : > { %2267 = vmatprep.mubr.bf16.mxu1 %v5912_v52  ;;  %825 = vperm.xlu1 %7383, %v285_v39   ;;  %v264_v51 = vld [vmem:[%s9473_s1 + $0x130] sm:$0xff] }
  0x77   : > { %6619 = vmatpush3.bf16.msra.mxu0 %v7494_v45  ;;  %v249_v45 = vld [vmem:[%s9473_s1 + $0xb8] sm:$0xff]  ;;  %v272_v52 = vld [vmem:[%s9473_s1 + $0x170] sm:$0xff]  ;;  %840 = vperm.xlu0 %7382, %v288_v50  }
  0x78   : > { %6659 = vmatpush3.bf16.msra.mxu1 %v7495_v46  ;;  %6620 = vmatprep.subr.bf16.mxu0 %v7496_v55  ;;  %v5914_v46 = vcombine.high %v248_v43, %v256_v44  ;;  %v5916_v49 = vcombine.high %v249_v45, %v257_v47  ;;  %v5913_v55 = vcombine.low %v248_v43, %v256_v44 }
  0x79   : > { %6660 = vmatprep.subr.bf16.mxu1 %v7497_v56  ;;  %v5915_v56 = vcombine.low %v249_v45, %v257_v47 }
  0x7a   : > { %2204 = vmatmul.mubr.bf16.gmra.mrb[36].mxu0 %v5909_v53  ;;  %v265_v53 = vld [vmem:[%s9473_s1 + $0x138] sm:$0xff]  ;;  %835 = vperm.xlu1 %7383, %v287_v48  }
  0x7b   : > { %2268 = vmatmul.mubr.bf16.gmra.mrb[36].mxu1 %v5911_v54  ;;  %6621 = vmatpush3.bf16.msra.mxu0 %v7498_v57  ;;  %v273_v54 = vld [vmem:[%s9473_s1 + $0x178] sm:$0xff]  ;;  %v5930_v57 = vcombine.high %v264_v51, %v272_v52 }
  0x7c   : > { %6661 = vmatpush3.bf16.msra.mxu1 %v7499_v58  ;;  %6622 = vmatprep.subr.bf16.mxu0 %v7500_v59  ;;  %v5932_v58 = vcombine.high %v265_v53, %v273_v54  ;;  %v280_v59 = vld [vmem:[%s9473_s1 + $0x1b0] sm:$0x11] }
  0x7d   : > { %6662 = vmatprep.subr.bf16.mxu1 %v7501_v60  ;;  %2211 = vmatprep.mubr.bf16.mxu0 %v5926_v2  ;;  %v281_v60 = vld [vmem:[%s9473_s1 + $0x1b8] sm:$0x11]  ;;  %v5946_v63 = vcombine.high %v280_v59, %v280_v59  ;;  %v5945_v1 = vcombine.low %v280_v59, %v280_v59 }
  0x7e   : > { %2275 = vmatprep.mubr.bf16.mxu1 %v5928_v5  ;;  %v5948_v0 = vcombine.high %v281_v60, %v281_v60  ;;  %v5947_v2 = vcombine.low %v281_v60, %v281_v60 }
  0x7f   : > { %6623 = vmatpush3.bf16.msra.mxu0 %v7502_v61  ;;  %v5929_v61 = vcombine.low %v264_v51, %v272_v52 }
  0x80   : > { %6663 = vmatpush3.bf16.msra.mxu1 %v7503_v62  ;;  %6624 = vmatprep.subr.bf16.mxu0 %v7504_v8  ;;  %v5931_v62 = vcombine.low %v265_v53, %v273_v54 }
  0x81   : > { %6664 = vmatprep.subr.bf16.mxu1 %v7505_v9 }
  0x82   : > { %2212 = vmatmul.mubr.bf16.gmra.mrb[40].mxu0 %v5925_v4 }
  0x83   : > { %2276 = vmatmul.mubr.bf16.gmra.mrb[40].mxu1 %v5927_v7  ;;  %6625 = vmatpush3.bf16.msra.mxu0 %v7506_v10 }
  0x84   : > { %6665 = vmatpush3.bf16.msra.mxu1 %v7507_v11  ;;  %6626 = vmatprep.subr.bf16.mxu0 %v7508_v12 }
  0x85   : > { %6666 = vmatprep.subr.bf16.mxu1 %v7509_v13  ;;  %2219 = vmatprep.mubr.bf16.mxu0 %v5942_v18 }
  0x86   : > { %2283 = vmatprep.mubr.bf16.mxu1 %v5944_v21 }
  0x87   : > { %6627 = vmatpush3.bf16.msra.mxu0 %v7510_v15 }
  0x88   : > { %6667 = vmatpush3.bf16.msra.mxu1 %v7511_v16  ;;  %6628 = vmatprep.subr.bf16.mxu0 %v7516_v23 }
  0x89   : > { %6668 = vmatprep.subr.bf16.mxu1 %v7517_v24 }
  0x8a   : > { %2220 = vmatmul.mubr.bf16.gmra.mrb[44].mxu0 %v5941_v20 }
  0x8b   : > { %2284 = vmatmul.mubr.bf16.gmra.mrb[44].mxu1 %v5943_v22  ;;  %6629 = vmatpush3.bf16.msra.mxu0 %v7518_v26 }
  0x8c   : > { %6669 = vmatpush3.bf16.msra.mxu1 %v7519_v27  ;;  %6630 = vmatprep.subr.bf16.mxu0 %v7520_v28 }
  0x8d   : > { %6670 = vmatprep.subr.bf16.mxu1 %v7521_v29  ;;  %2323 = vmatprep.mubr.bf16.mxu0 %v5898_v37 }
  0x8e   : > { %2387 = vmatprep.mubr.bf16.mxu1 %v5900_v42 }
  0x8f   : > { %6631 = vmatpush3.bf16.msra.mxu0 %v7522_v31 }
  0x90   : > { %6671 = vmatpush3.bf16.msra.mxu1 %v7523_v32 }
  0x92   : > { %2324 = vmatmul.mubr.bf16.vlgmr.msra.gmra.mrb[48].mxu0 %v5897_v36 }
  0x93   : > { %2388 = vmatmul.mubr.bf16.vlgmr.msra.gmra.mrb[48].mxu1 %v5899_v41  ;;  %2331 = vmatprep.mubr.bf16.mxu0 %v5914_v46 }
  0x94   : > { %2395 = vmatprep.mubr.bf16.mxu1 %v5916_v49 }
  0x9a   : > { %2332 = vmatmul.mubr.bf16.gmra.mrb[52].mxu0 %v5913_v55 }
  0x9b   : > { %2396 = vmatmul.mubr.bf16.gmra.mrb[52].mxu1 %v5915_v56  ;;  %2339 = vmatprep.mubr.bf16.mxu0 %v5930_v57 }
  0x9c   : > { %2403 = vmatprep.mubr.bf16.mxu1 %v5932_v58 }
  0xa2   : > { %2340 = vmatmul.mubr.bf16.gmra.mrb[56].mxu0 %v5929_v61 }
  0xa3   : > { %2404 = vmatmul.mubr.bf16.gmra.mrb[56].mxu1 %v5931_v62  ;;  %2347 = vmatprep.mubr.bf16.mxu0 %v5946_v63 }
  0xa4   : > { %2411 = vmatprep.mubr.bf16.mxu1 %v5948_v0 }
  0xaa   : > { %2348 = vmatmul.mubr.bf16.gmra.mrb[60].mxu0 %v5945_v1 }
  0xab   : > { %2412 = vmatmul.mubr.bf16.gmra.mrb[60].mxu1 %v5947_v2 }
  0xac   : > { %7036 = vmatprep.mubr.msk.bf16.mxu1 %vm2441_vm0, %v7528_v33 }
  0xe5   : > { %v811_v16 = vpop.permute.xlu0 %810 }
  0xed   : > { %v816_v31 = vpop.permute.xlu0 %815 }
  0xf0   : > { %v821_v34 = vpop.permute.xlu1 %820 }
  0xf1   : > { %v831_v48 = vpop.permute.xlu0 %830 }
  0xf5   : > { %v826_v47 = vpop.permute.xlu1 %825 }
  0xf9   : > { %v836_v56 = vpop.permute.xlu1 %835 }
 0x105   : > { %v6392_v3 = vpop.f32.mrb[0].mxu0 }
 0x106   : > { %v6432_v4 = vpop.f32.mrb[0].mxu1  ;;  %v6393_v5 = vpop.f32.mrb[1].mxu0 }
 0x107   : > { %v6394_v7 = vadd.f32 %v6393_v5, %v6392_v3  ;;  %v6433_v8 = vpop.f32.mrb[1].mxu1  ;;  %v6395_v9 = vpop.f32.mrb[2].mxu0 }
 0x108   : > { %v6434_v10 = vadd.f32 %v6433_v8, %v6432_v4  ;;  %v6435_v11 = vpop.f32.mrb[2].mxu1  ;;  %v6396_v12 = vpop.f32.mrb[3].mxu0 }
 0x109   : > { %v6397_v13 = vadd.f32 %v6396_v12, %v6395_v9  ;;  %v6436_v14 = vpop.f32.mrb[3].mxu1  ;;  %v1942_v17 = vadd.f32 %v6394_v7, %v811_v16  ;;  %v841_v3 = vpop.permute.xlu0 %840 }
 0x10a   : > { %v6437_v15 = vadd.f32 %v6436_v14, %v6435_v11 }
 0x10b   : > { %v2006_v24 = vadd.f32 %v6434_v10, %v1942_v17  ;;  %v1945_v32 = vadd.f32 %v6397_v13, %v816_v31 }
 0x10d   : > { %v6398_v18 = vpop.f32.mrb[4].mxu0  ;;  %v2009_v36 = vadd.f32 %v6437_v15, %v1945_v32 }
 0x10e   : > { %v6438_v19 = vpop.f32.mrb[4].mxu1  ;;  %v6399_v20 = vpop.f32.mrb[5].mxu0 }
 0x10f   : > { %v6400_v21 = vadd.f32 %v6399_v20, %v6398_v18  ;;  %v6439_v22 = vpop.f32.mrb[5].mxu1  ;;  %v6401_v23 = vpop.f32.mrb[6].mxu0 }
 0x110   : > { %v6440_v25 = vadd.f32 %v6439_v22, %v6438_v19  ;;  %v6441_v26 = vpop.f32.mrb[6].mxu1  ;;  %v6402_v27 = vpop.f32.mrb[7].mxu0 }
 0x111   : > { %v6403_v28 = vadd.f32 %v6402_v27, %v6401_v23  ;;  %v6442_v29 = vpop.f32.mrb[7].mxu1  ;;  %v1950_v37 = vadd.f32 %v6400_v21, %v821_v34 }
 0x112   : > { %v6443_v30 = vadd.f32 %v6442_v29, %v6441_v26 }
 0x113   : > { %v2014_v46 = vadd.f32 %v6440_v25, %v1950_v37  ;;  %v1953_v50 = vadd.f32 %v6403_v28, %v826_v47 }
 0x115   : > { %v6404_v35 = vpop.f32.mrb[8].mxu0  ;;  %v2017_v54 = vadd.f32 %v6443_v30, %v1953_v50 }
 0x116   : > { %v6444_v38 = vpop.f32.mrb[8].mxu1  ;;  %v6405_v39 = vpop.f32.mrb[9].mxu0 }
 0x117   : > { %v6406_v40 = vadd.f32 %v6405_v39, %v6404_v35  ;;  %v6445_v41 = vpop.f32.mrb[9].mxu1  ;;  %v6407_v42 = vpop.f32.mrb[10].mxu0 }
 0x118   : > { %v6446_v43 = vadd.f32 %v6445_v41, %v6444_v38  ;;  %v6447_v44 = vpop.f32.mrb[10].mxu1  ;;  %v6408_v45 = vpop.f32.mrb[11].mxu0 }
 0x119   : > { %v6409_v49 = vadd.f32 %v6408_v45, %v6407_v42  ;;  %v1958_v51 = vadd.f32 %v6406_v40, %v831_v48  ;;  %v6448_v52 = vpop.f32.mrb[11].mxu1 }
 0x11a   : > { %v6449_v53 = vadd.f32 %v6448_v52, %v6447_v44 }
 0x11b   : > { %v2022_v55 = vadd.f32 %v6446_v43, %v1958_v51  ;;  %v1961_v58 = vadd.f32 %v6409_v49, %v836_v56 }
 0x11d   : > { %v6410_v57 = vpop.f32.mrb[12].mxu0  ;;  %v2025_v0 = vadd.f32 %v6449_v53, %v1961_v58 }
 0x11e   : > { %v6450_v59 = vpop.f32.mrb[12].mxu1  ;;  %v6411_v60 = vpop.f32.mrb[13].mxu0 }
 0x11f   : > { %v6412_v61 = vadd.f32 %v6411_v60, %v6410_v57  ;;  %v6451_v62 = vpop.f32.mrb[13].mxu1  ;;  %v6413_v63 = vpop.f32.mrb[14].mxu0 }
 0x120   : > { %v6452_v1 = vadd.f32 %v6451_v62, %v6450_v59  ;;  %v6453_v2 = vpop.f32.mrb[14].mxu1  ;;  %v6414_v5 = vpop.f32.mrb[15].mxu0 }
 0x121   : > { %v1966_v4 = vadd.f32 %v6412_v61, %v841_v3  ;;  %v6454_v7 = vpop.f32.mrb[15].mxu1 }
 0x123   : > { %v2030_v8 = vadd.f32 %v6452_v1, %v1966_v4 }
 0x125   : > { %v6472_v9 = vpop.f32.mrb[16].mxu0 }
 0x126   : > { %v6512_v10 = vpop.f32.mrb[16].mxu1  ;;  %v6473_v11 = vpop.f32.mrb[17].mxu0 }
 0x127   : > { %v6474_v12 = vadd.f32 %v6473_v11, %v6472_v9  ;;  %v6513_v13 = vpop.f32.mrb[17].mxu1  ;;  %v6475_v14 = vpop.f32.mrb[18].mxu0 }
 0x128   : > { %v6514_v15 = vadd.f32 %v6513_v13, %v6512_v10  ;;  %v6515_v16 = vpop.f32.mrb[18].mxu1  ;;  %v6476_v17 = vpop.f32.mrb[19].mxu0 }
 0x129   : > { %v2070_v18 = vadd.f32 %v6474_v12, %v2006_v24  ;;  %v6477_v19 = vadd.f32 %v6476_v17, %v6475_v14  ;;  %v6516_v20 = vpop.f32.mrb[19].mxu1 }
 0x12a   : > { %v6517_v21 = vadd.f32 %v6516_v20, %v6515_v16 }
 0x12b   : > { %v2073_v22 = vadd.f32 %v6477_v19, %v2009_v36  ;;  %v2134_v23 = vadd.f32 %v6514_v15, %v2070_v18 }
 0x12d   : > { %v2137_v25 = vadd.f32 %v6517_v21, %v2073_v22  ;;  %v6478_v26 = vpop.f32.mrb[20].mxu0 }
 0x12e   : > { %v6518_v27 = vpop.f32.mrb[20].mxu1  ;;  %v6479_v28 = vpop.f32.mrb[21].mxu0 }
 0x12f   : > { %v6480_v29 = vadd.f32 %v6479_v28, %v6478_v26  ;;  %v6519_v30 = vpop.f32.mrb[21].mxu1  ;;  %v6481_v31 = vpop.f32.mrb[22].mxu0 }
 0x130   : > { %v6520_v32 = vadd.f32 %v6519_v30, %v6518_v27  ;;  %v6521_v33 = vpop.f32.mrb[22].mxu1  ;;  %v6482_v34 = vpop.f32.mrb[23].mxu0 }
 0x131   : > { %v2078_v35 = vadd.f32 %v6480_v29, %v2014_v46  ;;  %v6483_v37 = vadd.f32 %v6482_v34, %v6481_v31  ;;  %v6522_v38 = vpop.f32.mrb[23].mxu1 }
 0x132   : > { %v6523_v39 = vadd.f32 %v6522_v38, %v6521_v33 }
 0x133   : > { %v2081_v24 = vadd.f32 %v6483_v37, %v2017_v54  ;;  %v2142_v40 = vadd.f32 %v6520_v32, %v2078_v35 }
 0x135   : > { %v2145_v41 = vadd.f32 %v6523_v39, %v2081_v24  ;;  %v6484_v42 = vpop.f32.mrb[24].mxu0 }
 0x136   : > { %v6524_v36 = vpop.f32.mrb[24].mxu1  ;;  %v6485_v43 = vpop.f32.mrb[25].mxu0 }
 0x137   : > { %v6486_v44 = vadd.f32 %v6485_v43, %v6484_v42  ;;  %v6525_v45 = vpop.f32.mrb[25].mxu1  ;;  %v6487_v47 = vpop.f32.mrb[26].mxu0 }
 0x138   : > { %v6526_v48 = vadd.f32 %v6525_v45, %v6524_v36  ;;  %v6527_v49 = vpop.f32.mrb[26].mxu1  ;;  %v6488_v50 = vpop.f32.mrb[27].mxu0 }
 0x139   : > { %v2086_v51 = vadd.f32 %v6486_v44, %v2022_v55  ;;  %v6489_v52 = vadd.f32 %v6488_v50, %v6487_v47  ;;  %v6528_v53 = vpop.f32.mrb[27].mxu1 }
 0x13a   : > { %v6529_v56 = vadd.f32 %v6528_v53, %v6527_v49 }
 0x13b   : > { %v2089_v46 = vadd.f32 %v6489_v52, %v2025_v0  ;;  %v2150_v57 = vadd.f32 %v6526_v48, %v2086_v51 }
 0x13d   : > { %v2153_v58 = vadd.f32 %v6529_v56, %v2089_v46  ;;  %v6490_v59 = vpop.f32.mrb[28].mxu0 }
 0x13e   : > { %v6530_v54 = vpop.f32.mrb[28].mxu1  ;;  %v6491_v60 = vpop.f32.mrb[29].mxu0 }
 0x13f   : > { %v6492_v61 = vadd.f32 %v6491_v60, %v6490_v59  ;;  %v6531_v62 = vpop.f32.mrb[29].mxu1  ;;  %v6493_v63 = vpop.f32.mrb[30].mxu0 }
 0x140   : > { %v6532_v1 = vadd.f32 %v6531_v62, %v6530_v54  ;;  %v6533_v2 = vpop.f32.mrb[30].mxu1  ;;  %v6494_v3 = vpop.f32.mrb[31].mxu0 }
 0x141   : > { %v2094_v4 = vadd.f32 %v6492_v61, %v2030_v8  ;;  %v6534_v5 = vpop.f32.mrb[31].mxu1 }
 0x143   : > { %v2158_v7 = vadd.f32 %v6532_v1, %v2094_v4 }
 0x145   : > { %v6552_v9 = vpop.f32.mrb[32].mxu0 }
 0x146   : > { %v6592_v55 = vpop.f32.mrb[32].mxu1  ;;  %v6553_v10 = vpop.f32.mrb[33].mxu0 }
 0x147   : > { %v6554_v11 = vadd.f32 %v6553_v10, %v6552_v9  ;;  %v6593_v12 = vpop.f32.mrb[33].mxu1  ;;  %v6555_v0 = vpop.f32.mrb[34].mxu0 }
 0x148   : > { %v6594_v13 = vadd.f32 %v6593_v12, %v6592_v55  ;;  %v6595_v14 = vpop.f32.mrb[34].mxu1  ;;  %v6556_v15 = vpop.f32.mrb[35].mxu0 }
 0x149   : > { %v2198_v16 = vadd.f32 %v6554_v11, %v2134_v23  ;;  %v6557_v17 = vadd.f32 %v6556_v15, %v6555_v0  ;;  %v6596_v18 = vpop.f32.mrb[35].mxu1 }
 0x14a   : > { %v6597_v19 = vadd.f32 %v6596_v18, %v6595_v14 }
 0x14b   : > { %v2201_v20 = vadd.f32 %v6557_v17, %v2137_v25  ;;  %v2262_v21 = vadd.f32 %v6594_v13, %v2198_v16 }
 0x14d   : > { %v2265_v22 = vadd.f32 %v6597_v19, %v2201_v20  ;;  %v6558_v26 = vpop.f32.mrb[36].mxu0 }
 0x14e   : > { %v6598_v8 = vpop.f32.mrb[36].mxu1  ;;  %v6559_v27 = vpop.f32.mrb[37].mxu0 }
 0x14f   : > { %v6599_v28 = vpop.f32.mrb[37].mxu1  ;;  %v6560_v29 = vadd.f32 %v6559_v27, %v6558_v26  ;;  %v6561_v31 = vpop.f32.mrb[38].mxu0 }
 0x150   : > { %v6600_v30 = vadd.f32 %v6599_v28, %v6598_v8  ;;  %v6601_v32 = vpop.f32.mrb[38].mxu1  ;;  %v6562_v33 = vpop.f32.mrb[39].mxu0 }
 0x151   : > { %v6602_v34 = vpop.f32.mrb[39].mxu1  ;;  %v2206_v35 = vadd.f32 %v6560_v29, %v2142_v40  ;;  %v6563_v37 = vadd.f32 %v6562_v33, %v6561_v31 }
 0x152   : > { %v6603_v38 = vadd.f32 %v6602_v34, %v6601_v32 }
 0x153   : > { %v2209_v23 = vadd.f32 %v6563_v37, %v2145_v41  ;;  %v2270_v39 = vadd.f32 %v6600_v30, %v2206_v35 }
 0x155   : > { %v8054_v24 = vadd.f32 %v6603_v38, %v2209_v23  ;;  %v6564_v25 = vpop.f32.mrb[40].mxu0 }
 0x156   : > { %v6604_v42 = vpop.f32.mrb[40].mxu1  ;;  %v6565_v36 = vpop.f32.mrb[41].mxu0 }
 0x157   : > { %v6566_v43 = vadd.f32 %v6565_v36, %v6564_v25  ;;  %v6605_v44 = vpop.f32.mrb[41].mxu1  ;;  %v6567_v45 = vpop.f32.mrb[42].mxu0 }
 0x158   : > { %v6606_v47 = vadd.f32 %v6605_v44, %v6604_v42  ;;  %v6607_v48 = vpop.f32.mrb[42].mxu1  ;;  %v6568_v49 = vpop.f32.mrb[43].mxu0 }
 0x159   : > { %v2214_v50 = vadd.f32 %v6566_v43, %v2150_v57  ;;  %v6569_v51 = vadd.f32 %v6568_v49, %v6567_v45  ;;  %v6608_v52 = vpop.f32.mrb[43].mxu1 }
 0x15a   : > { %v6609_v53 = vadd.f32 %v6608_v52, %v6607_v48 }
 0x15b   : > { %v2217_v40 = vadd.f32 %v6569_v51, %v2153_v58  ;;  %v2278_v56 = vadd.f32 %v6606_v47, %v2214_v50 }
 0x15d   : > { %v8056_v46 = vadd.f32 %v6609_v53, %v2217_v40  ;;  %v6570_v41 = vpop.f32.mrb[44].mxu0 }
 0x15e   : > { %v6610_v59 = vpop.f32.mrb[44].mxu1  ;;  %v6571_v54 = vpop.f32.mrb[45].mxu0 }
 0x15f   : > { %v6572_v60 = vadd.f32 %v6571_v54, %v6570_v41  ;;  %v6611_v61 = vpop.f32.mrb[45].mxu1  ;;  %v6573_v62 = vpop.f32.mrb[46].mxu0 }
 0x160   : > { %v6612_v63 = vadd.f32 %v6611_v61, %v6610_v59  ;;  %v6613_v1 = vpop.f32.mrb[46].mxu1  ;;  %v6574_v2 = vpop.f32.mrb[47].mxu0 }
 0x161   : > { %v2222_v3 = vadd.f32 %v6572_v60, %v2158_v7  ;;  %v6614_v4 = vpop.f32.mrb[47].mxu1 }
 0x163   : > { %v8058_v5 = vadd.f32 %v6612_v63, %v2222_v3 }
 0x165   : > { %v6632_v57 = vpop.f32.mrb[48].mxu0 }
 0x166   : > { %v6672_v9 = vpop.f32.mrb[48].mxu1  ;;  %v6633_v55 = vpop.f32.mrb[49].mxu0 }
 0x167   : > { %v6634_v58 = vadd.f32 %v6633_v55, %v6632_v57  ;;  %v6673_v10 = vpop.f32.mrb[49].mxu1  ;;  %v6635_v11 = vpop.f32.mrb[50].mxu0 }
 0x168   : > { %v6674_v12 = vadd.f32 %v6673_v10, %v6672_v9  ;;  %v6675_v0 = vpop.f32.mrb[50].mxu1  ;;  %v6636_v13 = vpop.f32.mrb[51].mxu0  ;;  %v2456_v9 = vsel %vm2454_vm1, 65535, %v7668_v6  ;;  %v7529_v10 = vld [vmem:[%s9475_s3 + $0x8] sm:$0xff]  }
 0x169   : > { %v2326_v14 = vadd.f32 %v6634_v58, %v2262_v21  ;;  %v6637_v15 = vadd.f32 %v6636_v13, %v6635_v11  ;;  %v6676_v16 = vpop.f32.mrb[51].mxu1  ;;  %v7531_v6 = vld [vmem:[%s9475_s3 + $0x18] ss:$0 sps:$4 sm:$0x11]   ;;  %v7532_v11 = vld [vmem:[%s9476_s4] sm:$0xff]  }
 0x16a   : > { %v6677_v17 = vadd.f32 %v6676_v16, %v6675_v0 }
 0x16b   : > { %v2390_v18 = vadd.f32 %v6674_v12, %v2326_v14  ;;  %v2329_v19 = vadd.f32 %v6637_v15, %v2265_v22 }
 0x16d   : > { %v2393_v20 = vadd.f32 %v6677_v17, %v2329_v19  ;;  %v6638_v7 = vpop.f32.mrb[52].mxu0 }
 0x16e   : > { %v6678_v26 = vpop.f32.mrb[52].mxu1  ;;  %v6639_v8 = vpop.f32.mrb[53].mxu0 }
 0x16f   : > { %v8060_v27 = vpack.c.bf16 %v2393_v20, %v2390_v18  ;;  %v6640_v28 = vadd.f32 %v6639_v8, %v6638_v7  ;;  %v6679_v29 = vpop.f32.mrb[53].mxu1  ;;  %v6641_v30 = vpop.f32.mrb[54].mxu0 }
 0x170   : > { %v6680_v31 = vadd.f32 %v6679_v29, %v6678_v26  ;;  %v6681_v32 = vpop.f32.mrb[54].mxu1  ;;  %v6642_v33 = vpop.f32.mrb[55].mxu0 }
 0x171   : > { %v2334_v34 = vadd.f32 %v6640_v28, %v2270_v39  ;;  %v6643_v35 = vadd.f32 %v6642_v33, %v6641_v30  ;;  %v6682_v21 = vpop.f32.mrb[55].mxu1  ;;  %7028 = vmatprep.subr.bf16.mxu1 %v8060_v27  ;;  %6852 = vmatprep.mubr.msk.bf16.mxu0 %vm2441_vm0, %v8060_v27 }
 0x172   : > { %v6683_v22 = vadd.f32 %v6682_v21, %v6681_v32  ;;  %7029 = vmatpush3.bf16.msra.mxu1 %v8060_v27  ;;  %v7534_v21 = vld [vmem:[%s9476_s4 + $0x10] sm:$0xff]  }
 0x173   : > { %v2398_v37 = vadd.f32 %v6680_v31, %v2334_v34  ;;  %v2337_v38 = vadd.f32 %v6643_v35, %v8054_v24  ;;  %v7533_v35 = vld [vmem:[%s9476_s4 + $0x8] sm:$0xff]  }
 0x175   : > { %v2401_v23 = vadd.f32 %v6683_v22, %v2337_v38  ;;  %v6644_v25 = vpop.f32.mrb[56].mxu0  ;;  %v7535_v22 = vld [vmem:[%s9476_s4 + $0x18] sm:$0xff]   ;;  %v7537_v38 = vld [vmem:[%s9476_s4 + $0x28] sm:$0xff]  }
 0x176   : > { %v6684_v42 = vpop.f32.mrb[56].mxu1  ;;  %v6645_v36 = vpop.f32.mrb[57].mxu0 }
 0x177   : > { %v8067_v43 = vpack.c.bf16 %v2401_v23, %v2398_v37  ;;  %v6646_v39 = vadd.f32 %v6645_v36, %v6644_v25  ;;  %v6685_v44 = vpop.f32.mrb[57].mxu1  ;;  %v6647_v45 = vpop.f32.mrb[58].mxu0  ;;  %v7536_v37 = vld [vmem:[%s9476_s4 + $0x20] sm:$0xff]   ;;  %v7538_v23 = vld [vmem:[%s9476_s4 + $0x30] sm:$0xff]   ;;  %v7539_v25 = vld [vmem:[%s9476_s4 + $0x38] sm:$0xff]  }
 0x178   : > { %v6686_v47 = vadd.f32 %v6685_v44, %v6684_v42  ;;  %v6687_v48 = vpop.f32.mrb[58].mxu1  ;;  %v6648_v49 = vpop.f32.mrb[59].mxu0  ;;  %v7540_v42 = vld [vmem:[%s9476_s4 + $0x40] sm:$0xff]   ;;  %v7541_v36 = vld [vmem:[%s9476_s4 + $0x48] sm:$0xff]   ;;  %v7543_v44 = vld [vmem:[%s9476_s4 + $0x58] sm:$0xff]  }
 0x179   : > { %v2342_v50 = vadd.f32 %v6646_v39, %v2278_v56  ;;  %v6649_v51 = vadd.f32 %v6648_v49, %v6647_v45  ;;  %v6688_v52 = vpop.f32.mrb[59].mxu1  ;;  %7030 = vmatprep.subr.bf16.mxu1 %v8067_v43  ;;  %v7542_v39 = vld [vmem:[%s9476_s4 + $0x50] sm:$0xff]   ;;  %v7544_v45 = vld [vmem:[%s9476_s4 + $0x60] sm:$0xff]   ;;  %v7547_v49 = vld [vmem:[%s9476_s4 + $0x78] sm:$0xff]  }
 0x17a   : > { %v6689_v53 = vadd.f32 %v6688_v52, %v6687_v48  ;;  %7031 = vmatpush3.bf16.msra.mxu1 %v8067_v43  ;;  %v7546_v48 = vld [vmem:[%s9476_s4 + $0x70] sm:$0xff]  }
 0x17b   : > { %v2406_v24 = vadd.f32 %v6686_v47, %v2342_v50  ;;  %v2345_v40 = vadd.f32 %v6649_v51, %v8056_v46  ;;  %v7545_v47 = vld [vmem:[%s9476_s4 + $0x68] sm:$0xff]   ;;  %v7548_v50 = vld [vmem:[%s9476_s4 + $0x80] sm:$0xff]   ;;  %v7550_v52 = vld [vmem:[%s9476_s4 + $0x90] sm:$0xff]  }
 0x17c   : > { %v7549_v51 = vld [vmem:[%s9476_s4 + $0x88] sm:$0xff]  }
 0x17d   : > { %v2409_v41 = vadd.f32 %v6689_v53, %v2345_v40  ;;  %v6650_v59 = vpop.f32.mrb[60].mxu0  ;;  %v7551_v53 = vld [vmem:[%s9476_s4 + $0x98] sm:$0xff]   ;;  %v7553_v40 = vld [vmem:[%s9476_s4 + $0xa8] sm:$0xff]  }
 0x17e   : > { %v6690_v54 = vpop.f32.mrb[60].mxu1  ;;  %v6651_v60 = vpop.f32.mrb[61].mxu0 }
 0x17f   : > { %v8072_v61 = vpack.c.bf16 %v2409_v41, %v2406_v24  ;;  %v6652_v62 = vadd.f32 %v6651_v60, %v6650_v59  ;;  %v6691_v63 = vpop.f32.mrb[61].mxu1  ;;  %v6653_v1 = vpop.f32.mrb[62].mxu0  ;;  %v7552_v24 = vld [vmem:[%s9476_s4 + $0xa0] sm:$0xff]   ;;  %v7554_v41 = vld [vmem:[%s9476_s4 + $0xb0] sm:$0xff]   ;;  %v7555_v59 = vld [vmem:[%s9476_s4 + $0xb8] sm:$0xff]  }
 0x180   : > { %v6692_v56 = vadd.f32 %v6691_v63, %v6690_v54  ;;  %v6693_v2 = vpop.f32.mrb[62].mxu1  ;;  %v6654_v3 = vpop.f32.mrb[63].mxu0  ;;  %v7556_v54 = vld [vmem:[%s9476_s4 + $0xc0] sm:$0xff]   ;;  %v7557_v60 = vld [vmem:[%s9476_s4 + $0xc8] sm:$0xff]   ;;  %v7559_v63 = vld [vmem:[%s9476_s4 + $0xd8] sm:$0xff]  }
 0x181   : > { %v2350_v4 = vadd.f32 %v6652_v62, %v8058_v5  ;;  %v6694_v57 = vpop.f32.mrb[63].mxu1  ;;  %7032 = vmatprep.subr.bf16.mxu1 %v8072_v61  ;;  %v7530_v5 = vld [vmem:[%s9475_s3 + $0x10] sm:$0xff]   ;;  %v7560_v1 = vld [vmem:[%s9476_s4 + $0xe0] sm:$0xff]   ;;  %v7563_v3 = vld [vmem:[%s9476_s4 + $0xf8] sm:$0xff]  }
 0x182   : > { %7033 = vmatpush3.bf16.msra.mxu1 %v8072_v61  ;;  %v7558_v62 = vld [vmem:[%s9476_s4 + $0xd0] sm:$0xff]   ;;  %v7565_v57 = vld [vmem:[%s9476_s4 + $0x108] sm:$0xff]  }
 0x183   : > { %v2414_v46 = vadd.f32 %v6692_v56, %v2350_v4  ;;  %v7561_v56 = vld [vmem:[%s9476_s4 + $0xe8] sm:$0xff]   ;;  %v7562_v2 = vld [vmem:[%s9476_s4 + $0xf0] sm:$0xff]   ;;  %v7564_v4 = vld [vmem:[%s9476_s4 + $0x100] sm:$0xff]  }
 0x185   : > { %v8078_v55 = vpack.c.bf16 %v2414_v46, %v2414_v46  ;;  %v7566_v46 = vld [vmem:[%s9476_s4 + $0x110] sm:$0xff]  }
 0x187   : > { %v2458_v58 = vand.u32 %v2456_v9, %v8078_v55 }
 0x189   : > { %7034 = vmatprep.subr.bf16.mxu1 %v2458_v58 }
 0x18a   : > { %7035 = vmatpush3.bf16.msra.mxu1 %v2458_v58  ;;  %v7568_v58 = vld [vmem:[%s9476_s4 + $0x120] sm:$0xff]  }
 0x18d   : > { %7037 = vmatmul.mubr.msk.bf16.vlgmr.msra.gmra.mrb[64].mxu1 %vm2441_vm0, %v7529_v10  ;;  %v7569_v10 = vld [vmem:[%s9476_s4 + $0x128] sm:$0xff]  }
 0x18e   : > { %7040 = vmatprep.mubr.msk.bf16.mxu1 %vm2441_vm0, %v7530_v5  ;;  %v7570_v5 = vld [vmem:[%s9476_s4 + $0x130] sm:$0xff]  }
 0x195   : > { %7041 = vmatmul.mubr.msk.bf16.gmra.mrb[68].mxu1 %vm2441_vm0, %v7531_v6  ;;  %v7571_v6 = vld [vmem:[%s9476_s4 + $0x138] sm:$0xff]  }
 0x196   : > { %7052 = vmatprep.mubr.msk.bf16.mxu1 %vm2441_vm0, %v7532_v11  ;;  %v7572_v11 = vld [vmem:[%s9476_s4 + $0x140] sm:$0xff]  }
 0x260   : > { %v7038_v12 = vpop.f32.mrb[64].mxu1 }
 0x261   : > { %v2494_v0 = vpop.f32.mrb[65].mxu1  ;;  %v2526_v14 = vmax.f32 %v7038_v12, 0.0  ;;  %v7573_v12 = vld [vmem:[%s9476_s4 + $0x148] sm:$0xff]  }
 0x262   : > { %v7039_v13 = vpop.f32.mrb[66].mxu1  ;;  %v2524_v17 = vmax.f32 %v2494_v0, 0.0  ;;  %v7574_v0 = vld [vmem:[%s9476_s4 + $0x150] sm:$0xff]  }
 0x263   : > { %v2527_v15 = vmax.f32 %v7039_v13, 0.0  ;;  %v2497_v16 = vpop.f32.mrb[67].mxu1  ;;  %v7575_v13 = vld [vmem:[%s9476_s4 + $0x158] sm:$0xff]  }
 0x264   : > { %v2525_v18 = vmax.f32 %v2497_v16, 0.0  ;;  %v7578_v16 = vld [vmem:[%s9476_s4 + $0x170] sm:$0xff]  }
 0x265   : > { %v2532_v19 = vpack.c.bf16 %v2527_v15, %v2526_v14  ;;  %v7576_v14 = vld [vmem:[%s9476_s4 + $0x160] sm:$0xff]   ;;  %v7577_v15 = vld [vmem:[%s9476_s4 + $0x168] sm:$0xff]  }
 0x266   : > { %v2531_v20 = vpack.c.bf16 %v2525_v18, %v2524_v17  ;;  %v7579_v17 = vld [vmem:[%s9476_s4 + $0x178] sm:$0xff]   ;;  %v7580_v18 = vld [vmem:[%s9476_s4 + $0x180] sm:$0xff]  }
 0x268   : > { %v7042_v7 = vpop.f32.mrb[68].mxu1  ;;  %7044 = vmatprep.subr.bf16.mxu1 %v2531_v20 }
 0x269   : > { %v2530_v26 = vmax.f32 %v7042_v7, 0.0  ;;  %v2510_v8 = vpop.f32.mrb[69].mxu1  ;;  %7045 = vmatpush3.bf16.msra.mxu1 %v2531_v20  ;;  %v7582_v20 = vld [vmem:[%s9476_s4 + $0x190] sm:$0xff]   ;;  %v7583_v7 = vld [vmem:[%s9476_s4 + $0x198] sm:$0xff]  }
 0x26a   : > { %v7043_v28 = vpop.f32.mrb[70].mxu1  ;;  %7046 = vmatprep.subr.bf16.mxu1 %v2532_v19  ;;  %v2528_v31 = vmax.f32 %v2510_v8, 0.0  ;;  %v7585_v8 = vld [vmem:[%s9476_s4 + $0x1a8] sm:$0xff]  }
 0x26b   : > { %v2513_v29 = vpop.f32.mrb[71].mxu1  ;;  %v2534_v30 = vpack.c.bf16 %v2530_v26, %v2530_v26  ;;  %v7584_v26 = vld [vmem:[%s9476_s4 + $0x1a0] sm:$0xff]   ;;  %v7586_v28 = vld [vmem:[%s9476_s4 + $0x1b0] sm:$0xff]  }
 0x26c   : > { %v2529_v32 = vmax.f32 %v2513_v29, 0.0 }
 0x26d   : > { %7047 = vmatpush3.bf16.msra.mxu1 %v2532_v19  ;;  %v3560_v34 = vand.u32 %v2534_v30, %v2456_v9  ;;  %v7567_v9 = vld [vmem:[%s9476_s4 + $0x118] sm:$0xff]   ;;  %v7581_v19 = vld [vmem:[%s9476_s4 + $0x188] sm:$0xff]  }
 0x26e   : > { %v2533_v33 = vpack.c.bf16 %v2529_v32, %v2528_v31  ;;  %v7587_v31 = vld [vmem:[%s9476_s4 + $0x1b8] sm:$0xff]  }
 0x270   : > { %7048 = vmatprep.subr.bf16.mxu1 %v2533_v33 }
 0x271   : > { %7049 = vmatpush3.bf16.msra.mxu1 %v2533_v33  ;;  %v7588_v33 = vld [vmem:[%s9476_s4 + $0x1c0] sm:$0xff]  }
 0x272   : > { %7050 = vmatprep.subr.bf16.mxu1 %v3560_v34 }
 0x275   : > { %7051 = vmatpush3.bf16.msra.mxu1 %v3560_v34 }
 0x278   : > { %7053 = vmatmul.mubr.msk.bf16.vlgmr.msra.gmra.mrb[72].mxu1 %vm2441_vm0, %v7533_v35 }
 0x279   : > { %7056 = vmatprep.mubr.msk.bf16.mxu1 %vm2441_vm0, %v7534_v21 }
 0x280   : > { %7057 = vmatmul.mubr.msk.bf16.gmra.mrb[76].mxu1 %vm2441_vm0, %v7535_v22 }
 0x281   : > { %7060 = vmatprep.mubr.msk.bf16.mxu1 %vm2441_vm0, %v7536_v37 }
 0x288   : > { %7061 = vmatmul.mubr.msk.bf16.gmra.mrb[80].mxu1 %vm2441_vm0, %v7537_v38  ;;  %v7589_v38 = vld [vmem:[%s9476_s4 + $0x1c8] sm:$0xff]  }
 0x289   : > { %7064 = vmatprep.mubr.msk.bf16.mxu1 %vm2441_vm0, %v7538_v23 }
 0x290   : > { %7065 = vmatmul.mubr.msk.bf16.gmra.mrb[84].mxu1 %vm2441_vm0, %v7539_v25  ;;  %v7590_v25 = vld [vmem:[%s9476_s4 + $0x1d0] sm:$0xff]  }
 0x291   : > { %7068 = vmatprep.mubr.msk.bf16.mxu1 %vm2441_vm0, %v7540_v42 }
 0x298   : > { %7069 = vmatmul.mubr.msk.bf16.gmra.mrb[88].mxu1 %vm2441_vm0, %v7541_v36 }
 0x299   : > { %7072 = vmatprep.mubr.msk.bf16.mxu1 %vm2441_vm0, %v7542_v39 }
 0x2a0   : > { %7073 = vmatmul.mubr.msk.bf16.gmra.mrb[92].mxu1 %vm2441_vm0, %v7543_v44 }
 0x2a1   : > { %7076 = vmatprep.mubr.msk.bf16.mxu1 %vm2441_vm0, %v7544_v45 }
 0x2a8   : > { %7077 = vmatmul.mubr.msk.bf16.gmra.mrb[96].mxu1 %vm2441_vm0, %v7545_v47  ;;  %v7591_v47 = vld [vmem:[%s9476_s4 + $0x1d8] sm:$0xff]  }
 0x2a9   : > { %7080 = vmatprep.mubr.msk.bf16.mxu1 %vm2441_vm0, %v7546_v48 }
 0x2b0   : > { %7081 = vmatmul.mubr.msk.bf16.gmra.mrb[100].mxu1 %vm2441_vm0, %v7547_v49  ;;  %v7592_v49 = vld [vmem:[%s9476_s4 + $0x1e0] sm:$0xff]  }
 0x2b1   : > { %7084 = vmatprep.mubr.msk.bf16.mxu1 %vm2441_vm0, %v7548_v50 }
 0x2b8   : > { %7085 = vmatmul.mubr.msk.bf16.gmra.mrb[104].mxu1 %vm2441_vm0, %v7549_v51 }
 0x2b9   : > { %7088 = vmatprep.mubr.msk.bf16.mxu1 %vm2441_vm0, %v7550_v52 }
 0x2c0   : > { %7089 = vmatmul.mubr.msk.bf16.gmra.mrb[108].mxu1 %vm2441_vm0, %v7551_v53 }
 0x2c1   : > { %7092 = vmatprep.mubr.msk.bf16.mxu1 %vm2441_vm0, %v7552_v24 }
 0x2c8   : > { %7093 = vmatmul.mubr.msk.bf16.gmra.mrb[112].mxu1 %vm2441_vm0, %v7553_v40  ;;  %v7593_v40 = vld [vmem:[%s9476_s4 + $0x1e8] sm:$0xff]  }
 0x2c9   : > { %7096 = vmatprep.mubr.msk.bf16.mxu1 %vm2441_vm0, %v7554_v41 }
 0x2d0   : > { %7097 = vmatmul.mubr.msk.bf16.gmra.mrb[116].mxu1 %vm2441_vm0, %v7555_v59  ;;  %v7594_v59 = vld [vmem:[%s9476_s4 + $0x1f0] sm:$0xff]  }
 0x2d1   : > { %7100 = vmatprep.mubr.msk.bf16.mxu1 %vm2441_vm0, %v7556_v54 }
 0x2d8   : > { %7101 = vmatmul.mubr.msk.bf16.gmra.mrb[120].mxu1 %vm2441_vm0, %v7557_v60 }
 0x2d9   : > { %7104 = vmatprep.mubr.msk.bf16.mxu1 %vm2441_vm0, %v7558_v62 }
 0x2e0   : > { %7105 = vmatmul.mubr.msk.bf16.gmra.mrb[124].mxu1 %vm2441_vm0, %v7559_v63 }
 0x2e1   : > { %7108 = vmatprep.mubr.msk.bf16.mxu1 %vm2441_vm0, %v7560_v1 }
 0x2e8   : > { %7109 = vmatmul.mubr.msk.bf16.gmra.mrb[128].mxu1 %vm2441_vm0, %v7561_v56  ;;  %v7595_v56 = vld [vmem:[%s9476_s4 + $0x1f8] sm:$0xff]  }
 0x2e9   : > { %7112 = vmatprep.mubr.msk.bf16.mxu1 %vm2441_vm0, %v7562_v2 }
 0x2f0   : > { %7113 = vmatmul.mubr.msk.bf16.gmra.mrb[132].mxu1 %vm2441_vm0, %v7563_v3  ;;  %v7596_v3 = vld [vmem:[%s9476_s4 + $0x200] sm:$0xff]  }
 0x2f1   : > { %7116 = vmatprep.mubr.msk.bf16.mxu1 %vm2441_vm0, %v7564_v4 }
 0x2f8   : > { %7117 = vmatmul.mubr.msk.bf16.gmra.mrb[136].mxu1 %vm2441_vm0, %v7565_v57 }
 0x2f9   : > { %7120 = vmatprep.mubr.msk.bf16.mxu1 %vm2441_vm0, %v7566_v46 }
 0x300   : > { %7121 = vmatmul.mubr.msk.bf16.gmra.mrb[140].mxu1 %vm2441_vm0, %v7567_v9 }
 0x301   : > { %7124 = vmatprep.mubr.msk.bf16.mxu1 %vm2441_vm0, %v7568_v58 }
 0x308   : > { %7125 = vmatmul.mubr.msk.bf16.gmra.mrb[144].mxu1 %vm2441_vm0, %v7569_v10 }
 0x309   : > { %7128 = vmatprep.mubr.msk.bf16.mxu1 %vm2441_vm0, %v7570_v5  ;;  %v7597_v5 = vld [vmem:[%s9476_s4 + $0x208] sm:$0xff]  }
 0x310   : > { %7129 = vmatmul.mubr.msk.bf16.gmra.mrb[148].mxu1 %vm2441_vm0, %v7571_v6 }
 0x311   : > { %7132 = vmatprep.mubr.msk.bf16.mxu1 %vm2441_vm0, %v7572_v11  ;;  %v7598_v11 = vld [vmem:[%s9476_s4 + $0x210] sm:$0xff]  }
 0x318   : > { %7133 = vmatmul.mubr.msk.bf16.gmra.mrb[152].mxu1 %vm2441_vm0, %v7573_v12 }
 0x319   : > { %7136 = vmatprep.mubr.msk.bf16.mxu1 %vm2441_vm0, %v7574_v0 }
 0x320   : > { %7137 = vmatmul.mubr.msk.bf16.gmra.mrb[156].mxu1 %vm2441_vm0, %v7575_v13 }
 0x321   : > { %7140 = vmatprep.mubr.msk.bf16.mxu1 %vm2441_vm0, %v7576_v14 }
 0x328   : > { %7141 = vmatmul.mubr.msk.bf16.gmra.mrb[160].mxu1 %vm2441_vm0, %v7577_v15 }
 0x329   : > { %7144 = vmatprep.mubr.msk.bf16.mxu1 %vm2441_vm0, %v7578_v16 }
 0x330   : > { %7145 = vmatmul.mubr.msk.bf16.gmra.mrb[164].mxu1 %vm2441_vm0, %v7579_v17  ;;  %v7599_v17 = vld [vmem:[%s9476_s4 + $0x218] sm:$0xff]  }
 0x331   : > { %7148 = vmatprep.mubr.msk.bf16.mxu1 %vm2441_vm0, %v7580_v18 }
 0x338   : > { %7149 = vmatmul.mubr.msk.bf16.gmra.mrb[168].mxu1 %vm2441_vm0, %v7581_v19  ;;  %v7600_v19 = vld [vmem:[%s9476_s4 + $0x220] sm:$0xff]  }
 0x339   : > { %7152 = vmatprep.mubr.msk.bf16.mxu1 %vm2441_vm0, %v7582_v20 }
 0x340   : > { %7153 = vmatmul.mubr.msk.bf16.gmra.mrb[172].mxu1 %vm2441_vm0, %v7583_v7 }
 0x341   : > { %7156 = vmatprep.mubr.msk.bf16.mxu1 %vm2441_vm0, %v7584_v26 }
 0x348   : > { %7157 = vmatmul.mubr.msk.bf16.gmra.mrb[176].mxu1 %vm2441_vm0, %v7585_v8 }
 0x349   : > { %7160 = vmatprep.mubr.msk.bf16.mxu1 %vm2441_vm0, %v7586_v28 }
 0x34b   : > { %v8313_v29 = vpop.f32.mrb[72].mxu1 }
 0x34c   : > { %v3596_v30 = vpop.f32.mrb[73].mxu1 }
 0x34d   : > { %v7055_v32 = vpop.f32.mrb[74].mxu1 }
 0x34e   : > { %v4620_v34 = vpack.c.bf16 %v7055_v32, %v8313_v29  ;;  %v3599_v35 = vpop.f32.mrb[75].mxu1  ;;  %v7602_v32 = vld [vmem:[%s9476_s4 + $0x230] sm:$0xff]  }
 0x34f   : > { %v4619_v21 = vpack.c.bf16 %v3599_v35, %v3596_v30  ;;  %v7601_v30 = vld [vmem:[%s9476_s4 + $0x228] sm:$0xff]  }
 0x350   : > { %7161 = vmatmul.mubr.msk.bf16.gmra.mrb[180].mxu1 %vm2441_vm0, %v7587_v31  ;;  %v4762_v14 = vsel %vm2441_vm0, %v4620_v34, 0 }
 0x351   : > { %7164 = vmatprep.mubr.msk.bf16.mxu1 %vm2441_vm0, %v7588_v33  ;;  %v4759_v9 = vsel %vm2441_vm0, %v4619_v21, 0 }
 0x353   : > { %v8324_v22 = vpop.f32.mrb[76].mxu1 }
 0x354   : > { %v8326_v37 = vpop.f32.mrb[77].mxu1 }
 0x355   : > { %v8331_v23 = vpop.f32.mrb[78].mxu1 }
 0x356   : > { %v4622_v42 = vpack.c.bf16 %v8331_v23, %v8324_v22  ;;  %v3615_v36 = vpop.f32.mrb[79].mxu1  ;;  %v7604_v22 = vld [vmem:[%s9476_s4 + $0x240] sm:$0xff]  }
 0x357   : > { %v4621_v39 = vpack.c.bf16 %v3615_v36, %v8326_v37 }
 0x358   : > { %7165 = vmatmul.mubr.msk.bf16.gmra.mrb[184].mxu1 %vm2441_vm0, %v7589_v38  ;;  %v4768_v21 = vsel %vm2441_vm0, %v4622_v42, 0 }
 0x359   : > { %7168 = vmatprep.mubr.msk.bf16.mxu1 %vm2441_vm0, %v7590_v25  ;;  %v4765_v8 = vsel %vm2441_vm0, %v4621_v39, 0  ;;  %v7603_v25 = vld [vmem:[%s9476_s4 + $0x238] sm:$0xff]  }
 0x35b   : > { %v8341_v44 = vpop.f32.mrb[80].mxu1 }
 0x35c   : > { %v8343_v45 = vpop.f32.mrb[81].mxu1 }
 0x35d   : > { %v8348_v48 = vpop.f32.mrb[82].mxu1 }
 0x35e   : > { %v4624_v50 = vpack.c.bf16 %v8348_v48, %v8341_v44  ;;  %v8355_v51 = vpop.f32.mrb[83].mxu1  ;;  %v7608_v44 = vld [vmem:[%s9476_s4 + $0x260] sm:$0xff]  }
 0x35f   : > { %v4623_v52 = vpack.c.bf16 %v8355_v51, %v8343_v45  ;;  %v7606_v45 = vld [vmem:[%s9476_s4 + $0x250] sm:$0xff]  }
 0x360   : > { %7169 = vmatmul.mubr.msk.bf16.gmra.mrb[188].mxu1 %vm2441_vm0, %v7591_v47 }
 0x361   : > { %7172 = vmatprep.mubr.msk.bf16.mxu1 %vm2441_vm0, %v7592_v49  ;;  %v4771_v47 = vsel %vm2441_vm0, %v4623_v52, 0 }
 0x363   : > { %v8361_v53 = vpop.f32.mrb[84].mxu1 }
 0x364   : > { %v8363_v24 = vpop.f32.mrb[85].mxu1 }
 0x365   : > { %v8368_v41 = vpop.f32.mrb[86].mxu1 }
 0x366   : > { %v4626_v54 = vpack.c.bf16 %v8368_v41, %v8361_v53  ;;  %v8375_v60 = vpop.f32.mrb[87].mxu1 }
 0x367   : > { %v4625_v62 = vpack.c.bf16 %v8375_v60, %v8363_v24  ;;  %v7610_v24 = vld [vmem:[%s9476_s4 + $0x270] sm:$0xff]  }
 0x368   : > { %7173 = vmatmul.mubr.msk.bf16.gmra.mrb[192].mxu1 %vm2441_vm0, %v7593_v40 }
 0x369   : > { %7176 = vmatprep.mubr.msk.bf16.mxu1 %vm2441_vm0, %v7594_v59  ;;  %v7605_v59 = vld [vmem:[%s9476_s4 + $0x248] sm:$0xff]  }
 0x36b   : > { %v7070_v63 = vpop.f32.mrb[88].mxu1 }
 0x36c   : > { %v3660_v1 = vpop.f32.mrb[89].mxu1 }
 0x36d   : > { %v7071_v2 = vpop.f32.mrb[90].mxu1 }
 0x36e   : > { %v4628_v4 = vpack.c.bf16 %v7071_v2, %v7070_v63  ;;  %v3663_v57 = vpop.f32.mrb[91].mxu1 }
 0x36f   : > { %v4627_v46 = vpack.c.bf16 %v3663_v57, %v3660_v1 }
 0x370   : > { %7177 = vmatmul.mubr.msk.bf16.gmra.mrb[196].mxu1 %vm2441_vm0, %v7595_v56  ;;  %v4774_v56 = vsel %vm2441_vm0, %v4624_v50, 0 }
 0x371   : > { %7308 = vmatprep.subr.msk.bf16.mxu0 %vm2441_vm0, %v4627_v46  ;;  %7180 = vmatprep.mubr.msk.bf16.mxu1 %vm2441_vm0, %v7596_v3 }
 0x372   : > { %6837 = vmatpush3.bf16.xpose.msra.mxu0 %v4759_v9  ;;  %v4777_v9 = vsel %vm2441_vm0, %v4625_v62, 0 }
 0x373   : > { %7309 = vmatprep.subr.msk.bf16.mxu0 %vm2441_vm0, %v4628_v4  ;;  %v7074_v58 = vpop.f32.mrb[92].mxu1  ;;  %v7607_v4 = vld [vmem:[%s9476_s4 + $0x258] sm:$0xff]  }
 0x374   : > { %v3676_v10 = vpop.f32.mrb[93].mxu1 }
 0x375   : > { %v7075_v6 = vpop.f32.mrb[94].mxu1 }
 0x376   : > { %v4630_v12 = vpack.c.bf16 %v7075_v6, %v7074_v58  ;;  %v3679_v0 = vpop.f32.mrb[95].mxu1 }
 0x377   : > { %v4629_v13 = vpack.c.bf16 %v3679_v0, %v3676_v10 }
 0x378   : > { %7181 = vmatmul.mubr.msk.bf16.gmra.mrb[200].mxu1 %vm2441_vm0, %v7597_v5  ;;  %v7609_v5 = vld [vmem:[%s9476_s4 + $0x268] sm:$0xff]  }
 0x379   : > { %7184 = vmatprep.mubr.msk.bf16.mxu1 %vm2441_vm0, %v7598_v11 }
 0x37a   : > { %6839 = vmatpush3.bf16.xpose.msra.mxu0 %v4762_v14  ;;  %v7611_v14 = vld [vmem:[%s9476_s4 + $0x278] sm:$0xff]  }
 0x37b   : > { %7310 = vmatprep.subr.msk.bf16.mxu0 %vm2441_vm0, %v4629_v13  ;;  %v7078_v15 = vpop.f32.mrb[96].mxu1 }
 0x37c   : > { %v3692_v16 = vpop.f32.mrb[97].mxu1 }
 0x37d   : > { %v7079_v18 = vpop.f32.mrb[98].mxu1 }
 0x37e   : > { %v4632_v20 = vpack.c.bf16 %v7079_v18, %v7078_v15  ;;  %v3695_v7 = vpop.f32.mrb[99].mxu1 }
 0x37f   : > { %v4631_v26 = vpack.c.bf16 %v3695_v7, %v3692_v16 }
 0x380   : > { %7185 = vmatmul.mubr.msk.bf16.gmra.mrb[204].mxu1 %vm2441_vm0, %v7599_v17 }
 0x381   : > { %7188 = vmatprep.mubr.msk.bf16.mxu1 %vm2441_vm0, %v7600_v19  ;;  %v7612_v19 = vld [vmem:[%s9476_s4 + $0x280] sm:$0xff]  }
 0x382   : > { %6841 = vmatpush3.bf16.xpose.msra.mxu0 %v4765_v8 }
 0x383   : > { %7311 = vmatprep.subr.msk.bf16.mxu0 %vm2441_vm0, %v4630_v12  ;;  %v7082_v28 = vpop.f32.mrb[100].mxu1  ;;  %v4780_v12 = vsel %vm2441_vm0, %v4626_v54, 0 }
 0x384   : > { %v3708_v29 = vpop.f32.mrb[101].mxu1 }
 0x385   : > { %v7083_v31 = vpop.f32.mrb[102].mxu1 }
 0x386   : > { %v4634_v33 = vpack.c.bf16 %v7083_v31, %v7082_v28  ;;  %v3711_v34 = vpop.f32.mrb[103].mxu1 }
 0x387   : > { %v4633_v35 = vpack.c.bf16 %v3711_v34, %v3708_v29 }
 0x388   : > { %7189 = vmatmul.mubr.msk.bf16.gmra.mrb[208].mxu1 %vm2441_vm0, %v7601_v30 }
 0x389   : > { %7192 = vmatprep.mubr.msk.bf16.mxu1 %vm2441_vm0, %v7602_v32 }
 0x38a   : > { %6843 = vmatpush3.bf16.xpose.msra.mxu0 %v4768_v21 }
 0x38b   : > { %7312 = vmatprep.subr.msk.bf16.mxu0 %vm2441_vm0, %v4631_v26  ;;  %v8425_v37 = vpop.f32.mrb[104].mxu1  ;;  %v7614_v26 = vld [vmem:[%s9476_s4 + $0x290] sm:$0xff]  }
 0x38c   : > { %v3724_v38 = vpop.f32.mrb[105].mxu1 }
 0x38d   : > { %v8430_v36 = vpop.f32.mrb[106].mxu1 }
 0x38e   : > { %v4636_v23 = vpack.c.bf16 %v8430_v36, %v8425_v37  ;;  %v3727_v42 = vpop.f32.mrb[107].mxu1 }
 0x38f   : > { %v4635_v39 = vpack.c.bf16 %v3727_v42, %v3724_v38 }
 0x390   : > { %7193 = vmatmul.mubr.msk.bf16.gmra.mrb[212].mxu1 %vm2441_vm0, %v7603_v25  ;;  %v4810_v30 = vsel %vm2441_vm0, %v4636_v23, 0  ;;  %v7617_v23 = vld [vmem:[%s9476_s4 + $0x2a8] sm:$0xff]  }
 0x391   : > { %7196 = vmatprep.mubr.msk.bf16.mxu1 %vm2441_vm0, %v7604_v22  ;;  %v4807_v53 = vsel %vm2441_vm0, %v4635_v39, 0  ;;  %v7618_v39 = vld [vmem:[%s9476_s4 + $0x2b0] sm:$0xff]  }
 0x392   : > { %6845 = vmatpush3.bf16.xpose.msra.mxu0 %v4771_v47 }
 0x393   : > { %7313 = vmatprep.subr.msk.bf16.mxu0 %vm2441_vm0, %v4632_v20  ;;  %v8444_v49 = vpop.f32.mrb[108].mxu1  ;;  %v7613_v20 = vld [vmem:[%s9476_s4 + $0x288] sm:$0xff]  }
 0x394   : > { %v8446_v40 = vpop.f32.mrb[109].mxu1 }
 0x395   : > { %v8451_v63 = vpop.f32.mrb[110].mxu1 }
 0x396   : > { %v4638_v51 = vpack.c.bf16 %v8451_v63, %v8444_v49  ;;  %v8458_v52 = vpop.f32.mrb[111].mxu1  ;;  %v7619_v49 = vld [vmem:[%s9476_s4 + $0x2b8] sm:$0xff]  }
 0x397   : > { %v4637_v1 = vpack.c.bf16 %v8458_v52, %v8446_v40 }
 0x398   : > { %7197 = vmatmul.mubr.msk.bf16.gmra.mrb[216].mxu1 %vm2441_vm0, %v7605_v59 }
 0x399   : > { %7200 = vmatprep.mubr.msk.bf16.mxu1 %vm2441_vm0, %v7606_v45  ;;  %v4813_v25 = vsel %vm2441_vm0, %v4637_v1, 0  ;;  %v4816_v45 = vsel %vm2441_vm0, %v4638_v51, 0  ;;  %v7620_v51 = vld [vmem:[%s9476_s4 + $0x2c0] sm:$0xff]  }
 0x39a   : > { %6847 = vmatpush3.bf16.xpose.msra.mxu0 %v4774_v56 }
 0x39b   : > { %7314 = vmatprep.subr.msk.bf16.mxu0 %vm2441_vm0, %v4633_v35  ;;  %v8469_v2 = vpop.f32.mrb[112].mxu1  ;;  %v7616_v35 = vld [vmem:[%s9476_s4 + $0x2a0] sm:$0xff]  }
 0x39c   : > { %v8471_v3 = vpop.f32.mrb[113].mxu1 }
 0x39d   : > { %v8476_v57 = vpop.f32.mrb[114].mxu1 }
 0x39e   : > { %v4640_v48 = vpack.c.bf16 %v8476_v57, %v8469_v2  ;;  %v8483_v50 = vpop.f32.mrb[115].mxu1  ;;  %v7624_v2 = vld [vmem:[%s9476_s4 + $0x2e0] sm:$0xff]  }
 0x39f   : > { %v4639_v46 = vpack.c.bf16 %v8483_v50, %v8471_v3  ;;  %v7622_v3 = vld [vmem:[%s9476_s4 + $0x2d0] sm:$0xff]  }
 0x3a0   : > { %7201 = vmatmul.mubr.msk.bf16.gmra.mrb[220].mxu1 %vm2441_vm0, %v7607_v4 }
 0x3a1   : > { %7204 = vmatprep.mubr.msk.bf16.mxu1 %vm2441_vm0, %v7608_v44 }
 0x3a2   : > { %6849 = vmatpush3.bf16.xpose.msra.mxu0 %v4777_v9  ;;  %v4819_v9 = vsel %vm2441_vm0, %v4639_v46, 0 }
 0x3a3   : > { %7315 = vmatprep.subr.msk.bf16.mxu0 %vm2441_vm0, %v4634_v33  ;;  %v8494_v58 = vpop.f32.mrb[116].mxu1  ;;  %v7615_v33 = vld [vmem:[%s9476_s4 + $0x298] sm:$0xff]  }
 0x3a4   : > { %v8496_v10 = vpop.f32.mrb[117].mxu1 }
 0x3a5   : > { %v8501_v6 = vpop.f32.mrb[118].mxu1 }
 0x3a6   : > { %v4642_v60 = vpack.c.bf16 %v8501_v6, %v8494_v58  ;;  %v8508_v62 = vpop.f32.mrb[119].mxu1 }
 0x3a7   : > { %v4641_v11 = vpack.c.bf16 %v8508_v62, %v8496_v10  ;;  %v7626_v10 = vld [vmem:[%s9476_s4 + $0x2f0] sm:$0xff]  }
 0x3a8   : > { %7205 = vmatmul.mubr.msk.bf16.gmra.mrb[224].mxu1 %vm2441_vm0, %v7609_v5 }
 0x3a9   : > { %7208 = vmatprep.mubr.msk.bf16.mxu1 %vm2441_vm0, %v7610_v24 }
 0x3aa   : > { %6851 = vmatpush3.bf16.xpose.msra.mxu0 %v4780_v12  ;;  %v7621_v12 = vld [vmem:[%s9476_s4 + $0x2c8] sm:$0xff]  }
 0x3ab   : > { %v7102_v0 = vpop.f32.mrb[120].mxu1 }
 0x3ac   : > { %v3788_v13 = vpop.f32.mrb[121].mxu1 }
 0x3ad   : > { %v7103_v15 = vpop.f32.mrb[122].mxu1 }
 0x3ae   : > { %v4644_v16 = vpack.c.bf16 %v7103_v15, %v7102_v0  ;;  %v3791_v17 = vpop.f32.mrb[123].mxu1 }
 0x3af   : > { %v4643_v18 = vpack.c.bf16 %v3791_v17, %v3788_v13  ;;  %v7623_v17 = vld [vmem:[%s9476_s4 + $0x2d8] sm:$0xff]  }
 0x3b0   : > { %7209 = vmatmul.mubr.msk.bf16.gmra.mrb[228].mxu1 %vm2441_vm0, %v7611_v14  ;;  %v4822_v14 = vsel %vm2441_vm0, %v4640_v48, 0 }
 0x3b1   : > { %6853 = vmatmul.mubr.msk.bf16.vlgmr.msra.gmra.mrb[64].mxu0 %vm2441_vm0, %v8060_v27  ;;  %7316 = vmatprep.subr.msk.bf16.mxu0 %vm2441_vm0, %v4643_v18 }
 0x3b2   : > { %6854 = vmatprep.mubr.msk.bf16.mxu0 %vm2441_vm0, %v8067_v43  ;;  %6861 = vmatpush3.bf16.xpose.msra.mxu0 %v4807_v53  ;;  %v4825_v53 = vsel %vm2441_vm0, %v4641_v11, 0 }
 0x3b3   : > { %7317 = vmatprep.subr.msk.bf16.mxu0 %vm2441_vm0, %v4644_v16  ;;  %v7106_v41 = vpop.f32.mrb[124].mxu1  ;;  %7212 = vmatprep.mubr.msk.bf16.mxu1 %vm2441_vm0, %v7612_v19 }
 0x3b4   : > { %v3804_v54 = vpop.f32.mrb[125].mxu1 }
 0x3b5   : > { %v7107_v7 = vpop.f32.mrb[126].mxu1 }
 0x3b6   : > { %v4646_v8 = vpack.c.bf16 %v7107_v7, %v7106_v41  ;;  %v3807_v28 = vpop.f32.mrb[127].mxu1 }
 0x3b7   : > { %v4645_v29 = vpack.c.bf16 %v3807_v28, %v3804_v54 }
 0x3b8   : > { %7213 = vmatmul.mubr.msk.bf16.gmra.mrb[232].mxu1 %vm2441_vm0, %v7613_v20  ;;  %v7625_v20 = vld [vmem:[%s9476_s4 + $0x2e8] sm:$0xff]  }
 0x3b9   : > { %6855 = vmatmul.mubr.msk.bf16.gmra.mrb[68].mxu0 %vm2441_vm0, %v8067_v43  ;;  %7216 = vmatprep.mubr.msk.bf16.mxu1 %vm2441_vm0, %v7614_v26 }
 0x3ba   : > { %6856 = vmatprep.mubr.msk.bf16.mxu0 %vm2441_vm0, %v8072_v61  ;;  %6863 = vmatpush3.bf16.xpose.msra.mxu0 %v4810_v30  ;;  %v7627_v30 = vld [vmem:[%s9476_s4 + $0x2f8] sm:$0xff]  }
 0x3bb   : > { %7318 = vmatprep.subr.msk.bf16.mxu0 %vm2441_vm0, %v4645_v29  ;;  %v7110_v31 = vpop.f32.mrb[128].mxu1 }
 0x3bc   : > { %v3820_v32 = vpop.f32.mrb[129].mxu1 }
 0x3bd   : > { %v7111_v34 = vpop.f32.mrb[130].mxu1 }
 0x3be   : > { %v4648_v21 = vpack.c.bf16 %v7111_v34, %v7110_v31  ;;  %v3823_v37 = vpop.f32.mrb[131].mxu1 }
 0x3bf   : > { %v4647_v38 = vpack.c.bf16 %v3823_v37, %v3820_v32 }
 0x3c0   : > { %7217 = vmatmul.mubr.msk.bf16.gmra.mrb[236].mxu1 %vm2441_vm0, %v7615_v33 }
 0x3c1   : > { %6857 = vmatmul.mubr.msk.bf16.gmra.mrb[72].mxu0 %vm2441_vm0, %v8072_v61  ;;  %7220 = vmatprep.mubr.msk.bf16.mxu1 %vm2441_vm0, %v7616_v35  ;;  %v7628_v35 = vld [vmem:[%s9476_s4 + $0x300] sm:$0xff]  }
 0x3c2   : > { %6858 = vmatprep.mubr.msk.bf16.mxu0 %vm2441_vm0, %v8078_v55  ;;  %6865 = vmatpush3.bf16.xpose.msra.mxu0 %v4813_v25 }
 0x3c3   : > { %7319 = vmatprep.subr.msk.bf16.mxu0 %vm2441_vm0, %v4646_v8  ;;  %v7114_v36 = vpop.f32.mrb[132].mxu1  ;;  %v4828_v8 = vsel %vm2441_vm0, %v4642_v60, 0 }
 0x3c4   : > { %v3836_v22 = vpop.f32.mrb[133].mxu1 }
 0x3c5   : > { %v7115_v42 = vpop.f32.mrb[134].mxu1 }
 0x3c6   : > { %v4650_v47 = vpack.c.bf16 %v7115_v42, %v7114_v36  ;;  %v3839_v40 = vpop.f32.mrb[135].mxu1 }
 0x3c7   : > { %v4649_v59 = vpack.c.bf16 %v3839_v40, %v3836_v22 }
 0x3c8   : > { %7221 = vmatmul.mubr.msk.bf16.gmra.mrb[240].mxu1 %vm2441_vm0, %v7617_v23 }
 0x3c9   : > { %6859 = vmatmul.mubr.msk.bf16.gmra.mrb[76].mxu0 %vm2441_vm0, %v8078_v55  ;;  %7224 = vmatprep.mubr.msk.bf16.mxu1 %vm2441_vm0, %v7618_v39 }
 0x3ca   : > { %6867 = vmatpush3.bf16.xpose.msra.mxu0 %v4816_v45  ;;  %6876 = vmatprep.mubr.msk.bf16.mxu0 %vm2441_vm0, %v8060_v27 }
 0x3cb   : > { %7320 = vmatprep.subr.msk.bf16.mxu0 %vm2441_vm0, %v4647_v38  ;;  %v8584_v52 = vpop.f32.mrb[136].mxu1  ;;  %v7630_v38 = vld [vmem:[%s9476_s4 + $0x310] sm:$0xff]  }
 0x3cc   : > { %v3852_v1 = vpop.f32.mrb[137].mxu1 }
 0x3cd   : > { %v8589_v63 = vpop.f32.mrb[138].mxu1 }
 0x3ce   : > { %v4652_v56 = vpack.c.bf16 %v8589_v63, %v8584_v52  ;;  %v3855_v4 = vpop.f32.mrb[139].mxu1 }
 0x3cf   : > { %v4651_v44 = vpack.c.bf16 %v3855_v4, %v3852_v1 }
 0x3d0   : > { %7225 = vmatmul.mubr.msk.bf16.gmra.mrb[244].mxu1 %vm2441_vm0, %v7619_v49  ;;  %v4858_v23 = vsel %vm2441_vm0, %v4652_v56, 0  ;;  %v7633_v56 = vld [vmem:[%s9476_s4 + $0x328] sm:$0xff]  }
 0x3d1   : > { %7228 = vmatprep.mubr.msk.bf16.mxu1 %vm2441_vm0, %v7620_v51  ;;  %v4855_v58 = vsel %vm2441_vm0, %v4651_v44, 0  ;;  %v7634_v44 = vld [vmem:[%s9476_s4 + $0x330] sm:$0xff]  }
 0x3d2   : > { %6869 = vmatpush3.bf16.xpose.msra.mxu0 %v4819_v9 }
 0x3d3   : > { %7321 = vmatprep.subr.msk.bf16.mxu0 %vm2441_vm0, %v4648_v21  ;;  %v8603_v5 = vpop.f32.mrb[140].mxu1  ;;  %v7629_v21 = vld [vmem:[%s9476_s4 + $0x308] sm:$0xff]  }
 0x3d4   : > { %v8605_v24 = vpop.f32.mrb[141].mxu1 }
 0x3d5   : > { %v8610_v0 = vpop.f32.mrb[142].mxu1 }
 0x3d6   : > { %v4654_v50 = vpack.c.bf16 %v8610_v0, %v8603_v5  ;;  %v8617_v46 = vpop.f32.mrb[143].mxu1  ;;  %v7635_v5 = vld [vmem:[%s9476_s4 + $0x338] sm:$0xff]  }
 0x3d7   : > { %v4653_v13 = vpack.c.bf16 %v8617_v46, %v8605_v24 }
 0x3d8   : > { %7229 = vmatmul.mubr.msk.bf16.gmra.mrb[248].mxu1 %vm2441_vm0, %v7621_v12 }
 0x3d9   : > { %7232 = vmatprep.mubr.msk.bf16.mxu1 %vm2441_vm0, %v7622_v3  ;;  %v4861_v49 = vsel %vm2441_vm0, %v4653_v13, 0  ;;  %v4864_v3 = vsel %vm2441_vm0, %v4654_v50, 0  ;;  %v7636_v50 = vld [vmem:[%s9476_s4 + $0x340] sm:$0xff]  }
 0x3da   : > { %6871 = vmatpush3.bf16.xpose.msra.mxu0 %v4822_v14 }
 0x3db   : > { %7322 = vmatprep.subr.msk.bf16.mxu0 %vm2441_vm0, %v4649_v59  ;;  %v8628_v15 = vpop.f32.mrb[144].mxu1  ;;  %v7632_v59 = vld [vmem:[%s9476_s4 + $0x320] sm:$0xff]  }
 0x3dc   : > { %v8630_v16 = vpop.f32.mrb[145].mxu1 }
 0x3dd   : > { %v8635_v18 = vpop.f32.mrb[146].mxu1 }
 0x3de   : > { %v4656_v57 = vpack.c.bf16 %v8635_v18, %v8628_v15  ;;  %v8642_v48 = vpop.f32.mrb[147].mxu1  ;;  %v7640_v15 = vld [vmem:[%s9476_s4 + $0x360] sm:$0xff]  }
 0x3df   : > { %v4655_v19 = vpack.c.bf16 %v8642_v48, %v8630_v16  ;;  %v7638_v16 = vld [vmem:[%s9476_s4 + $0x350] sm:$0xff]  }
 0x3e0   : > { %7233 = vmatmul.mubr.msk.bf16.gmra.mrb[252].mxu1 %vm2441_vm0, %v7623_v17 }
 0x3e1   : > { %7236 = vmatprep.mubr.msk.bf16.mxu1 %vm2441_vm0, %v7624_v2 }
 0x3e2   : > { %6873 = vmatpush3.bf16.xpose.msra.mxu0 %v4825_v53  ;;  %v4867_v53 = vsel %vm2441_vm0, %v4655_v19, 0 }
 0x3e3   : > { %7323 = vmatprep.subr.msk.bf16.mxu0 %vm2441_vm0, %v4650_v47  ;;  %v8653_v41 = vpop.f32.mrb[148].mxu1  ;;  %v7631_v47 = vld [vmem:[%s9476_s4 + $0x318] sm:$0xff]  }
 0x3e4   : > { %v8655_v54 = vpop.f32.mrb[149].mxu1 }
 0x3e5   : > { %v8660_v7 = vpop.f32.mrb[150].mxu1 }
 0x3e6   : > { %v4658_v62 = vpack.c.bf16 %v8660_v7, %v8653_v41  ;;  %v8667_v11 = vpop.f32.mrb[151].mxu1 }
 0x3e7   : > { %v4657_v26 = vpack.c.bf16 %v8667_v11, %v8655_v54  ;;  %v7642_v54 = vld [vmem:[%s9476_s4 + $0x370] sm:$0xff]  }
 0x3e8   : > { %7237 = vmatmul.mubr.msk.bf16.gmra.mrb[0].mxu1 %vm2441_vm0, %v7625_v20 }
 0x3e9   : > { %7240 = vmatprep.mubr.msk.bf16.mxu1 %vm2441_vm0, %v7626_v10 }
 0x3ea   : > { %6875 = vmatpush3.bf16.xpose.msra.mxu0 %v4828_v8  ;;  %v7637_v8 = vld [vmem:[%s9476_s4 + $0x348] sm:$0xff]  }
 0x3eb   : > { %v7134_v28 = vpop.f32.mrb[152].mxu1 }
 0x3ec   : > { %v3916_v29 = vpop.f32.mrb[153].mxu1 }
 0x3ed   : > { %v7135_v31 = vpop.f32.mrb[154].mxu1 }
 0x3ee   : > { %v4660_v32 = vpack.c.bf16 %v7135_v31, %v7134_v28  ;;  %v3919_v33 = vpop.f32.mrb[155].mxu1 }
 0x3ef   : > { %v4659_v34 = vpack.c.bf16 %v3919_v33, %v3916_v29  ;;  %v7639_v33 = vld [vmem:[%s9476_s4 + $0x358] sm:$0xff]  }
 0x3f0   : > { %7241 = vmatmul.mubr.msk.bf16.gmra.mrb[4].mxu1 %vm2441_vm0, %v7627_v30  ;;  %v4870_v30 = vsel %vm2441_vm0, %v4656_v57, 0 }
 0x3f1   : > { %6877 = vmatmul.mubr.msk.bf16.vlgmr.msra.gmra.mrb[80].mxu0 %vm2441_vm0, %v8060_v27  ;;  %7324 = vmatprep.subr.msk.bf16.mxu0 %vm2441_vm0, %v4659_v34 }
 0x3f2   : > { %6878 = vmatprep.mubr.msk.bf16.mxu0 %vm2441_vm0, %v8067_v43  ;;  %6885 = vmatpush3.bf16.xpose.msra.mxu0 %v4855_v58  ;;  %v4873_v58 = vsel %vm2441_vm0, %v4657_v26, 0 }
 0x3f3   : > { %7325 = vmatprep.subr.msk.bf16.mxu0 %vm2441_vm0, %v4660_v32  ;;  %v7138_v6 = vpop.f32.mrb[156].mxu1  ;;  %7244 = vmatprep.mubr.msk.bf16.mxu1 %vm2441_vm0, %v7628_v35 }
 0x3f4   : > { %v3932_v60 = vpop.f32.mrb[157].mxu1 }
 0x3f5   : > { %v7139_v37 = vpop.f32.mrb[158].mxu1 }
 0x3f6   : > { %v4662_v25 = vpack.c.bf16 %v7139_v37, %v7138_v6  ;;  %v3935_v36 = vpop.f32.mrb[159].mxu1 }
 0x3f7   : > { %v4661_v22 = vpack.c.bf16 %v3935_v36, %v3932_v60 }
 0x3f8   : > { %7245 = vmatmul.mubr.msk.bf16.gmra.mrb[8].mxu1 %vm2441_vm0, %v7629_v21  ;;  %v7641_v21 = vld [vmem:[%s9476_s4 + $0x368] sm:$0xff]  }
 0x3f9   : > { %6879 = vmatmul.mubr.msk.bf16.gmra.mrb[84].mxu0 %vm2441_vm0, %v8067_v43  ;;  %7248 = vmatprep.mubr.msk.bf16.mxu1 %vm2441_vm0, %v7630_v38 }
 0x3fa   : > { %6880 = vmatprep.mubr.msk.bf16.mxu0 %vm2441_vm0, %v8072_v61  ;;  %6887 = vmatpush3.bf16.xpose.msra.mxu0 %v4858_v23  ;;  %v7643_v23 = vld [vmem:[%s9476_s4 + $0x378] sm:$0xff]  }
 0x3fb   : > { %7326 = vmatprep.subr.msk.bf16.mxu0 %vm2441_vm0, %v4661_v22  ;;  %v7142_v42 = vpop.f32.mrb[160].mxu1 }
 0x3fc   : > { %v3948_v39 = vpop.f32.mrb[161].mxu1 }
 0x3fd   : > { %v7143_v40 = vpop.f32.mrb[162].mxu1 }
 0x3fe   : > { %v4664_v45 = vpack.c.bf16 %v7143_v40, %v7142_v42  ;;  %v3951_v52 = vpop.f32.mrb[163].mxu1 }
 0x3ff   : > { %v4663_v1 = vpack.c.bf16 %v3951_v52, %v3948_v39 }
 0x400   : > { %7249 = vmatmul.mubr.msk.bf16.gmra.mrb[12].mxu1 %vm2441_vm0, %v7631_v47 }
 0x401   : > { %6881 = vmatmul.mubr.msk.bf16.gmra.mrb[88].mxu0 %vm2441_vm0, %v8072_v61  ;;  %7252 = vmatprep.mubr.msk.bf16.mxu1 %vm2441_vm0, %v7632_v59  ;;  %v7644_v59 = vld [vmem:[%s9476_s4 + $0x380] sm:$0xff]  }
 0x402   : > { %6882 = vmatprep.mubr.msk.bf16.mxu0 %vm2441_vm0, %v8078_v55  ;;  %6889 = vmatpush3.bf16.xpose.msra.mxu0 %v4861_v49 }
 0x403   : > { %7327 = vmatprep.subr.msk.bf16.mxu0 %vm2441_vm0, %v4662_v25  ;;  %v7146_v63 = vpop.f32.mrb[164].mxu1  ;;  %v4876_v25 = vsel %vm2441_vm0, %v4658_v62, 0 }
 0x404   : > { %v3964_v51 = vpop.f32.mrb[165].mxu1 }
 0x405   : > { %v7147_v4 = vpop.f32.mrb[166].mxu1 }
 0x406   : > { %v4666_v9 = vpack.c.bf16 %v7147_v4, %v7146_v63  ;;  %v3967_v24 = vpop.f32.mrb[167].mxu1 }
 0x407   : > { %v4665_v12 = vpack.c.bf16 %v3967_v24, %v3964_v51 }
 0x408   : > { %7253 = vmatmul.mubr.msk.bf16.gmra.mrb[16].mxu1 %vm2441_vm0, %v7633_v56 }
 0x409   : > { %6883 = vmatmul.mubr.msk.bf16.gmra.mrb[92].mxu0 %vm2441_vm0, %v8078_v55  ;;  %7256 = vmatprep.mubr.msk.bf16.mxu1 %vm2441_vm0, %v7634_v44 }
 0x40a   : > { %6891 = vmatpush3.bf16.xpose.msra.mxu0 %v4864_v3  ;;  %6900 = vmatprep.mubr.msk.bf16.mxu0 %vm2441_vm0, %v8060_v27 }
 0x40b   : > { %7328 = vmatprep.subr.msk.bf16.mxu0 %vm2441_vm0, %v4663_v1  ;;  %v8743_v46 = vpop.f32.mrb[168].mxu1  ;;  %v7646_v1 = vld [vmem:[%s9476_s4 + $0x390] sm:$0xff]  }
 0x40c   : > { %v3980_v13 = vpop.f32.mrb[169].mxu1 }
 0x40d   : > { %v8748_v0 = vpop.f32.mrb[170].mxu1 }
 0x40e   : > { %v4668_v14 = vpack.c.bf16 %v8748_v0, %v8743_v46  ;;  %v3983_v17 = vpop.f32.mrb[171].mxu1 }
 0x40f   : > { %v4667_v2 = vpack.c.bf16 %v3983_v17, %v3980_v13 }
 0x410   : > { %7257 = vmatmul.mubr.msk.bf16.gmra.mrb[20].mxu1 %vm2441_vm0, %v7635_v5  ;;  %v4906_v56 = vsel %vm2441_vm0, %v4668_v14, 0  ;;  %v7649_v14 = vld [vmem:[%s9476_s4 + $0x3a8] sm:$0xff]  }
 0x411   : > { %7260 = vmatprep.mubr.msk.bf16.mxu1 %vm2441_vm0, %v7636_v50  ;;  %v4903_v41 = vsel %vm2441_vm0, %v4667_v2, 0  ;;  %v7650_v2 = vld [vmem:[%s9476_s4 + $0x3b0] sm:$0xff]  }
 0x412   : > { %6893 = vmatpush3.bf16.xpose.msra.mxu0 %v4867_v53 }
 0x413   : > { %7329 = vmatprep.subr.msk.bf16.mxu0 %vm2441_vm0, %v4664_v45  ;;  %v8762_v20 = vpop.f32.mrb[172].mxu1  ;;  %v7645_v45 = vld [vmem:[%s9476_s4 + $0x388] sm:$0xff]  }
 0x414   : > { %v8764_v10 = vpop.f32.mrb[173].mxu1 }
 0x415   : > { %v8769_v28 = vpop.f32.mrb[174].mxu1 }
 0x416   : > { %v4670_v48 = vpack.c.bf16 %v8769_v28, %v8762_v20  ;;  %v8776_v19 = vpop.f32.mrb[175].mxu1  ;;  %v7651_v20 = vld [vmem:[%s9476_s4 + $0x3b8] sm:$0xff]  }
 0x417   : > { %v4669_v29 = vpack.c.bf16 %v8776_v19, %v8764_v10 }
 0x418   : > { %7261 = vmatmul.mubr.msk.bf16.gmra.mrb[24].mxu1 %vm2441_vm0, %v7637_v8 }
 0x419   : > { %7264 = vmatprep.mubr.msk.bf16.mxu1 %vm2441_vm0, %v7638_v16  ;;  %v4909_v5 = vsel %vm2441_vm0, %v4669_v29, 0  ;;  %v4912_v16 = vsel %vm2441_vm0, %v4670_v48, 0  ;;  %v7652_v48 = vld [vmem:[%s9476_s4 + $0x3c0] sm:$0xff]  }
 0x41a   : > { %6895 = vmatpush3.bf16.xpose.msra.mxu0 %v4870_v30 }
 0x41b   : > { %7330 = vmatprep.subr.msk.bf16.mxu0 %vm2441_vm0, %v4665_v12  ;;  %v8787_v31 = vpop.f32.mrb[176].mxu1  ;;  %v7648_v12 = vld [vmem:[%s9476_s4 + $0x3a0] sm:$0xff]  }
 0x41c   : > { %v8789_v32 = vpop.f32.mrb[177].mxu1 }
 0x41d   : > { %v8794_v34 = vpop.f32.mrb[178].mxu1 }
 0x41e   : > { %v4672_v18 = vpack.c.bf16 %v8794_v34, %v8787_v31  ;;  %v8801_v57 = vpop.f32.mrb[179].mxu1  ;;  %v7656_v31 = vld [vmem:[%s9476_s4 + $0x3e0] sm:$0xff]  }
 0x41f   : > { %v4671_v35 = vpack.c.bf16 %v8801_v57, %v8789_v32  ;;  %v7654_v32 = vld [vmem:[%s9476_s4 + $0x3d0] sm:$0xff]  }
 0x420   : > { %7265 = vmatmul.mubr.msk.bf16.gmra.mrb[28].mxu1 %vm2441_vm0, %v7639_v33 }
 0x421   : > { %7268 = vmatprep.mubr.msk.bf16.mxu1 %vm2441_vm0, %v7640_v15 }
 0x422   : > { %6897 = vmatpush3.bf16.xpose.msra.mxu0 %v4873_v58  ;;  %v4915_v58 = vsel %vm2441_vm0, %v4671_v35, 0 }
 0x423   : > { %7331 = vmatprep.subr.msk.bf16.mxu0 %vm2441_vm0, %v4666_v9  ;;  %v8812_v6 = vpop.f32.mrb[180].mxu1  ;;  %v7647_v9 = vld [vmem:[%s9476_s4 + $0x398] sm:$0xff]  }
 0x424   : > { %v8814_v60 = vpop.f32.mrb[181].mxu1 }
 0x425   : > { %v8819_v37 = vpop.f32.mrb[182].mxu1 }
 0x426   : > { %v4674_v11 = vpack.c.bf16 %v8819_v37, %v8812_v6  ;;  %v8826_v26 = vpop.f32.mrb[183].mxu1 }
 0x427   : > { %v4673_v38 = vpack.c.bf16 %v8826_v26, %v8814_v60  ;;  %v7658_v60 = vld [vmem:[%s9476_s4 + $0x3f0] sm:$0xff]  }
 0x428   : > { %7269 = vmatmul.mubr.msk.bf16.gmra.mrb[32].mxu1 %vm2441_vm0, %v7641_v21 }
 0x429   : > { %7272 = vmatprep.mubr.msk.bf16.mxu1 %vm2441_vm0, %v7642_v54 }
 0x42a   : > { %6899 = vmatpush3.bf16.xpose.msra.mxu0 %v4876_v25  ;;  %v7653_v25 = vld [vmem:[%s9476_s4 + $0x3c8] sm:$0xff]  }
 0x42b   : > { %v7166_v36 = vpop.f32.mrb[184].mxu1 }
 0x42c   : > { %v4044_v22 = vpop.f32.mrb[185].mxu1 }
 0x42d   : > { %v7167_v42 = vpop.f32.mrb[186].mxu1 }
 0x42e   : > { %v4676_v39 = vpack.c.bf16 %v7167_v42, %v7166_v36  ;;  %v4047_v47 = vpop.f32.mrb[187].mxu1 }
 0x42f   : > { %v4675_v40 = vpack.c.bf16 %v4047_v47, %v4044_v22  ;;  %v7655_v47 = vld [vmem:[%s9476_s4 + $0x3d8] sm:$0xff]  }
 0x430   : > { %7273 = vmatmul.mubr.msk.bf16.gmra.mrb[36].mxu1 %vm2441_vm0, %v7643_v23  ;;  %v4918_v23 = vsel %vm2441_vm0, %v4672_v18, 0 }
 0x431   : > { %6901 = vmatmul.mubr.msk.bf16.vlgmr.msra.gmra.mrb[96].mxu0 %vm2441_vm0, %v8060_v27  ;;  %7332 = vmatprep.subr.msk.bf16.mxu0 %vm2441_vm0, %v4675_v40 }
 0x432   : > { %6902 = vmatprep.mubr.msk.bf16.mxu0 %vm2441_vm0, %v8067_v43  ;;  %6909 = vmatpush3.bf16.xpose.msra.mxu0 %v4903_v41  ;;  %v4921_v41 = vsel %vm2441_vm0, %v4673_v38, 0 }
 0x433   : > { %7333 = vmatprep.subr.msk.bf16.mxu0 %vm2441_vm0, %v4676_v39  ;;  %v7170_v7 = vpop.f32.mrb[188].mxu1  ;;  %7276 = vmatprep.mubr.msk.bf16.mxu1 %vm2441_vm0, %v7644_v59 }
 0x434   : > { %v4060_v62 = vpop.f32.mrb[189].mxu1 }
 0x435   : > { %v7171_v52 = vpop.f32.mrb[190].mxu1 }
 0x436   : > { %v4678_v49 = vpack.c.bf16 %v7171_v52, %v7170_v7  ;;  %v4063_v63 = vpop.f32.mrb[191].mxu1 }
 0x437   : > { %v4677_v51 = vpack.c.bf16 %v4063_v63, %v4060_v62 }
 0x438   : > { %7277 = vmatmul.mubr.msk.bf16.gmra.mrb[40].mxu1 %vm2441_vm0, %v7645_v45  ;;  %v7657_v45 = vld [vmem:[%s9476_s4 + $0x3e8] sm:$0xff]  }
 0x439   : > { %6903 = vmatmul.mubr.msk.bf16.gmra.mrb[100].mxu0 %vm2441_vm0, %v8067_v43  ;;  %7280 = vmatprep.mubr.msk.bf16.mxu1 %vm2441_vm0, %v7646_v1 }
 0x43a   : > { %6904 = vmatprep.mubr.msk.bf16.mxu0 %vm2441_vm0, %v8072_v61  ;;  %6911 = vmatpush3.bf16.xpose.msra.mxu0 %v4906_v56  ;;  %v7659_v56 = vld [vmem:[%s9476_s4 + $0x3f8] sm:$0xff]  }
 0x43b   : > { %7334 = vmatprep.subr.msk.bf16.mxu0 %vm2441_vm0, %v4677_v51  ;;  %v7174_v4 = vpop.f32.mrb[192].mxu1 }
 0x43c   : > { %v4076_v44 = vpop.f32.mrb[193].mxu1 }
 0x43d   : > { %v7175_v24 = vpop.f32.mrb[194].mxu1 }
 0x43e   : > { %v4680_v3 = vpack.c.bf16 %v7175_v24, %v7174_v4  ;;  %v4079_v46 = vpop.f32.mrb[195].mxu1 }
 0x43f   : > { %v4679_v13 = vpack.c.bf16 %v4079_v46, %v4076_v44 }
 0x440   : > { %7281 = vmatmul.mubr.msk.bf16.gmra.mrb[44].mxu1 %vm2441_vm0, %v7647_v9 }
 0x441   : > { %6905 = vmatmul.mubr.msk.bf16.gmra.mrb[104].mxu0 %vm2441_vm0, %v8072_v61  ;;  %7284 = vmatprep.mubr.msk.bf16.mxu1 %vm2441_vm0, %v7648_v12 }
 0x442   : > { %6906 = vmatprep.mubr.msk.bf16.mxu0 %vm2441_vm0, %v8078_v55  ;;  %6913 = vmatpush3.bf16.xpose.msra.mxu0 %v4909_v5 }
 0x443   : > { %7335 = vmatprep.subr.msk.bf16.mxu0 %vm2441_vm0, %v4678_v49  ;;  %v7178_v0 = vpop.f32.mrb[196].mxu1  ;;  %v4924_v49 = vsel %vm2441_vm0, %v4674_v11, 0 }
 0x444   : > { %v4092_v50 = vpop.f32.mrb[197].mxu1 }
 0x445   : > { %v7179_v17 = vpop.f32.mrb[198].mxu1 }
 0x446   : > { %v4682_v53 = vpack.c.bf16 %v7179_v17, %v7178_v0  ;;  %v4095_v10 = vpop.f32.mrb[199].mxu1 }
 0x447   : > { %v4681_v8 = vpack.c.bf16 %v4095_v10, %v4092_v50 }
 0x448   : > { %7285 = vmatmul.mubr.msk.bf16.gmra.mrb[48].mxu1 %vm2441_vm0, %v7649_v14 }
 0x449   : > { %6907 = vmatmul.mubr.msk.bf16.gmra.mrb[108].mxu0 %vm2441_vm0, %v8078_v55  ;;  %7288 = vmatprep.mubr.msk.bf16.mxu1 %vm2441_vm0, %v7650_v2 }
 0x44a   : > { %6915 = vmatpush3.bf16.xpose.msra.mxu0 %v4912_v16  ;;  %6924 = vmatprep.mubr.msk.bf16.mxu0 %vm2441_vm0, %v8060_v27 }
 0x44b   : > { %7336 = vmatprep.subr.msk.bf16.mxu0 %vm2441_vm0, %v4679_v13  ;;  %v8902_v19 = vpop.f32.mrb[200].mxu1 }
 0x44c   : > { %v4108_v29 = vpop.f32.mrb[201].mxu1 }
 0x44d   : > { %v8907_v28 = vpop.f32.mrb[202].mxu1 }
 0x44e   : > { %v4684_v30 = vpack.c.bf16 %v8907_v28, %v8902_v19  ;;  %v4111_v33 = vpop.f32.mrb[203].mxu1 }
 0x44f   : > { %v4683_v15 = vpack.c.bf16 %v4111_v33, %v4108_v29 }
 0x450   : > { %7289 = vmatmul.mubr.msk.bf16.gmra.mrb[52].mxu1 %vm2441_vm0, %v7651_v20  ;;  %v4954_v5 = vsel %vm2441_vm0, %v4684_v30, 0 }
 0x451   : > { %7292 = vmatprep.mubr.msk.bf16.mxu1 %vm2441_vm0, %v7652_v48  ;;  %v4951_v12 = vsel %vm2441_vm0, %v4683_v15, 0 }
 0x452   : > { %6917 = vmatpush3.bf16.xpose.msra.mxu0 %v4915_v58 }
 0x453   : > { %7337 = vmatprep.subr.msk.bf16.mxu0 %vm2441_vm0, %v4680_v3  ;;  %v8921_v21 = vpop.f32.mrb[204].mxu1 }
 0x454   : > { %v8923_v54 = vpop.f32.mrb[205].mxu1 }
 0x455   : > { %v8928_v36 = vpop.f32.mrb[206].mxu1 }
 0x456   : > { %v4686_v57 = vpack.c.bf16 %v8928_v36, %v8921_v21  ;;  %v8935_v35 = vpop.f32.mrb[207].mxu1 }
 0x457   : > { %v4685_v22 = vpack.c.bf16 %v8935_v35, %v8923_v54 }
 0x458   : > { %7293 = vmatmul.mubr.msk.bf16.gmra.mrb[56].mxu1 %vm2441_vm0, %v7653_v25  ;;  %v4960_v58 = vsel %vm2441_vm0, %v4686_v57, 0 }
 0x459   : > { %7296 = vmatprep.mubr.msk.bf16.mxu1 %vm2441_vm0, %v7654_v32  ;;  %v4957_v10 = vsel %vm2441_vm0, %v4685_v22, 0 }
 0x45a   : > { %6919 = vmatpush3.bf16.xpose.msra.mxu0 %v4918_v23 }
 0x45b   : > { %7338 = vmatprep.subr.msk.bf16.mxu0 %vm2441_vm0, %v4681_v8  ;;  %v8946_v42 = vpop.f32.mrb[208].mxu1 }
 0x45c   : > { %v8948_v39 = vpop.f32.mrb[209].mxu1 }
 0x45d   : > { %v8953_v40 = vpop.f32.mrb[210].mxu1 }
 0x45e   : > { %v4688_v34 = vpack.c.bf16 %v8953_v40, %v8946_v42  ;;  %v8960_v18 = vpop.f32.mrb[211].mxu1 }
 0x45f   : > { %v4687_v59 = vpack.c.bf16 %v8960_v18, %v8948_v39 }
 0x460   : > { %7297 = vmatmul.mubr.msk.bf16.gmra.mrb[60].mxu1 %vm2441_vm0, %v7655_v47 }
 0x461   : > { %7300 = vmatprep.mubr.msk.bf16.mxu1 %vm2441_vm0, %v7656_v31  ;;  %v4963_v31 = vsel %vm2441_vm0, %v4687_v59, 0 }
 0x462   : > { %6921 = vmatpush3.bf16.xpose.msra.mxu0 %v4921_v41 }
 0x463   : > { %7339 = vmatprep.subr.msk.bf16.mxu0 %vm2441_vm0, %v4682_v53  ;;  %v8971_v7 = vpop.f32.mrb[212].mxu1 }
 0x464   : > { %v8973_v62 = vpop.f32.mrb[213].mxu1 }
 0x465   : > { %v8978_v52 = vpop.f32.mrb[214].mxu1 }
 0x466   : > { %v4690_v26 = vpack.c.bf16 %v8978_v52, %v8971_v7  ;;  %v8985_v38 = vpop.f32.mrb[215].mxu1 }
 0x467   : > { %v4689_v1 = vpack.c.bf16 %v8985_v38, %v8973_v62 }
 0x468   : > { %7301 = vmatmul.mubr.msk.bf16.gmra.mrb[64].mxu1 %vm2441_vm0, %v7657_v45  ;;  %v4972_v62 = vsel %vm2441_vm0, %v4690_v26, 0 }
 0x469   : > { %7304 = vmatprep.mubr.msk.bf16.mxu1 %vm2441_vm0, %v7658_v60 }
 0x46a   : > { %6923 = vmatpush3.bf16.xpose.msra.mxu0 %v4924_v49 }
 0x46b   : > { %v7198_v63 = vpop.f32.mrb[216].mxu1 }
 0x46c   : > { %v4172_v51 = vpop.f32.mrb[217].mxu1 }
 0x46d   : > { %v7199_v4 = vpop.f32.mrb[218].mxu1 }
 0x46e   : > { %v4692_v44 = vpack.c.bf16 %v7199_v4, %v7198_v63  ;;  %v4175_v9 = vpop.f32.mrb[219].mxu1  ;;  %v4966_v4 = vsel %vm2441_vm0, %v4688_v34, 0 }
 0x46f   : > { %v4691_v24 = vpack.c.bf16 %v4175_v9, %v4172_v51 }
 0x470   : > { %7305 = vmatmul.mubr.msk.bf16.gmra.mrb[68].mxu1 %vm2441_vm0, %v7659_v56 }
 0x471   : > { %6925 = vmatmul.mubr.msk.bf16.vlgmr.msra.gmra.mrb[112].mxu0 %vm2441_vm0, %v8060_v27  ;;  %7340 = vmatprep.subr.msk.bf16.mxu0 %vm2441_vm0, %v4691_v24 }
 0x472   : > { %6926 = vmatprep.mubr.msk.bf16.mxu0 %vm2441_vm0, %v8067_v43  ;;  %6933 = vmatpush3.bf16.xpose.msra.mxu0 %v4951_v12 }
 0x473   : > { %7341 = vmatprep.subr.msk.bf16.mxu0 %vm2441_vm0, %v4692_v44  ;;  %v7202_v6 = vpop.f32.mrb[220].mxu1 }
 0x474   : > { %v4188_v37 = vpop.f32.mrb[221].mxu1 }
 0x475   : > { %v7203_v11 = vpop.f32.mrb[222].mxu1 }
 0x476   : > { %v4694_v3 = vpack.c.bf16 %v7203_v11, %v7202_v6  ;;  %v4191_v46 = vpop.f32.mrb[223].mxu1 }
 0x477   : > { %v4693_v13 = vpack.c.bf16 %v4191_v46, %v4188_v37 }
 0x479   : > { %6927 = vmatmul.mubr.msk.bf16.gmra.mrb[116].mxu0 %vm2441_vm0, %v8067_v43 }
 0x47a   : > { %6928 = vmatprep.mubr.msk.bf16.mxu0 %vm2441_vm0, %v8072_v61  ;;  %6935 = vmatpush3.bf16.xpose.msra.mxu0 %v4954_v5 }
 0x47b   : > { %7342 = vmatprep.subr.msk.bf16.mxu0 %vm2441_vm0, %v4693_v13  ;;  %v7206_v0 = vpop.f32.mrb[224].mxu1 }
 0x47c   : > { %v4204_v50 = vpop.f32.mrb[225].mxu1 }
 0x47d   : > { %v7207_v14 = vpop.f32.mrb[226].mxu1 }
 0x47e   : > { %v4696_v17 = vpack.c.bf16 %v7207_v14, %v7206_v0  ;;  %v4207_v2 = vpop.f32.mrb[227].mxu1 }
 0x47f   : > { %v4695_v53 = vpack.c.bf16 %v4207_v2, %v4204_v50 }
 0x481   : > { %6929 = vmatmul.mubr.msk.bf16.gmra.mrb[120].mxu0 %vm2441_vm0, %v8072_v61 }
 0x482   : > { %6930 = vmatprep.mubr.msk.bf16.mxu0 %vm2441_vm0, %v8078_v55  ;;  %6937 = vmatpush3.bf16.xpose.msra.mxu0 %v4957_v10 }
 0x483   : > { %7343 = vmatprep.subr.msk.bf16.mxu0 %vm2441_vm0, %v4694_v3  ;;  %v9030_v8 = vpop.f32.mrb[228].mxu1  ;;  %v4969_v3 = vsel %vm2441_vm0, %v4689_v1, 0 }
 0x484   : > { %v5176_v16 = vpop.f32.mrb[64].mxu0  ;;  %v4220_v19 = vpop.f32.mrb[229].mxu1 }
 0x485   : > { %5710 = vst [vmem:[%s9027_s29] sm:$0xff] %v5176_v16  ;;  %v5178_v29 = vpop.f32.mrb[65].mxu0  ;;  %v9033_v20 = vpop.f32.mrb[230].mxu1 }
 0x486   : > { %5711 = vst [vmem:[%s9027_s29 + $0x8] sm:$0xff] %v5178_v29  ;;  %v5180_v28 = vpop.f32.mrb[66].mxu0  ;;  %v4698_v48 = vpack.c.bf16 %v9033_v20, %v9030_v8  ;;  %v4223_v30 = vpop.f32.mrb[231].mxu1 }
 0x487   : > { %5726 = vst [vmem:[%s9027_s29 + $0x80] sm:$0xff] %v5180_v28  ;;  %v5182_v33 = vpop.f32.mrb[67].mxu0  ;;  %v4697_v15 = vpack.c.bf16 %v4223_v30, %v4220_v19 }
 0x488   : > { %5727 = vst [vmem:[%s9027_s29 + $0x88] sm:$0xff] %v5182_v33 }
 0x489   : > { %6931 = vmatmul.mubr.msk.bf16.gmra.mrb[124].mxu0 %vm2441_vm0, %v8078_v55 }
 0x48a   : > { %6939 = vmatpush3.bf16.xpose.msra.mxu0 %v4960_v58  ;;  %6948 = vmatprep.mubr.msk.bf16.mxu0 %vm2441_vm0, %v8060_v27 }
 0x48b   : > { %7344 = vmatprep.subr.msk.bf16.mxu0 %vm2441_vm0, %v4695_v53  ;;  %v9049_v54 = vpop.f32.mrb[232].mxu1 }
 0x48c   : > { %v5186_v25 = vpop.f32.mrb[68].mxu0  ;;  %v4236_v32 = vpop.f32.mrb[233].mxu1 }
 0x48d   : > { %5742 = vst [vmem:[%s9027_s29 + $0x100] sm:$0xff] %v5186_v25  ;;  %v5188_v35 = vpop.f32.mrb[69].mxu0  ;;  %v9052_v21 = vpop.f32.mrb[234].mxu1 }
 0x48e   : > { %5743 = vst [vmem:[%s9027_s29 + $0x108] sm:$0xff] %v5188_v35  ;;  %v5190_v36 = vpop.f32.mrb[70].mxu0  ;;  %v4700_v57 = vpack.c.bf16 %v9052_v21, %v9049_v54  ;;  %v4239_v22 = vpop.f32.mrb[235].mxu1 }
 0x48f   : > { %5758 = vst [vmem:[%s9027_s29 + $0x180] sm:$0xff] %v5190_v36  ;;  %v5192_v23 = vpop.f32.mrb[71].mxu0  ;;  %v4699_v47 = vpack.c.bf16 %v4239_v22, %v4236_v32 }
 0x490   : > { %5759 = vst [vmem:[%s9027_s29 + $0x188] sm:$0xff] %v5192_v23  ;;  %v5002_v20 = vsel %vm2441_vm0, %v4700_v57, 0 }
 0x491   : > { %v4999_v8 = vsel %vm2441_vm0, %v4699_v47, 0 }
 0x492   : > { %6941 = vmatpush3.bf16.xpose.msra.mxu0 %v4963_v31 }
 0x493   : > { %7345 = vmatprep.subr.msk.bf16.mxu0 %vm2441_vm0, %v4696_v17  ;;  %v9064_v41 = vpop.f32.mrb[236].mxu1 }
 0x494   : > { %v5196_v45 = vpop.f32.mrb[72].mxu0  ;;  %v9066_v60 = vpop.f32.mrb[237].mxu1 }
 0x495   : > { %5774 = vst [vmem:[%s9027_s29 + $0x200] sm:$0xff] %v5196_v45  ;;  %v5198_v49 = vpop.f32.mrb[73].mxu0  ;;  %v9069_v63 = vpop.f32.mrb[238].mxu1 }
 0x496   : > { %5775 = vst [vmem:[%s9027_s29 + $0x208] sm:$0xff] %v5198_v49  ;;  %v5200_v51 = vpop.f32.mrb[74].mxu0  ;;  %v4702_v39 = vpack.c.bf16 %v9069_v63, %v9064_v41  ;;  %v4255_v18 = vpop.f32.mrb[239].mxu1 }
 0x497   : > { %5790 = vst [vmem:[%s9027_s29 + $0x280] sm:$0xff] %v5200_v51  ;;  %v5202_v59 = vpop.f32.mrb[75].mxu0  ;;  %v4701_v56 = vpack.c.bf16 %v4255_v18, %v9066_v60 }
 0x498   : > { %5791 = vst [vmem:[%s9027_s29 + $0x288] sm:$0xff] %v5202_v59  ;;  %v5008_v45 = vsel %vm2441_vm0, %v4702_v39, 0 }
 0x499   : > { %v5005_v54 = vsel %vm2441_vm0, %v4701_v56, 0 }
 0x49a   : > { %6943 = vmatpush3.bf16.xpose.msra.mxu0 %v4966_v4 }
 0x49b   : > { %7346 = vmatprep.subr.msk.bf16.mxu0 %vm2441_vm0, %v4697_v15  ;;  %v9082_v44 = vpop.f32.mrb[240].mxu1 }
 0x49c   : > { %v5206_v9 = vpop.f32.mrb[76].mxu0  ;;  %v9084_v24 = vpop.f32.mrb[241].mxu1 }
 0x49d   : > { %5806 = vst [vmem:[%s9027_s29 + $0x300] sm:$0x1] %v5206_v9  ;;  %v5208_v12 = vpop.f32.mrb[77].mxu0  ;;  %v9087_v6 = vpop.f32.mrb[242].mxu1 }
 0x49e   : > { %5807 = vst [vmem:[%s9027_s29 + $0x308] sm:$0x1] %v5208_v12  ;;  %v5210_v37 = vpop.f32.mrb[78].mxu0  ;;  %v4704_v11 = vpack.c.bf16 %v9087_v6, %v9082_v44  ;;  %v9092_v42 = vpop.f32.mrb[243].mxu1 }
 0x49f   : > { %v5211_v40 = vpop.f32.mrb[79].mxu0  ;;  %v4703_v34 = vpack.c.bf16 %v9092_v42, %v9084_v24 }
 0x4a1   : > { %v5011_v9 = vsel %vm2441_vm0, %v4703_v34, 0 }
 0x4a2   : > { %6945 = vmatpush3.bf16.xpose.msra.mxu0 %v4969_v3 }
 0x4a3   : > { %7347 = vmatprep.subr.msk.bf16.mxu0 %vm2441_vm0, %v4698_v48  ;;  %v9101_v46 = vpop.f32.mrb[244].mxu1 }
 0x4a4   : > { %v9103_v13 = vpop.f32.mrb[245].mxu1 }
 0x4a5   : > { %v9105_v5 = vpop.f32.mrb[246].mxu1 }
 0x4a6   : > { %v4706_v0 = vpack.c.bf16 %v9105_v5, %v9101_v46  ;;  %v9109_v50 = vpop.f32.mrb[247].mxu1 }
 0x4a7   : > { %v4705_v14 = vpack.c.bf16 %v9109_v50, %v9103_v13 }
 0x4a8   : > { %v5020_v13 = vsel %vm2441_vm0, %v4706_v0, 0 }
 0x4aa   : > { %6947 = vmatpush3.bf16.xpose.msra.mxu0 %v4972_v62 }
 0x4ab   : > { %v7230_v38 = vpop.f32.mrb[248].mxu1 }
 0x4ac   : > { %v4300_v1 = vpop.f32.mrb[249].mxu1 }
 0x4ad   : > { %v7231_v17 = vpop.f32.mrb[250].mxu1 }
 0x4ae   : > { %v4708_v2 = vpack.c.bf16 %v7231_v17, %v7230_v38  ;;  %v4303_v53 = vpop.f32.mrb[251].mxu1  ;;  %v5014_v17 = vsel %vm2441_vm0, %v4704_v11, 0 }
 0x4af   : > { %v4707_v10 = vpack.c.bf16 %v4303_v53, %v4300_v1 }
 0x4b1   : > { %6949 = vmatmul.mubr.msk.bf16.vlgmr.msra.gmra.mrb[128].mxu0 %vm2441_vm0, %v8060_v27  ;;  %7348 = vmatprep.subr.msk.bf16.mxu0 %vm2441_vm0, %v4707_v10 }
 0x4b2   : > { %6950 = vmatprep.mubr.msk.bf16.mxu0 %vm2441_vm0, %v8067_v43  ;;  %6957 = vmatpush3.bf16.xpose.msra.mxu0 %v4999_v8 }
 0x4b3   : > { %7349 = vmatprep.subr.msk.bf16.mxu0 %vm2441_vm0, %v4708_v2  ;;  %v7234_v7 = vpop.f32.mrb[252].mxu1 }
 0x4b4   : > { %v4316_v52 = vpop.f32.mrb[253].mxu1 }
 0x4b5   : > { %v7235_v26 = vpop.f32.mrb[254].mxu1 }
 0x4b6   : > { %v4710_v16 = vpack.c.bf16 %v7235_v26, %v7234_v7  ;;  %v4319_v19 = vpop.f32.mrb[255].mxu1 }
 0x4b7   : > { %v4709_v29 = vpack.c.bf16 %v4319_v19, %v4316_v52 }
 0x4b9   : > { %6951 = vmatmul.mubr.msk.bf16.gmra.mrb[132].mxu0 %vm2441_vm0, %v8067_v43 }
 0x4ba   : > { %6952 = vmatprep.mubr.msk.bf16.mxu0 %vm2441_vm0, %v8072_v61  ;;  %6959 = vmatpush3.bf16.xpose.msra.mxu0 %v5002_v20 }
 0x4bb   : > { %7350 = vmatprep.subr.msk.bf16.mxu0 %vm2441_vm0, %v4709_v29  ;;  %v7238_v28 = vpop.f32.mrb[0].mxu1 }
 0x4bc   : > { %v4332_v48 = vpop.f32.mrb[1].mxu1 }
 0x4bd   : > { %v7239_v30 = vpop.f32.mrb[2].mxu1 }
 0x4be   : > { %v4712_v33 = vpack.c.bf16 %v7239_v30, %v7238_v28  ;;  %v4335_v15 = vpop.f32.mrb[3].mxu1 }
 0x4bf   : > { %v4711_v58 = vpack.c.bf16 %v4335_v15, %v4332_v48 }
 0x4c1   : > { %6953 = vmatmul.mubr.msk.bf16.gmra.mrb[136].mxu0 %vm2441_vm0, %v8072_v61 }
 0x4c2   : > { %6954 = vmatprep.mubr.msk.bf16.mxu0 %vm2441_vm0, %v8078_v55  ;;  %6961 = vmatpush3.bf16.xpose.msra.mxu0 %v5005_v54 }
 0x4c3   : > { %7351 = vmatprep.subr.msk.bf16.mxu0 %vm2441_vm0, %v4710_v16  ;;  %v9139_v25 = vpop.f32.mrb[4].mxu1  ;;  %v5017_v16 = vsel %vm2441_vm0, %v4705_v14, 0 }
 0x4c4   : > { %v5247_v32 = vpop.f32.mrb[80].mxu0  ;;  %v4348_v35 = vpop.f32.mrb[5].mxu1 }
 0x4c5   : > { %5712 = vst [vmem:[%s9027_s29 + $0x10] sm:$0xff] %v5247_v32  ;;  %v5249_v21 = vpop.f32.mrb[81].mxu0  ;;  %v9142_v36 = vpop.f32.mrb[6].mxu1 }
 0x4c6   : > { %5713 = vst [vmem:[%s9027_s29 + $0x18] sm:$0xff] %v5249_v21  ;;  %v5251_v57 = vpop.f32.mrb[82].mxu0  ;;  %v4714_v22 = vpack.c.bf16 %v9142_v36, %v9139_v25  ;;  %v4351_v23 = vpop.f32.mrb[7].mxu1 }
 0x4c7   : > { %5728 = vst [vmem:[%s9027_s29 + $0x90] sm:$0xff] %v5251_v57  ;;  %v5253_v47 = vpop.f32.mrb[83].mxu0  ;;  %v4713_v31 = vpack.c.bf16 %v4351_v23, %v4348_v35 }
 0x4c8   : > { %5729 = vst [vmem:[%s9027_s29 + $0x98] sm:$0xff] %v5253_v47 }
 0x4c9   : > { %6955 = vmatmul.mubr.msk.bf16.gmra.mrb[140].mxu0 %vm2441_vm0, %v8078_v55 }
 0x4ca   : > { %6963 = vmatpush3.bf16.xpose.msra.mxu0 %v5008_v45  ;;  %6972 = vmatprep.mubr.msk.bf16.mxu0 %vm2441_vm0, %v8060_v27 }
 0x4cb   : > { %7352 = vmatprep.subr.msk.bf16.mxu0 %vm2441_vm0, %v4711_v58  ;;  %v9158_v60 = vpop.f32.mrb[8].mxu1 }
 0x4cc   : > { %v5257_v49 = vpop.f32.mrb[84].mxu0  ;;  %v4364_v51 = vpop.f32.mrb[9].mxu1 }
 0x4cd   : > { %5744 = vst [vmem:[%s9027_s29 + $0x110] sm:$0xff] %v5257_v49  ;;  %v5259_v18 = vpop.f32.mrb[85].mxu0  ;;  %v9161_v41 = vpop.f32.mrb[10].mxu1 }
 0x4ce   : > { %5745 = vst [vmem:[%s9027_s29 + $0x118] sm:$0xff] %v5259_v18  ;;  %v5261_v63 = vpop.f32.mrb[86].mxu0  ;;  %v4716_v39 = vpack.c.bf16 %v9161_v41, %v9158_v60  ;;  %v4367_v59 = vpop.f32.mrb[11].mxu1 }
 0x4cf   : > { %5760 = vst [vmem:[%s9027_s29 + $0x190] sm:$0xff] %v5261_v63  ;;  %v5263_v56 = vpop.f32.mrb[87].mxu0  ;;  %v4715_v4 = vpack.c.bf16 %v4367_v59, %v4364_v51 }
 0x4d0   : > { %5761 = vst [vmem:[%s9027_s29 + $0x198] sm:$0xff] %v5263_v56  ;;  %v5050_v36 = vsel %vm2441_vm0, %v4716_v39, 0 }
 0x4d1   : > { %v5047_v25 = vsel %vm2441_vm0, %v4715_v4, 0 }
 0x4d2   : > { %6965 = vmatpush3.bf16.xpose.msra.mxu0 %v5011_v9 }
 0x4d3   : > { %7353 = vmatprep.subr.msk.bf16.mxu0 %vm2441_vm0, %v4712_v33  ;;  %v9173_v12 = vpop.f32.mrb[12].mxu1 }
 0x4d4   : > { %v5267_v37 = vpop.f32.mrb[88].mxu0  ;;  %v9175_v40 = vpop.f32.mrb[13].mxu1 }
 0x4d5   : > { %5776 = vst [vmem:[%s9027_s29 + $0x210] sm:$0xff] %v5267_v37  ;;  %v5269_v3 = vpop.f32.mrb[89].mxu0  ;;  %v9178_v62 = vpop.f32.mrb[14].mxu1 }
 0x4d6   : > { %5777 = vst [vmem:[%s9027_s29 + $0x218] sm:$0xff] %v5269_v3  ;;  %v5271_v38 = vpop.f32.mrb[90].mxu0  ;;  %v4718_v24 = vpack.c.bf16 %v9178_v62, %v9173_v12  ;;  %v4383_v42 = vpop.f32.mrb[15].mxu1 }
 0x4d7   : > { %5792 = vst [vmem:[%s9027_s29 + $0x290] sm:$0xff] %v5271_v38  ;;  %v5273_v34 = vpop.f32.mrb[91].mxu0  ;;  %v4717_v1 = vpack.c.bf16 %v4383_v42, %v9175_v40 }
 0x4d8   : > { %5793 = vst [vmem:[%s9027_s29 + $0x298] sm:$0xff] %v5273_v34  ;;  %v5056_v37 = vsel %vm2441_vm0, %v4718_v24, 0 }
 0x4d9   : > { %v5053_v60 = vsel %vm2441_vm0, %v4717_v1, 0 }
 0x4da   : > { %6967 = vmatpush3.bf16.xpose.msra.mxu0 %v5014_v17 }
 0x4db   : > { %7354 = vmatprep.subr.msk.bf16.mxu0 %vm2441_vm0, %v4713_v31  ;;  %v9191_v2 = vpop.f32.mrb[16].mxu1 }
 0x4dc   : > { %v5277_v53 = vpop.f32.mrb[92].mxu0  ;;  %v9193_v10 = vpop.f32.mrb[17].mxu1 }
 0x4dd   : > { %5808 = vst [vmem:[%s9027_s29 + $0x310] sm:$0x1] %v5277_v53  ;;  %v5279_v8 = vpop.f32.mrb[93].mxu0  ;;  %v9196_v7 = vpop.f32.mrb[18].mxu1 }
 0x4de   : > { %5809 = vst [vmem:[%s9027_s29 + $0x318] sm:$0x1] %v5279_v8  ;;  %v5281_v52 = vpop.f32.mrb[94].mxu0  ;;  %v4720_v26 = vpack.c.bf16 %v9196_v7, %v9191_v2  ;;  %v9201_v44 = vpop.f32.mrb[19].mxu1 }
 0x4df   : > { %v5282_v6 = vpop.f32.mrb[95].mxu0  ;;  %v4719_v11 = vpack.c.bf16 %v9201_v44, %v9193_v10 }
 0x4e1   : > { %v5059_v53 = vsel %vm2441_vm0, %v4719_v11, 0 }
 0x4e2   : > { %6969 = vmatpush3.bf16.xpose.msra.mxu0 %v5017_v16 }
 0x4e3   : > { %7355 = vmatprep.subr.msk.bf16.mxu0 %vm2441_vm0, %v4714_v22  ;;  %v9210_v19 = vpop.f32.mrb[20].mxu1 }
 0x4e4   : > { %v9212_v29 = vpop.f32.mrb[21].mxu1 }
 0x4e5   : > { %v9214_v20 = vpop.f32.mrb[22].mxu1 }
 0x4e6   : > { %v4722_v28 = vpack.c.bf16 %v9214_v20, %v9210_v19  ;;  %v9218_v48 = vpop.f32.mrb[23].mxu1 }
 0x4e7   : > { %v4721_v30 = vpack.c.bf16 %v9218_v48, %v9212_v29 }
 0x4e8   : > { %v5068_v29 = vsel %vm2441_vm0, %v4722_v28, 0 }
 0x4ea   : > { %6971 = vmatpush3.bf16.xpose.msra.mxu0 %v5020_v13 }
 0x4eb   : > { %v7262_v50 = vpop.f32.mrb[24].mxu1 }
 0x4ec   : > { %v4428_v14 = vpop.f32.mrb[25].mxu1 }
 0x4ed   : > { %v7263_v33 = vpop.f32.mrb[26].mxu1 }
 0x4ee   : > { %v4724_v15 = vpack.c.bf16 %v7263_v33, %v7262_v50  ;;  %v4431_v58 = vpop.f32.mrb[27].mxu1  ;;  %v5062_v33 = vsel %vm2441_vm0, %v4720_v26, 0 }
 0x4ef   : > { %v4723_v54 = vpack.c.bf16 %v4431_v58, %v4428_v14 }
 0x4f1   : > { %6973 = vmatmul.mubr.msk.bf16.vlgmr.msra.gmra.mrb[144].mxu0 %vm2441_vm0, %v8060_v27  ;;  %7356 = vmatprep.subr.msk.bf16.mxu0 %vm2441_vm0, %v4723_v54 }
 0x4f2   : > { %6974 = vmatprep.mubr.msk.bf16.mxu0 %vm2441_vm0, %v8067_v43  ;;  %6981 = vmatpush3.bf16.xpose.msra.mxu0 %v5047_v25 }
 0x4f3   : > { %7357 = vmatprep.subr.msk.bf16.mxu0 %vm2441_vm0, %v4724_v15  ;;  %v7266_v46 = vpop.f32.mrb[28].mxu1 }
 0x4f4   : > { %v4444_v5 = vpop.f32.mrb[29].mxu1 }
 0x4f5   : > { %v7267_v0 = vpop.f32.mrb[30].mxu1 }
 0x4f6   : > { %v4726_v32 = vpack.c.bf16 %v7267_v0, %v7266_v46  ;;  %v4447_v35 = vpop.f32.mrb[31].mxu1 }
 0x4f7   : > { %v4725_v21 = vpack.c.bf16 %v4447_v35, %v4444_v5 }
 0x4f9   : > { %6975 = vmatmul.mubr.msk.bf16.gmra.mrb[148].mxu0 %vm2441_vm0, %v8067_v43 }
 0x4fa   : > { %6976 = vmatprep.mubr.msk.bf16.mxu0 %vm2441_vm0, %v8072_v61  ;;  %6983 = vmatpush3.bf16.xpose.msra.mxu0 %v5050_v36 }
 0x4fb   : > { %7358 = vmatprep.subr.msk.bf16.mxu0 %vm2441_vm0, %v4725_v21  ;;  %v7270_v57 = vpop.f32.mrb[32].mxu1 }
 0x4fc   : > { %v4460_v22 = vpop.f32.mrb[33].mxu1 }
 0x4fd   : > { %v7271_v23 = vpop.f32.mrb[34].mxu1 }
 0x4fe   : > { %v4728_v47 = vpack.c.bf16 %v7271_v23, %v7270_v57  ;;  %v4463_v31 = vpop.f32.mrb[35].mxu1 }
 0x4ff   : > { %v4727_v45 = vpack.c.bf16 %v4463_v31, %v4460_v22 }
 0x501   : > { %6977 = vmatmul.mubr.msk.bf16.gmra.mrb[152].mxu0 %vm2441_vm0, %v8072_v61 }
 0x502   : > { %6978 = vmatprep.mubr.msk.bf16.mxu0 %vm2441_vm0, %v8078_v55  ;;  %6985 = vmatpush3.bf16.xpose.msra.mxu0 %v5053_v60 }
 0x503   : > { %7359 = vmatprep.subr.msk.bf16.mxu0 %vm2441_vm0, %v4726_v32  ;;  %v9248_v49 = vpop.f32.mrb[36].mxu1  ;;  %v5065_v32 = vsel %vm2441_vm0, %v4721_v30, 0 }
 0x504   : > { %v5318_v51 = vpop.f32.mrb[96].mxu0  ;;  %v4476_v18 = vpop.f32.mrb[37].mxu1 }
 0x505   : > { %5714 = vst [vmem:[%s9027_s29 + $0x20] sm:$0xff] %v5318_v51  ;;  %v5320_v41 = vpop.f32.mrb[97].mxu0  ;;  %v9251_v63 = vpop.f32.mrb[38].mxu1 }
 0x506   : > { %5715 = vst [vmem:[%s9027_s29 + $0x28] sm:$0xff] %v5320_v41  ;;  %v5322_v39 = vpop.f32.mrb[98].mxu0  ;;  %v4730_v59 = vpack.c.bf16 %v9251_v63, %v9248_v49  ;;  %v4479_v56 = vpop.f32.mrb[39].mxu1 }
 0x507   : > { %5730 = vst [vmem:[%s9027_s29 + $0xa0] sm:$0xff] %v5322_v39  ;;  %v5324_v4 = vpop.f32.mrb[99].mxu0  ;;  %v4729_v9 = vpack.c.bf16 %v4479_v56, %v4476_v18 }
 0x508   : > { %5731 = vst [vmem:[%s9027_s29 + $0xa8] sm:$0xff] %v5324_v4 }
 0x509   : > { %6979 = vmatmul.mubr.msk.bf16.gmra.mrb[156].mxu0 %vm2441_vm0, %v8078_v55 }
 0x50a   : > { %6987 = vmatpush3.bf16.xpose.msra.mxu0 %v5056_v37  ;;  %6996 = vmatprep.mubr.msk.bf16.mxu0 %vm2441_vm0, %v8060_v27 }
 0x50b   : > { %7360 = vmatprep.subr.msk.bf16.mxu0 %vm2441_vm0, %v4727_v45  ;;  %v9267_v40 = vpop.f32.mrb[40].mxu1 }
 0x50c   : > { %v5328_v3 = vpop.f32.mrb[100].mxu0  ;;  %v4492_v38 = vpop.f32.mrb[41].mxu1 }
 0x50d   : > { %5746 = vst [vmem:[%s9027_s29 + $0x120] sm:$0xff] %v5328_v3  ;;  %v5330_v42 = vpop.f32.mrb[101].mxu0  ;;  %v9270_v12 = vpop.f32.mrb[42].mxu1 }
 0x50e   : > { %5747 = vst [vmem:[%s9027_s29 + $0x128] sm:$0xff] %v5330_v42  ;;  %v5332_v62 = vpop.f32.mrb[102].mxu0  ;;  %v4732_v24 = vpack.c.bf16 %v9270_v12, %v9267_v40  ;;  %v4495_v34 = vpop.f32.mrb[43].mxu1 }
 0x50f   : > { %5762 = vst [vmem:[%s9027_s29 + $0x1a0] sm:$0xff] %v5332_v62  ;;  %v5334_v1 = vpop.f32.mrb[103].mxu0  ;;  %v4731_v17 = vpack.c.bf16 %v4495_v34, %v4492_v38 }
 0x510   : > { %5763 = vst [vmem:[%s9027_s29 + $0x1a8] sm:$0xff] %v5334_v1  ;;  %v5098_v63 = vsel %vm2441_vm0, %v4732_v24, 0 }
 0x511   : > { %v5095_v49 = vsel %vm2441_vm0, %v4731_v17, 0 }
 0x512   : > { %6989 = vmatpush3.bf16.xpose.msra.mxu0 %v5059_v53 }
 0x513   : > { %7361 = vmatprep.subr.msk.bf16.mxu0 %vm2441_vm0, %v4728_v47  ;;  %v9282_v8 = vpop.f32.mrb[44].mxu1 }
 0x514   : > { %v5338_v52 = vpop.f32.mrb[104].mxu0  ;;  %v9284_v6 = vpop.f32.mrb[45].mxu1 }
 0x515   : > { %5778 = vst [vmem:[%s9027_s29 + $0x220] sm:$0xff] %v5338_v52  ;;  %v5340_v16 = vpop.f32.mrb[105].mxu0  ;;  %v9287_v13 = vpop.f32.mrb[46].mxu1 }
 0x516   : > { %5779 = vst [vmem:[%s9027_s29 + $0x228] sm:$0xff] %v5340_v16  ;;  %v5342_v50 = vpop.f32.mrb[106].mxu0  ;;  %v4734_v10 = vpack.c.bf16 %v9287_v13, %v9282_v8  ;;  %v4511_v44 = vpop.f32.mrb[47].mxu1 }
 0x517   : > { %5794 = vst [vmem:[%s9027_s29 + $0x2a0] sm:$0xff] %v5342_v50  ;;  %v5344_v11 = vpop.f32.mrb[107].mxu0  ;;  %v4733_v14 = vpack.c.bf16 %v4511_v44, %v9284_v6 }
 0x518   : > { %5795 = vst [vmem:[%s9027_s29 + $0x2a8] sm:$0xff] %v5344_v11  ;;  %v5104_v52 = vsel %vm2441_vm0, %v4734_v10, 0 }
 0x519   : > { %v5101_v40 = vsel %vm2441_vm0, %v4733_v14, 0 }
 0x51a   : > { %6991 = vmatpush3.bf16.xpose.msra.mxu0 %v5062_v33 }
 0x51b   : > { %7362 = vmatprep.subr.msk.bf16.mxu0 %vm2441_vm0, %v4729_v9  ;;  %v9300_v15 = vpop.f32.mrb[48].mxu1 }
 0x51c   : > { %v5348_v58 = vpop.f32.mrb[108].mxu0  ;;  %v9302_v54 = vpop.f32.mrb[49].mxu1 }
 0x51d   : > { %5810 = vst [vmem:[%s9027_s29 + $0x320] sm:$0x1] %v5348_v58  ;;  %v5350_v25 = vpop.f32.mrb[109].mxu0  ;;  %v9305_v46 = vpop.f32.mrb[50].mxu1 }
 0x51e   : > { %5811 = vst [vmem:[%s9027_s29 + $0x328] sm:$0x1] %v5350_v25  ;;  %v5352_v5 = vpop.f32.mrb[110].mxu0  ;;  %v4736_v0 = vpack.c.bf16 %v9305_v46, %v9300_v15  ;;  %v9310_v2 = vpop.f32.mrb[51].mxu1 }
 0x51f   : > { %v5353_v7 = vpop.f32.mrb[111].mxu0  ;;  %v4735_v26 = vpack.c.bf16 %v9310_v2, %v9302_v54 }
 0x520   : > { %v5110_v33 = vsel %vm2441_vm0, %v4736_v0, 0 }
 0x521   : > { %v5107_v50 = vsel %vm2441_vm0, %v4735_v26, 0 }
 0x522   : > { %6993 = vmatpush3.bf16.xpose.msra.mxu0 %v5065_v32 }
 0x523   : > { %7363 = vmatprep.subr.msk.bf16.mxu0 %vm2441_vm0, %v4730_v59  ;;  %v9319_v35 = vpop.f32.mrb[52].mxu1 }
 0x524   : > { %v9321_v21 = vpop.f32.mrb[53].mxu1 }
 0x525   : > { %v9323_v36 = vpop.f32.mrb[54].mxu1 }
 0x526   : > { %v4738_v57 = vpack.c.bf16 %v9323_v36, %v9319_v35  ;;  %v9327_v22 = vpop.f32.mrb[55].mxu1 }
 0x527   : > { %v4737_v23 = vpack.c.bf16 %v9327_v22, %v9321_v21 }
 0x528   : > { %v5116_v15 = vsel %vm2441_vm0, %v4738_v57, 0 }
 0x529   : > { %v5113_v2 = vsel %vm2441_vm0, %v4737_v23, 0 }
 0x52a   : > { %6995 = vmatpush3.bf16.xpose.msra.mxu0 %v5068_v29 }
 0x52b   : > { %v7294_v48 = vpop.f32.mrb[56].mxu1 }
 0x52c   : > { %v4556_v30 = vpop.f32.mrb[57].mxu1 }
 0x52d   : > { %v7295_v47 = vpop.f32.mrb[58].mxu1 }
 0x52e   : > { %v4740_v31 = vpack.c.bf16 %v7295_v47, %v7294_v48  ;;  %v4559_v45 = vpop.f32.mrb[59].mxu1 }
 0x52f   : > { %v4739_v60 = vpack.c.bf16 %v4559_v45, %v4556_v30 }
 0x531   : > { %6997 = vmatmul.mubr.msk.bf16.vlgmr.msra.gmra.mrb[160].mxu0 %vm2441_vm0, %v8060_v27  ;;  %7364 = vmatprep.subr.msk.bf16.mxu0 %vm2441_vm0, %v4739_v60 }
 0x532   : > { %6998 = vmatprep.mubr.msk.bf16.mxu0 %vm2441_vm0, %v8067_v43  ;;  %7005 = vmatpush3.bf16.xpose.msra.mxu0 %v5095_v49 }
 0x533   : > { %7365 = vmatprep.subr.msk.bf16.mxu0 %vm2441_vm0, %v4740_v31  ;;  %v7298_v19 = vpop.f32.mrb[60].mxu1 }
 0x534   : > { %v4572_v20 = vpop.f32.mrb[61].mxu1 }
 0x535   : > { %v7299_v28 = vpop.f32.mrb[62].mxu1 }
 0x536   : > { %v4742_v51 = vpack.c.bf16 %v7299_v28, %v7298_v19  ;;  %v4575_v18 = vpop.f32.mrb[63].mxu1 }
 0x537   : > { %v4741_v41 = vpack.c.bf16 %v4575_v18, %v4572_v20 }
 0x539   : > { %6999 = vmatmul.mubr.msk.bf16.gmra.mrb[164].mxu0 %vm2441_vm0, %v8067_v43 }
 0x53a   : > { %7000 = vmatprep.mubr.msk.bf16.mxu0 %vm2441_vm0, %v8072_v61  ;;  %7007 = vmatpush3.bf16.xpose.msra.mxu0 %v5098_v63 }
 0x53b   : > { %7366 = vmatprep.subr.msk.bf16.mxu0 %vm2441_vm0, %v4741_v41  ;;  %v7302_v39 = vpop.f32.mrb[64].mxu1 }
 0x53c   : > { %v4588_v59 = vpop.f32.mrb[65].mxu1 }
 0x53d   : > { %v7303_v56 = vpop.f32.mrb[66].mxu1 }
 0x53e   : > { %v4744_v4 = vpack.c.bf16 %v7303_v56, %v7302_v39  ;;  %v4591_v9 = vpop.f32.mrb[67].mxu1 }
 0x53f   : > { %v4743_v37 = vpack.c.bf16 %v4591_v9, %v4588_v59 }
 0x541   : > { %7001 = vmatmul.mubr.msk.bf16.gmra.mrb[168].mxu0 %vm2441_vm0, %v8072_v61 }
 0x542   : > { %7002 = vmatprep.mubr.msk.bf16.mxu0 %vm2441_vm0, %v8078_v55  ;;  %7009 = vmatpush3.bf16.xpose.msra.mxu0 %v5101_v40 }
 0x543   : > { %7367 = vmatprep.subr.msk.bf16.mxu0 %vm2441_vm0, %v4742_v51  ;;  %v7306_v3 = vpop.f32.mrb[68].mxu1 }
 0x544   : > { %v5389_v38 = vpop.f32.mrb[112].mxu0  ;;  %v4604_v42 = vpop.f32.mrb[69].mxu1 }
 0x545   : > { %5716 = vst [vmem:[%s9027_s29 + $0x30] sm:$0xff] %v5389_v38  ;;  %v5391_v12 = vpop.f32.mrb[113].mxu0  ;;  %v7307_v62 = vpop.f32.mrb[70].mxu1 }
 0x546   : > { %5717 = vst [vmem:[%s9027_s29 + $0x38] sm:$0xff] %v5391_v12  ;;  %v5393_v24 = vpop.f32.mrb[114].mxu0  ;;  %v4746_v34 = vpack.c.bf16 %v7307_v62, %v7306_v3  ;;  %v4607_v1 = vpop.f32.mrb[71].mxu1 }
 0x547   : > { %5732 = vst [vmem:[%s9027_s29 + $0xb0] sm:$0xff] %v5393_v24  ;;  %v5395_v17 = vpop.f32.mrb[115].mxu0  ;;  %v4745_v53 = vpack.c.bf16 %v4607_v1, %v4604_v42 }
 0x548   : > { %5733 = vst [vmem:[%s9027_s29 + $0xb8] sm:$0xff] %v5395_v17 }
 0x549   : > { %7003 = vmatmul.mubr.msk.bf16.gmra.mrb[172].mxu0 %vm2441_vm0, %v8078_v55 }
 0x54a   : > { %7011 = vmatpush3.bf16.xpose.msra.mxu0 %v5104_v52  ;;  %7020 = vmatprep.mubr.msk.bf16.mxu0 %vm2441_vm0, %v8060_v27 }
 0x54b   : > { %7368 = vmatprep.subr.msk.bf16.mxu0 %vm2441_vm0, %v4743_v37 }
 0x54c   : > { %v5399_v6 = vpop.f32.mrb[116].mxu0 }
 0x54d   : > { %5748 = vst [vmem:[%s9027_s29 + $0x130] sm:$0xff] %v5399_v6  ;;  %v5401_v16 = vpop.f32.mrb[117].mxu0 }
 0x54e   : > { %5749 = vst [vmem:[%s9027_s29 + $0x138] sm:$0xff] %v5401_v16  ;;  %v5403_v8 = vpop.f32.mrb[118].mxu0 }
 0x54f   : > { %5764 = vst [vmem:[%s9027_s29 + $0x1b0] sm:$0xff] %v5403_v8  ;;  %v5405_v13 = vpop.f32.mrb[119].mxu0 }
 0x550   : > { %5765 = vst [vmem:[%s9027_s29 + $0x1b8] sm:$0xff] %v5405_v13 }
 0x552   : > { %7013 = vmatpush3.bf16.xpose.msra.mxu0 %v5107_v50 }
 0x553   : > { %7369 = vmatprep.subr.msk.bf16.mxu0 %vm2441_vm0, %v4744_v4 }
 0x554   : > { %v5409_v10 = vpop.f32.mrb[120].mxu0 }
 0x555   : > { %5780 = vst [vmem:[%s9027_s29 + $0x230] sm:$0xff] %v5409_v10  ;;  %v5411_v44 = vpop.f32.mrb[121].mxu0 }
 0x556   : > { %5781 = vst [vmem:[%s9027_s29 + $0x238] sm:$0xff] %v5411_v44  ;;  %v5413_v11 = vpop.f32.mrb[122].mxu0 }
 0x557   : > { %5796 = vst [vmem:[%s9027_s29 + $0x2b0] sm:$0xff] %v5413_v11  ;;  %v5415_v14 = vpop.f32.mrb[123].mxu0 }
 0x558   : > { %5797 = vst [vmem:[%s9027_s29 + $0x2b8] sm:$0xff] %v5415_v14 }
 0x55a   : > { %7015 = vmatpush3.bf16.xpose.msra.mxu0 %v5110_v33 }
 0x55b   : > { %7370 = vmatprep.subr.msk.bf16.mxu0 %vm2441_vm0, %v4745_v53 }
 0x55c   : > { %v5419_v58 = vpop.f32.mrb[124].mxu0 }
 0x55d   : > { %5812 = vst [vmem:[%s9027_s29 + $0x330] sm:$0x1] %v5419_v58  ;;  %v5421_v54 = vpop.f32.mrb[125].mxu0 }
 0x55e   : > { %5813 = vst [vmem:[%s9027_s29 + $0x338] sm:$0x1] %v5421_v54  ;;  %v5423_v25 = vpop.f32.mrb[126].mxu0 }
 0x55f   : > { %v5424_v5 = vpop.f32.mrb[127].mxu0 }
 0x562   : > { %7017 = vmatpush3.bf16.xpose.msra.mxu0 %v5113_v2 }
 0x563   : > { %7371 = vmatprep.subr.msk.bf16.mxu0 %vm2441_vm0, %v4746_v34 }
 0x56a   : > { %7019 = vmatpush3.bf16.xpose.msra.mxu0 %v5116_v15 }
 0x571   : > { %7021 = vmatmul.mubr.msk.bf16.vlgmr.msra.gmra.mrb[176].mxu0 %vm2441_vm0, %v8060_v27 }
 0x572   : > { %7022 = vmatprep.mubr.msk.bf16.mxu0 %vm2441_vm0, %v8067_v43 }
 0x579   : > { %7023 = vmatmul.mubr.msk.bf16.gmra.mrb[180].mxu0 %vm2441_vm0, %v8067_v43 }
 0x57a   : > { %7024 = vmatprep.mubr.msk.bf16.mxu0 %vm2441_vm0, %v8072_v61 }
 0x581   : > { %7025 = vmatmul.mubr.msk.bf16.gmra.mrb[184].mxu0 %vm2441_vm0, %v8072_v61 }
 0x582   : > { %7026 = vmatprep.mubr.msk.bf16.mxu0 %vm2441_vm0, %v8078_v55 }
 0x584   : > { %v5460_v46 = vpop.f32.mrb[128].mxu0 }
 0x585   : > { %5718 = vst [vmem:[%s9027_s29 + $0x40] sm:$0xff] %v5460_v46  ;;  %v5462_v27 = vpop.f32.mrb[129].mxu0 }
 0x586   : > { %5719 = vst [vmem:[%s9027_s29 + $0x48] sm:$0xff] %v5462_v27  ;;  %v5464_v0 = vpop.f32.mrb[130].mxu0 }
 0x587   : > { %5734 = vst [vmem:[%s9027_s29 + $0xc0] sm:$0xff] %v5464_v0  ;;  %v5466_v43 = vpop.f32.mrb[131].mxu0 }
 0x588   : > { %5735 = vst [vmem:[%s9027_s29 + $0xc8] sm:$0xff] %v5466_v43 }
 0x589   : > { %7027 = vmatmul.mubr.msk.bf16.gmra.mrb[188].mxu0 %vm2441_vm0, %v8078_v55 }
 0x58c   : > { %v5470_v61 = vpop.f32.mrb[132].mxu0 }
 0x58d   : > { %5750 = vst [vmem:[%s9027_s29 + $0x140] sm:$0xff] %v5470_v61  ;;  %v5472_v7 = vpop.f32.mrb[133].mxu0 }
 0x58e   : > { %5751 = vst [vmem:[%s9027_s29 + $0x148] sm:$0xff] %v5472_v7  ;;  %v5474_v26 = vpop.f32.mrb[134].mxu0 }
 0x58f   : > { %5766 = vst [vmem:[%s9027_s29 + $0x1c0] sm:$0xff] %v5474_v26  ;;  %v5476_v32 = vpop.f32.mrb[135].mxu0 }
 0x590   : > { %5767 = vst [vmem:[%s9027_s29 + $0x1c8] sm:$0xff] %v5476_v32 }
 0x594   : > { %v5480_v35 = vpop.f32.mrb[136].mxu0 }
 0x595   : > { %5782 = vst [vmem:[%s9027_s29 + $0x240] sm:$0xff] %v5480_v35  ;;  %v5482_v21 = vpop.f32.mrb[137].mxu0 }
 0x596   : > { %5783 = vst [vmem:[%s9027_s29 + $0x248] sm:$0xff] %v5482_v21  ;;  %v5484_v36 = vpop.f32.mrb[138].mxu0 }
 0x597   : > { %5798 = vst [vmem:[%s9027_s29 + $0x2c0] sm:$0xff] %v5484_v36  ;;  %v5486_v55 = vpop.f32.mrb[139].mxu0 }
 0x598   : > { %5799 = vst [vmem:[%s9027_s29 + $0x2c8] sm:$0xff] %v5486_v55 }
 0x59c   : > { %v5490_v57 = vpop.f32.mrb[140].mxu0 }
 0x59d   : > { %5814 = vst [vmem:[%s9027_s29 + $0x340] sm:$0x1] %v5490_v57  ;;  %v5492_v22 = vpop.f32.mrb[141].mxu0 }
 0x59e   : > { %5815 = vst [vmem:[%s9027_s29 + $0x348] sm:$0x1] %v5492_v22  ;;  %v5494_v23 = vpop.f32.mrb[142].mxu0 }
 0x59f   : > { %v5495_v29 = vpop.f32.mrb[143].mxu0 }
 0x5c4   : > { %v5531_v48 = vpop.f32.mrb[144].mxu0 }
 0x5c5   : > { %5720 = vst [vmem:[%s9027_s29 + $0x50] sm:$0xff] %v5531_v48  ;;  %v5533_v30 = vpop.f32.mrb[145].mxu0 }
 0x5c6   : > { %5721 = vst [vmem:[%s9027_s29 + $0x58] sm:$0xff] %v5533_v30  ;;  %v5535_v47 = vpop.f32.mrb[146].mxu0 }
 0x5c7   : > { %5736 = vst [vmem:[%s9027_s29 + $0xd0] sm:$0xff] %v5535_v47  ;;  %v5537_v31 = vpop.f32.mrb[147].mxu0 }
 0x5c8   : > { %5737 = vst [vmem:[%s9027_s29 + $0xd8] sm:$0xff] %v5537_v31 }
 0x5cc   : > { %v5541_v45 = vpop.f32.mrb[148].mxu0 }
 0x5cd   : > { %5752 = vst [vmem:[%s9027_s29 + $0x150] sm:$0xff] %v5541_v45  ;;  %v5543_v60 = vpop.f32.mrb[149].mxu0 }
 0x5ce   : > { %5753 = vst [vmem:[%s9027_s29 + $0x158] sm:$0xff] %v5543_v60  ;;  %v5545_v49 = vpop.f32.mrb[150].mxu0 }
 0x5cf   : > { %5768 = vst [vmem:[%s9027_s29 + $0x1d0] sm:$0xff] %v5545_v49  ;;  %v5547_v19 = vpop.f32.mrb[151].mxu0 }
 0x5d0   : > { %5769 = vst [vmem:[%s9027_s29 + $0x1d8] sm:$0xff] %v5547_v19 }
 0x5d4   : > { %v5551_v20 = vpop.f32.mrb[152].mxu0 }
 0x5d5   : > { %5784 = vst [vmem:[%s9027_s29 + $0x250] sm:$0xff] %v5551_v20  ;;  %v5553_v28 = vpop.f32.mrb[153].mxu0 }
 0x5d6   : > { %5785 = vst [vmem:[%s9027_s29 + $0x258] sm:$0xff] %v5553_v28  ;;  %v5555_v51 = vpop.f32.mrb[154].mxu0 }
 0x5d7   : > { %5800 = vst [vmem:[%s9027_s29 + $0x2d0] sm:$0xff] %v5555_v51  ;;  %v5557_v18 = vpop.f32.mrb[155].mxu0 }
 0x5d8   : > { %5801 = vst [vmem:[%s9027_s29 + $0x2d8] sm:$0xff] %v5557_v18 }
 0x5dc   : > { %v5561_v41 = vpop.f32.mrb[156].mxu0 }
 0x5dd   : > { %5816 = vst [vmem:[%s9027_s29 + $0x350] sm:$0x1] %v5561_v41  ;;  %v5563_v63 = vpop.f32.mrb[157].mxu0 }
 0x5de   : > { %5817 = vst [vmem:[%s9027_s29 + $0x358] sm:$0x1] %v5563_v63  ;;  %v5565_v39 = vpop.f32.mrb[158].mxu0 }
 0x5df   : > { %v5566_v59 = vpop.f32.mrb[159].mxu0 }
 0x604   : > { %v5602_v56 = vpop.f32.mrb[160].mxu0 }
 0x605   : > { %5722 = vst [vmem:[%s9027_s29 + $0x60] sm:$0xff] %v5602_v56  ;;  %v5604_v4 = vpop.f32.mrb[161].mxu0 }
 0x606   : > { %5723 = vst [vmem:[%s9027_s29 + $0x68] sm:$0xff] %v5604_v4  ;;  %v5606_v9 = vpop.f32.mrb[162].mxu0 }
 0x607   : > { %5738 = vst [vmem:[%s9027_s29 + $0xe0] sm:$0xff] %v5606_v9  ;;  %v5608_v37 = vpop.f32.mrb[163].mxu0 }
 0x608   : > { %5739 = vst [vmem:[%s9027_s29 + $0xe8] sm:$0xff] %v5608_v37 }
 0x60c   : > { %v5612_v40 = vpop.f32.mrb[164].mxu0 }
 0x60d   : > { %5754 = vst [vmem:[%s9027_s29 + $0x160] sm:$0xff] %v5612_v40  ;;  %v5614_v3 = vpop.f32.mrb[165].mxu0 }
 0x60e   : > { %5755 = vst [vmem:[%s9027_s29 + $0x168] sm:$0xff] %v5614_v3  ;;  %v5616_v38 = vpop.f32.mrb[166].mxu0 }
 0x60f   : > { %5770 = vst [vmem:[%s9027_s29 + $0x1e0] sm:$0xff] %v5616_v38  ;;  %v5618_v42 = vpop.f32.mrb[167].mxu0 }
 0x610   : > { %5771 = vst [vmem:[%s9027_s29 + $0x1e8] sm:$0xff] %v5618_v42 }
 0x614   : > { %v5622_v12 = vpop.f32.mrb[168].mxu0 }
 0x615   : > { %5786 = vst [vmem:[%s9027_s29 + $0x260] sm:$0xff] %v5622_v12  ;;  %v5624_v62 = vpop.f32.mrb[169].mxu0 }
 0x616   : > { %5787 = vst [vmem:[%s9027_s29 + $0x268] sm:$0xff] %v5624_v62  ;;  %v5626_v24 = vpop.f32.mrb[170].mxu0 }
 0x617   : > { %5802 = vst [vmem:[%s9027_s29 + $0x2e0] sm:$0xff] %v5626_v24  ;;  %v5628_v34 = vpop.f32.mrb[171].mxu0 }
 0x618   : > { %5803 = vst [vmem:[%s9027_s29 + $0x2e8] sm:$0xff] %v5628_v34 }
 0x61c   : > { %v5632_v1 = vpop.f32.mrb[172].mxu0 }
 0x61d   : > { %5818 = vst [vmem:[%s9027_s29 + $0x360] sm:$0x1] %v5632_v1  ;;  %v5634_v17 = vpop.f32.mrb[173].mxu0 }
 0x61e   : > { %5819 = vst [vmem:[%s9027_s29 + $0x368] sm:$0x1] %v5634_v17  ;;  %v5636_v53 = vpop.f32.mrb[174].mxu0 }
 0x61f   : > { %v5637_v52 = vpop.f32.mrb[175].mxu0 }
 0x644   : > { %v5673_v6 = vpop.f32.mrb[176].mxu0 }
 0x645   : > { %5724 = vst [vmem:[%s9027_s29 + $0x70] sm:$0xff] %v5673_v6  ;;  %v5675_v16 = vpop.f32.mrb[177].mxu0 }
 0x646   : > { %5725 = vst [vmem:[%s9027_s29 + $0x78] sm:$0xff] %v5675_v16  ;;  %v5677_v8 = vpop.f32.mrb[178].mxu0 }
 0x647   : > { %5740 = vst [vmem:[%s9027_s29 + $0xf0] sm:$0xff] %v5677_v8  ;;  %v5679_v13 = vpop.f32.mrb[179].mxu0 }
 0x648   : > { %5741 = vst [vmem:[%s9027_s29 + $0xf8] sm:$0xff] %v5679_v13 }
 0x64c   : > { %v5683_v50 = vpop.f32.mrb[180].mxu0 }
 0x64d   : > { %5756 = vst [vmem:[%s9027_s29 + $0x170] sm:$0xff] %v5683_v50  ;;  %v5685_v10 = vpop.f32.mrb[181].mxu0 }
 0x64e   : > { %5757 = vst [vmem:[%s9027_s29 + $0x178] sm:$0xff] %v5685_v10  ;;  %v5687_v44 = vpop.f32.mrb[182].mxu0 }
 0x64f   : > { %5772 = vst [vmem:[%s9027_s29 + $0x1f0] sm:$0xff] %v5687_v44  ;;  %v5689_v11 = vpop.f32.mrb[183].mxu0 }
 0x650   : > { %5773 = vst [vmem:[%s9027_s29 + $0x1f8] sm:$0xff] %v5689_v11 }
 0x654   : > { %v5693_v14 = vpop.f32.mrb[184].mxu0 }
 0x655   : > { %5788 = vst [vmem:[%s9027_s29 + $0x270] sm:$0xff] %v5693_v14  ;;  %v5695_v33 = vpop.f32.mrb[185].mxu0 }
 0x656   : > { %5789 = vst [vmem:[%s9027_s29 + $0x278] sm:$0xff] %v5695_v33  ;;  %v5697_v58 = vpop.f32.mrb[186].mxu0 }
 0x657   : > { %5804 = vst [vmem:[%s9027_s29 + $0x2f0] sm:$0xff] %v5697_v58  ;;  %v5699_v54 = vpop.f32.mrb[187].mxu0 }
 0x658   : > { %5805 = vst [vmem:[%s9027_s29 + $0x2f8] sm:$0xff] %v5699_v54 }
 0x65c   : > { %v5703_v25 = vpop.f32.mrb[188].mxu0 }
 0x65d   : > { %5820 = vst [vmem:[%s9027_s29 + $0x370] sm:$0x1] %v5703_v25  ;;  %v5705_v5 = vpop.f32.mrb[189].mxu0 }
 0x65e   : > { %5821 = vst [vmem:[%s9027_s29 + $0x378] sm:$0x1] %v5705_v5  ;;  %v5707_v2 = vpop.f32.mrb[190].mxu0 }
 0x65f   : > { %v5708_v15 = vpop.f32.mrb[191].mxu0 }
 0x660 PF: > { %s15_s18 = sadd.s32 1, %s7666_s18  }
 0x661   : > { %p12_p4 = scmp.ge.s32.totalorder %s15_s18, 4  }
 0x663   :  { %14 = sbr.rel (!%p12_p4) target bundleno = 1 (0x1), region = 70 }

// kernel: tpu_custom_call.1
= control target key start
LH: loop header
LB: loop body
LE: loop exit
PB: predicated region body
PF: predicated region fallthrough
CT: control target
= control target key end

     0   :  { %s7699_s18 = smov 0   ;;  %s9472_s0 = inlined_call_operand.vmem [shape: bf16[2,2048,49], index: 0, kind: input, shape index: {}]   ;;  %s9473_s1 = inlined_call_operand.vmem [shape: bf16[49,2048], index: 1, kind: input, shape index: {}]   ;;  %s9474_s2 = inlined_call_operand.vmem [shape: f32[49,1], index: 2, kind: input, shape index: {}]   ;;  %s9475_s3 = inlined_call_operand.vmem [shape: bf16[49,49], index: 3, kind: input, shape index: {}]   ;;  %s9476_s4 = inlined_call_operand.vmem [shape: bf16[2048,49], index: 4, kind: input, shape index: {}]   ;;  %s9477_s5 = inlined_call_operand.vmem [shape: f32[2,49,2048], index: 5, kind: output, shape index: {}]  }
   0x1 LB: > { %s5877_s19 = sadd.s32 4294967295, %s7666_s18   ;;  %p5881_p0 = scmp.ge.s32.totalorder %s7666_s18, 1  ;;  %s7666_s18 = sphi %s7699_s18, %s15_s18  }
   0x2   : > { %p187_p1 = scmp.lt.s32.totalorder %s7666_s18, 3 }
   0x4   : > { %p188_p2 = pnand %p5881_p0, %p187_p1 }
   0x5   : > { %p215_p3 = scmp.lt.s32.totalorder (!%p188_p2), %s5877_s19, 1  ;;  %v7710_v0 = vld [vmem:[%s9473_s1] sm:$0xff] (!%p188_p2)  ;;  %v7720_v2 = vld [vmem:[%s9473_s1 + $0x8] sm:$0xff] (!%p188_p2)  ;;  %v7668_v6 = vmov (!%p188_p2), 0   ;;  %vm2441_vm0 = vcmask (!%p188_p2), 400384   ;;  %vm2454_vm1 = vcmask (!%p188_p2), 1040384  }
   0x6   : > { %191 = sbr.rel (%p188_p2) target bundleno = 1632 (0x660), region = 40  ;;  %v7715_v1 = vld [vmem:[%s9473_s1 + $0x40] sm:$0xff] (!%p188_p2)  ;;  %v7727_v4 = vld [vmem:[%s9473_s1 + $0x48] sm:$0xff] (!%p188_p2)  ;;  %7382 = vset.pattern.permute.xlu0 (!%p188_p2), %v7668_v6  ;;  %7383 = vset.pattern.permute.xlu1 (!%p188_p2), %v7668_v6 }
   0x7   : > { %v5886_v3 = vcombine.high (!%p188_p2), %v7710_v0, %v7715_v1  ;;  %v5888_v5 = vcombine.high (!%p188_p2), %v7720_v2, %v7727_v4  ;;  %v242_v36 = vld [vmem:[%s9473_s1 + $0x80] sm:$0xff] (!%p188_p2)  ;;  %v243_v39 = vld [vmem:[%s9473_s1 + $0x88] sm:$0xff] (!%p188_p2)  ;;  %v5885_v43 = vcombine.low (!%p188_p2), %v7710_v0, %v7715_v1  ;;  %v5887_v44 = vcombine.low (!%p188_p2), %v7720_v2, %v7727_v4 }
   0x8   : > { %v250_v37 = vld [vmem:[%s9473_s1 + $0xc0] sm:$0xff] (!%p188_p2)  ;;  %v251_v40 = vld [vmem:[%s9473_s1 + $0xc8] sm:$0xff] (!%p188_p2) }
   0x9   : > { %1939 = vmatprep.mubr.bf16.mxu0 (!%p188_p2), %v5886_v3  ;;  %2003 = vmatprep.mubr.bf16.mxu1 (!%p188_p2), %v5888_v5  ;;  %v5902_v47 = vcombine.high (!%p188_p2), %v242_v36, %v250_v37  ;;  %v5904_v49 = vcombine.high (!%p188_p2), %v243_v39, %v251_v40  ;;  %v258_v52 = vld [vmem:[%s9473_s1 + $0x100] sm:$0xff] (!%p188_p2)  ;;  %v259_v55 = vld [vmem:[%s9473_s1 + $0x108] sm:$0xff] (!%p188_p2)  ;;  %v5901_v59 = vcombine.low (!%p188_p2), %v242_v36, %v250_v37 }
   0xa   : > { %v266_v53 = vld [vmem:[%s9473_s1 + $0x140] sm:$0xff] (!%p188_p2)  ;;  %v267_v56 = vld [vmem:[%s9473_s1 + $0x148] sm:$0xff] (!%p188_p2)  ;;  %v5903_v60 = vcombine.low (!%p188_p2), %v243_v39, %v251_v40 }
   0xb   : > { %v5918_v63 = vcombine.high (!%p188_p2), %v258_v52, %v266_v53  ;;  %v5920_v1 = vcombine.high (!%p188_p2), %v259_v55, %v267_v56  ;;  %v274_v4 = vld [vmem:[%s9473_s1 + $0x180] sm:$0x11] (!%p188_p2) }
   0xd   : > { %s9479_s19 = smov (!%p215_p3, %s5877_s19), 1 }
   0xe   : > { %s6375_s28 = sshll.u32 %s9479_s19, 10  ;;  %s7372_s26 = smul.u32 896, %s9479_s19 }
   0xf   : > { %s7737_s6 = scalar_lea.vmem %s9472_s0, %s6375_s28 }
  0x10   : > { %v7384_v7 = vld [vmem:[%s7737_s6 + $0x40] sm:$0xff]   ;;  %v7388_v11 = vld [vmem:[%s7737_s6 + $0x48] sm:$0xff]   ;;  %v7392_v15 = vld [vmem:[%s7737_s6 + $0x50] sm:$0xff]   ;;  %s9027_s29 = scalar_lea.vmem %s9477_s5, %s7372_s26 }
  0x11   : > { %v7385_v8 = vld [vmem:[%s7737_s6 + $0xc0] sm:$0xff]   ;;  %6376 = vmatprep.subr.bf16.mxu0 %v7384_v7  ;;  %v7389_v12 = vld [vmem:[%s7737_s6 + $0xc8] sm:$0xff]   ;;  %v7393_v16 = vld [vmem:[%s7737_s6 + $0xd0] sm:$0xff]  }
  0x12   : > { %v7386_v9 = vld [vmem:[%s7737_s6] sm:$0xff]   ;;  %6416 = vmatprep.subr.bf16.mxu1 %v7385_v8  ;;  %v7390_v13 = vld [vmem:[%s7737_s6 + $0x8] sm:$0xff]   ;;  %v7394_v17 = vld [vmem:[%s7737_s6 + $0x10] sm:$0xff]  }
  0x13   : > { %v7387_v10 = vld [vmem:[%s7737_s6 + $0x80] sm:$0xff]   ;;  %6377 = vmatpush3.bf16.msra.mxu0 %v7386_v9  ;;  %v7391_v14 = vld [vmem:[%s7737_s6 + $0x88] sm:$0xff]   ;;  %v7395_v18 = vld [vmem:[%s7737_s6 + $0x90] sm:$0xff]  }
  0x14   : > { %6417 = vmatpush3.bf16.msra.mxu1 %v7387_v10  ;;  %6378 = vmatprep.subr.bf16.mxu0 %v7388_v11  ;;  %v7396_v19 = vld [vmem:[%s7737_s6 + $0x58] sm:$0xff]   ;;  %v7400_v23 = vld [vmem:[%s7737_s6 + $0x60] sm:$0xff]   ;;  %v7404_v27 = vld [vmem:[%s7737_s6 + $0x68] sm:$0xff]   ;;  %v5917_v10 = vcombine.low %v258_v52, %v266_v53  ;;  %v5919_v11 = vcombine.low %v259_v55, %v267_v56 }
  0x15   : > { %6418 = vmatprep.subr.bf16.mxu1 %v7389_v12  ;;  %v7397_v20 = vld [vmem:[%s7737_s6 + $0xd8] sm:$0xff]   ;;  %v7401_v24 = vld [vmem:[%s7737_s6 + $0xe0] sm:$0xff]   ;;  %v7405_v28 = vld [vmem:[%s7737_s6 + $0xe8] sm:$0xff]  }
  0x16   : > { %v7398_v21 = vld [vmem:[%s7737_s6 + $0x18] sm:$0xff]   ;;  %v7402_v25 = vld [vmem:[%s7737_s6 + $0x20] sm:$0xff]   ;;  %v7406_v29 = vld [vmem:[%s7737_s6 + $0x28] sm:$0xff]  }
  0x17   : > { %6379 = vmatpush3.bf16.msra.mxu0 %v7390_v13  ;;  %v7399_v22 = vld [vmem:[%s7737_s6 + $0x98] sm:$0xff]   ;;  %v7403_v26 = vld [vmem:[%s7737_s6 + $0xa0] sm:$0xff]   ;;  %v7407_v30 = vld [vmem:[%s7737_s6 + $0xa8] sm:$0xff]  }
  0x18   : > { %6419 = vmatpush3.bf16.msra.mxu1 %v7391_v14  ;;  %6380 = vmatprep.subr.bf16.mxu0 %v7392_v15  ;;  %v7408_v31 = vld [vmem:[%s7737_s6 + $0x70] sm:$0xff]   ;;  %v7412_v35 = vld [vmem:[%s7737_s6 + $0x78] sm:$0xff]   ;;  %v7416_v45 = vld [vmem:[%s7737_s6 + $0x140] sm:$0xff]   ;;  %v5934_v14 = vcombine.high %v274_v4, %v274_v4 }
  0x19   : > { %6420 = vmatprep.subr.bf16.mxu1 %v7393_v16  ;;  %v7409_v32 = vld [vmem:[%s7737_s6 + $0xf0] sm:$0xff]   ;;  %v7413_v38 = vld [vmem:[%s7737_s6 + $0xf8] sm:$0xff]   ;;  %v7417_v46 = vld [vmem:[%s7737_s6 + $0x1c0] sm:$0xff]  }
  0x1a   : > { %v7410_v33 = vld [vmem:[%s7737_s6 + $0x30] sm:$0xff]   ;;  %v7414_v41 = vld [vmem:[%s7737_s6 + $0x38] sm:$0xff]   ;;  %v7418_v48 = vld [vmem:[%s7737_s6 + $0x100] sm:$0xff]  }
  0x1b   : > { %6381 = vmatpush3.bf16.msra.mxu0 %v7394_v17  ;;  %v7411_v34 = vld [vmem:[%s7737_s6 + $0xb0] sm:$0xff]   ;;  %v7415_v42 = vld [vmem:[%s7737_s6 + $0xb8] sm:$0xff]   ;;  %v7419_v50 = vld [vmem:[%s7737_s6 + $0x180] sm:$0xff]  }
  0x1c   : > { %6421 = vmatpush3.bf16.msra.mxu1 %v7395_v18  ;;  %6382 = vmatprep.subr.bf16.mxu0 %v7396_v19  ;;  %v7420_v51 = vld [vmem:[%s7737_s6 + $0x148] sm:$0xff]   ;;  %v7424_v61 = vld [vmem:[%s7737_s6 + $0x150] sm:$0xff]   ;;  %v7428_v3 = vld [vmem:[%s7737_s6 + $0x158] sm:$0xff]  }
  0x1d   : > { %6422 = vmatprep.subr.bf16.mxu1 %v7397_v20  ;;  %v7421_v54 = vld [vmem:[%s7737_s6 + $0x1c8] sm:$0xff]   ;;  %v7425_v62 = vld [vmem:[%s7737_s6 + $0x1d0] sm:$0xff]   ;;  %v7429_v5 = vld [vmem:[%s7737_s6 + $0x1d8] sm:$0xff]  }
  0x1e   : > { %v7422_v57 = vld [vmem:[%s7737_s6 + $0x108] sm:$0xff]   ;;  %v7426_v0 = vld [vmem:[%s7737_s6 + $0x110] sm:$0xff]   ;;  %v7430_v8 = vld [vmem:[%s7737_s6 + $0x118] sm:$0xff]  }
  0x1f   : > { %6383 = vmatpush3.bf16.msra.mxu0 %v7398_v21  ;;  %v7423_v58 = vld [vmem:[%s7737_s6 + $0x188] sm:$0xff]   ;;  %v7427_v2 = vld [vmem:[%s7737_s6 + $0x190] sm:$0xff]   ;;  %v7431_v9 = vld [vmem:[%s7737_s6 + $0x198] sm:$0xff]  }
  0x20   : > { %6423 = vmatpush3.bf16.msra.mxu1 %v7399_v22  ;;  %6384 = vmatprep.subr.bf16.mxu0 %v7400_v23  ;;  %v275_v7 = vld [vmem:[%s9473_s1 + $0x188] sm:$0x11]  ;;  %v7432_v12 = vld [vmem:[%s7737_s6 + $0x160] sm:$0xff]   ;;  %v228_v19 = vld [vmem:[%s9473_s1 + $0x10] sm:$0xff] }
  0x21   : > { %6424 = vmatprep.subr.bf16.mxu1 %v7401_v24  ;;  %v7433_v13 = vld [vmem:[%s7737_s6 + $0x1e0] sm:$0xff]   ;;  %v5936_v16 = vcombine.high %v275_v7, %v275_v7  ;;  %v7436_v18 = vld [vmem:[%s7737_s6 + $0x168] sm:$0xff]   ;;  %v236_v20 = vld [vmem:[%s9473_s1 + $0x50] sm:$0xff] }
  0x22   : > { %v7434_v15 = vld [vmem:[%s7737_s6 + $0x120] sm:$0xff]   ;;  %v7437_v21 = vld [vmem:[%s7737_s6 + $0x1e8] sm:$0xff]   ;;  %v229_v22 = vld [vmem:[%s9473_s1 + $0x18] sm:$0xff] }
  0x23   : > { %6385 = vmatpush3.bf16.msra.mxu0 %v7402_v25  ;;  %v7435_v17 = vld [vmem:[%s7737_s6 + $0x1a0] sm:$0xff]   ;;  %v237_v23 = vld [vmem:[%s9473_s1 + $0x58] sm:$0xff]  ;;  %v7438_v24 = vld [vmem:[%s7737_s6 + $0x128] sm:$0xff]  }
  0x24   : > { %6425 = vmatpush3.bf16.msra.mxu1 %v7403_v26  ;;  %6386 = vmatprep.subr.bf16.mxu0 %v7404_v27  ;;  %v7439_v25 = vld [vmem:[%s7737_s6 + $0x1a8] sm:$0xff]   ;;  %v5933_v26 = vcombine.low %v274_v4, %v274_v4  ;;  %v5935_v27 = vcombine.low %v275_v7, %v275_v7  ;;  %v7450_v36 = vld [vmem:[%s7737_s6 + $0x138] sm:$0xff]   ;;  %v5891_v39 = vcombine.low %v229_v22, %v237_v23  ;;  %v7452_v40 = vld [vmem:[%s7737_s6 + $0x240] sm:$0xff]  }
  0x25   : > { %6426 = vmatprep.subr.bf16.mxu1 %v7405_v28  ;;  %v7444_v28 = vld [vmem:[%s7737_s6 + $0x170] sm:$0xff]   ;;  %v7451_v37 = vld [vmem:[%s7737_s6 + $0x1b8] sm:$0xff]  }
  0x26   : > { %v253_v52 = vld [vmem:[%s9473_s1 + $0xd8] sm:$0xff]  ;;  %v7460_v56 = vld [vmem:[%s7737_s6 + $0x250] sm:$0xff]  }
  0x27   : > { %6387 = vmatpush3.bf16.msra.mxu0 %v7406_v29  ;;  %v7445_v29 = vld [vmem:[%s7737_s6 + $0x1f0] sm:$0xff]   ;;  %v269_v4 = vld [vmem:[%s9473_s1 + $0x158] sm:$0xff] }
  0x28   : > { %6427 = vmatpush3.bf16.msra.mxu1 %v7407_v30  ;;  %6388 = vmatprep.subr.bf16.mxu0 %v7408_v31  ;;  %v5890_v30 = vcombine.high %v228_v19, %v236_v20  ;;  %v7446_v31 = vld [vmem:[%s7737_s6 + $0x130] sm:$0xff]  }
  0x29   : > { %6428 = vmatprep.subr.bf16.mxu1 %v7409_v32  ;;  %v5892_v32 = vcombine.high %v229_v22, %v237_v23  ;;  %v7480_v23 = vld [vmem:[%s7737_s6 + $0x270] sm:$0xff]  }
  0x2b   : > { %6389 = vmatpush3.bf16.msra.mxu0 %v7410_v33  ;;  %v7447_v33 = vld [vmem:[%s7737_s6 + $0x1b0] sm:$0xff]  }
  0x2c   : > { %6429 = vmatpush3.bf16.msra.mxu1 %v7411_v34  ;;  %6390 = vmatprep.subr.bf16.mxu0 %v7412_v35  ;;  %v7448_v34 = vld [vmem:[%s7737_s6 + $0x178] sm:$0xff]  }
  0x2d   : > { %6430 = vmatprep.subr.bf16.mxu1 %v7413_v38  ;;  %v7449_v35 = vld [vmem:[%s7737_s6 + $0x1f8] sm:$0xff]   ;;  %v5889_v38 = vcombine.low %v228_v19, %v236_v20 }
  0x2e   : > { %v277_v19 = vld [vmem:[%s9473_s1 + $0x198] sm:$0x11] }
  0x2f   : > { %6391 = vmatpush3.bf16.msra.mxu0 %v7414_v41  ;;  %v7453_v41 = vld [vmem:[%s7737_s6 + $0x2c0] sm:$0xff]   ;;  %v5939_v22 = vcombine.low %v277_v19, %v277_v19 }
  0x30   : > { %6431 = vmatpush3.bf16.msra.mxu1 %v7415_v42  ;;  %6456 = vmatprep.subr.bf16.mxu0 %v7416_v45  ;;  %v7454_v42 = vld [vmem:[%s7737_s6 + $0x200] sm:$0xff]   ;;  %v7457_v45 = vld [vmem:[%s7737_s6 + $0x2c8] sm:$0xff]  }
  0x31   : > { %6496 = vmatprep.subr.bf16.mxu1 %v7417_v46  ;;  %v7458_v46 = vld [vmem:[%s7737_s6 + $0x208] sm:$0xff]  }
  0x32   : > { %1940 = vmatmul.mubr.bf16.vlgmr.msra.gmra.mrb[0].mxu0 %v5885_v43  ;;  %v7455_v43 = vld [vmem:[%s7737_s6 + $0x280] sm:$0xff]  }
  0x33   : > { %2004 = vmatmul.mubr.bf16.vlgmr.msra.gmra.mrb[0].mxu1 %v5887_v44  ;;  %6457 = vmatpush3.bf16.msra.mxu0 %v7418_v48  ;;  %v7456_v44 = vld [vmem:[%s7737_s6 + $0x248] sm:$0xff]   ;;  %v244_v48 = vld [vmem:[%s9473_s1 + $0x90] sm:$0xff] }
  0x34   : > { %6497 = vmatpush3.bf16.msra.mxu1 %v7419_v50  ;;  %1947 = vmatprep.mubr.bf16.mxu0 %v5902_v47  ;;  %v7459_v47 = vld [vmem:[%s7737_s6 + $0x288] sm:$0xff]   ;;  %v245_v50 = vld [vmem:[%s9473_s1 + $0x98] sm:$0xff] }
  0x35   : > { %6458 = vmatprep.subr.bf16.mxu0 %v7420_v51  ;;  %2011 = vmatprep.mubr.bf16.mxu1 %v5904_v49  ;;  %v252_v49 = vld [vmem:[%s9473_s1 + $0xd0] sm:$0xff]  ;;  %v5907_v55 = vcombine.low %v245_v50, %v253_v52 }
  0x36   : > { %6498 = vmatprep.subr.bf16.mxu1 %v7421_v54  ;;  %v5906_v51 = vcombine.high %v244_v48, %v252_v49  ;;  %v5905_v53 = vcombine.low %v244_v48, %v252_v49  ;;  %v5908_v54 = vcombine.high %v245_v50, %v253_v52  ;;  %v254_v48 = vld [vmem:[%s9473_s1 + $0xe0] sm:$0xff]  ;;  %v247_v49 = vld [vmem:[%s9473_s1 + $0xa8] sm:$0xff] }
  0x37   : > { %6459 = vmatpush3.bf16.msra.mxu0 %v7422_v57  ;;  %v7461_v57 = vld [vmem:[%s7737_s6 + $0x2d0] sm:$0xff]   ;;  %v255_v50 = vld [vmem:[%s9473_s1 + $0xe8] sm:$0xff] }
  0x38   : > { %6499 = vmatpush3.bf16.msra.mxu1 %v7423_v58  ;;  %6460 = vmatprep.subr.bf16.mxu0 %v7424_v61  ;;  %v7462_v58 = vld [vmem:[%s7737_s6 + $0x210] sm:$0xff]   ;;  %v7465_v61 = vld [vmem:[%s7737_s6 + $0x2d8] sm:$0xff]   ;;  %v5912_v52 = vcombine.high %v247_v49, %v255_v50 }
  0x39   : > { %6500 = vmatprep.subr.bf16.mxu1 %v7425_v62  ;;  %v7466_v62 = vld [vmem:[%s7737_s6 + $0x218] sm:$0xff]  }
  0x3a   : > { %1948 = vmatmul.mubr.bf16.gmra.mrb[4].mxu0 %v5901_v59  ;;  %v7463_v59 = vld [vmem:[%s7737_s6 + $0x290] sm:$0xff]  }
  0x3b   : > { %2012 = vmatmul.mubr.bf16.gmra.mrb[4].mxu1 %v5903_v60  ;;  %6461 = vmatpush3.bf16.msra.mxu0 %v7426_v0  ;;  %v7464_v60 = vld [vmem:[%s7737_s6 + $0x258] sm:$0xff]   ;;  %v260_v0 = vld [vmem:[%s9473_s1 + $0x110] sm:$0xff] }
  0x3c   : > { %6501 = vmatpush3.bf16.msra.mxu1 %v7427_v2  ;;  %1955 = vmatprep.mubr.bf16.mxu0 %v5918_v63  ;;  %v7467_v63 = vld [vmem:[%s7737_s6 + $0x298] sm:$0xff]  }
  0x3d   : > { %6462 = vmatprep.subr.bf16.mxu0 %v7428_v3  ;;  %2019 = vmatprep.mubr.bf16.mxu1 %v5920_v1  ;;  %v268_v1 = vld [vmem:[%s9473_s1 + $0x150] sm:$0xff]  ;;  %v261_v3 = vld [vmem:[%s9473_s1 + $0x118] sm:$0xff] }
  0x3e   : > { %6502 = vmatprep.subr.bf16.mxu1 %v7429_v5  ;;  %v5922_v2 = vcombine.high %v260_v0, %v268_v1  ;;  %v5921_v5 = vcombine.low %v260_v0, %v268_v1  ;;  %v5924_v7 = vcombine.high %v261_v3, %v269_v4  ;;  %v270_v0 = vld [vmem:[%s9473_s1 + $0x160] sm:$0xff]  ;;  %v263_v1 = vld [vmem:[%s9473_s1 + $0x128] sm:$0xff] }
  0x3f   : > { %6463 = vmatpush3.bf16.msra.mxu0 %v7430_v8  ;;  %v5923_v8 = vcombine.low %v261_v3, %v269_v4  ;;  %v271_v3 = vld [vmem:[%s9473_s1 + $0x168] sm:$0xff] }
  0x40   : > { %6503 = vmatpush3.bf16.msra.mxu1 %v7431_v9  ;;  %6464 = vmatprep.subr.bf16.mxu0 %v7432_v12  ;;  %v7468_v9 = vld [vmem:[%s7737_s6 + $0x260] sm:$0xff]  }
  0x41   : > { %6504 = vmatprep.subr.bf16.mxu1 %v7433_v13  ;;  %v7471_v12 = vld [vmem:[%s7737_s6 + $0x2a0] sm:$0xff]   ;;  %v7472_v13 = vld [vmem:[%s7737_s6 + $0x268] sm:$0xff]  }
  0x42   : > { %1956 = vmatmul.mubr.bf16.gmra.mrb[8].mxu0 %v5917_v10  ;;  %v7469_v10 = vld [vmem:[%s7737_s6 + $0x2e0] sm:$0xff]  }
  0x43   : > { %2020 = vmatmul.mubr.bf16.gmra.mrb[8].mxu1 %v5919_v11  ;;  %6465 = vmatpush3.bf16.msra.mxu0 %v7434_v15  ;;  %v7470_v11 = vld [vmem:[%s7737_s6 + $0x220] sm:$0xff]   ;;  %v7474_v15 = vld [vmem:[%s7737_s6 + $0x228] sm:$0xff]  }
  0x44   : > { %6505 = vmatpush3.bf16.msra.mxu1 %v7435_v17  ;;  %1963 = vmatprep.mubr.bf16.mxu0 %v5934_v14  ;;  %v7473_v14 = vld [vmem:[%s7737_s6 + $0x2e8] sm:$0xff]   ;;  %v276_v17 = vld [vmem:[%s9473_s1 + $0x190] sm:$0x11] }
  0x45   : > { %6466 = vmatprep.subr.bf16.mxu0 %v7436_v18  ;;  %2027 = vmatprep.mubr.bf16.mxu1 %v5936_v16  ;;  %v7475_v16 = vld [vmem:[%s7737_s6 + $0x2a8] sm:$0xff]   ;;  %v5938_v18 = vcombine.high %v276_v17, %v276_v17  ;;  %v5937_v20 = vcombine.low %v276_v17, %v276_v17  ;;  %v278_v17 = vld [vmem:[%s9473_s1 + $0x1a0] sm:$0x11] }
  0x46   : > { %6506 = vmatprep.subr.bf16.mxu1 %v7437_v21  ;;  %v5940_v21 = vcombine.high %v277_v19, %v277_v19  ;;  %v279_v19 = vld [vmem:[%s9473_s1 + $0x1a8] sm:$0x11] }
  0x47   : > { %6467 = vmatpush3.bf16.msra.mxu0 %v7438_v24  ;;  %v7481_v24 = vld [vmem:[%s7737_s6 + $0x2f0] sm:$0xff]  }
  0x48   : > { %6507 = vmatpush3.bf16.msra.mxu1 %v7439_v25  ;;  %6468 = vmatprep.subr.bf16.mxu0 %v7444_v28  ;;  %v7482_v25 = vld [vmem:[%s7737_s6 + $0x230] sm:$0xff]   ;;  %v7485_v28 = vld [vmem:[%s7737_s6 + $0x2f8] sm:$0xff]  }
  0x49   : > { %6508 = vmatprep.subr.bf16.mxu1 %v7445_v29  ;;  %v7486_v29 = vld [vmem:[%s7737_s6 + $0x238] sm:$0xff]  }
  0x4a   : > { %1964 = vmatmul.mubr.bf16.gmra.mrb[12].mxu0 %v5933_v26  ;;  %v7483_v26 = vld [vmem:[%s7737_s6 + $0x2b0] sm:$0xff]  }
  0x4b   : > { %2028 = vmatmul.mubr.bf16.gmra.mrb[12].mxu1 %v5935_v27  ;;  %6469 = vmatpush3.bf16.msra.mxu0 %v7446_v31  ;;  %v7484_v27 = vld [vmem:[%s7737_s6 + $0x278] sm:$0xff]   ;;  %v230_v31 = vld [vmem:[%s9473_s1 + $0x20] sm:$0xff] }
  0x4c   : > { %6509 = vmatpush3.bf16.msra.mxu1 %v7447_v33  ;;  %2067 = vmatprep.mubr.bf16.mxu0 %v5890_v30  ;;  %v7487_v30 = vld [vmem:[%s7737_s6 + $0x2b8] sm:$0xff]  }
  0x4d   : > { %6470 = vmatprep.subr.bf16.mxu0 %v7448_v34  ;;  %2131 = vmatprep.mubr.bf16.mxu1 %v5892_v32  ;;  %v238_v32 = vld [vmem:[%s9473_s1 + $0x60] sm:$0xff] }
  0x4e   : > { %6510 = vmatprep.subr.bf16.mxu1 %v7449_v35  ;;  %v5893_v33 = vcombine.low %v230_v31, %v238_v32  ;;  %v5894_v34 = vcombine.high %v230_v31, %v238_v32  ;;  %v231_v35 = vld [vmem:[%s9473_s1 + $0x28] sm:$0xff]  ;;  %v7522_v31 = vld [vmem:[%s7737_s6 + $0x338] sm:$0xff]  }
  0x4f   : > { %6471 = vmatpush3.bf16.msra.mxu0 %v7450_v36  ;;  %v239_v36 = vld [vmem:[%s9473_s1 + $0x68] sm:$0xff]  ;;  %v7523_v32 = vld [vmem:[%s7737_s6 + $0x3b8] sm:$0xff]  }
  0x50   : > { %6511 = vmatpush3.bf16.msra.mxu1 %v7451_v37  ;;  %6536 = vmatprep.subr.bf16.mxu0 %v7452_v40  ;;  %v5895_v37 = vcombine.low %v231_v35, %v239_v36  ;;  %v7489_v40 = vld [vmem:[%s7737_s6 + $0x3c0] sm:$0xff]  }
  0x51   : > { %6576 = vmatprep.subr.bf16.mxu1 %v7453_v41  ;;  %v7490_v41 = vld [vmem:[%s7737_s6 + $0x300] sm:$0xff]  }
  0x52   : > { %2068 = vmatmul.mubr.bf16.vlgmr.msra.gmra.mrb[16].mxu0 %v5889_v38  ;;  %v5896_v38 = vcombine.high %v231_v35, %v239_v36  ;;  %v233_v35 = vld [vmem:[%s9473_s1 + $0x38] sm:$0xff] }
  0x53   : > { %2132 = vmatmul.mubr.bf16.vlgmr.msra.gmra.mrb[16].mxu1 %v5891_v39  ;;  %6537 = vmatpush3.bf16.msra.mxu0 %v7454_v42  ;;  %v7488_v39 = vld [vmem:[%s7737_s6 + $0x340] sm:$0xff]  }
  0x54   : > { %6577 = vmatpush3.bf16.msra.mxu1 %v7455_v43  ;;  %6538 = vmatprep.subr.bf16.mxu0 %v7456_v44  ;;  %v7491_v42 = vld [vmem:[%s7737_s6 + $0x380] sm:$0xff]   ;;  %v7492_v43 = vld [vmem:[%s7737_s6 + $0x348] sm:$0xff]  }
  0x55   : > { %6578 = vmatprep.subr.bf16.mxu1 %v7457_v45  ;;  %2075 = vmatprep.mubr.bf16.mxu0 %v5906_v51  ;;  %v7493_v44 = vld [vmem:[%s7737_s6 + $0x3c8] sm:$0xff]  }
  0x56   : > { %2139 = vmatprep.mubr.bf16.mxu1 %v5908_v54  ;;  %v7494_v45 = vld [vmem:[%s7737_s6 + $0x308] sm:$0xff]   ;;  %v5911_v54 = vcombine.low %v247_v49, %v255_v50  ;;  %v288_v50 = vld [vmem:[%s9474_s2 + $0x30] sm:$0x1] }
  0x57   : > { %6539 = vmatpush3.bf16.msra.mxu0 %v7458_v46  ;;  %v7495_v46 = vld [vmem:[%s7737_s6 + $0x388] sm:$0xff]  }
  0x58   : > { %6579 = vmatpush3.bf16.msra.mxu1 %v7459_v47  ;;  %6540 = vmatprep.subr.bf16.mxu0 %v7460_v56  ;;  %v246_v47 = vld [vmem:[%s9473_s1 + $0xa0] sm:$0xff]  ;;  %v7497_v56 = vld [vmem:[%s7737_s6 + $0x3d0] sm:$0xff]  }
  0x59   : > { %6580 = vmatprep.subr.bf16.mxu1 %v7461_v57  ;;  %v5910_v51 = vcombine.high %v246_v47, %v254_v48  ;;  %v7498_v57 = vld [vmem:[%s7737_s6 + $0x310] sm:$0xff]  }
  0x5a   : > { %2076 = vmatmul.mubr.bf16.gmra.mrb[20].mxu0 %v5905_v53  ;;  %v5909_v53 = vcombine.low %v246_v47, %v254_v48  ;;  %v257_v47 = vld [vmem:[%s9473_s1 + $0xf8] sm:$0xff]  ;;  %v287_v48 = vld [vmem:[%s9474_s2 + $0x28] sm:$0xff] }
  0x5b   : > { %2140 = vmatmul.mubr.bf16.gmra.mrb[20].mxu1 %v5907_v55  ;;  %6541 = vmatpush3.bf16.msra.mxu0 %v7462_v58  ;;  %v7496_v55 = vld [vmem:[%s7737_s6 + $0x350] sm:$0xff]  }
  0x5c   : > { %6581 = vmatpush3.bf16.msra.mxu1 %v7463_v59  ;;  %6542 = vmatprep.subr.bf16.mxu0 %v7464_v60  ;;  %v7499_v58 = vld [vmem:[%s7737_s6 + $0x390] sm:$0xff]   ;;  %v7500_v59 = vld [vmem:[%s7737_s6 + $0x358] sm:$0xff]  }
  0x5d   : > { %6582 = vmatprep.subr.bf16.mxu1 %v7465_v61  ;;  %2083 = vmatprep.mubr.bf16.mxu0 %v5922_v2  ;;  %v7501_v60 = vld [vmem:[%s7737_s6 + $0x3d8] sm:$0xff]  }
  0x5e   : > { %2147 = vmatprep.mubr.bf16.mxu1 %v5924_v7  ;;  %v7502_v61 = vld [vmem:[%s7737_s6 + $0x318] sm:$0xff]   ;;  %v5927_v7 = vcombine.low %v263_v1, %v271_v3 }
  0x5f   : > { %6543 = vmatpush3.bf16.msra.mxu0 %v7466_v62  ;;  %v7503_v62 = vld [vmem:[%s7737_s6 + $0x398] sm:$0xff]  }
  0x60   : > { %6583 = vmatpush3.bf16.msra.mxu1 %v7467_v63  ;;  %6544 = vmatprep.subr.bf16.mxu0 %v7468_v9  ;;  %v262_v63 = vld [vmem:[%s9473_s1 + $0x120] sm:$0xff] }
  0x61   : > { %6584 = vmatprep.subr.bf16.mxu1 %v7469_v10  ;;  %v5926_v2 = vcombine.high %v262_v63, %v270_v0  ;;  %v5925_v4 = vcombine.low %v262_v63, %v270_v0  ;;  %v7505_v9 = vld [vmem:[%s7737_s6 + $0x3e0] sm:$0xff]  }
  0x62   : > { %2084 = vmatmul.mubr.bf16.gmra.mrb[24].mxu0 %v5921_v5  ;;  %v5928_v5 = vcombine.high %v263_v1, %v271_v3  ;;  %v7506_v10 = vld [vmem:[%s7737_s6 + $0x320] sm:$0xff]  }
  0x63   : > { %2148 = vmatmul.mubr.bf16.gmra.mrb[24].mxu1 %v5923_v8  ;;  %6545 = vmatpush3.bf16.msra.mxu0 %v7470_v11  ;;  %v7504_v8 = vld [vmem:[%s7737_s6 + $0x360] sm:$0xff]  }
  0x64   : > { %6585 = vmatpush3.bf16.msra.mxu1 %v7471_v12  ;;  %6546 = vmatprep.subr.bf16.mxu0 %v7472_v13  ;;  %v7507_v11 = vld [vmem:[%s7737_s6 + $0x3a0] sm:$0xff]   ;;  %v7508_v12 = vld [vmem:[%s7737_s6 + $0x368] sm:$0xff]  }
  0x65   : > { %6586 = vmatprep.subr.bf16.mxu1 %v7473_v14  ;;  %2091 = vmatprep.mubr.bf16.mxu0 %v5938_v18  ;;  %v7509_v13 = vld [vmem:[%s7737_s6 + $0x3e8] sm:$0xff]   ;;  %v282_v14 = vld [vmem:[%s9474_s2] sm:$0xff]  ;;  %v5942_v18 = vcombine.high %v278_v17, %v278_v17 }
  0x66   : > { %2155 = vmatprep.mubr.bf16.mxu1 %v5940_v21  ;;  %810 = vperm.xlu0 %7382, %v282_v14   ;;  %v5944_v21 = vcombine.high %v279_v19, %v279_v19 }
  0x67   : > { %6547 = vmatpush3.bf16.msra.mxu0 %v7474_v15  ;;  %v7510_v15 = vld [vmem:[%s7737_s6 + $0x328] sm:$0xff]  }
  0x68   : > { %6587 = vmatpush3.bf16.msra.mxu1 %v7475_v16  ;;  %6548 = vmatprep.subr.bf16.mxu0 %v7480_v23  ;;  %v7511_v16 = vld [vmem:[%s7737_s6 + $0x3a8] sm:$0xff]   ;;  %v7516_v23 = vld [vmem:[%s7737_s6 + $0x370] sm:$0xff]  }
  0x69   : > { %6588 = vmatprep.subr.bf16.mxu1 %v7481_v24  ;;  %v7517_v24 = vld [vmem:[%s7737_s6 + $0x3f0] sm:$0xff]  }
  0x6a   : > { %2092 = vmatmul.mubr.bf16.gmra.mrb[28].mxu0 %v5937_v20  ;;  %v5941_v20 = vcombine.low %v278_v17, %v278_v17 }
  0x6b   : > { %2156 = vmatmul.mubr.bf16.gmra.mrb[28].mxu1 %v5939_v22  ;;  %6549 = vmatpush3.bf16.msra.mxu0 %v7482_v25  ;;  %v5943_v22 = vcombine.low %v279_v19, %v279_v19  ;;  %v283_v25 = vld [vmem:[%s9474_s2 + $0x8] sm:$0xff] }
  0x6c   : > { %6589 = vmatpush3.bf16.msra.mxu1 %v7483_v26  ;;  %6550 = vmatprep.subr.bf16.mxu0 %v7484_v27  ;;  %v7518_v26 = vld [vmem:[%s7737_s6 + $0x330] sm:$0xff]  }
  0x6d   : > { %6590 = vmatprep.subr.bf16.mxu1 %v7485_v28  ;;  %2195 = vmatprep.mubr.bf16.mxu0 %v5894_v34  ;;  %v7519_v27 = vld [vmem:[%s7737_s6 + $0x3b0] sm:$0xff]   ;;  %v7520_v28 = vld [vmem:[%s7737_s6 + $0x378] sm:$0xff]  }
  0x6e   : > { %2259 = vmatprep.mubr.bf16.mxu1 %v5896_v38  ;;  %815 = vperm.xlu0 %7382, %v283_v25   ;;  %v240_v34 = vld [vmem:[%s9473_s1 + $0x70] sm:$0xff]  ;;  %v241_v38 = vld [vmem:[%s9473_s1 + $0x78] sm:$0xff] }
  0x6f   : > { %6551 = vmatpush3.bf16.msra.mxu0 %v7486_v29  ;;  %v7521_v29 = vld [vmem:[%s7737_s6 + $0x3f8] sm:$0xff]  }
  0x70   : > { %6591 = vmatpush3.bf16.msra.mxu1 %v7487_v30  ;;  %6616 = vmatprep.subr.bf16.mxu0 %v7488_v39  ;;  %v284_v30 = vld [vmem:[%s9474_s2 + $0x10] sm:$0xff]  ;;  %v285_v39 = vld [vmem:[%s9474_s2 + $0x18] sm:$0xff] }
  0x71   : > { %6656 = vmatprep.subr.bf16.mxu1 %v7489_v40  ;;  %820 = vperm.xlu1 %7383, %v284_v30   ;;  %v286_v40 = vld [vmem:[%s9474_s2 + $0x20] sm:$0xff] }
  0x72   : > { %2196 = vmatmul.mubr.bf16.vlgmr.msra.gmra.mrb[32].mxu0 %v5893_v33  ;;  %v232_v33 = vld [vmem:[%s9473_s1 + $0x30] sm:$0xff]  ;;  %830 = vperm.xlu0 %7382, %v286_v40  }
  0x73   : > { %2260 = vmatmul.mubr.bf16.vlgmr.msra.gmra.mrb[32].mxu1 %v5895_v37  ;;  %6617 = vmatpush3.bf16.msra.mxu0 %v7490_v41  ;;  %v5897_v36 = vcombine.low %v232_v33, %v240_v34  ;;  %v5898_v37 = vcombine.high %v232_v33, %v240_v34  ;;  %v5899_v41 = vcombine.low %v233_v35, %v241_v38  ;;  %v7528_v33 = vld [vmem:[%s9475_s3] sm:$0xff]  }
  0x74   : > { %6657 = vmatpush3.bf16.msra.mxu1 %v7491_v42  ;;  %6618 = vmatprep.subr.bf16.mxu0 %v7492_v43  ;;  %v5900_v42 = vcombine.high %v233_v35, %v241_v38  ;;  %v248_v43 = vld [vmem:[%s9473_s1 + $0xb0] sm:$0xff] }
  0x75   : > { %6658 = vmatprep.subr.bf16.mxu1 %v7493_v44  ;;  %2203 = vmatprep.mubr.bf16.mxu0 %v5910_v51  ;;  %v256_v44 = vld [vmem:[%s9473_s1 + $0xf0] sm:$0xff] }
  0x76   : > { %2267 = vmatprep.mubr.bf16.mxu1 %v5912_v52  ;;  %825 = vperm.xlu1 %7383, %v285_v39   ;;  %v264_v51 = vld [vmem:[%s9473_s1 + $0x130] sm:$0xff] }
  0x77   : > { %6619 = vmatpush3.bf16.msra.mxu0 %v7494_v45  ;;  %v249_v45 = vld [vmem:[%s9473_s1 + $0xb8] sm:$0xff]  ;;  %v272_v52 = vld [vmem:[%s9473_s1 + $0x170] sm:$0xff]  ;;  %840 = vperm.xlu0 %7382, %v288_v50  }
  0x78   : > { %6659 = vmatpush3.bf16.msra.mxu1 %v7495_v46  ;;  %6620 = vmatprep.subr.bf16.mxu0 %v7496_v55  ;;  %v5914_v46 = vcombine.high %v248_v43, %v256_v44  ;;  %v5916_v49 = vcombine.high %v249_v45, %v257_v47  ;;  %v5913_v55 = vcombine.low %v248_v43, %v256_v44 }
  0x79   : > { %6660 = vmatprep.subr.bf16.mxu1 %v7497_v56  ;;  %v5915_v56 = vcombine.low %v249_v45, %v257_v47 }
  0x7a   : > { %2204 = vmatmul.mubr.bf16.gmra.mrb[36].mxu0 %v5909_v53  ;;  %v265_v53 = vld [vmem:[%s9473_s1 + $0x138] sm:$0xff]  ;;  %835 = vperm.xlu1 %7383, %v287_v48  }
  0x7b   : > { %2268 = vmatmul.mubr.bf16.gmra.mrb[36].mxu1 %v5911_v54  ;;  %6621 = vmatpush3.bf16.msra.mxu0 %v7498_v57  ;;  %v273_v54 = vld [vmem:[%s9473_s1 + $0x178] sm:$0xff]  ;;  %v5930_v57 = vcombine.high %v264_v51, %v272_v52 }
  0x7c   : > { %6661 = vmatpush3.bf16.msra.mxu1 %v7499_v58  ;;  %6622 = vmatprep.subr.bf16.mxu0 %v7500_v59  ;;  %v5932_v58 = vcombine.high %v265_v53, %v273_v54  ;;  %v280_v59 = vld [vmem:[%s9473_s1 + $0x1b0] sm:$0x11] }
  0x7d   : > { %6662 = vmatprep.subr.bf16.mxu1 %v7501_v60  ;;  %2211 = vmatprep.mubr.bf16.mxu0 %v5926_v2  ;;  %v281_v60 = vld [vmem:[%s9473_s1 + $0x1b8] sm:$0x11]  ;;  %v5946_v63 = vcombine.high %v280_v59, %v280_v59  ;;  %v5945_v1 = vcombine.low %v280_v59, %v280_v59 }
  0x7e   : > { %2275 = vmatprep.mubr.bf16.mxu1 %v5928_v5  ;;  %v5948_v0 = vcombine.high %v281_v60, %v281_v60  ;;  %v5947_v2 = vcombine.low %v281_v60, %v281_v60 }
  0x7f   : > { %6623 = vmatpush3.bf16.msra.mxu0 %v7502_v61  ;;  %v5929_v61 = vcombine.low %v264_v51, %v272_v52 }
  0x80   : > { %6663 = vmatpush3.bf16.msra.mxu1 %v7503_v62  ;;  %6624 = vmatprep.subr.bf16.mxu0 %v7504_v8  ;;  %v5931_v62 = vcombine.low %v265_v53, %v273_v54 }
  0x81   : > { %6664 = vmatprep.subr.bf16.mxu1 %v7505_v9 }
  0x82   : > { %2212 = vmatmul.mubr.bf16.gmra.mrb[40].mxu0 %v5925_v4 }
  0x83   : > { %2276 = vmatmul.mubr.bf16.gmra.mrb[40].mxu1 %v5927_v7  ;;  %6625 = vmatpush3.bf16.msra.mxu0 %v7506_v10 }
  0x84   : > { %6665 = vmatpush3.bf16.msra.mxu1 %v7507_v11  ;;  %6626 = vmatprep.subr.bf16.mxu0 %v7508_v12 }
  0x85   : > { %6666 = vmatprep.subr.bf16.mxu1 %v7509_v13  ;;  %2219 = vmatprep.mubr.bf16.mxu0 %v5942_v18 }
  0x86   : > { %2283 = vmatprep.mubr.bf16.mxu1 %v5944_v21 }
  0x87   : > { %6627 = vmatpush3.bf16.msra.mxu0 %v7510_v15 }
  0x88   : > { %6667 = vmatpush3.bf16.msra.mxu1 %v7511_v16  ;;  %6628 = vmatprep.subr.bf16.mxu0 %v7516_v23 }
  0x89   : > { %6668 = vmatprep.subr.bf16.mxu1 %v7517_v24 }
  0x8a   : > { %2220 = vmatmul.mubr.bf16.gmra.mrb[44].mxu0 %v5941_v20 }
  0x8b   : > { %2284 = vmatmul.mubr.bf16.gmra.mrb[44].mxu1 %v5943_v22  ;;  %6629 = vmatpush3.bf16.msra.mxu0 %v7518_v26 }
  0x8c   : > { %6669 = vmatpush3.bf16.msra.mxu1 %v7519_v27  ;;  %6630 = vmatprep.subr.bf16.mxu0 %v7520_v28 }
  0x8d   : > { %6670 = vmatprep.subr.bf16.mxu1 %v7521_v29  ;;  %2323 = vmatprep.mubr.bf16.mxu0 %v5898_v37 }
  0x8e   : > { %2387 = vmatprep.mubr.bf16.mxu1 %v5900_v42 }
  0x8f   : > { %6631 = vmatpush3.bf16.msra.mxu0 %v7522_v31 }
  0x90   : > { %6671 = vmatpush3.bf16.msra.mxu1 %v7523_v32 }
  0x92   : > { %2324 = vmatmul.mubr.bf16.vlgmr.msra.gmra.mrb[48].mxu0 %v5897_v36 }
  0x93   : > { %2388 = vmatmul.mubr.bf16.vlgmr.msra.gmra.mrb[48].mxu1 %v5899_v41  ;;  %2331 = vmatprep.mubr.bf16.mxu0 %v5914_v46 }
  0x94   : > { %2395 = vmatprep.mubr.bf16.mxu1 %v5916_v49 }
  0x9a   : > { %2332 = vmatmul.mubr.bf16.gmra.mrb[52].mxu0 %v5913_v55 }
  0x9b   : > { %2396 = vmatmul.mubr.bf16.gmra.mrb[52].mxu1 %v5915_v56  ;;  %2339 = vmatprep.mubr.bf16.mxu0 %v5930_v57 }
  0x9c   : > { %2403 = vmatprep.mubr.bf16.mxu1 %v5932_v58 }
  0xa2   : > { %2340 = vmatmul.mubr.bf16.gmra.mrb[56].mxu0 %v5929_v61 }
  0xa3   : > { %2404 = vmatmul.mubr.bf16.gmra.mrb[56].mxu1 %v5931_v62  ;;  %2347 = vmatprep.mubr.bf16.mxu0 %v5946_v63 }
  0xa4   : > { %2411 = vmatprep.mubr.bf16.mxu1 %v5948_v0 }
  0xaa   : > { %2348 = vmatmul.mubr.bf16.gmra.mrb[60].mxu0 %v5945_v1 }
  0xab   : > { %2412 = vmatmul.mubr.bf16.gmra.mrb[60].mxu1 %v5947_v2 }
  0xac   : > { %7036 = vmatprep.mubr.msk.bf16.mxu1 %vm2441_vm0, %v7528_v33 }
  0xe5   : > { %v811_v16 = vpop.permute.xlu0 %810 }
  0xed   : > { %v816_v31 = vpop.permute.xlu0 %815 }
  0xf0   : > { %v821_v34 = vpop.permute.xlu1 %820 }
  0xf1   : > { %v831_v48 = vpop.permute.xlu0 %830 }
  0xf5   : > { %v826_v47 = vpop.permute.xlu1 %825 }
  0xf9   : > { %v836_v56 = vpop.permute.xlu1 %835 }
 0x105   : > { %v6392_v3 = vpop.f32.mrb[0].mxu0 }
 0x106   : > { %v6432_v4 = vpop.f32.mrb[0].mxu1  ;;  %v6393_v5 = vpop.f32.mrb[1].mxu0 }
 0x107   : > { %v6394_v7 = vadd.f32 %v6393_v5, %v6392_v3  ;;  %v6433_v8 = vpop.f32.mrb[1].mxu1  ;;  %v6395_v9 = vpop.f32.mrb[2].mxu0 }
 0x108   : > { %v6434_v10 = vadd.f32 %v6433_v8, %v6432_v4  ;;  %v6435_v11 = vpop.f32.mrb[2].mxu1  ;;  %v6396_v12 = vpop.f32.mrb[3].mxu0 }
 0x109   : > { %v6397_v13 = vadd.f32 %v6396_v12, %v6395_v9  ;;  %v6436_v14 = vpop.f32.mrb[3].mxu1  ;;  %v1942_v17 = vadd.f32 %v6394_v7, %v811_v16  ;;  %v841_v3 = vpop.permute.xlu0 %840 }
 0x10a   : > { %v6437_v15 = vadd.f32 %v6436_v14, %v6435_v11 }
 0x10b   : > { %v2006_v24 = vadd.f32 %v6434_v10, %v1942_v17  ;;  %v1945_v32 = vadd.f32 %v6397_v13, %v816_v31 }
 0x10d   : > { %v6398_v18 = vpop.f32.mrb[4].mxu0  ;;  %v2009_v36 = vadd.f32 %v6437_v15, %v1945_v32 }
 0x10e   : > { %v6438_v19 = vpop.f32.mrb[4].mxu1  ;;  %v6399_v20 = vpop.f32.mrb[5].mxu0 }
 0x10f   : > { %v6400_v21 = vadd.f32 %v6399_v20, %v6398_v18  ;;  %v6439_v22 = vpop.f32.mrb[5].mxu1  ;;  %v6401_v23 = vpop.f32.mrb[6].mxu0 }
 0x110   : > { %v6440_v25 = vadd.f32 %v6439_v22, %v6438_v19  ;;  %v6441_v26 = vpop.f32.mrb[6].mxu1  ;;  %v6402_v27 = vpop.f32.mrb[7].mxu0 }
 0x111   : > { %v6403_v28 = vadd.f32 %v6402_v27, %v6401_v23  ;;  %v6442_v29 = vpop.f32.mrb[7].mxu1  ;;  %v1950_v37 = vadd.f32 %v6400_v21, %v821_v34 }
 0x112   : > { %v6443_v30 = vadd.f32 %v6442_v29, %v6441_v26 }
 0x113   : > { %v2014_v46 = vadd.f32 %v6440_v25, %v1950_v37  ;;  %v1953_v50 = vadd.f32 %v6403_v28, %v826_v47 }
 0x115   : > { %v6404_v35 = vpop.f32.mrb[8].mxu0  ;;  %v2017_v54 = vadd.f32 %v6443_v30, %v1953_v50 }
 0x116   : > { %v6444_v38 = vpop.f32.mrb[8].mxu1  ;;  %v6405_v39 = vpop.f32.mrb[9].mxu0 }
 0x117   : > { %v6406_v40 = vadd.f32 %v6405_v39, %v6404_v35  ;;  %v6445_v41 = vpop.f32.mrb[9].mxu1  ;;  %v6407_v42 = vpop.f32.mrb[10].mxu0 }
 0x118   : > { %v6446_v43 = vadd.f32 %v6445_v41, %v6444_v38  ;;  %v6447_v44 = vpop.f32.mrb[10].mxu1  ;;  %v6408_v45 = vpop.f32.mrb[11].mxu0 }
 0x119   : > { %v6409_v49 = vadd.f32 %v6408_v45, %v6407_v42  ;;  %v1958_v51 = vadd.f32 %v6406_v40, %v831_v48  ;;  %v6448_v52 = vpop.f32.mrb[11].mxu1 }
 0x11a   : > { %v6449_v53 = vadd.f32 %v6448_v52, %v6447_v44 }
 0x11b   : > { %v2022_v55 = vadd.f32 %v6446_v43, %v1958_v51  ;;  %v1961_v58 = vadd.f32 %v6409_v49, %v836_v56 }
 0x11d   : > { %v6410_v57 = vpop.f32.mrb[12].mxu0  ;;  %v2025_v0 = vadd.f32 %v6449_v53, %v1961_v58 }
 0x11e   : > { %v6450_v59 = vpop.f32.mrb[12].mxu1  ;;  %v6411_v60 = vpop.f32.mrb[13].mxu0 }
 0x11f   : > { %v6412_v61 = vadd.f32 %v6411_v60, %v6410_v57  ;;  %v6451_v62 = vpop.f32.mrb[13].mxu1  ;;  %v6413_v63 = vpop.f32.mrb[14].mxu0 }
 0x120   : > { %v6452_v1 = vadd.f32 %v6451_v62, %v6450_v59  ;;  %v6453_v2 = vpop.f32.mrb[14].mxu1  ;;  %v6414_v5 = vpop.f32.mrb[15].mxu0 }
 0x121   : > { %v1966_v4 = vadd.f32 %v6412_v61, %v841_v3  ;;  %v6454_v7 = vpop.f32.mrb[15].mxu1 }
 0x123   : > { %v2030_v8 = vadd.f32 %v6452_v1, %v1966_v4 }
 0x125   : > { %v6472_v9 = vpop.f32.mrb[16].mxu0 }
 0x126   : > { %v6512_v10 = vpop.f32.mrb[16].mxu1  ;;  %v6473_v11 = vpop.f32.mrb[17].mxu0 }
 0x127   : > { %v6474_v12 = vadd.f32 %v6473_v11, %v6472_v9  ;;  %v6513_v13 = vpop.f32.mrb[17].mxu1  ;;  %v6475_v14 = vpop.f32.mrb[18].mxu0 }
 0x128   : > { %v6514_v15 = vadd.f32 %v6513_v13, %v6512_v10  ;;  %v6515_v16 = vpop.f32.mrb[18].mxu1  ;;  %v6476_v17 = vpop.f32.mrb[19].mxu0 }
 0x129   : > { %v2070_v18 = vadd.f32 %v6474_v12, %v2006_v24  ;;  %v6477_v19 = vadd.f32 %v6476_v17, %v6475_v14  ;;  %v6516_v20 = vpop.f32.mrb[19].mxu1 }
 0x12a   : > { %v6517_v21 = vadd.f32 %v6516_v20, %v6515_v16 }
 0x12b   : > { %v2073_v22 = vadd.f32 %v6477_v19, %v2009_v36  ;;  %v2134_v23 = vadd.f32 %v6514_v15, %v2070_v18 }
 0x12d   : > { %v2137_v25 = vadd.f32 %v6517_v21, %v2073_v22  ;;  %v6478_v26 = vpop.f32.mrb[20].mxu0 }
 0x12e   : > { %v6518_v27 = vpop.f32.mrb[20].mxu1  ;;  %v6479_v28 = vpop.f32.mrb[21].mxu0 }
 0x12f   : > { %v6480_v29 = vadd.f32 %v6479_v28, %v6478_v26  ;;  %v6519_v30 = vpop.f32.mrb[21].mxu1  ;;  %v6481_v31 = vpop.f32.mrb[22].mxu0 }
 0x130   : > { %v6520_v32 = vadd.f32 %v6519_v30, %v6518_v27  ;;  %v6521_v33 = vpop.f32.mrb[22].mxu1  ;;  %v6482_v34 = vpop.f32.mrb[23].mxu0 }
 0x131   : > { %v2078_v35 = vadd.f32 %v6480_v29, %v2014_v46  ;;  %v6483_v37 = vadd.f32 %v6482_v34, %v6481_v31  ;;  %v6522_v38 = vpop.f32.mrb[23].mxu1 }
 0x132   : > { %v6523_v39 = vadd.f32 %v6522_v38, %v6521_v33 }
 0x133   : > { %v2081_v24 = vadd.f32 %v6483_v37, %v2017_v54  ;;  %v2142_v40 = vadd.f32 %v6520_v32, %v2078_v35 }
 0x135   : > { %v2145_v41 = vadd.f32 %v6523_v39, %v2081_v24  ;;  %v6484_v42 = vpop.f32.mrb[24].mxu0 }
 0x136   : > { %v6524_v36 = vpop.f32.mrb[24].mxu1  ;;  %v6485_v43 = vpop.f32.mrb[25].mxu0 }
 0x137   : > { %v6486_v44 = vadd.f32 %v6485_v43, %v6484_v42  ;;  %v6525_v45 = vpop.f32.mrb[25].mxu1  ;;  %v6487_v47 = vpop.f32.mrb[26].mxu0 }
 0x138   : > { %v6526_v48 = vadd.f32 %v6525_v45, %v6524_v36  ;;  %v6527_v49 = vpop.f32.mrb[26].mxu1  ;;  %v6488_v50 = vpop.f32.mrb[27].mxu0 }
 0x139   : > { %v2086_v51 = vadd.f32 %v6486_v44, %v2022_v55  ;;  %v6489_v52 = vadd.f32 %v6488_v50, %v6487_v47  ;;  %v6528_v53 = vpop.f32.mrb[27].mxu1 }
 0x13a   : > { %v6529_v56 = vadd.f32 %v6528_v53, %v6527_v49 }
 0x13b   : > { %v2089_v46 = vadd.f32 %v6489_v52, %v2025_v0  ;;  %v2150_v57 = vadd.f32 %v6526_v48, %v2086_v51 }
 0x13d   : > { %v2153_v58 = vadd.f32 %v6529_v56, %v2089_v46  ;;  %v6490_v59 = vpop.f32.mrb[28].mxu0 }
 0x13e   : > { %v6530_v54 = vpop.f32.mrb[28].mxu1  ;;  %v6491_v60 = vpop.f32.mrb[29].mxu0 }
 0x13f   : > { %v6492_v61 = vadd.f32 %v6491_v60, %v6490_v59  ;;  %v6531_v62 = vpop.f32.mrb[29].mxu1  ;;  %v6493_v63 = vpop.f32.mrb[30].mxu0 }
 0x140   : > { %v6532_v1 = vadd.f32 %v6531_v62, %v6530_v54  ;;  %v6533_v2 = vpop.f32.mrb[30].mxu1  ;;  %v6494_v3 = vpop.f32.mrb[31].mxu0 }
 0x141   : > { %v2094_v4 = vadd.f32 %v6492_v61, %v2030_v8  ;;  %v6534_v5 = vpop.f32.mrb[31].mxu1 }
 0x143   : > { %v2158_v7 = vadd.f32 %v6532_v1, %v2094_v4 }
 0x145   : > { %v6552_v9 = vpop.f32.mrb[32].mxu0 }
 0x146   : > { %v6592_v55 = vpop.f32.mrb[32].mxu1  ;;  %v6553_v10 = vpop.f32.mrb[33].mxu0 }
 0x147   : > { %v6554_v11 = vadd.f32 %v6553_v10, %v6552_v9  ;;  %v6593_v12 = vpop.f32.mrb[33].mxu1  ;;  %v6555_v0 = vpop.f32.mrb[34].mxu0 }
 0x148   : > { %v6594_v13 = vadd.f32 %v6593_v12, %v6592_v55  ;;  %v6595_v14 = vpop.f32.mrb[34].mxu1  ;;  %v6556_v15 = vpop.f32.mrb[35].mxu0 }
 0x149   : > { %v2198_v16 = vadd.f32 %v6554_v11, %v2134_v23  ;;  %v6557_v17 = vadd.f32 %v6556_v15, %v6555_v0  ;;  %v6596_v18 = vpop.f32.mrb[35].mxu1 }
 0x14a   : > { %v6597_v19 = vadd.f32 %v6596_v18, %v6595_v14 }
 0x14b   : > { %v2201_v20 = vadd.f32 %v6557_v17, %v2137_v25  ;;  %v2262_v21 = vadd.f32 %v6594_v13, %v2198_v16 }
 0x14d   : > { %v2265_v22 = vadd.f32 %v6597_v19, %v2201_v20  ;;  %v6558_v26 = vpop.f32.mrb[36].mxu0 }
 0x14e   : > { %v6598_v8 = vpop.f32.mrb[36].mxu1  ;;  %v6559_v27 = vpop.f32.mrb[37].mxu0 }
 0x14f   : > { %v6599_v28 = vpop.f32.mrb[37].mxu1  ;;  %v6560_v29 = vadd.f32 %v6559_v27, %v6558_v26  ;;  %v6561_v31 = vpop.f32.mrb[38].mxu0 }
 0x150   : > { %v6600_v30 = vadd.f32 %v6599_v28, %v6598_v8  ;;  %v6601_v32 = vpop.f32.mrb[38].mxu1  ;;  %v6562_v33 = vpop.f32.mrb[39].mxu0 }
 0x151   : > { %v6602_v34 = vpop.f32.mrb[39].mxu1  ;;  %v2206_v35 = vadd.f32 %v6560_v29, %v2142_v40  ;;  %v6563_v37 = vadd.f32 %v6562_v33, %v6561_v31 }
 0x152   : > { %v6603_v38 = vadd.f32 %v6602_v34, %v6601_v32 }
 0x153   : > { %v2209_v23 = vadd.f32 %v6563_v37, %v2145_v41  ;;  %v2270_v39 = vadd.f32 %v6600_v30, %v2206_v35 }
 0x155   : > { %v8054_v24 = vadd.f32 %v6603_v38, %v2209_v23  ;;  %v6564_v25 = vpop.f32.mrb[40].mxu0 }
 0x156   : > { %v6604_v42 = vpop.f32.mrb[40].mxu1  ;;  %v6565_v36 = vpop.f32.mrb[41].mxu0 }
 0x157   : > { %v6566_v43 = vadd.f32 %v6565_v36, %v6564_v25  ;;  %v6605_v44 = vpop.f32.mrb[41].mxu1  ;;  %v6567_v45 = vpop.f32.mrb[42].mxu0 }
 0x158   : > { %v6606_v47 = vadd.f32 %v6605_v44, %v6604_v42  ;;  %v6607_v48 = vpop.f32.mrb[42].mxu1  ;;  %v6568_v49 = vpop.f32.mrb[43].mxu0 }
 0x159   : > { %v2214_v50 = vadd.f32 %v6566_v43, %v2150_v57  ;;  %v6569_v51 = vadd.f32 %v6568_v49, %v6567_v45  ;;  %v6608_v52 = vpop.f32.mrb[43].mxu1 }
 0x15a   : > { %v6609_v53 = vadd.f32 %v6608_v52, %v6607_v48 }
 0x15b   : > { %v2217_v40 = vadd.f32 %v6569_v51, %v2153_v58  ;;  %v2278_v56 = vadd.f32 %v6606_v47, %v2214_v50 }
 0x15d   : > { %v8056_v46 = vadd.f32 %v6609_v53, %v2217_v40  ;;  %v6570_v41 = vpop.f32.mrb[44].mxu0 }
 0x15e   : > { %v6610_v59 = vpop.f32.mrb[44].mxu1  ;;  %v6571_v54 = vpop.f32.mrb[45].mxu0 }
 0x15f   : > { %v6572_v60 = vadd.f32 %v6571_v54, %v6570_v41  ;;  %v6611_v61 = vpop.f32.mrb[45].mxu1  ;;  %v6573_v62 = vpop.f32.mrb[46].mxu0 }
 0x160   : > { %v6612_v63 = vadd.f32 %v6611_v61, %v6610_v59  ;;  %v6613_v1 = vpop.f32.mrb[46].mxu1  ;;  %v6574_v2 = vpop.f32.mrb[47].mxu0 }
 0x161   : > { %v2222_v3 = vadd.f32 %v6572_v60, %v2158_v7  ;;  %v6614_v4 = vpop.f32.mrb[47].mxu1 }
 0x163   : > { %v8058_v5 = vadd.f32 %v6612_v63, %v2222_v3 }
 0x165   : > { %v6632_v57 = vpop.f32.mrb[48].mxu0 }
 0x166   : > { %v6672_v9 = vpop.f32.mrb[48].mxu1  ;;  %v6633_v55 = vpop.f32.mrb[49].mxu0 }
 0x167   : > { %v6634_v58 = vadd.f32 %v6633_v55, %v6632_v57  ;;  %v6673_v10 = vpop.f32.mrb[49].mxu1  ;;  %v6635_v11 = vpop.f32.mrb[50].mxu0 }
 0x168   : > { %v6674_v12 = vadd.f32 %v6673_v10, %v6672_v9  ;;  %v6675_v0 = vpop.f32.mrb[50].mxu1  ;;  %v6636_v13 = vpop.f32.mrb[51].mxu0  ;;  %v2456_v9 = vsel %vm2454_vm1, 65535, %v7668_v6  ;;  %v7529_v10 = vld [vmem:[%s9475_s3 + $0x8] sm:$0xff]  }
 0x169   : > { %v2326_v14 = vadd.f32 %v6634_v58, %v2262_v21  ;;  %v6637_v15 = vadd.f32 %v6636_v13, %v6635_v11  ;;  %v6676_v16 = vpop.f32.mrb[51].mxu1  ;;  %v7531_v6 = vld [vmem:[%s9475_s3 + $0x18] ss:$0 sps:$4 sm:$0x11]   ;;  %v7532_v11 = vld [vmem:[%s9476_s4] sm:$0xff]  }
 0x16a   : > { %v6677_v17 = vadd.f32 %v6676_v16, %v6675_v0 }
 0x16b   : > { %v2390_v18 = vadd.f32 %v6674_v12, %v2326_v14  ;;  %v2329_v19 = vadd.f32 %v6637_v15, %v2265_v22 }
 0x16d   : > { %v2393_v20 = vadd.f32 %v6677_v17, %v2329_v19  ;;  %v6638_v7 = vpop.f32.mrb[52].mxu0 }
 0x16e   : > { %v6678_v26 = vpop.f32.mrb[52].mxu1  ;;  %v6639_v8 = vpop.f32.mrb[53].mxu0 }
 0x16f   : > { %v8060_v27 = vpack.c.bf16 %v2393_v20, %v2390_v18  ;;  %v6640_v28 = vadd.f32 %v6639_v8, %v6638_v7  ;;  %v6679_v29 = vpop.f32.mrb[53].mxu1  ;;  %v6641_v30 = vpop.f32.mrb[54].mxu0 }
 0x170   : > { %v6680_v31 = vadd.f32 %v6679_v29, %v6678_v26  ;;  %v6681_v32 = vpop.f32.mrb[54].mxu1  ;;  %v6642_v33 = vpop.f32.mrb[55].mxu0 }
 0x171   : > { %v2334_v34 = vadd.f32 %v6640_v28, %v2270_v39  ;;  %v6643_v35 = vadd.f32 %v6642_v33, %v6641_v30  ;;  %v6682_v21 = vpop.f32.mrb[55].mxu1  ;;  %7028 = vmatprep.subr.bf16.mxu1 %v8060_v27  ;;  %6852 = vmatprep.mubr.msk.bf16.mxu0 %vm2441_vm0, %v8060_v27 }
 0x172   : > { %v6683_v22 = vadd.f32 %v6682_v21, %v6681_v32  ;;  %7029 = vmatpush3.bf16.msra.mxu1 %v8060_v27  ;;  %v7534_v21 = vld [vmem:[%s9476_s4 + $0x10] sm:$0xff]  }
 0x173   : > { %v2398_v37 = vadd.f32 %v6680_v31, %v2334_v34  ;;  %v2337_v38 = vadd.f32 %v6643_v35, %v8054_v24  ;;  %v7533_v35 = vld [vmem:[%s9476_s4 + $0x8] sm:$0xff]  }
 0x175   : > { %v2401_v23 = vadd.f32 %v6683_v22, %v2337_v38  ;;  %v6644_v25 = vpop.f32.mrb[56].mxu0  ;;  %v7535_v22 = vld [vmem:[%s9476_s4 + $0x18] sm:$0xff]   ;;  %v7537_v38 = vld [vmem:[%s9476_s4 + $0x28] sm:$0xff]  }
 0x176   : > { %v6684_v42 = vpop.f32.mrb[56].mxu1  ;;  %v6645_v36 = vpop.f32.mrb[57].mxu0 }
 0x177   : > { %v8067_v43 = vpack.c.bf16 %v2401_v23, %v2398_v37  ;;  %v6646_v39 = vadd.f32 %v6645_v36, %v6644_v25  ;;  %v6685_v44 = vpop.f32.mrb[57].mxu1  ;;  %v6647_v45 = vpop.f32.mrb[58].mxu0  ;;  %v7536_v37 = vld [vmem:[%s9476_s4 + $0x20] sm:$0xff]   ;;  %v7538_v23 = vld [vmem:[%s9476_s4 + $0x30] sm:$0xff]   ;;  %v7539_v25 = vld [vmem:[%s9476_s4 + $0x38] sm:$0xff]  }
 0x178   : > { %v6686_v47 = vadd.f32 %v6685_v44, %v6684_v42  ;;  %v6687_v48 = vpop.f32.mrb[58].mxu1  ;;  %v6648_v49 = vpop.f32.mrb[59].mxu0  ;;  %v7540_v42 = vld [vmem:[%s9476_s4 + $0x40] sm:$0xff]   ;;  %v7541_v36 = vld [vmem:[%s9476_s4 + $0x48] sm:$0xff]   ;;  %v7543_v44 = vld [vmem:[%s9476_s4 + $0x58] sm:$0xff]  }
 0x179   : > { %v2342_v50 = vadd.f32 %v6646_v39, %v2278_v56  ;;  %v6649_v51 = vadd.f32 %v6648_v49, %v6647_v45  ;;  %v6688_v52 = vpop.f32.mrb[59].mxu1  ;;  %7030 = vmatprep.subr.bf16.mxu1 %v8067_v43  ;;  %v7542_v39 = vld [vmem:[%s9476_s4 + $0x50] sm:$0xff]   ;;  %v7544_v45 = vld [vmem:[%s9476_s4 + $0x60] sm:$0xff]   ;;  %v7547_v49 = vld [vmem:[%s9476_s4 + $0x78] sm:$0xff]  }
 0x17a   : > { %v6689_v53 = vadd.f32 %v6688_v52, %v6687_v48  ;;  %7031 = vmatpush3.bf16.msra.mxu1 %v8067_v43  ;;  %v7546_v48 = vld [vmem:[%s9476_s4 + $0x70] sm:$0xff]  }
 0x17b   : > { %v2406_v24 = vadd.f32 %v6686_v47, %v2342_v50  ;;  %v2345_v40 = vadd.f32 %v6649_v51, %v8056_v46  ;;  %v7545_v47 = vld [vmem:[%s9476_s4 + $0x68] sm:$0xff]   ;;  %v7548_v50 = vld [vmem:[%s9476_s4 + $0x80] sm:$0xff]   ;;  %v7550_v52 = vld [vmem:[%s9476_s4 + $0x90] sm:$0xff]  }
 0x17c   : > { %v7549_v51 = vld [vmem:[%s9476_s4 + $0x88] sm:$0xff]  }
 0x17d   : > { %v2409_v41 = vadd.f32 %v6689_v53, %v2345_v40  ;;  %v6650_v59 = vpop.f32.mrb[60].mxu0  ;;  %v7551_v53 = vld [vmem:[%s9476_s4 + $0x98] sm:$0xff]   ;;  %v7553_v40 = vld [vmem:[%s9476_s4 + $0xa8] sm:$0xff]  }
 0x17e   : > { %v6690_v54 = vpop.f32.mrb[60].mxu1  ;;  %v6651_v60 = vpop.f32.mrb[61].mxu0 }
 0x17f   : > { %v8072_v61 = vpack.c.bf16 %v2409_v41, %v2406_v24  ;;  %v6652_v62 = vadd.f32 %v6651_v60, %v6650_v59  ;;  %v6691_v63 = vpop.f32.mrb[61].mxu1  ;;  %v6653_v1 = vpop.f32.mrb[62].mxu0  ;;  %v7552_v24 = vld [vmem:[%s9476_s4 + $0xa0] sm:$0xff]   ;;  %v7554_v41 = vld [vmem:[%s9476_s4 + $0xb0] sm:$0xff]   ;;  %v7555_v59 = vld [vmem:[%s9476_s4 + $0xb8] sm:$0xff]  }
 0x180   : > { %v6692_v56 = vadd.f32 %v6691_v63, %v6690_v54  ;;  %v6693_v2 = vpop.f32.mrb[62].mxu1  ;;  %v6654_v3 = vpop.f32.mrb[63].mxu0  ;;  %v7556_v54 = vld [vmem:[%s9476_s4 + $0xc0] sm:$0xff]   ;;  %v7557_v60 = vld [vmem:[%s9476_s4 + $0xc8] sm:$0xff]   ;;  %v7559_v63 = vld [vmem:[%s9476_s4 + $0xd8] sm:$0xff]  }
 0x181   : > { %v2350_v4 = vadd.f32 %v6652_v62, %v8058_v5  ;;  %v6694_v57 = vpop.f32.mrb[63].mxu1  ;;  %7032 = vmatprep.subr.bf16.mxu1 %v8072_v61  ;;  %v7530_v5 = vld [vmem:[%s9475_s3 + $0x10] sm:$0xff]   ;;  %v7560_v1 = vld [vmem:[%s9476_s4 + $0xe0] sm:$0xff]   ;;  %v7563_v3 = vld [vmem:[%s9476_s4 + $0xf8] sm:$0xff]  }
 0x182   : > { %7033 = vmatpush3.bf16.msra.mxu1 %v8072_v61  ;;  %v7558_v62 = vld [vmem:[%s9476_s4 + $0xd0] sm:$0xff]   ;;  %v7565_v57 = vld [vmem:[%s9476_s4 + $0x108] sm:$0xff]  }
 0x183   : > { %v2414_v46 = vadd.f32 %v6692_v56, %v2350_v4  ;;  %v7561_v56 = vld [vmem:[%s9476_s4 + $0xe8] sm:$0xff]   ;;  %v7562_v2 = vld [vmem:[%s9476_s4 + $0xf0] sm:$0xff]   ;;  %v7564_v4 = vld [vmem:[%s9476_s4 + $0x100] sm:$0xff]  }
 0x185   : > { %v8078_v55 = vpack.c.bf16 %v2414_v46, %v2414_v46  ;;  %v7566_v46 = vld [vmem:[%s9476_s4 + $0x110] sm:$0xff]  }
 0x187   : > { %v2458_v58 = vand.u32 %v2456_v9, %v8078_v55 }
 0x189   : > { %7034 = vmatprep.subr.bf16.mxu1 %v2458_v58 }
 0x18a   : > { %7035 = vmatpush3.bf16.msra.mxu1 %v2458_v58  ;;  %v7568_v58 = vld [vmem:[%s9476_s4 + $0x120] sm:$0xff]  }
 0x18d   : > { %7037 = vmatmul.mubr.msk.bf16.vlgmr.msra.gmra.mrb[64].mxu1 %vm2441_vm0, %v7529_v10  ;;  %v7569_v10 = vld [vmem:[%s9476_s4 + $0x128] sm:$0xff]  }
 0x18e   : > { %7040 = vmatprep.mubr.msk.bf16.mxu1 %vm2441_vm0, %v7530_v5  ;;  %v7570_v5 = vld [vmem:[%s9476_s4 + $0x130] sm:$0xff]  }
 0x195   : > { %7041 = vmatmul.mubr.msk.bf16.gmra.mrb[68].mxu1 %vm2441_vm0, %v7531_v6  ;;  %v7571_v6 = vld [vmem:[%s9476_s4 + $0x138] sm:$0xff]  }
 0x196   : > { %7052 = vmatprep.mubr.msk.bf16.mxu1 %vm2441_vm0, %v7532_v11  ;;  %v7572_v11 = vld [vmem:[%s9476_s4 + $0x140] sm:$0xff]  }
 0x260   : > { %v7038_v12 = vpop.f32.mrb[64].mxu1 }
 0x261   : > { %v2494_v0 = vpop.f32.mrb[65].mxu1  ;;  %v2526_v14 = vmax.f32 %v7038_v12, 0.0  ;;  %v7573_v12 = vld [vmem:[%s9476_s4 + $0x148] sm:$0xff]  }
 0x262   : > { %v7039_v13 = vpop.f32.mrb[66].mxu1  ;;  %v2524_v17 = vmax.f32 %v2494_v0, 0.0  ;;  %v7574_v0 = vld [vmem:[%s9476_s4 + $0x150] sm:$0xff]  }
 0x263   : > { %v2527_v15 = vmax.f32 %v7039_v13, 0.0  ;;  %v2497_v16 = vpop.f32.mrb[67].mxu1  ;;  %v7575_v13 = vld [vmem:[%s9476_s4 + $0x158] sm:$0xff]  }
 0x264   : > { %v2525_v18 = vmax.f32 %v2497_v16, 0.0  ;;  %v7578_v16 = vld [vmem:[%s9476_s4 + $0x170] sm:$0xff]  }
 0x265   : > { %v2532_v19 = vpack.c.bf16 %v2527_v15, %v2526_v14  ;;  %v7576_v14 = vld [vmem:[%s9476_s4 + $0x160] sm:$0xff]   ;;  %v7577_v15 = vld [vmem:[%s9476_s4 + $0x168] sm:$0xff]  }
 0x266   : > { %v2531_v20 = vpack.c.bf16 %v2525_v18, %v2524_v17  ;;  %v7579_v17 = vld [vmem:[%s9476_s4 + $0x178] sm:$0xff]   ;;  %v7580_v18 = vld [vmem:[%s9476_s4 + $0x180] sm:$0xff]  }
 0x268   : > { %v7042_v7 = vpop.f32.mrb[68].mxu1  ;;  %7044 = vmatprep.subr.bf16.mxu1 %v2531_v20 }
 0x269   : > { %v2530_v26 = vmax.f32 %v7042_v7, 0.0  ;;  %v2510_v8 = vpop.f32.mrb[69].mxu1  ;;  %7045 = vmatpush3.bf16.msra.mxu1 %v2531_v20  ;;  %v7582_v20 = vld [vmem:[%s9476_s4 + $0x190] sm:$0xff]   ;;  %v7583_v7 = vld [vmem:[%s9476_s4 + $0x198] sm:$0xff]  }
 0x26a   : > { %v7043_v28 = vpop.f32.mrb[70].mxu1  ;;  %7046 = vmatprep.subr.bf16.mxu1 %v2532_v19  ;;  %v2528_v31 = vmax.f32 %v2510_v8, 0.0  ;;  %v7585_v8 = vld [vmem:[%s9476_s4 + $0x1a8] sm:$0xff]  }
 0x26b   : > { %v2513_v29 = vpop.f32.mrb[71].mxu1  ;;  %v2534_v30 = vpack.c.bf16 %v2530_v26, %v2530_v26  ;;  %v7584_v26 = vld [vmem:[%s9476_s4 + $0x1a0] sm:$0xff]   ;;  %v7586_v28 = vld [vmem:[%s9476_s4 + $0x1b0] sm:$0xff]  }
 0x26c   : > { %v2529_v32 = vmax.f32 %v2513_v29, 0.0 }
 0x26d   : > { %7047 = vmatpush3.bf16.msra.mxu1 %v2532_v19  ;;  %v3560_v34 = vand.u32 %v2534_v30, %v2456_v9  ;;  %v7567_v9 = vld [vmem:[%s9476_s4 + $0x118] sm:$0xff]   ;;  %v7581_v19 = vld [vmem:[%s9476_s4 + $0x188] sm:$0xff]  }
 0x26e   : > { %v2533_v33 = vpack.c.bf16 %v2529_v32, %v2528_v31  ;;  %v7587_v31 = vld [vmem:[%s9476_s4 + $0x1b8] sm:$0xff]  }
 0x270   : > { %7048 = vmatprep.subr.bf16.mxu1 %v2533_v33 }
 0x271   : > { %7049 = vmatpush3.bf16.msra.mxu1 %v2533_v33  ;;  %v7588_v33 = vld [vmem:[%s9476_s4 + $0x1c0] sm:$0xff]  }
 0x272   : > { %7050 = vmatprep.subr.bf16.mxu1 %v3560_v34 }
 0x275   : > { %7051 = vmatpush3.bf16.msra.mxu1 %v3560_v34 }
 0x278   : > { %7053 = vmatmul.mubr.msk.bf16.vlgmr.msra.gmra.mrb[72].mxu1 %vm2441_vm0, %v7533_v35 }
 0x279   : > { %7056 = vmatprep.mubr.msk.bf16.mxu1 %vm2441_vm0, %v7534_v21 }
 0x280   : > { %7057 = vmatmul.mubr.msk.bf16.gmra.mrb[76].mxu1 %vm2441_vm0, %v7535_v22 }
 0x281   : > { %7060 = vmatprep.mubr.msk.bf16.mxu1 %vm2441_vm0, %v7536_v37 }
 0x288   : > { %7061 = vmatmul.mubr.msk.bf16.gmra.mrb[80].mxu1 %vm2441_vm0, %v7537_v38  ;;  %v7589_v38 = vld [vmem:[%s9476_s4 + $0x1c8] sm:$0xff]  }
 0x289   : > { %7064 = vmatprep.mubr.msk.bf16.mxu1 %vm2441_vm0, %v7538_v23 }
 0x290   : > { %7065 = vmatmul.mubr.msk.bf16.gmra.mrb[84].mxu1 %vm2441_vm0, %v7539_v25  ;;  %v7590_v25 = vld [vmem:[%s9476_s4 + $0x1d0] sm:$0xff]  }
 0x291   : > { %7068 = vmatprep.mubr.msk.bf16.mxu1 %vm2441_vm0, %v7540_v42 }
 0x298   : > { %7069 = vmatmul.mubr.msk.bf16.gmra.mrb[88].mxu1 %vm2441_vm0, %v7541_v36 }
 0x299   : > { %7072 = vmatprep.mubr.msk.bf16.mxu1 %vm2441_vm0, %v7542_v39 }
 0x2a0   : > { %7073 = vmatmul.mubr.msk.bf16.gmra.mrb[92].mxu1 %vm2441_vm0, %v7543_v44 }
 0x2a1   : > { %7076 = vmatprep.mubr.msk.bf16.mxu1 %vm2441_vm0, %v7544_v45 }
 0x2a8   : > { %7077 = vmatmul.mubr.msk.bf16.gmra.mrb[96].mxu1 %vm2441_vm0, %v7545_v47  ;;  %v7591_v47 = vld [vmem:[%s9476_s4 + $0x1d8] sm:$0xff]  }
 0x2a9   : > { %7080 = vmatprep.mubr.msk.bf16.mxu1 %vm2441_vm0, %v7546_v48 }
 0x2b0   : > { %7081 = vmatmul.mubr.msk.bf16.gmra.mrb[100].mxu1 %vm2441_vm0, %v7547_v49  ;;  %v7592_v49 = vld [vmem:[%s9476_s4 + $0x1e0] sm:$0xff]  }
 0x2b1   : > { %7084 = vmatprep.mubr.msk.bf16.mxu1 %vm2441_vm0, %v7548_v50 }
 0x2b8   : > { %7085 = vmatmul.mubr.msk.bf16.gmra.mrb[104].mxu1 %vm2441_vm0, %v7549_v51 }
 0x2b9   : > { %7088 = vmatprep.mubr.msk.bf16.mxu1 %vm2441_vm0, %v7550_v52 }
 0x2c0   : > { %7089 = vmatmul.mubr.msk.bf16.gmra.mrb[108].mxu1 %vm2441_vm0, %v7551_v53 }
 0x2c1   : > { %7092 = vmatprep.mubr.msk.bf16.mxu1 %vm2441_vm0, %v7552_v24 }
 0x2c8   : > { %7093 = vmatmul.mubr.msk.bf16.gmra.mrb[112].mxu1 %vm2441_vm0, %v7553_v40  ;;  %v7593_v40 = vld [vmem:[%s9476_s4 + $0x1e8] sm:$0xff]  }
 0x2c9   : > { %7096 = vmatprep.mubr.msk.bf16.mxu1 %vm2441_vm0, %v7554_v41 }
 0x2d0   : > { %7097 = vmatmul.mubr.msk.bf16.gmra.mrb[116].mxu1 %vm2441_vm0, %v7555_v59  ;;  %v7594_v59 = vld [vmem:[%s9476_s4 + $0x1f0] sm:$0xff]  }
 0x2d1   : > { %7100 = vmatprep.mubr.msk.bf16.mxu1 %vm2441_vm0, %v7556_v54 }
 0x2d8   : > { %7101 = vmatmul.mubr.msk.bf16.gmra.mrb[120].mxu1 %vm2441_vm0, %v7557_v60 }
 0x2d9   : > { %7104 = vmatprep.mubr.msk.bf16.mxu1 %vm2441_vm0, %v7558_v62 }
 0x2e0   : > { %7105 = vmatmul.mubr.msk.bf16.gmra.mrb[124].mxu1 %vm2441_vm0, %v7559_v63 }
 0x2e1   : > { %7108 = vmatprep.mubr.msk.bf16.mxu1 %vm2441_vm0, %v7560_v1 }
 0x2e8   : > { %7109 = vmatmul.mubr.msk.bf16.gmra.mrb[128].mxu1 %vm2441_vm0, %v7561_v56  ;;  %v7595_v56 = vld [vmem:[%s9476_s4 + $0x1f8] sm:$0xff]  }
 0x2e9   : > { %7112 = vmatprep.mubr.msk.bf16.mxu1 %vm2441_vm0, %v7562_v2 }
 0x2f0   : > { %7113 = vmatmul.mubr.msk.bf16.gmra.mrb[132].mxu1 %vm2441_vm0, %v7563_v3  ;;  %v7596_v3 = vld [vmem:[%s9476_s4 + $0x200] sm:$0xff]  }
 0x2f1   : > { %7116 = vmatprep.mubr.msk.bf16.mxu1 %vm2441_vm0, %v7564_v4 }
 0x2f8   : > { %7117 = vmatmul.mubr.msk.bf16.gmra.mrb[136].mxu1 %vm2441_vm0, %v7565_v57 }
 0x2f9   : > { %7120 = vmatprep.mubr.msk.bf16.mxu1 %vm2441_vm0, %v7566_v46 }
 0x300   : > { %7121 = vmatmul.mubr.msk.bf16.gmra.mrb[140].mxu1 %vm2441_vm0, %v7567_v9 }
 0x301   : > { %7124 = vmatprep.mubr.msk.bf16.mxu1 %vm2441_vm0, %v7568_v58 }
 0x308   : > { %7125 = vmatmul.mubr.msk.bf16.gmra.mrb[144].mxu1 %vm2441_vm0, %v7569_v10 }
 0x309   : > { %7128 = vmatprep.mubr.msk.bf16.mxu1 %vm2441_vm0, %v7570_v5  ;;  %v7597_v5 = vld [vmem:[%s9476_s4 + $0x208] sm:$0xff]  }
 0x310   : > { %7129 = vmatmul.mubr.msk.bf16.gmra.mrb[148].mxu1 %vm2441_vm0, %v7571_v6 }
 0x311   : > { %7132 = vmatprep.mubr.msk.bf16.mxu1 %vm2441_vm0, %v7572_v11  ;;  %v7598_v11 = vld [vmem:[%s9476_s4 + $0x210] sm:$0xff]  }
 0x318   : > { %7133 = vmatmul.mubr.msk.bf16.gmra.mrb[152].mxu1 %vm2441_vm0, %v7573_v12 }
 0x319   : > { %7136 = vmatprep.mubr.msk.bf16.mxu1 %vm2441_vm0, %v7574_v0 }
 0x320   : > { %7137 = vmatmul.mubr.msk.bf16.gmra.mrb[156].mxu1 %vm2441_vm0, %v7575_v13 }
 0x321   : > { %7140 = vmatprep.mubr.msk.bf16.mxu1 %vm2441_vm0, %v7576_v14 }
 0x328   : > { %7141 = vmatmul.mubr.msk.bf16.gmra.mrb[160].mxu1 %vm2441_vm0, %v7577_v15 }
 0x329   : > { %7144 = vmatprep.mubr.msk.bf16.mxu1 %vm2441_vm0, %v7578_v16 }
 0x330   : > { %7145 = vmatmul.mubr.msk.bf16.gmra.mrb[164].mxu1 %vm2441_vm0, %v7579_v17  ;;  %v7599_v17 = vld [vmem:[%s9476_s4 + $0x218] sm:$0xff]  }
 0x331   : > { %7148 = vmatprep.mubr.msk.bf16.mxu1 %vm2441_vm0, %v7580_v18 }
 0x338   : > { %7149 = vmatmul.mubr.msk.bf16.gmra.mrb[168].mxu1 %vm2441_vm0, %v7581_v19  ;;  %v7600_v19 = vld [vmem:[%s9476_s4 + $0x220] sm:$0xff]  }
 0x339   : > { %7152 = vmatprep.mubr.msk.bf16.mxu1 %vm2441_vm0, %v7582_v20 }
 0x340   : > { %7153 = vmatmul.mubr.msk.bf16.gmra.mrb[172].mxu1 %vm2441_vm0, %v7583_v7 }
 0x341   : > { %7156 = vmatprep.mubr.msk.bf16.mxu1 %vm2441_vm0, %v7584_v26 }
 0x348   : > { %7157 = vmatmul.mubr.msk.bf16.gmra.mrb[176].mxu1 %vm2441_vm0, %v7585_v8 }
 0x349   : > { %7160 = vmatprep.mubr.msk.bf16.mxu1 %vm2441_vm0, %v7586_v28 }
 0x34b   : > { %v8313_v29 = vpop.f32.mrb[72].mxu1 }
 0x34c   : > { %v3596_v30 = vpop.f32.mrb[73].mxu1 }
 0x34d   : > { %v7055_v32 = vpop.f32.mrb[74].mxu1 }
 0x34e   : > { %v4620_v34 = vpack.c.bf16 %v7055_v32, %v8313_v29  ;;  %v3599_v35 = vpop.f32.mrb[75].mxu1  ;;  %v7602_v32 = vld [vmem:[%s9476_s4 + $0x230] sm:$0xff]  }
 0x34f   : > { %v4619_v21 = vpack.c.bf16 %v3599_v35, %v3596_v30  ;;  %v7601_v30 = vld [vmem:[%s9476_s4 + $0x228] sm:$0xff]  }
 0x350   : > { %7161 = vmatmul.mubr.msk.bf16.gmra.mrb[180].mxu1 %vm2441_vm0, %v7587_v31  ;;  %v4762_v14 = vsel %vm2441_vm0, %v4620_v34, 0 }
 0x351   : > { %7164 = vmatprep.mubr.msk.bf16.mxu1 %vm2441_vm0, %v7588_v33  ;;  %v4759_v9 = vsel %vm2441_vm0, %v4619_v21, 0 }
 0x353   : > { %v8324_v22 = vpop.f32.mrb[76].mxu1 }
 0x354   : > { %v8326_v37 = vpop.f32.mrb[77].mxu1 }
 0x355   : > { %v8331_v23 = vpop.f32.mrb[78].mxu1 }
 0x356   : > { %v4622_v42 = vpack.c.bf16 %v8331_v23, %v8324_v22  ;;  %v3615_v36 = vpop.f32.mrb[79].mxu1  ;;  %v7604_v22 = vld [vmem:[%s9476_s4 + $0x240] sm:$0xff]  }
 0x357   : > { %v4621_v39 = vpack.c.bf16 %v3615_v36, %v8326_v37 }
 0x358   : > { %7165 = vmatmul.mubr.msk.bf16.gmra.mrb[184].mxu1 %vm2441_vm0, %v7589_v38  ;;  %v4768_v21 = vsel %vm2441_vm0, %v4622_v42, 0 }
 0x359   : > { %7168 = vmatprep.mubr.msk.bf16.mxu1 %vm2441_vm0, %v7590_v25  ;;  %v4765_v8 = vsel %vm2441_vm0, %v4621_v39, 0  ;;  %v7603_v25 = vld [vmem:[%s9476_s4 + $0x238] sm:$0xff]  }
 0x35b   : > { %v8341_v44 = vpop.f32.mrb[80].mxu1 }
 0x35c   : > { %v8343_v45 = vpop.f32.mrb[81].mxu1 }
 0x35d   : > { %v8348_v48 = vpop.f32.mrb[82].mxu1 }
 0x35e   : > { %v4624_v50 = vpack.c.bf16 %v8348_v48, %v8341_v44  ;;  %v8355_v51 = vpop.f32.mrb[83].mxu1  ;;  %v7608_v44 = vld [vmem:[%s9476_s4 + $0x260] sm:$0xff]  }
 0x35f   : > { %v4623_v52 = vpack.c.bf16 %v8355_v51, %v8343_v45  ;;  %v7606_v45 = vld [vmem:[%s9476_s4 + $0x250] sm:$0xff]  }
 0x360   : > { %7169 = vmatmul.mubr.msk.bf16.gmra.mrb[188].mxu1 %vm2441_vm0, %v7591_v47 }
 0x361   : > { %7172 = vmatprep.mubr.msk.bf16.mxu1 %vm2441_vm0, %v7592_v49  ;;  %v4771_v47 = vsel %vm2441_vm0, %v4623_v52, 0 }
 0x363   : > { %v8361_v53 = vpop.f32.mrb[84].mxu1 }
 0x364   : > { %v8363_v24 = vpop.f32.mrb[85].mxu1 }
 0x365   : > { %v8368_v41 = vpop.f32.mrb[86].mxu1 }
 0x366   : > { %v4626_v54 = vpack.c.bf16 %v8368_v41, %v8361_v53  ;;  %v8375_v60 = vpop.f32.mrb[87].mxu1 }
 0x367   : > { %v4625_v62 = vpack.c.bf16 %v8375_v60, %v8363_v24  ;;  %v7610_v24 = vld [vmem:[%s9476_s4 + $0x270] sm:$0xff]  }
 0x368   : > { %7173 = vmatmul.mubr.msk.bf16.gmra.mrb[192].mxu1 %vm2441_vm0, %v7593_v40 }
 0x369   : > { %7176 = vmatprep.mubr.msk.bf16.mxu1 %vm2441_vm0, %v7594_v59  ;;  %v7605_v59 = vld [vmem:[%s9476_s4 + $0x248] sm:$0xff]  }
 0x36b   : > { %v7070_v63 = vpop.f32.mrb[88].mxu1 }
 0x36c   : > { %v3660_v1 = vpop.f32.mrb[89].mxu1 }
 0x36d   : > { %v7071_v2 = vpop.f32.mrb[90].mxu1 }
 0x36e   : > { %v4628_v4 = vpack.c.bf16 %v7071_v2, %v7070_v63  ;;  %v3663_v57 = vpop.f32.mrb[91].mxu1 }
 0x36f   : > { %v4627_v46 = vpack.c.bf16 %v3663_v57, %v3660_v1 }
 0x370   : > { %7177 = vmatmul.mubr.msk.bf16.gmra.mrb[196].mxu1 %vm2441_vm0, %v7595_v56  ;;  %v4774_v56 = vsel %vm2441_vm0, %v4624_v50, 0 }
 0x371   : > { %7308 = vmatprep.subr.msk.bf16.mxu0 %vm2441_vm0, %v4627_v46  ;;  %7180 = vmatprep.mubr.msk.bf16.mxu1 %vm2441_vm0, %v7596_v3 }
 0x372   : > { %6837 = vmatpush3.bf16.xpose.msra.mxu0 %v4759_v9  ;;  %v4777_v9 = vsel %vm2441_vm0, %v4625_v62, 0 }
 0x373   : > { %7309 = vmatprep.subr.msk.bf16.mxu0 %vm2441_vm0, %v4628_v4  ;;  %v7074_v58 = vpop.f32.mrb[92].mxu1  ;;  %v7607_v4 = vld [vmem:[%s9476_s4 + $0x258] sm:$0xff]  }
 0x374   : > { %v3676_v10 = vpop.f32.mrb[93].mxu1 }
 0x375   : > { %v7075_v6 = vpop.f32.mrb[94].mxu1 }
 0x376   : > { %v4630_v12 = vpack.c.bf16 %v7075_v6, %v7074_v58  ;;  %v3679_v0 = vpop.f32.mrb[95].mxu1 }
 0x377   : > { %v4629_v13 = vpack.c.bf16 %v3679_v0, %v3676_v10 }
 0x378   : > { %7181 = vmatmul.mubr.msk.bf16.gmra.mrb[200].mxu1 %vm2441_vm0, %v7597_v5  ;;  %v7609_v5 = vld [vmem:[%s9476_s4 + $0x268] sm:$0xff]  }
 0x379   : > { %7184 = vmatprep.mubr.msk.bf16.mxu1 %vm2441_vm0, %v7598_v11 }
 0x37a   : > { %6839 = vmatpush3.bf16.xpose.msra.mxu0 %v4762_v14  ;;  %v7611_v14 = vld [vmem:[%s9476_s4 + $0x278] sm:$0xff]  }
 0x37b   : > { %7310 = vmatprep.subr.msk.bf16.mxu0 %vm2441_vm0, %v4629_v13  ;;  %v7078_v15 = vpop.f32.mrb[96].mxu1 }
 0x37c   : > { %v3692_v16 = vpop.f32.mrb[97].mxu1 }
 0x37d   : > { %v7079_v18 = vpop.f32.mrb[98].mxu1 }
 0x37e   : > { %v4632_v20 = vpack.c.bf16 %v7079_v18, %v7078_v15  ;;  %v3695_v7 = vpop.f32.mrb[99].mxu1 }
 0x37f   : > { %v4631_v26 = vpack.c.bf16 %v3695_v7, %v3692_v16 }
 0x380   : > { %7185 = vmatmul.mubr.msk.bf16.gmra.mrb[204].mxu1 %vm2441_vm0, %v7599_v17 }
 0x381   : > { %7188 = vmatprep.mubr.msk.bf16.mxu1 %vm2441_vm0, %v7600_v19  ;;  %v7612_v19 = vld [vmem:[%s9476_s4 + $0x280] sm:$0xff]  }
 0x382   : > { %6841 = vmatpush3.bf16.xpose.msra.mxu0 %v4765_v8 }
 0x383   : > { %7311 = vmatprep.subr.msk.bf16.mxu0 %vm2441_vm0, %v4630_v12  ;;  %v7082_v28 = vpop.f32.mrb[100].mxu1  ;;  %v4780_v12 = vsel %vm2441_vm0, %v4626_v54, 0 }
 0x384   : > { %v3708_v29 = vpop.f32.mrb[101].mxu1 }
 0x385   : > { %v7083_v31 = vpop.f32.mrb[102].mxu1 }
 0x386   : > { %v4634_v33 = vpack.c.bf16 %v7083_v31, %v7082_v28  ;;  %v3711_v34 = vpop.f32.mrb[103].mxu1 }
 0x387   : > { %v4633_v35 = vpack.c.bf16 %v3711_v34, %v3708_v29 }
 0x388   : > { %7189 = vmatmul.mubr.msk.bf16.gmra.mrb[208].mxu1 %vm2441_vm0, %v7601_v30 }
 0x389   : > { %7192 = vmatprep.mubr.msk.bf16.mxu1 %vm2441_vm0, %v7602_v32 }
 0x38a   : > { %6843 = vmatpush3.bf16.xpose.msra.mxu0 %v4768_v21 }
 0x38b   : > { %7312 = vmatprep.subr.msk.bf16.mxu0 %vm2441_vm0, %v4631_v26  ;;  %v8425_v37 = vpop.f32.mrb[104].mxu1  ;;  %v7614_v26 = vld [vmem:[%s9476_s4 + $0x290] sm:$0xff]  }
 0x38c   : > { %v3724_v38 = vpop.f32.mrb[105].mxu1 }
 0x38d   : > { %v8430_v36 = vpop.f32.mrb[106].mxu1 }
 0x38e   : > { %v4636_v23 = vpack.c.bf16 %v8430_v36, %v8425_v37  ;;  %v3727_v42 = vpop.f32.mrb[107].mxu1 }
 0x38f   : > { %v4635_v39 = vpack.c.bf16 %v3727_v42, %v3724_v38 }
 0x390   : > { %7193 = vmatmul.mubr.msk.bf16.gmra.mrb[212].mxu1 %vm2441_vm0, %v7603_v25  ;;  %v4810_v30 = vsel %vm2441_vm0, %v4636_v23, 0  ;;  %v7617_v23 = vld [vmem:[%s9476_s4 + $0x2a8] sm:$0xff]  }
 0x391   : > { %7196 = vmatprep.mubr.msk.bf16.mxu1 %vm2441_vm0, %v7604_v22  ;;  %v4807_v53 = vsel %vm2441_vm0, %v4635_v39, 0  ;;  %v7618_v39 = vld [vmem:[%s9476_s4 + $0x2b0] sm:$0xff]  }
 0x392   : > { %6845 = vmatpush3.bf16.xpose.msra.mxu0 %v4771_v47 }
 0x393   : > { %7313 = vmatprep.subr.msk.bf16.mxu0 %vm2441_vm0, %v4632_v20  ;;  %v8444_v49 = vpop.f32.mrb[108].mxu1  ;;  %v7613_v20 = vld [vmem:[%s9476_s4 + $0x288] sm:$0xff]  }
 0x394   : > { %v8446_v40 = vpop.f32.mrb[109].mxu1 }
 0x395   : > { %v8451_v63 = vpop.f32.mrb[110].mxu1 }
 0x396   : > { %v4638_v51 = vpack.c.bf16 %v8451_v63, %v8444_v49  ;;  %v8458_v52 = vpop.f32.mrb[111].mxu1  ;;  %v7619_v49 = vld [vmem:[%s9476_s4 + $0x2b8] sm:$0xff]  }
 0x397   : > { %v4637_v1 = vpack.c.bf16 %v8458_v52, %v8446_v40 }
 0x398   : > { %7197 = vmatmul.mubr.msk.bf16.gmra.mrb[216].mxu1 %vm2441_vm0, %v7605_v59 }
 0x399   : > { %7200 = vmatprep.mubr.msk.bf16.mxu1 %vm2441_vm0, %v7606_v45  ;;  %v4813_v25 = vsel %vm2441_vm0, %v4637_v1, 0  ;;  %v4816_v45 = vsel %vm2441_vm0, %v4638_v51, 0  ;;  %v7620_v51 = vld [vmem:[%s9476_s4 + $0x2c0] sm:$0xff]  }
 0x39a   : > { %6847 = vmatpush3.bf16.xpose.msra.mxu0 %v4774_v56 }
 0x39b   : > { %7314 = vmatprep.subr.msk.bf16.mxu0 %vm2441_vm0, %v4633_v35  ;;  %v8469_v2 = vpop.f32.mrb[112].mxu1  ;;  %v7616_v35 = vld [vmem:[%s9476_s4 + $0x2a0] sm:$0xff]  }
 0x39c   : > { %v8471_v3 = vpop.f32.mrb[113].mxu1 }
 0x39d   : > { %v8476_v57 = vpop.f32.mrb[114].mxu1 }
 0x39e   : > { %v4640_v48 = vpack.c.bf16 %v8476_v57, %v8469_v2  ;;  %v8483_v50 = vpop.f32.mrb[115].mxu1  ;;  %v7624_v2 = vld [vmem:[%s9476_s4 + $0x2e0] sm:$0xff]  }
 0x39f   : > { %v4639_v46 = vpack.c.bf16 %v8483_v50, %v8471_v3  ;;  %v7622_v3 = vld [vmem:[%s9476_s4 + $0x2d0] sm:$0xff]  }
 0x3a0   : > { %7201 = vmatmul.mubr.msk.bf16.gmra.mrb[220].mxu1 %vm2441_vm0, %v7607_v4 }
 0x3a1   : > { %7204 = vmatprep.mubr.msk.bf16.mxu1 %vm2441_vm0, %v7608_v44 }
 0x3a2   : > { %6849 = vmatpush3.bf16.xpose.msra.mxu0 %v4777_v9  ;;  %v4819_v9 = vsel %vm2441_vm0, %v4639_v46, 0 }
 0x3a3   : > { %7315 = vmatprep.subr.msk.bf16.mxu0 %vm2441_vm0, %v4634_v33  ;;  %v8494_v58 = vpop.f32.mrb[116].mxu1  ;;  %v7615_v33 = vld [vmem:[%s9476_s4 + $0x298] sm:$0xff]  }
 0x3a4   : > { %v8496_v10 = vpop.f32.mrb[117].mxu1 }
 0x3a5   : > { %v8501_v6 = vpop.f32.mrb[118].mxu1 }
 0x3a6   : > { %v4642_v60 = vpack.c.bf16 %v8501_v6, %v8494_v58  ;;  %v8508_v62 = vpop.f32.mrb[119].mxu1 }
 0x3a7   : > { %v4641_v11 = vpack.c.bf16 %v8508_v62, %v8496_v10  ;;  %v7626_v10 = vld [vmem:[%s9476_s4 + $0x2f0] sm:$0xff]  }
 0x3a8   : > { %7205 = vmatmul.mubr.msk.bf16.gmra.mrb[224].mxu1 %vm2441_vm0, %v7609_v5 }
 0x3a9   : > { %7208 = vmatprep.mubr.msk.bf16.mxu1 %vm2441_vm0, %v7610_v24 }
 0x3aa   : > { %6851 = vmatpush3.bf16.xpose.msra.mxu0 %v4780_v12  ;;  %v7621_v12 = vld [vmem:[%s9476_s4 + $0x2c8] sm:$0xff]  }
 0x3ab   : > { %v7102_v0 = vpop.f32.mrb[120].mxu1 }
 0x3ac   : > { %v3788_v13 = vpop.f32.mrb[121].mxu1 }
 0x3ad   : > { %v7103_v15 = vpop.f32.mrb[122].mxu1 }
 0x3ae   : > { %v4644_v16 = vpack.c.bf16 %v7103_v15, %v7102_v0  ;;  %v3791_v17 = vpop.f32.mrb[123].mxu1 }
 0x3af   : > { %v4643_v18 = vpack.c.bf16 %v3791_v17, %v3788_v13  ;;  %v7623_v17 = vld [vmem:[%s9476_s4 + $0x2d8] sm:$0xff]  }
 0x3b0   : > { %7209 = vmatmul.mubr.msk.bf16.gmra.mrb[228].mxu1 %vm2441_vm0, %v7611_v14  ;;  %v4822_v14 = vsel %vm2441_vm0, %v4640_v48, 0 }
 0x3b1   : > { %6853 = vmatmul.mubr.msk.bf16.vlgmr.msra.gmra.mrb[64].mxu0 %vm2441_vm0, %v8060_v27  ;;  %7316 = vmatprep.subr.msk.bf16.mxu0 %vm2441_vm0, %v4643_v18 }
 0x3b2   : > { %6854 = vmatprep.mubr.msk.bf16.mxu0 %vm2441_vm0, %v8067_v43  ;;  %6861 = vmatpush3.bf16.xpose.msra.mxu0 %v4807_v53  ;;  %v4825_v53 = vsel %vm2441_vm0, %v4641_v11, 0 }
 0x3b3   : > { %7317 = vmatprep.subr.msk.bf16.mxu0 %vm2441_vm0, %v4644_v16  ;;  %v7106_v41 = vpop.f32.mrb[124].mxu1  ;;  %7212 = vmatprep.mubr.msk.bf16.mxu1 %vm2441_vm0, %v7612_v19 }
 0x3b4   : > { %v3804_v54 = vpop.f32.mrb[125].mxu1 }
 0x3b5   : > { %v7107_v7 = vpop.f32.mrb[126].mxu1 }
 0x3b6   : > { %v4646_v8 = vpack.c.bf16 %v7107_v7, %v7106_v41  ;;  %v3807_v28 = vpop.f32.mrb[127].mxu1 }
 0x3b7   : > { %v4645_v29 = vpack.c.bf16 %v3807_v28, %v3804_v54 }
 0x3b8   : > { %7213 = vmatmul.mubr.msk.bf16.gmra.mrb[232].mxu1 %vm2441_vm0, %v7613_v20  ;;  %v7625_v20 = vld [vmem:[%s9476_s4 + $0x2e8] sm:$0xff]  }
 0x3b9   : > { %6855 = vmatmul.mubr.msk.bf16.gmra.mrb[68].mxu0 %vm2441_vm0, %v8067_v43  ;;  %7216 = vmatprep.mubr.msk.bf16.mxu1 %vm2441_vm0, %v7614_v26 }
 0x3ba   : > { %6856 = vmatprep.mubr.msk.bf16.mxu0 %vm2441_vm0, %v8072_v61  ;;  %6863 = vmatpush3.bf16.xpose.msra.mxu0 %v4810_v30  ;;  %v7627_v30 = vld [vmem:[%s9476_s4 + $0x2f8] sm:$0xff]  }
 0x3bb   : > { %7318 = vmatprep.subr.msk.bf16.mxu0 %vm2441_vm0, %v4645_v29  ;;  %v7110_v31 = vpop.f32.mrb[128].mxu1 }
 0x3bc   : > { %v3820_v32 = vpop.f32.mrb[129].mxu1 }
 0x3bd   : > { %v7111_v34 = vpop.f32.mrb[130].mxu1 }
 0x3be   : > { %v4648_v21 = vpack.c.bf16 %v7111_v34, %v7110_v31  ;;  %v3823_v37 = vpop.f32.mrb[131].mxu1 }
 0x3bf   : > { %v4647_v38 = vpack.c.bf16 %v3823_v37, %v3820_v32 }
 0x3c0   : > { %7217 = vmatmul.mubr.msk.bf16.gmra.mrb[236].mxu1 %vm2441_vm0, %v7615_v33 }
 0x3c1   : > { %6857 = vmatmul.mubr.msk.bf16.gmra.mrb[72].mxu0 %vm2441_vm0, %v8072_v61  ;;  %7220 = vmatprep.mubr.msk.bf16.mxu1 %vm2441_vm0, %v7616_v35  ;;  %v7628_v35 = vld [vmem:[%s9476_s4 + $0x300] sm:$0xff]  }
 0x3c2   : > { %6858 = vmatprep.mubr.msk.bf16.mxu0 %vm2441_vm0, %v8078_v55  ;;  %6865 = vmatpush3.bf16.xpose.msra.mxu0 %v4813_v25 }
 0x3c3   : > { %7319 = vmatprep.subr.msk.bf16.mxu0 %vm2441_vm0, %v4646_v8  ;;  %v7114_v36 = vpop.f32.mrb[132].mxu1  ;;  %v4828_v8 = vsel %vm2441_vm0, %v4642_v60, 0 }
 0x3c4   : > { %v3836_v22 = vpop.f32.mrb[133].mxu1 }
 0x3c5   : > { %v7115_v42 = vpop.f32.mrb[134].mxu1 }
 0x3c6   : > { %v4650_v47 = vpack.c.bf16 %v7115_v42, %v7114_v36  ;;  %v3839_v40 = vpop.f32.mrb[135].mxu1 }
 0x3c7   : > { %v4649_v59 = vpack.c.bf16 %v3839_v40, %v3836_v22 }
 0x3c8   : > { %7221 = vmatmul.mubr.msk.bf16.gmra.mrb[240].mxu1 %vm2441_vm0, %v7617_v23 }
 0x3c9   : > { %6859 = vmatmul.mubr.msk.bf16.gmra.mrb[76].mxu0 %vm2441_vm0, %v8078_v55  ;;  %7224 = vmatprep.mubr.msk.bf16.mxu1 %vm2441_vm0, %v7618_v39 }
 0x3ca   : > { %6867 = vmatpush3.bf16.xpose.msra.mxu0 %v4816_v45  ;;  %6876 = vmatprep.mubr.msk.bf16.mxu0 %vm2441_vm0, %v8060_v27 }
 0x3cb   : > { %7320 = vmatprep.subr.msk.bf16.mxu0 %vm2441_vm0, %v4647_v38  ;;  %v8584_v52 = vpop.f32.mrb[136].mxu1  ;;  %v7630_v38 = vld [vmem:[%s9476_s4 + $0x310] sm:$0xff]  }
 0x3cc   : > { %v3852_v1 = vpop.f32.mrb[137].mxu1 }
 0x3cd   : > { %v8589_v63 = vpop.f32.mrb[138].mxu1 }
 0x3ce   : > { %v4652_v56 = vpack.c.bf16 %v8589_v63, %v8584_v52  ;;  %v3855_v4 = vpop.f32.mrb[139].mxu1 }
 0x3cf   : > { %v4651_v44 = vpack.c.bf16 %v3855_v4, %v3852_v1 }
 0x3d0   : > { %7225 = vmatmul.mubr.msk.bf16.gmra.mrb[244].mxu1 %vm2441_vm0, %v7619_v49  ;;  %v4858_v23 = vsel %vm2441_vm0, %v4652_v56, 0  ;;  %v7633_v56 = vld [vmem:[%s9476_s4 + $0x328] sm:$0xff]  }
 0x3d1   : > { %7228 = vmatprep.mubr.msk.bf16.mxu1 %vm2441_vm0, %v7620_v51  ;;  %v4855_v58 = vsel %vm2441_vm0, %v4651_v44, 0  ;;  %v7634_v44 = vld [vmem:[%s9476_s4 + $0x330] sm:$0xff]  }
 0x3d2   : > { %6869 = vmatpush3.bf16.xpose.msra.mxu0 %v4819_v9 }
 0x3d3   : > { %7321 = vmatprep.subr.msk.bf16.mxu0 %vm2441_vm0, %v4648_v21  ;;  %v8603_v5 = vpop.f32.mrb[140].mxu1  ;;  %v7629_v21 = vld [vmem:[%s9476_s4 + $0x308] sm:$0xff]  }
 0x3d4   : > { %v8605_v24 = vpop.f32.mrb[141].mxu1 }
 0x3d5   : > { %v8610_v0 = vpop.f32.mrb[142].mxu1 }
 0x3d6   : > { %v4654_v50 = vpack.c.bf16 %v8610_v0, %v8603_v5  ;;  %v8617_v46 = vpop.f32.mrb[143].mxu1  ;;  %v7635_v5 = vld [vmem:[%s9476_s4 + $0x338] sm:$0xff]  }
 0x3d7   : > { %v4653_v13 = vpack.c.bf16 %v8617_v46, %v8605_v24 }
 0x3d8   : > { %7229 = vmatmul.mubr.msk.bf16.gmra.mrb[248].mxu1 %vm2441_vm0, %v7621_v12 }
 0x3d9   : > { %7232 = vmatprep.mubr.msk.bf16.mxu1 %vm2441_vm0, %v7622_v3  ;;  %v4861_v49 = vsel %vm2441_vm0, %v4653_v13, 0  ;;  %v4864_v3 = vsel %vm2441_vm0, %v4654_v50, 0  ;;  %v7636_v50 = vld [vmem:[%s9476_s4 + $0x340] sm:$0xff]  }
 0x3da   : > { %6871 = vmatpush3.bf16.xpose.msra.mxu0 %v4822_v14 }
 0x3db   : > { %7322 = vmatprep.subr.msk.bf16.mxu0 %vm2441_vm0, %v4649_v59  ;;  %v8628_v15 = vpop.f32.mrb[144].mxu1  ;;  %v7632_v59 = vld [vmem:[%s9476_s4 + $0x320] sm:$0xff]  }
 0x3dc   : > { %v8630_v16 = vpop.f32.mrb[145].mxu1 }
 0x3dd   : > { %v8635_v18 = vpop.f32.mrb[146].mxu1 }
 0x3de   : > { %v4656_v57 = vpack.c.bf16 %v8635_v18, %v8628_v15  ;;  %v8642_v48 = vpop.f32.mrb[147].mxu1  ;;  %v7640_v15 = vld [vmem:[%s9476_s4 + $0x360] sm:$0xff]  }
 0x3df   : > { %v4655_v19 = vpack.c.bf16 %v8642_v48, %v8630_v16  ;;  %v7638_v16 = vld [vmem:[%s9476_s4 + $0x350] sm:$0xff]  }
 0x3e0   : > { %7233 = vmatmul.mubr.msk.bf16.gmra.mrb[252].mxu1 %vm2441_vm0, %v7623_v17 }
 0x3e1   : > { %7236 = vmatprep.mubr.msk.bf16.mxu1 %vm2441_vm0, %v7624_v2 }
 0x3e2   : > { %6873 = vmatpush3.bf16.xpose.msra.mxu0 %v4825_v53  ;;  %v4867_v53 = vsel %vm2441_vm0, %v4655_v19, 0 }
 0x3e3   : > { %7323 = vmatprep.subr.msk.bf16.mxu0 %vm2441_vm0, %v4650_v47  ;;  %v8653_v41 = vpop.f32.mrb[148].mxu1  ;;  %v7631_v47 = vld [vmem:[%s9476_s4 + $0x318] sm:$0xff]  }
 0x3e4   : > { %v8655_v54 = vpop.f32.mrb[149].mxu1 }
 0x3e5   : > { %v8660_v7 = vpop.f32.mrb[150].mxu1 }
 0x3e6   : > { %v4658_v62 = vpack.c.bf16 %v8660_v7, %v8653_v41  ;;  %v8667_v11 = vpop.f32.mrb[151].mxu1 }
 0x3e7   : > { %v4657_v26 = vpack.c.bf16 %v8667_v11, %v8655_v54  ;;  %v7642_v54 = vld [vmem:[%s9476_s4 + $0x370] sm:$0xff]  }
 0x3e8   : > { %7237 = vmatmul.mubr.msk.bf16.gmra.mrb[0].mxu1 %vm2441_vm0, %v7625_v20 }
 0x3e9   : > { %7240 = vmatprep.mubr.msk.bf16.mxu1 %vm2441_vm0, %v7626_v10 }
 0x3ea   : > { %6875 = vmatpush3.bf16.xpose.msra.mxu0 %v4828_v8  ;;  %v7637_v8 = vld [vmem:[%s9476_s4 + $0x348] sm:$0xff]  }
 0x3eb   : > { %v7134_v28 = vpop.f32.mrb[152].mxu1 }
 0x3ec   : > { %v3916_v29 = vpop.f32.mrb[153].mxu1 }
 0x3ed   : > { %v7135_v31 = vpop.f32.mrb[154].mxu1 }
 0x3ee   : > { %v4660_v32 = vpack.c.bf16 %v7135_v31, %v7134_v28  ;;  %v3919_v33 = vpop.f32.mrb[155].mxu1 }
 0x3ef   : > { %v4659_v34 = vpack.c.bf16 %v3919_v33, %v3916_v29  ;;  %v7639_v33 = vld [vmem:[%s9476_s4 + $0x358] sm:$0xff]  }
 0x3f0   : > { %7241 = vmatmul.mubr.msk.bf16.gmra.mrb[4].mxu1 %vm2441_vm0, %v7627_v30  ;;  %v4870_v30 = vsel %vm2441_vm0, %v4656_v57, 0 }
 0x3f1   : > { %6877 = vmatmul.mubr.msk.bf16.vlgmr.msra.gmra.mrb[80].mxu0 %vm2441_vm0, %v8060_v27  ;;  %7324 = vmatprep.subr.msk.bf16.mxu0 %vm2441_vm0, %v4659_v34 }
 0x3f2   : > { %6878 = vmatprep.mubr.msk.bf16.mxu0 %vm2441_vm0, %v8067_v43  ;;  %6885 = vmatpush3.bf16.xpose.msra.mxu0 %v4855_v58  ;;  %v4873_v58 = vsel %vm2441_vm0, %v4657_v26, 0 }
 0x3f3   : > { %7325 = vmatprep.subr.msk.bf16.mxu0 %vm2441_vm0, %v4660_v32  ;;  %v7138_v6 = vpop.f32.mrb[156].mxu1  ;;  %7244 = vmatprep.mubr.msk.bf16.mxu1 %vm2441_vm0, %v7628_v35 }
 0x3f4   : > { %v3932_v60 = vpop.f32.mrb[157].mxu1 }
 0x3f5   : > { %v7139_v37 = vpop.f32.mrb[158].mxu1 }
 0x3f6   : > { %v4662_v25 = vpack.c.bf16 %v7139_v37, %v7138_v6  ;;  %v3935_v36 = vpop.f32.mrb[159].mxu1 }
 0x3f7   : > { %v4661_v22 = vpack.c.bf16 %v3935_v36, %v3932_v60 }
 0x3f8   : > { %7245 = vmatmul.mubr.msk.bf16.gmra.mrb[8].mxu1 %vm2441_vm0, %v7629_v21  ;;  %v7641_v21 = vld [vmem:[%s9476_s4 + $0x368] sm:$0xff]  }
 0x3f9   : > { %6879 = vmatmul.mubr.msk.bf16.gmra.mrb[84].mxu0 %vm2441_vm0, %v8067_v43  ;;  %7248 = vmatprep.mubr.msk.bf16.mxu1 %vm2441_vm0, %v7630_v38 }
 0x3fa   : > { %6880 = vmatprep.mubr.msk.bf16.mxu0 %vm2441_vm0, %v8072_v61  ;;  %6887 = vmatpush3.bf16.xpose.msra.mxu0 %v4858_v23  ;;  %v7643_v23 = vld [vmem:[%s9476_s4 + $0x378] sm:$0xff]  }
 0x3fb   : > { %7326 = vmatprep.subr.msk.bf16.mxu0 %vm2441_vm0, %v4661_v22  ;;  %v7142_v42 = vpop.f32.mrb[160].mxu1 }
 0x3fc   : > { %v3948_v39 = vpop.f32.mrb[161].mxu1 }
 0x3fd   : > { %v7143_v40 = vpop.f32.mrb[162].mxu1 }
 0x3fe   : > { %v4664_v45 = vpack.c.bf16 %v7143_v40, %v7142_v42  ;;  %v3951_v52 = vpop.f32.mrb[163].mxu1 }
 0x3ff   : > { %v4663_v1 = vpack.c.bf16 %v3951_v52, %v3948_v39 }
 0x400   : > { %7249 = vmatmul.mubr.msk.bf16.gmra.mrb[12].mxu1 %vm2441_vm0, %v7631_v47 }
 0x401   : > { %6881 = vmatmul.mubr.msk.bf16.gmra.mrb[88].mxu0 %vm2441_vm0, %v8072_v61  ;;  %7252 = vmatprep.mubr.msk.bf16.mxu1 %vm2441_vm0, %v7632_v59  ;;  %v7644_v59 = vld [vmem:[%s9476_s4 + $0x380] sm:$0xff]  }
 0x402   : > { %6882 = vmatprep.mubr.msk.bf16.mxu0 %vm2441_vm0, %v8078_v55  ;;  %6889 = vmatpush3.bf16.xpose.msra.mxu0 %v4861_v49 }
 0x403   : > { %7327 = vmatprep.subr.msk.bf16.mxu0 %vm2441_vm0, %v4662_v25  ;;  %v7146_v63 = vpop.f32.mrb[164].mxu1  ;;  %v4876_v25 = vsel %vm2441_vm0, %v4658_v62, 0 }
 0x404   : > { %v3964_v51 = vpop.f32.mrb[165].mxu1 }
 0x405   : > { %v7147_v4 = vpop.f32.mrb[166].mxu1 }
 0x406   : > { %v4666_v9 = vpack.c.bf16 %v7147_v4, %v7146_v63  ;;  %v3967_v24 = vpop.f32.mrb[167].mxu1 }
 0x407   : > { %v4665_v12 = vpack.c.bf16 %v3967_v24, %v3964_v51 }
 0x408   : > { %7253 = vmatmul.mubr.msk.bf16.gmra.mrb[16].mxu1 %vm2441_vm0, %v7633_v56 }
 0x409   : > { %6883 = vmatmul.mubr.msk.bf16.gmra.mrb[92].mxu0 %vm2441_vm0, %v8078_v55  ;;  %7256 = vmatprep.mubr.msk.bf16.mxu1 %vm2441_vm0, %v7634_v44 }
 0x40a   : > { %6891 = vmatpush3.bf16.xpose.msra.mxu0 %v4864_v3  ;;  %6900 = vmatprep.mubr.msk.bf16.mxu0 %vm2441_vm0, %v8060_v27 }
 0x40b   : > { %7328 = vmatprep.subr.msk.bf16.mxu0 %vm2441_vm0, %v4663_v1  ;;  %v8743_v46 = vpop.f32.mrb[168].mxu1  ;;  %v7646_v1 = vld [vmem:[%s9476_s4 + $0x390] sm:$0xff]  }
 0x40c   : > { %v3980_v13 = vpop.f32.mrb[169].mxu1 }
 0x40d   : > { %v8748_v0 = vpop.f32.mrb[170].mxu1 }
 0x40e   : > { %v4668_v14 = vpack.c.bf16 %v8748_v0, %v8743_v46  ;;  %v3983_v17 = vpop.f32.mrb[171].mxu1 }
 0x40f   : > { %v4667_v2 = vpack.c.bf16 %v3983_v17, %v3980_v13 }
 0x410   : > { %7257 = vmatmul.mubr.msk.bf16.gmra.mrb[20].mxu1 %vm2441_vm0, %v7635_v5  ;;  %v4906_v56 = vsel %vm2441_vm0, %v4668_v14, 0  ;;  %v7649_v14 = vld [vmem:[%s9476_s4 + $0x3a8] sm:$0xff]  }
 0x411   : > { %7260 = vmatprep.mubr.msk.bf16.mxu1 %vm2441_vm0, %v7636_v50  ;;  %v4903_v41 = vsel %vm2441_vm0, %v4667_v2, 0  ;;  %v7650_v2 = vld [vmem:[%s9476_s4 + $0x3b0] sm:$0xff]  }
 0x412   : > { %6893 = vmatpush3.bf16.xpose.msra.mxu0 %v4867_v53 }
 0x413   : > { %7329 = vmatprep.subr.msk.bf16.mxu0 %vm2441_vm0, %v4664_v45  ;;  %v8762_v20 = vpop.f32.mrb[172].mxu1  ;;  %v7645_v45 = vld [vmem:[%s9476_s4 + $0x388] sm:$0xff]  }
 0x414   : > { %v8764_v10 = vpop.f32.mrb[173].mxu1 }
 0x415   : > { %v8769_v28 = vpop.f32.mrb[174].mxu1 }
 0x416   : > { %v4670_v48 = vpack.c.bf16 %v8769_v28, %v8762_v20  ;;  %v8776_v19 = vpop.f32.mrb[175].mxu1  ;;  %v7651_v20 = vld [vmem:[%s9476_s4 + $0x3b8] sm:$0xff]  }
 0x417   : > { %v4669_v29 = vpack.c.bf16 %v8776_v19, %v8764_v10 }
 0x418   : > { %7261 = vmatmul.mubr.msk.bf16.gmra.mrb[24].mxu1 %vm2441_vm0, %v7637_v8 }
 0x419   : > { %7264 = vmatprep.mubr.msk.bf16.mxu1 %vm2441_vm0, %v7638_v16  ;;  %v4909_v5 = vsel %vm2441_vm0, %v4669_v29, 0  ;;  %v4912_v16 = vsel %vm2441_vm0, %v4670_v48, 0  ;;  %v7652_v48 = vld [vmem:[%s9476_s4 + $0x3c0] sm:$0xff]  }
 0x41a   : > { %6895 = vmatpush3.bf16.xpose.msra.mxu0 %v4870_v30 }
 0x41b   : > { %7330 = vmatprep.subr.msk.bf16.mxu0 %vm2441_vm0, %v4665_v12  ;;  %v8787_v31 = vpop.f32.mrb[176].mxu1  ;;  %v7648_v12 = vld [vmem:[%s9476_s4 + $0x3a0] sm:$0xff]  }
 0x41c   : > { %v8789_v32 = vpop.f32.mrb[177].mxu1 }
 0x41d   : > { %v8794_v34 = vpop.f32.mrb[178].mxu1 }
 0x41e   : > { %v4672_v18 = vpack.c.bf16 %v8794_v34, %v8787_v31  ;;  %v8801_v57 = vpop.f32.mrb[179].mxu1  ;;  %v7656_v31 = vld [vmem:[%s9476_s4 + $0x3e0] sm:$0xff]  }
 0x41f   : > { %v4671_v35 = vpack.c.bf16 %v8801_v57, %v8789_v32  ;;  %v7654_v32 = vld [vmem:[%s9476_s4 + $0x3d0] sm:$0xff]  }
 0x420   : > { %7265 = vmatmul.mubr.msk.bf16.gmra.mrb[28].mxu1 %vm2441_vm0, %v7639_v33 }
 0x421   : > { %7268 = vmatprep.mubr.msk.bf16.mxu1 %vm2441_vm0, %v7640_v15 }
 0x422   : > { %6897 = vmatpush3.bf16.xpose.msra.mxu0 %v4873_v58  ;;  %v4915_v58 = vsel %vm2441_vm0, %v4671_v35, 0 }
 0x423   : > { %7331 = vmatprep.subr.msk.bf16.mxu0 %vm2441_vm0, %v4666_v9  ;;  %v8812_v6 = vpop.f32.mrb[180].mxu1  ;;  %v7647_v9 = vld [vmem:[%s9476_s4 + $0x398] sm:$0xff]  }
 0x424   : > { %v8814_v60 = vpop.f32.mrb[181].mxu1 }
 0x425   : > { %v8819_v37 = vpop.f32.mrb[182].mxu1 }
 0x426   : > { %v4674_v11 = vpack.c.bf16 %v8819_v37, %v8812_v6  ;;  %v8826_v26 = vpop.f32.mrb[183].mxu1 }
 0x427   : > { %v4673_v38 = vpack.c.bf16 %v8826_v26, %v8814_v60  ;;  %v7658_v60 = vld [vmem:[%s9476_s4 + $0x3f0] sm:$0xff]  }
 0x428   : > { %7269 = vmatmul.mubr.msk.bf16.gmra.mrb[32].mxu1 %vm2441_vm0, %v7641_v21 }
 0x429   : > { %7272 = vmatprep.mubr.msk.bf16.mxu1 %vm2441_vm0, %v7642_v54 }
 0x42a   : > { %6899 = vmatpush3.bf16.xpose.msra.mxu0 %v4876_v25  ;;  %v7653_v25 = vld [vmem:[%s9476_s4 + $0x3c8] sm:$0xff]  }
 0x42b   : > { %v7166_v36 = vpop.f32.mrb[184].mxu1 }
 0x42c   : > { %v4044_v22 = vpop.f32.mrb[185].mxu1 }
 0x42d   : > { %v7167_v42 = vpop.f32.mrb[186].mxu1 }
 0x42e   : > { %v4676_v39 = vpack.c.bf16 %v7167_v42, %v7166_v36  ;;  %v4047_v47 = vpop.f32.mrb[187].mxu1 }
 0x42f   : > { %v4675_v40 = vpack.c.bf16 %v4047_v47, %v4044_v22  ;;  %v7655_v47 = vld [vmem:[%s9476_s4 + $0x3d8] sm:$0xff]  }
 0x430   : > { %7273 = vmatmul.mubr.msk.bf16.gmra.mrb[36].mxu1 %vm2441_vm0, %v7643_v23  ;;  %v4918_v23 = vsel %vm2441_vm0, %v4672_v18, 0 }
 0x431   : > { %6901 = vmatmul.mubr.msk.bf16.vlgmr.msra.gmra.mrb[96].mxu0 %vm2441_vm0, %v8060_v27  ;;  %7332 = vmatprep.subr.msk.bf16.mxu0 %vm2441_vm0, %v4675_v40 }
 0x432   : > { %6902 = vmatprep.mubr.msk.bf16.mxu0 %vm2441_vm0, %v8067_v43  ;;  %6909 = vmatpush3.bf16.xpose.msra.mxu0 %v4903_v41  ;;  %v4921_v41 = vsel %vm2441_vm0, %v4673_v38, 0 }
 0x433   : > { %7333 = vmatprep.subr.msk.bf16.mxu0 %vm2441_vm0, %v4676_v39  ;;  %v7170_v7 = vpop.f32.mrb[188].mxu1  ;;  %7276 = vmatprep.mubr.msk.bf16.mxu1 %vm2441_vm0, %v7644_v59 }
 0x434   : > { %v4060_v62 = vpop.f32.mrb[189].mxu1 }
 0x435   : > { %v7171_v52 = vpop.f32.mrb[190].mxu1 }
 0x436   : > { %v4678_v49 = vpack.c.bf16 %v7171_v52, %v7170_v7  ;;  %v4063_v63 = vpop.f32.mrb[191].mxu1 }
 0x437   : > { %v4677_v51 = vpack.c.bf16 %v4063_v63, %v4060_v62 }
 0x438   : > { %7277 = vmatmul.mubr.msk.bf16.gmra.mrb[40].mxu1 %vm2441_vm0, %v7645_v45  ;;  %v7657_v45 = vld [vmem:[%s9476_s4 + $0x3e8] sm:$0xff]  }
 0x439   : > { %6903 = vmatmul.mubr.msk.bf16.gmra.mrb[100].mxu0 %vm2441_vm0, %v8067_v43  ;;  %7280 = vmatprep.mubr.msk.bf16.mxu1 %vm2441_vm0, %v7646_v1 }
 0x43a   : > { %6904 = vmatprep.mubr.msk.bf16.mxu0 %vm2441_vm0, %v8072_v61  ;;  %6911 = vmatpush3.bf16.xpose.msra.mxu0 %v4906_v56  ;;  %v7659_v56 = vld [vmem:[%s9476_s4 + $0x3f8] sm:$0xff]  }
 0x43b   : > { %7334 = vmatprep.subr.msk.bf16.mxu0 %vm2441_vm0, %v4677_v51  ;;  %v7174_v4 = vpop.f32.mrb[192].mxu1 }
 0x43c   : > { %v4076_v44 = vpop.f32.mrb[193].mxu1 }
 0x43d   : > { %v7175_v24 = vpop.f32.mrb[194].mxu1 }
 0x43e   : > { %v4680_v3 = vpack.c.bf16 %v7175_v24, %v7174_v4  ;;  %v4079_v46 = vpop.f32.mrb[195].mxu1 }
 0x43f   : > { %v4679_v13 = vpack.c.bf16 %v4079_v46, %v4076_v44 }
 0x440   : > { %7281 = vmatmul.mubr.msk.bf16.gmra.mrb[44].mxu1 %vm2441_vm0, %v7647_v9 }
 0x441   : > { %6905 = vmatmul.mubr.msk.bf16.gmra.mrb[104].mxu0 %vm2441_vm0, %v8072_v61  ;;  %7284 = vmatprep.mubr.msk.bf16.mxu1 %vm2441_vm0, %v7648_v12 }
 0x442   : > { %6906 = vmatprep.mubr.msk.bf16.mxu0 %vm2441_vm0, %v8078_v55  ;;  %6913 = vmatpush3.bf16.xpose.msra.mxu0 %v4909_v5 }
 0x443   : > { %7335 = vmatprep.subr.msk.bf16.mxu0 %vm2441_vm0, %v4678_v49  ;;  %v7178_v0 = vpop.f32.mrb[196].mxu1  ;;  %v4924_v49 = vsel %vm2441_vm0, %v4674_v11, 0 }
 0x444   : > { %v4092_v50 = vpop.f32.mrb[197].mxu1 }
 0x445   : > { %v7179_v17 = vpop.f32.mrb[198].mxu1 }
 0x446   : > { %v4682_v53 = vpack.c.bf16 %v7179_v17, %v7178_v0  ;;  %v4095_v10 = vpop.f32.mrb[199].mxu1 }
 0x447   : > { %v4681_v8 = vpack.c.bf16 %v4095_v10, %v4092_v50 }
 0x448   : > { %7285 = vmatmul.mubr.msk.bf16.gmra.mrb[48].mxu1 %vm2441_vm0, %v7649_v14 }
 0x449   : > { %6907 = vmatmul.mubr.msk.bf16.gmra.mrb[108].mxu0 %vm2441_vm0, %v8078_v55  ;;  %7288 = vmatprep.mubr.msk.bf16.mxu1 %vm2441_vm0, %v7650_v2 }
 0x44a   : > { %6915 = vmatpush3.bf16.xpose.msra.mxu0 %v4912_v16  ;;  %6924 = vmatprep.mubr.msk.bf16.mxu0 %vm2441_vm0, %v8060_v27 }
 0x44b   : > { %7336 = vmatprep.subr.msk.bf16.mxu0 %vm2441_vm0, %v4679_v13  ;;  %v8902_v19 = vpop.f32.mrb[200].mxu1 }
 0x44c   : > { %v4108_v29 = vpop.f32.mrb[201].mxu1 }
 0x44d   : > { %v8907_v28 = vpop.f32.mrb[202].mxu1 }
 0x44e   : > { %v4684_v30 = vpack.c.bf16 %v8907_v28, %v8902_v19  ;;  %v4111_v33 = vpop.f32.mrb[203].mxu1 }
 0x44f   : > { %v4683_v15 = vpack.c.bf16 %v4111_v33, %v4108_v29 }
 0x450   : > { %7289 = vmatmul.mubr.msk.bf16.gmra.mrb[52].mxu1 %vm2441_vm0, %v7651_v20  ;;  %v4954_v5 = vsel %vm2441_vm0, %v4684_v30, 0 }
 0x451   : > { %7292 = vmatprep.mubr.msk.bf16.mxu1 %vm2441_vm0, %v7652_v48  ;;  %v4951_v12 = vsel %vm2441_vm0, %v4683_v15, 0 }
 0x452   : > { %6917 = vmatpush3.bf16.xpose.msra.mxu0 %v4915_v58 }
 0x453   : > { %7337 = vmatprep.subr.msk.bf16.mxu0 %vm2441_vm0, %v4680_v3  ;;  %v8921_v21 = vpop.f32.mrb[204].mxu1 }
 0x454   : > { %v8923_v54 = vpop.f32.mrb[205].mxu1 }
 0x455   : > { %v8928_v36 = vpop.f32.mrb[206].mxu1 }
 0x456   : > { %v4686_v57 = vpack.c.bf16 %v8928_v36, %v8921_v21  ;;  %v8935_v35 = vpop.f32.mrb[207].mxu1 }
 0x457   : > { %v4685_v22 = vpack.c.bf16 %v8935_v35, %v8923_v54 }
 0x458   : > { %7293 = vmatmul.mubr.msk.bf16.gmra.mrb[56].mxu1 %vm2441_vm0, %v7653_v25  ;;  %v4960_v58 = vsel %vm2441_vm0, %v4686_v57, 0 }
 0x459   : > { %7296 = vmatprep.mubr.msk.bf16.mxu1 %vm2441_vm0, %v7654_v32  ;;  %v4957_v10 = vsel %vm2441_vm0, %v4685_v22, 0 }
 0x45a   : > { %6919 = vmatpush3.bf16.xpose.msra.mxu0 %v4918_v23 }
 0x45b   : > { %7338 = vmatprep.subr.msk.bf16.mxu0 %vm2441_vm0, %v4681_v8  ;;  %v8946_v42 = vpop.f32.mrb[208].mxu1 }
 0x45c   : > { %v8948_v39 = vpop.f32.mrb[209].mxu1 }
 0x45d   : > { %v8953_v40 = vpop.f32.mrb[210].mxu1 }
 0x45e   : > { %v4688_v34 = vpack.c.bf16 %v8953_v40, %v8946_v42  ;;  %v8960_v18 = vpop.f32.mrb[211].mxu1 }
 0x45f   : > { %v4687_v59 = vpack.c.bf16 %v8960_v18, %v8948_v39 }
 0x460   : > { %7297 = vmatmul.mubr.msk.bf16.gmra.mrb[60].mxu1 %vm2441_vm0, %v7655_v47 }
 0x461   : > { %7300 = vmatprep.mubr.msk.bf16.mxu1 %vm2441_vm0, %v7656_v31  ;;  %v4963_v31 = vsel %vm2441_vm0, %v4687_v59, 0 }
 0x462   : > { %6921 = vmatpush3.bf16.xpose.msra.mxu0 %v4921_v41 }
 0x463   : > { %7339 = vmatprep.subr.msk.bf16.mxu0 %vm2441_vm0, %v4682_v53  ;;  %v8971_v7 = vpop.f32.mrb[212].mxu1 }
 0x464   : > { %v8973_v62 = vpop.f32.mrb[213].mxu1 }
 0x465   : > { %v8978_v52 = vpop.f32.mrb[214].mxu1 }
 0x466   : > { %v4690_v26 = vpack.c.bf16 %v8978_v52, %v8971_v7  ;;  %v8985_v38 = vpop.f32.mrb[215].mxu1 }
 0x467   : > { %v4689_v1 = vpack.c.bf16 %v8985_v38, %v8973_v62 }
 0x468   : > { %7301 = vmatmul.mubr.msk.bf16.gmra.mrb[64].mxu1 %vm2441_vm0, %v7657_v45  ;;  %v4972_v62 = vsel %vm2441_vm0, %v4690_v26, 0 }
 0x469   : > { %7304 = vmatprep.mubr.msk.bf16.mxu1 %vm2441_vm0, %v7658_v60 }
 0x46a   : > { %6923 = vmatpush3.bf16.xpose.msra.mxu0 %v4924_v49 }
 0x46b   : > { %v7198_v63 = vpop.f32.mrb[216].mxu1 }
 0x46c   : > { %v4172_v51 = vpop.f32.mrb[217].mxu1 }
 0x46d   : > { %v7199_v4 = vpop.f32.mrb[218].mxu1 }
 0x46e   : > { %v4692_v44 = vpack.c.bf16 %v7199_v4, %v7198_v63  ;;  %v4175_v9 = vpop.f32.mrb[219].mxu1  ;;  %v4966_v4 = vsel %vm2441_vm0, %v4688_v34, 0 }
 0x46f   : > { %v4691_v24 = vpack.c.bf16 %v4175_v9, %v4172_v51 }
 0x470   : > { %7305 = vmatmul.mubr.msk.bf16.gmra.mrb[68].mxu1 %vm2441_vm0, %v7659_v56 }
 0x471   : > { %6925 = vmatmul.mubr.msk.bf16.vlgmr.msra.gmra.mrb[112].mxu0 %vm2441_vm0, %v8060_v27  ;;  %7340 = vmatprep.subr.msk.bf16.mxu0 %vm2441_vm0, %v4691_v24 }
 0x472   : > { %6926 = vmatprep.mubr.msk.bf16.mxu0 %vm2441_vm0, %v8067_v43  ;;  %6933 = vmatpush3.bf16.xpose.msra.mxu0 %v4951_v12 }
 0x473   : > { %7341 = vmatprep.subr.msk.bf16.mxu0 %vm2441_vm0, %v4692_v44  ;;  %v7202_v6 = vpop.f32.mrb[220].mxu1 }
 0x474   : > { %v4188_v37 = vpop.f32.mrb[221].mxu1 }
 0x475   : > { %v7203_v11 = vpop.f32.mrb[222].mxu1 }
 0x476   : > { %v4694_v3 = vpack.c.bf16 %v7203_v11, %v7202_v6  ;;  %v4191_v46 = vpop.f32.mrb[223].mxu1 }
 0x477   : > { %v4693_v13 = vpack.c.bf16 %v4191_v46, %v4188_v37 }
 0x479   : > { %6927 = vmatmul.mubr.msk.bf16.gmra.mrb[116].mxu0 %vm2441_vm0, %v8067_v43 }
 0x47a   : > { %6928 = vmatprep.mubr.msk.bf16.mxu0 %vm2441_vm0, %v8072_v61  ;;  %6935 = vmatpush3.bf16.xpose.msra.mxu0 %v4954_v5 }
 0x47b   : > { %7342 = vmatprep.subr.msk.bf16.mxu0 %vm2441_vm0, %v4693_v13  ;;  %v7206_v0 = vpop.f32.mrb[224].mxu1 }
 0x47c   : > { %v4204_v50 = vpop.f32.mrb[225].mxu1 }
 0x47d   : > { %v7207_v14 = vpop.f32.mrb[226].mxu1 }
 0x47e   : > { %v4696_v17 = vpack.c.bf16 %v7207_v14, %v7206_v0  ;;  %v4207_v2 = vpop.f32.mrb[227].mxu1 }
 0x47f   : > { %v4695_v53 = vpack.c.bf16 %v4207_v2, %v4204_v50 }
 0x481   : > { %6929 = vmatmul.mubr.msk.bf16.gmra.mrb[120].mxu0 %vm2441_vm0, %v8072_v61 }
 0x482   : > { %6930 = vmatprep.mubr.msk.bf16.mxu0 %vm2441_vm0, %v8078_v55  ;;  %6937 = vmatpush3.bf16.xpose.msra.mxu0 %v4957_v10 }
 0x483   : > { %7343 = vmatprep.subr.msk.bf16.mxu0 %vm2441_vm0, %v4694_v3  ;;  %v9030_v8 = vpop.f32.mrb[228].mxu1  ;;  %v4969_v3 = vsel %vm2441_vm0, %v4689_v1, 0 }
 0x484   : > { %v5176_v16 = vpop.f32.mrb[64].mxu0  ;;  %v4220_v19 = vpop.f32.mrb[229].mxu1 }
 0x485   : > { %5710 = vst [vmem:[%s9027_s29] sm:$0xff] %v5176_v16  ;;  %v5178_v29 = vpop.f32.mrb[65].mxu0  ;;  %v9033_v20 = vpop.f32.mrb[230].mxu1 }
 0x486   : > { %5711 = vst [vmem:[%s9027_s29 + $0x8] sm:$0xff] %v5178_v29  ;;  %v5180_v28 = vpop.f32.mrb[66].mxu0  ;;  %v4698_v48 = vpack.c.bf16 %v9033_v20, %v9030_v8  ;;  %v4223_v30 = vpop.f32.mrb[231].mxu1 }
 0x487   : > { %5726 = vst [vmem:[%s9027_s29 + $0x80] sm:$0xff] %v5180_v28  ;;  %v5182_v33 = vpop.f32.mrb[67].mxu0  ;;  %v4697_v15 = vpack.c.bf16 %v4223_v30, %v4220_v19 }
 0x488   : > { %5727 = vst [vmem:[%s9027_s29 + $0x88] sm:$0xff] %v5182_v33 }
 0x489   : > { %6931 = vmatmul.mubr.msk.bf16.gmra.mrb[124].mxu0 %vm2441_vm0, %v8078_v55 }
 0x48a   : > { %6939 = vmatpush3.bf16.xpose.msra.mxu0 %v4960_v58  ;;  %6948 = vmatprep.mubr.msk.bf16.mxu0 %vm2441_vm0, %v8060_v27 }
 0x48b   : > { %7344 = vmatprep.subr.msk.bf16.mxu0 %vm2441_vm0, %v4695_v53  ;;  %v9049_v54 = vpop.f32.mrb[232].mxu1 }
 0x48c   : > { %v5186_v25 = vpop.f32.mrb[68].mxu0  ;;  %v4236_v32 = vpop.f32.mrb[233].mxu1 }
 0x48d   : > { %5742 = vst [vmem:[%s9027_s29 + $0x100] sm:$0xff] %v5186_v25  ;;  %v5188_v35 = vpop.f32.mrb[69].mxu0  ;;  %v9052_v21 = vpop.f32.mrb[234].mxu1 }
 0x48e   : > { %5743 = vst [vmem:[%s9027_s29 + $0x108] sm:$0xff] %v5188_v35  ;;  %v5190_v36 = vpop.f32.mrb[70].mxu0  ;;  %v4700_v57 = vpack.c.bf16 %v9052_v21, %v9049_v54  ;;  %v4239_v22 = vpop.f32.mrb[235].mxu1 }
 0x48f   : > { %5758 = vst [vmem:[%s9027_s29 + $0x180] sm:$0xff] %v5190_v36  ;;  %v5192_v23 = vpop.f32.mrb[71].mxu0  ;;  %v4699_v47 = vpack.c.bf16 %v4239_v22, %v4236_v32 }
 0x490   : > { %5759 = vst [vmem:[%s9027_s29 + $0x188] sm:$0xff] %v5192_v23  ;;  %v5002_v20 = vsel %vm2441_vm0, %v4700_v57, 0 }
 0x491   : > { %v4999_v8 = vsel %vm2441_vm0, %v4699_v47, 0 }
 0x492   : > { %6941 = vmatpush3.bf16.xpose.msra.mxu0 %v4963_v31 }
 0x493   : > { %7345 = vmatprep.subr.msk.bf16.mxu0 %vm2441_vm0, %v4696_v17  ;;  %v9064_v41 = vpop.f32.mrb[236].mxu1 }
 0x494   : > { %v5196_v45 = vpop.f32.mrb[72].mxu0  ;;  %v9066_v60 = vpop.f32.mrb[237].mxu1 }
 0x495   : > { %5774 = vst [vmem:[%s9027_s29 + $0x200] sm:$0xff] %v5196_v45  ;;  %v5198_v49 = vpop.f32.mrb[73].mxu0  ;;  %v9069_v63 = vpop.f32.mrb[238].mxu1 }
 0x496   : > { %5775 = vst [vmem:[%s9027_s29 + $0x208] sm:$0xff] %v5198_v49  ;;  %v5200_v51 = vpop.f32.mrb[74].mxu0  ;;  %v4702_v39 = vpack.c.bf16 %v9069_v63, %v9064_v41  ;;  %v4255_v18 = vpop.f32.mrb[239].mxu1 }
 0x497   : > { %5790 = vst [vmem:[%s9027_s29 + $0x280] sm:$0xff] %v5200_v51  ;;  %v5202_v59 = vpop.f32.mrb[75].mxu0  ;;  %v4701_v56 = vpack.c.bf16 %v4255_v18, %v9066_v60 }
 0x498   : > { %5791 = vst [vmem:[%s9027_s29 + $0x288] sm:$0xff] %v5202_v59  ;;  %v5008_v45 = vsel %vm2441_vm0, %v4702_v39, 0 }
 0x499   : > { %v5005_v54 = vsel %vm2441_vm0, %v4701_v56, 0 }
 0x49a   : > { %6943 = vmatpush3.bf16.xpose.msra.mxu0 %v4966_v4 }
 0x49b   : > { %7346 = vmatprep.subr.msk.bf16.mxu0 %vm2441_vm0, %v4697_v15  ;;  %v9082_v44 = vpop.f32.mrb[240].mxu1 }
 0x49c   : > { %v5206_v9 = vpop.f32.mrb[76].mxu0  ;;  %v9084_v24 = vpop.f32.mrb[241].mxu1 }
 0x49d   : > { %5806 = vst [vmem:[%s9027_s29 + $0x300] sm:$0x1] %v5206_v9  ;;  %v5208_v12 = vpop.f32.mrb[77].mxu0  ;;  %v9087_v6 = vpop.f32.mrb[242].mxu1 }
 0x49e   : > { %5807 = vst [vmem:[%s9027_s29 + $0x308] sm:$0x1] %v5208_v12  ;;  %v5210_v37 = vpop.f32.mrb[78].mxu0  ;;  %v4704_v11 = vpack.c.bf16 %v9087_v6, %v9082_v44  ;;  %v9092_v42 = vpop.f32.mrb[243].mxu1 }
 0x49f   : > { %v5211_v40 = vpop.f32.mrb[79].mxu0  ;;  %v4703_v34 = vpack.c.bf16 %v9092_v42, %v9084_v24 }
 0x4a1   : > { %v5011_v9 = vsel %vm2441_vm0, %v4703_v34, 0 }
 0x4a2   : > { %6945 = vmatpush3.bf16.xpose.msra.mxu0 %v4969_v3 }
 0x4a3   : > { %7347 = vmatprep.subr.msk.bf16.mxu0 %vm2441_vm0, %v4698_v48  ;;  %v9101_v46 = vpop.f32.mrb[244].mxu1 }
 0x4a4   : > { %v9103_v13 = vpop.f32.mrb[245].mxu1 }
 0x4a5   : > { %v9105_v5 = vpop.f32.mrb[246].mxu1 }
 0x4a6   : > { %v4706_v0 = vpack.c.bf16 %v9105_v5, %v9101_v46  ;;  %v9109_v50 = vpop.f32.mrb[247].mxu1 }
 0x4a7   : > { %v4705_v14 = vpack.c.bf16 %v9109_v50, %v9103_v13 }
 0x4a8   : > { %v5020_v13 = vsel %vm2441_vm0, %v4706_v0, 0 }
 0x4aa   : > { %6947 = vmatpush3.bf16.xpose.msra.mxu0 %v4972_v62 }
 0x4ab   : > { %v7230_v38 = vpop.f32.mrb[248].mxu1 }
 0x4ac   : > { %v4300_v1 = vpop.f32.mrb[249].mxu1 }
 0x4ad   : > { %v7231_v17 = vpop.f32.mrb[250].mxu1 }
 0x4ae   : > { %v4708_v2 = vpack.c.bf16 %v7231_v17, %v7230_v38  ;;  %v4303_v53 = vpop.f32.mrb[251].mxu1  ;;  %v5014_v17 = vsel %vm2441_vm0, %v4704_v11, 0 }
 0x4af   : > { %v4707_v10 = vpack.c.bf16 %v4303_v53, %v4300_v1 }
 0x4b1   : > { %6949 = vmatmul.mubr.msk.bf16.vlgmr.msra.gmra.mrb[128].mxu0 %vm2441_vm0, %v8060_v27  ;;  %7348 = vmatprep.subr.msk.bf16.mxu0 %vm2441_vm0, %v4707_v10 }
 0x4b2   : > { %6950 = vmatprep.mubr.msk.bf16.mxu0 %vm2441_vm0, %v8067_v43  ;;  %6957 = vmatpush3.bf16.xpose.msra.mxu0 %v4999_v8 }
 0x4b3   : > { %7349 = vmatprep.subr.msk.bf16.mxu0 %vm2441_vm0, %v4708_v2  ;;  %v7234_v7 = vpop.f32.mrb[252].mxu1 }
 0x4b4   : > { %v4316_v52 = vpop.f32.mrb[253].mxu1 }
 0x4b5   : > { %v7235_v26 = vpop.f32.mrb[254].mxu1 }
 0x4b6   : > { %v4710_v16 = vpack.c.bf16 %v7235_v26, %v7234_v7  ;;  %v4319_v19 = vpop.f32.mrb[255].mxu1 }
 0x4b7   : > { %v4709_v29 = vpack.c.bf16 %v4319_v19, %v4316_v52 }
 0x4b9   : > { %6951 = vmatmul.mubr.msk.bf16.gmra.mrb[132].mxu0 %vm2441_vm0, %v8067_v43 }
 0x4ba   : > { %6952 = vmatprep.mubr.msk.bf16.mxu0 %vm2441_vm0, %v8072_v61  ;;  %6959 = vmatpush3.bf16.xpose.msra.mxu0 %v5002_v20 }
 0x4bb   : > { %7350 = vmatprep.subr.msk.bf16.mxu0 %vm2441_vm0, %v4709_v29  ;;  %v7238_v28 = vpop.f32.mrb[0].mxu1 }
 0x4bc   : > { %v4332_v48 = vpop.f32.mrb[1].mxu1 }
 0x4bd   : > { %v7239_v30 = vpop.f32.mrb[2].mxu1 }
 0x4be   : > { %v4712_v33 = vpack.c.bf16 %v7239_v30, %v7238_v28  ;;  %v4335_v15 = vpop.f32.mrb[3].mxu1 }
 0x4bf   : > { %v4711_v58 = vpack.c.bf16 %v4335_v15, %v4332_v48 }
 0x4c1   : > { %6953 = vmatmul.mubr.msk.bf16.gmra.mrb[136].mxu0 %vm2441_vm0, %v8072_v61 }
 0x4c2   : > { %6954 = vmatprep.mubr.msk.bf16.mxu0 %vm2441_vm0, %v8078_v55  ;;  %6961 = vmatpush3.bf16.xpose.msra.mxu0 %v5005_v54 }
 0x4c3   : > { %7351 = vmatprep.subr.msk.bf16.mxu0 %vm2441_vm0, %v4710_v16  ;;  %v9139_v25 = vpop.f32.mrb[4].mxu1  ;;  %v5017_v16 = vsel %vm2441_vm0, %v4705_v14, 0 }
 0x4c4   : > { %v5247_v32 = vpop.f32.mrb[80].mxu0  ;;  %v4348_v35 = vpop.f32.mrb[5].mxu1 }
 0x4c5   : > { %5712 = vst [vmem:[%s9027_s29 + $0x10] sm:$0xff] %v5247_v32  ;;  %v5249_v21 = vpop.f32.mrb[81].mxu0  ;;  %v9142_v36 = vpop.f32.mrb[6].mxu1 }
 0x4c6   : > { %5713 = vst [vmem:[%s9027_s29 + $0x18] sm:$0xff] %v5249_v21  ;;  %v5251_v57 = vpop.f32.mrb[82].mxu0  ;;  %v4714_v22 = vpack.c.bf16 %v9142_v36, %v9139_v25  ;;  %v4351_v23 = vpop.f32.mrb[7].mxu1 }
 0x4c7   : > { %5728 = vst [vmem:[%s9027_s29 + $0x90] sm:$0xff] %v5251_v57  ;;  %v5253_v47 = vpop.f32.mrb[83].mxu0  ;;  %v4713_v31 = vpack.c.bf16 %v4351_v23, %v4348_v35 }
 0x4c8   : > { %5729 = vst [vmem:[%s9027_s29 + $0x98] sm:$0xff] %v5253_v47 }
 0x4c9   : > { %6955 = vmatmul.mubr.msk.bf16.gmra.mrb[140].mxu0 %vm2441_vm0, %v8078_v55 }
 0x4ca   : > { %6963 = vmatpush3.bf16.xpose.msra.mxu0 %v5008_v45  ;;  %6972 = vmatprep.mubr.msk.bf16.mxu0 %vm2441_vm0, %v8060_v27 }
 0x4cb   : > { %7352 = vmatprep.subr.msk.bf16.mxu0 %vm2441_vm0, %v4711_v58  ;;  %v9158_v60 = vpop.f32.mrb[8].mxu1 }
 0x4cc   : > { %v5257_v49 = vpop.f32.mrb[84].mxu0  ;;  %v4364_v51 = vpop.f32.mrb[9].mxu1 }
 0x4cd   : > { %5744 = vst [vmem:[%s9027_s29 + $0x110] sm:$0xff] %v5257_v49  ;;  %v5259_v18 = vpop.f32.mrb[85].mxu0  ;;  %v9161_v41 = vpop.f32.mrb[10].mxu1 }
 0x4ce   : > { %5745 = vst [vmem:[%s9027_s29 + $0x118] sm:$0xff] %v5259_v18  ;;  %v5261_v63 = vpop.f32.mrb[86].mxu0  ;;  %v4716_v39 = vpack.c.bf16 %v9161_v41, %v9158_v60  ;;  %v4367_v59 = vpop.f32.mrb[11].mxu1 }
 0x4cf   : > { %5760 = vst [vmem:[%s9027_s29 + $0x190] sm:$0xff] %v5261_v63  ;;  %v5263_v56 = vpop.f32.mrb[87].mxu0  ;;  %v4715_v4 = vpack.c.bf16 %v4367_v59, %v4364_v51 }
 0x4d0   : > { %5761 = vst [vmem:[%s9027_s29 + $0x198] sm:$0xff] %v5263_v56  ;;  %v5050_v36 = vsel %vm2441_vm0, %v4716_v39, 0 }
 0x4d1   : > { %v5047_v25 = vsel %vm2441_vm0, %v4715_v4, 0 }
 0x4d2   : > { %6965 = vmatpush3.bf16.xpose.msra.mxu0 %v5011_v9 }
 0x4d3   : > { %7353 = vmatprep.subr.msk.bf16.mxu0 %vm2441_vm0, %v4712_v33  ;;  %v9173_v12 = vpop.f32.mrb[12].mxu1 }
 0x4d4   : > { %v5267_v37 = vpop.f32.mrb[88].mxu0  ;;  %v9175_v40 = vpop.f32.mrb[13].mxu1 }
 0x4d5   : > { %5776 = vst [vmem:[%s9027_s29 + $0x210] sm:$0xff] %v5267_v37  ;;  %v5269_v3 = vpop.f32.mrb[89].mxu0  ;;  %v9178_v62 = vpop.f32.mrb[14].mxu1 }
 0x4d6   : > { %5777 = vst [vmem:[%s9027_s29 + $0x218] sm:$0xff] %v5269_v3  ;;  %v5271_v38 = vpop.f32.mrb[90].mxu0  ;;  %v4718_v24 = vpack.c.bf16 %v9178_v62, %v9173_v12  ;;  %v4383_v42 = vpop.f32.mrb[15].mxu1 }
 0x4d7   : > { %5792 = vst [vmem:[%s9027_s29 + $0x290] sm:$0xff] %v5271_v38  ;;  %v5273_v34 = vpop.f32.mrb[91].mxu0  ;;  %v4717_v1 = vpack.c.bf16 %v4383_v42, %v9175_v40 }
 0x4d8   : > { %5793 = vst [vmem:[%s9027_s29 + $0x298] sm:$0xff] %v5273_v34  ;;  %v5056_v37 = vsel %vm2441_vm0, %v4718_v24, 0 }
 0x4d9   : > { %v5053_v60 = vsel %vm2441_vm0, %v4717_v1, 0 }
 0x4da   : > { %6967 = vmatpush3.bf16.xpose.msra.mxu0 %v5014_v17 }
 0x4db   : > { %7354 = vmatprep.subr.msk.bf16.mxu0 %vm2441_vm0, %v4713_v31  ;;  %v9191_v2 = vpop.f32.mrb[16].mxu1 }
 0x4dc   : > { %v5277_v53 = vpop.f32.mrb[92].mxu0  ;;  %v9193_v10 = vpop.f32.mrb[17].mxu1 }
 0x4dd   : > { %5808 = vst [vmem:[%s9027_s29 + $0x310] sm:$0x1] %v5277_v53  ;;  %v5279_v8 = vpop.f32.mrb[93].mxu0  ;;  %v9196_v7 = vpop.f32.mrb[18].mxu1 }
 0x4de   : > { %5809 = vst [vmem:[%s9027_s29 + $0x318] sm:$0x1] %v5279_v8  ;;  %v5281_v52 = vpop.f32.mrb[94].mxu0  ;;  %v4720_v26 = vpack.c.bf16 %v9196_v7, %v9191_v2  ;;  %v9201_v44 = vpop.f32.mrb[19].mxu1 }
 0x4df   : > { %v5282_v6 = vpop.f32.mrb[95].mxu0  ;;  %v4719_v11 = vpack.c.bf16 %v9201_v44, %v9193_v10 }
 0x4e1   : > { %v5059_v53 = vsel %vm2441_vm0, %v4719_v11, 0 }
 0x4e2   : > { %6969 = vmatpush3.bf16.xpose.msra.mxu0 %v5017_v16 }
 0x4e3   : > { %7355 = vmatprep.subr.msk.bf16.mxu0 %vm2441_vm0, %v4714_v22  ;;  %v9210_v19 = vpop.f32.mrb[20].mxu1 }
 0x4e4   : > { %v9212_v29 = vpop.f32.mrb[21].mxu1 }
 0x4e5   : > { %v9214_v20 = vpop.f32.mrb[22].mxu1 }
 0x4e6   : > { %v4722_v28 = vpack.c.bf16 %v9214_v20, %v9210_v19  ;;  %v9218_v48 = vpop.f32.mrb[23].mxu1 }
 0x4e7   : > { %v4721_v30 = vpack.c.bf16 %v9218_v48, %v9212_v29 }
 0x4e8   : > { %v5068_v29 = vsel %vm2441_vm0, %v4722_v28, 0 }
 0x4ea   : > { %6971 = vmatpush3.bf16.xpose.msra.mxu0 %v5020_v13 }
 0x4eb   : > { %v7262_v50 = vpop.f32.mrb[24].mxu1 }
 0x4ec   : > { %v4428_v14 = vpop.f32.mrb[25].mxu1 }
 0x4ed   : > { %v7263_v33 = vpop.f32.mrb[26].mxu1 }
 0x4ee   : > { %v4724_v15 = vpack.c.bf16 %v7263_v33, %v7262_v50  ;;  %v4431_v58 = vpop.f32.mrb[27].mxu1  ;;  %v5062_v33 = vsel %vm2441_vm0, %v4720_v26, 0 }
 0x4ef   : > { %v4723_v54 = vpack.c.bf16 %v4431_v58, %v4428_v14 }
 0x4f1   : > { %6973 = vmatmul.mubr.msk.bf16.vlgmr.msra.gmra.mrb[144].mxu0 %vm2441_vm0, %v8060_v27  ;;  %7356 = vmatprep.subr.msk.bf16.mxu0 %vm2441_vm0, %v4723_v54 }
 0x4f2   : > { %6974 = vmatprep.mubr.msk.bf16.mxu0 %vm2441_vm0, %v8067_v43  ;;  %6981 = vmatpush3.bf16.xpose.msra.mxu0 %v5047_v25 }
 0x4f3   : > { %7357 = vmatprep.subr.msk.bf16.mxu0 %vm2441_vm0, %v4724_v15  ;;  %v7266_v46 = vpop.f32.mrb[28].mxu1 }
 0x4f4   : > { %v4444_v5 = vpop.f32.mrb[29].mxu1 }
 0x4f5   : > { %v7267_v0 = vpop.f32.mrb[30].mxu1 }
 0x4f6   : > { %v4726_v32 = vpack.c.bf16 %v7267_v0, %v7266_v46  ;;  %v4447_v35 = vpop.f32.mrb[31].mxu1 }
 0x4f7   : > { %v4725_v21 = vpack.c.bf16 %v4447_v35, %v4444_v5 }
 0x4f9   : > { %6975 = vmatmul.mubr.msk.bf16.gmra.mrb[148].mxu0 %vm2441_vm0, %v8067_v43 }
 0x4fa   : > { %6976 = vmatprep.mubr.msk.bf16.mxu0 %vm2441_vm0, %v8072_v61  ;;  %6983 = vmatpush3.bf16.xpose.msra.mxu0 %v5050_v36 }
 0x4fb   : > { %7358 = vmatprep.subr.msk.bf16.mxu0 %vm2441_vm0, %v4725_v21  ;;  %v7270_v57 = vpop.f32.mrb[32].mxu1 }
 0x4fc   : > { %v4460_v22 = vpop.f32.mrb[33].mxu1 }
 0x4fd   : > { %v7271_v23 = vpop.f32.mrb[34].mxu1 }
 0x4fe   : > { %v4728_v47 = vpack.c.bf16 %v7271_v23, %v7270_v57  ;;  %v4463_v31 = vpop.f32.mrb[35].mxu1 }
 0x4ff   : > { %v4727_v45 = vpack.c.bf16 %v4463_v31, %v4460_v22 }
 0x501   : > { %6977 = vmatmul.mubr.msk.bf16.gmra.mrb[152].mxu0 %vm2441_vm0, %v8072_v61 }
 0x502   : > { %6978 = vmatprep.mubr.msk.bf16.mxu0 %vm2441_vm0, %v8078_v55  ;;  %6985 = vmatpush3.bf16.xpose.msra.mxu0 %v5053_v60 }
 0x503   : > { %7359 = vmatprep.subr.msk.bf16.mxu0 %vm2441_vm0, %v4726_v32  ;;  %v9248_v49 = vpop.f32.mrb[36].mxu1  ;;  %v5065_v32 = vsel %vm2441_vm0, %v4721_v30, 0 }
 0x504   : > { %v5318_v51 = vpop.f32.mrb[96].mxu0  ;;  %v4476_v18 = vpop.f32.mrb[37].mxu1 }
 0x505   : > { %5714 = vst [vmem:[%s9027_s29 + $0x20] sm:$0xff] %v5318_v51  ;;  %v5320_v41 = vpop.f32.mrb[97].mxu0  ;;  %v9251_v63 = vpop.f32.mrb[38].mxu1 }
 0x506   : > { %5715 = vst [vmem:[%s9027_s29 + $0x28] sm:$0xff] %v5320_v41  ;;  %v5322_v39 = vpop.f32.mrb[98].mxu0  ;;  %v4730_v59 = vpack.c.bf16 %v9251_v63, %v9248_v49  ;;  %v4479_v56 = vpop.f32.mrb[39].mxu1 }
 0x507   : > { %5730 = vst [vmem:[%s9027_s29 + $0xa0] sm:$0xff] %v5322_v39  ;;  %v5324_v4 = vpop.f32.mrb[99].mxu0  ;;  %v4729_v9 = vpack.c.bf16 %v4479_v56, %v4476_v18 }
 0x508   : > { %5731 = vst [vmem:[%s9027_s29 + $0xa8] sm:$0xff] %v5324_v4 }
 0x509   : > { %6979 = vmatmul.mubr.msk.bf16.gmra.mrb[156].mxu0 %vm2441_vm0, %v8078_v55 }
 0x50a   : > { %6987 = vmatpush3.bf16.xpose.msra.mxu0 %v5056_v37  ;;  %6996 = vmatprep.mubr.msk.bf16.mxu0 %vm2441_vm0, %v8060_v27 }
 0x50b   : > { %7360 = vmatprep.subr.msk.bf16.mxu0 %vm2441_vm0, %v4727_v45  ;;  %v9267_v40 = vpop.f32.mrb[40].mxu1 }
 0x50c   : > { %v5328_v3 = vpop.f32.mrb[100].mxu0  ;;  %v4492_v38 = vpop.f32.mrb[41].mxu1 }
 0x50d   : > { %5746 = vst [vmem:[%s9027_s29 + $0x120] sm:$0xff] %v5328_v3  ;;  %v5330_v42 = vpop.f32.mrb[101].mxu0  ;;  %v9270_v12 = vpop.f32.mrb[42].mxu1 }
 0x50e   : > { %5747 = vst [vmem:[%s9027_s29 + $0x128] sm:$0xff] %v5330_v42  ;;  %v5332_v62 = vpop.f32.mrb[102].mxu0  ;;  %v4732_v24 = vpack.c.bf16 %v9270_v12, %v9267_v40  ;;  %v4495_v34 = vpop.f32.mrb[43].mxu1 }
 0x50f   : > { %5762 = vst [vmem:[%s9027_s29 + $0x1a0] sm:$0xff] %v5332_v62  ;;  %v5334_v1 = vpop.f32.mrb[103].mxu0  ;;  %v4731_v17 = vpack.c.bf16 %v4495_v34, %v4492_v38 }
 0x510   : > { %5763 = vst [vmem:[%s9027_s29 + $0x1a8] sm:$0xff] %v5334_v1  ;;  %v5098_v63 = vsel %vm2441_vm0, %v4732_v24, 0 }
 0x511   : > { %v5095_v49 = vsel %vm2441_vm0, %v4731_v17, 0 }
 0x512   : > { %6989 = vmatpush3.bf16.xpose.msra.mxu0 %v5059_v53 }
 0x513   : > { %7361 = vmatprep.subr.msk.bf16.mxu0 %vm2441_vm0, %v4728_v47  ;;  %v9282_v8 = vpop.f32.mrb[44].mxu1 }
 0x514   : > { %v5338_v52 = vpop.f32.mrb[104].mxu0  ;;  %v9284_v6 = vpop.f32.mrb[45].mxu1 }
 0x515   : > { %5778 = vst [vmem:[%s9027_s29 + $0x220] sm:$0xff] %v5338_v52  ;;  %v5340_v16 = vpop.f32.mrb[105].mxu0  ;;  %v9287_v13 = vpop.f32.mrb[46].mxu1 }
 0x516   : > { %5779 = vst [vmem:[%s9027_s29 + $0x228] sm:$0xff] %v5340_v16  ;;  %v5342_v50 = vpop.f32.mrb[106].mxu0  ;;  %v4734_v10 = vpack.c.bf16 %v9287_v13, %v9282_v8  ;;  %v4511_v44 = vpop.f32.mrb[47].mxu1 }
 0x517   : > { %5794 = vst [vmem:[%s9027_s29 + $0x2a0] sm:$0xff] %v5342_v50  ;;  %v5344_v11 = vpop.f32.mrb[107].mxu0  ;;  %v4733_v14 = vpack.c.bf16 %v4511_v44, %v9284_v6 }
 0x518   : > { %5795 = vst [vmem:[%s9027_s29 + $0x2a8] sm:$0xff] %v5344_v11  ;;  %v5104_v52 = vsel %vm2441_vm0, %v4734_v10, 0 }
 0x519   : > { %v5101_v40 = vsel %vm2441_vm0, %v4733_v14, 0 }
 0x51a   : > { %6991 = vmatpush3.bf16.xpose.msra.mxu0 %v5062_v33 }
 0x51b   : > { %7362 = vmatprep.subr.msk.bf16.mxu0 %vm2441_vm0, %v4729_v9  ;;  %v9300_v15 = vpop.f32.mrb[48].mxu1 }
 0x51c   : > { %v5348_v58 = vpop.f32.mrb[108].mxu0  ;;  %v9302_v54 = vpop.f32.mrb[49].mxu1 }
 0x51d   : > { %5810 = vst [vmem:[%s9027_s29 + $0x320] sm:$0x1] %v5348_v58  ;;  %v5350_v25 = vpop.f32.mrb[109].mxu0  ;;  %v9305_v46 = vpop.f32.mrb[50].mxu1 }
 0x51e   : > { %5811 = vst [vmem:[%s9027_s29 + $0x328] sm:$0x1] %v5350_v25  ;;  %v5352_v5 = vpop.f32.mrb[110].mxu0  ;;  %v4736_v0 = vpack.c.bf16 %v9305_v46, %v9300_v15  ;;  %v9310_v2 = vpop.f32.mrb[51].mxu1 }
 0x51f   : > { %v5353_v7 = vpop.f32.mrb[111].mxu0  ;;  %v4735_v26 = vpack.c.bf16 %v9310_v2, %v9302_v54 }
 0x520   : > { %v5110_v33 = vsel %vm2441_vm0, %v4736_v0, 0 }
 0x521   : > { %v5107_v50 = vsel %vm2441_vm0, %v4735_v26, 0 }
 0x522   : > { %6993 = vmatpush3.bf16.xpose.msra.mxu0 %v5065_v32 }
 0x523   : > { %7363 = vmatprep.subr.msk.bf16.mxu0 %vm2441_vm0, %v4730_v59  ;;  %v9319_v35 = vpop.f32.mrb[52].mxu1 }
 0x524   : > { %v9321_v21 = vpop.f32.mrb[53].mxu1 }
 0x525   : > { %v9323_v36 = vpop.f32.mrb[54].mxu1 }
 0x526   : > { %v4738_v57 = vpack.c.bf16 %v9323_v36, %v9319_v35  ;;  %v9327_v22 = vpop.f32.mrb[55].mxu1 }
 0x527   : > { %v4737_v23 = vpack.c.bf16 %v9327_v22, %v9321_v21 }
 0x528   : > { %v5116_v15 = vsel %vm2441_vm0, %v4738_v57, 0 }
 0x529   : > { %v5113_v2 = vsel %vm2441_vm0, %v4737_v23, 0 }
 0x52a   : > { %6995 = vmatpush3.bf16.xpose.msra.mxu0 %v5068_v29 }
 0x52b   : > { %v7294_v48 = vpop.f32.mrb[56].mxu1 }
 0x52c   : > { %v4556_v30 = vpop.f32.mrb[57].mxu1 }
 0x52d   : > { %v7295_v47 = vpop.f32.mrb[58].mxu1 }
 0x52e   : > { %v4740_v31 = vpack.c.bf16 %v7295_v47, %v7294_v48  ;;  %v4559_v45 = vpop.f32.mrb[59].mxu1 }
 0x52f   : > { %v4739_v60 = vpack.c.bf16 %v4559_v45, %v4556_v30 }
 0x531   : > { %6997 = vmatmul.mubr.msk.bf16.vlgmr.msra.gmra.mrb[160].mxu0 %vm2441_vm0, %v8060_v27  ;;  %7364 = vmatprep.subr.msk.bf16.mxu0 %vm2441_vm0, %v4739_v60 }
 0x532   : > { %6998 = vmatprep.mubr.msk.bf16.mxu0 %vm2441_vm0, %v8067_v43  ;;  %7005 = vmatpush3.bf16.xpose.msra.mxu0 %v5095_v49 }
 0x533   : > { %7365 = vmatprep.subr.msk.bf16.mxu0 %vm2441_vm0, %v4740_v31  ;;  %v7298_v19 = vpop.f32.mrb[60].mxu1 }
 0x534   : > { %v4572_v20 = vpop.f32.mrb[61].mxu1 }
 0x535   : > { %v7299_v28 = vpop.f32.mrb[62].mxu1 }
 0x536   : > { %v4742_v51 = vpack.c.bf16 %v7299_v28, %v7298_v19  ;;  %v4575_v18 = vpop.f32.mrb[63].mxu1 }
 0x537   : > { %v4741_v41 = vpack.c.bf16 %v4575_v18, %v4572_v20 }
 0x539   : > { %6999 = vmatmul.mubr.msk.bf16.gmra.mrb[164].mxu0 %vm2441_vm0, %v8067_v43 }
 0x53a   : > { %7000 = vmatprep.mubr.msk.bf16.mxu0 %vm2441_vm0, %v8072_v61  ;;  %7007 = vmatpush3.bf16.xpose.msra.mxu0 %v5098_v63 }
 0x53b   : > { %7366 = vmatprep.subr.msk.bf16.mxu0 %vm2441_vm0, %v4741_v41  ;;  %v7302_v39 = vpop.f32.mrb[64].mxu1 }
 0x53c   : > { %v4588_v59 = vpop.f32.mrb[65].mxu1 }
 0x53d   : > { %v7303_v56 = vpop.f32.mrb[66].mxu1 }
 0x53e   : > { %v4744_v4 = vpack.c.bf16 %v7303_v56, %v7302_v39  ;;  %v4591_v9 = vpop.f32.mrb[67].mxu1 }
 0x53f   : > { %v4743_v37 = vpack.c.bf16 %v4591_v9, %v4588_v59 }
 0x541   : > { %7001 = vmatmul.mubr.msk.bf16.gmra.mrb[168].mxu0 %vm2441_vm0, %v8072_v61 }
 0x542   : > { %7002 = vmatprep.mubr.msk.bf16.mxu0 %vm2441_vm0, %v8078_v55  ;;  %7009 = vmatpush3.bf16.xpose.msra.mxu0 %v5101_v40 }
 0x543   : > { %7367 = vmatprep.subr.msk.bf16.mxu0 %vm2441_vm0, %v4742_v51  ;;  %v7306_v3 = vpop.f32.mrb[68].mxu1 }
 0x544   : > { %v5389_v38 = vpop.f32.mrb[112].mxu0  ;;  %v4604_v42 = vpop.f32.mrb[69].mxu1 }
 0x545   : > { %5716 = vst [vmem:[%s9027_s29 + $0x30] sm:$0xff] %v5389_v38  ;;  %v5391_v12 = vpop.f32.mrb[113].mxu0  ;;  %v7307_v62 = vpop.f32.mrb[70].mxu1 }
 0x546   : > { %5717 = vst [vmem:[%s9027_s29 + $0x38] sm:$0xff] %v5391_v12  ;;  %v5393_v24 = vpop.f32.mrb[114].mxu0  ;;  %v4746_v34 = vpack.c.bf16 %v7307_v62, %v7306_v3  ;;  %v4607_v1 = vpop.f32.mrb[71].mxu1 }
 0x547   : > { %5732 = vst [vmem:[%s9027_s29 + $0xb0] sm:$0xff] %v5393_v24  ;;  %v5395_v17 = vpop.f32.mrb[115].mxu0  ;;  %v4745_v53 = vpack.c.bf16 %v4607_v1, %v4604_v42 }
 0x548   : > { %5733 = vst [vmem:[%s9027_s29 + $0xb8] sm:$0xff] %v5395_v17 }
 0x549   : > { %7003 = vmatmul.mubr.msk.bf16.gmra.mrb[172].mxu0 %vm2441_vm0, %v8078_v55 }
 0x54a   : > { %7011 = vmatpush3.bf16.xpose.msra.mxu0 %v5104_v52  ;;  %7020 = vmatprep.mubr.msk.bf16.mxu0 %vm2441_vm0, %v8060_v27 }
 0x54b   : > { %7368 = vmatprep.subr.msk.bf16.mxu0 %vm2441_vm0, %v4743_v37 }
 0x54c   : > { %v5399_v6 = vpop.f32.mrb[116].mxu0 }
 0x54d   : > { %5748 = vst [vmem:[%s9027_s29 + $0x130] sm:$0xff] %v5399_v6  ;;  %v5401_v16 = vpop.f32.mrb[117].mxu0 }
 0x54e   : > { %5749 = vst [vmem:[%s9027_s29 + $0x138] sm:$0xff] %v5401_v16  ;;  %v5403_v8 = vpop.f32.mrb[118].mxu0 }
 0x54f   : > { %5764 = vst [vmem:[%s9027_s29 + $0x1b0] sm:$0xff] %v5403_v8  ;;  %v5405_v13 = vpop.f32.mrb[119].mxu0 }
 0x550   : > { %5765 = vst [vmem:[%s9027_s29 + $0x1b8] sm:$0xff] %v5405_v13 }
 0x552   : > { %7013 = vmatpush3.bf16.xpose.msra.mxu0 %v5107_v50 }
 0x553   : > { %7369 = vmatprep.subr.msk.bf16.mxu0 %vm2441_vm0, %v4744_v4 }
 0x554   : > { %v5409_v10 = vpop.f32.mrb[120].mxu0 }
 0x555   : > { %5780 = vst [vmem:[%s9027_s29 + $0x230] sm:$0xff] %v5409_v10  ;;  %v5411_v44 = vpop.f32.mrb[121].mxu0 }
 0x556   : > { %5781 = vst [vmem:[%s9027_s29 + $0x238] sm:$0xff] %v5411_v44  ;;  %v5413_v11 = vpop.f32.mrb[122].mxu0 }
 0x557   : > { %5796 = vst [vmem:[%s9027_s29 + $0x2b0] sm:$0xff] %v5413_v11  ;;  %v5415_v14 = vpop.f32.mrb[123].mxu0 }
 0x558   : > { %5797 = vst [vmem:[%s9027_s29 + $0x2b8] sm:$0xff] %v5415_v14 }
 0x55a   : > { %7015 = vmatpush3.bf16.xpose.msra.mxu0 %v5110_v33 }
 0x55b   : > { %7370 = vmatprep.subr.msk.bf16.mxu0 %vm2441_vm0, %v4745_v53 }
 0x55c   : > { %v5419_v58 = vpop.f32.mrb[124].mxu0 }
 0x55d   : > { %5812 = vst [vmem:[%s9027_s29 + $0x330] sm:$0x1] %v5419_v58  ;;  %v5421_v54 = vpop.f32.mrb[125].mxu0 }
 0x55e   : > { %5813 = vst [vmem:[%s9027_s29 + $0x338] sm:$0x1] %v5421_v54  ;;  %v5423_v25 = vpop.f32.mrb[126].mxu0 }
 0x55f   : > { %v5424_v5 = vpop.f32.mrb[127].mxu0 }
 0x562   : > { %7017 = vmatpush3.bf16.xpose.msra.mxu0 %v5113_v2 }
 0x563   : > { %7371 = vmatprep.subr.msk.bf16.mxu0 %vm2441_vm0, %v4746_v34 }
 0x56a   : > { %7019 = vmatpush3.bf16.xpose.msra.mxu0 %v5116_v15 }
 0x571   : > { %7021 = vmatmul.mubr.msk.bf16.vlgmr.msra.gmra.mrb[176].mxu0 %vm2441_vm0, %v8060_v27 }
 0x572   : > { %7022 = vmatprep.mubr.msk.bf16.mxu0 %vm2441_vm0, %v8067_v43 }
 0x579   : > { %7023 = vmatmul.mubr.msk.bf16.gmra.mrb[180].mxu0 %vm2441_vm0, %v8067_v43 }
 0x57a   : > { %7024 = vmatprep.mubr.msk.bf16.mxu0 %vm2441_vm0, %v8072_v61 }
 0x581   : > { %7025 = vmatmul.mubr.msk.bf16.gmra.mrb[184].mxu0 %vm2441_vm0, %v8072_v61 }
 0x582   : > { %7026 = vmatprep.mubr.msk.bf16.mxu0 %vm2441_vm0, %v8078_v55 }
 0x584   : > { %v5460_v46 = vpop.f32.mrb[128].mxu0 }
 0x585   : > { %5718 = vst [vmem:[%s9027_s29 + $0x40] sm:$0xff] %v5460_v46  ;;  %v5462_v27 = vpop.f32.mrb[129].mxu0 }
 0x586   : > { %5719 = vst [vmem:[%s9027_s29 + $0x48] sm:$0xff] %v5462_v27  ;;  %v5464_v0 = vpop.f32.mrb[130].mxu0 }
 0x587   : > { %5734 = vst [vmem:[%s9027_s29 + $0xc0] sm:$0xff] %v5464_v0  ;;  %v5466_v43 = vpop.f32.mrb[131].mxu0 }
 0x588   : > { %5735 = vst [vmem:[%s9027_s29 + $0xc8] sm:$0xff] %v5466_v43 }
 0x589   : > { %7027 = vmatmul.mubr.msk.bf16.gmra.mrb[188].mxu0 %vm2441_vm0, %v8078_v55 }
 0x58c   : > { %v5470_v61 = vpop.f32.mrb[132].mxu0 }
 0x58d   : > { %5750 = vst [vmem:[%s9027_s29 + $0x140] sm:$0xff] %v5470_v61  ;;  %v5472_v7 = vpop.f32.mrb[133].mxu0 }
 0x58e   : > { %5751 = vst [vmem:[%s9027_s29 + $0x148] sm:$0xff] %v5472_v7  ;;  %v5474_v26 = vpop.f32.mrb[134].mxu0 }
 0x58f   : > { %5766 = vst [vmem:[%s9027_s29 + $0x1c0] sm:$0xff] %v5474_v26  ;;  %v5476_v32 = vpop.f32.mrb[135].mxu0 }
 0x590   : > { %5767 = vst [vmem:[%s9027_s29 + $0x1c8] sm:$0xff] %v5476_v32 }
 0x594   : > { %v5480_v35 = vpop.f32.mrb[136].mxu0 }
 0x595   : > { %5782 = vst [vmem:[%s9027_s29 + $0x240] sm:$0xff] %v5480_v35  ;;  %v5482_v21 = vpop.f32.mrb[137].mxu0 }
 0x596   : > { %5783 = vst [vmem:[%s9027_s29 + $0x248] sm:$0xff] %v5482_v21  ;;  %v5484_v36 = vpop.f32.mrb[138].mxu0 }
 0x597   : > { %5798 = vst [vmem:[%s9027_s29 + $0x2c0] sm:$0xff] %v5484_v36  ;;  %v5486_v55 = vpop.f32.mrb[139].mxu0 }
 0x598   : > { %5799 = vst [vmem:[%s9027_s29 + $0x2c8] sm:$0xff] %v5486_v55 }
 0x59c   : > { %v5490_v57 = vpop.f32.mrb[140].mxu0 }
 0x59d   : > { %5814 = vst [vmem:[%s9027_s29 + $0x340] sm:$0x1] %v5490_v57  ;;  %v5492_v22 = vpop.f32.mrb[141].mxu0 }
 0x59e   : > { %5815 = vst [vmem:[%s9027_s29 + $0x348] sm:$0x1] %v5492_v22  ;;  %v5494_v23 = vpop.f32.mrb[142].mxu0 }
 0x59f   : > { %v5495_v29 = vpop.f32.mrb[143].mxu0 }
 0x5c4   : > { %v5531_v48 = vpop.f32.mrb[144].mxu0 }
 0x5c5   : > { %5720 = vst [vmem:[%s9027_s29 + $0x50] sm:$0xff] %v5531_v48  ;;  %v5533_v30 = vpop.f32.mrb[145].mxu0 }
 0x5c6   : > { %5721 = vst [vmem:[%s9027_s29 + $0x58] sm:$0xff] %v5533_v30  ;;  %v5535_v47 = vpop.f32.mrb[146].mxu0 }
 0x5c7   : > { %5736 = vst [vmem:[%s9027_s29 + $0xd0] sm:$0xff] %v5535_v47  ;;  %v5537_v31 = vpop.f32.mrb[147].mxu0 }
 0x5c8   : > { %5737 = vst [vmem:[%s9027_s29 + $0xd8] sm:$0xff] %v5537_v31 }
 0x5cc   : > { %v5541_v45 = vpop.f32.mrb[148].mxu0 }
 0x5cd   : > { %5752 = vst [vmem:[%s9027_s29 + $0x150] sm:$0xff] %v5541_v45  ;;  %v5543_v60 = vpop.f32.mrb[149].mxu0 }
 0x5ce   : > { %5753 = vst [vmem:[%s9027_s29 + $0x158] sm:$0xff] %v5543_v60  ;;  %v5545_v49 = vpop.f32.mrb[150].mxu0 }
 0x5cf   : > { %5768 = vst [vmem:[%s9027_s29 + $0x1d0] sm:$0xff] %v5545_v49  ;;  %v5547_v19 = vpop.f32.mrb[151].mxu0 }
 0x5d0   : > { %5769 = vst [vmem:[%s9027_s29 + $0x1d8] sm:$0xff] %v5547_v19 }
 0x5d4   : > { %v5551_v20 = vpop.f32.mrb[152].mxu0 }
 0x5d5   : > { %5784 = vst [vmem:[%s9027_s29 + $0x250] sm:$0xff] %v5551_v20  ;;  %v5553_v28 = vpop.f32.mrb[153].mxu0 }
 0x5d6   : > { %5785 = vst [vmem:[%s9027_s29 + $0x258] sm:$0xff] %v5553_v28  ;;  %v5555_v51 = vpop.f32.mrb[154].mxu0 }
 0x5d7   : > { %5800 = vst [vmem:[%s9027_s29 + $0x2d0] sm:$0xff] %v5555_v51  ;;  %v5557_v18 = vpop.f32.mrb[155].mxu0 }
 0x5d8   : > { %5801 = vst [vmem:[%s9027_s29 + $0x2d8] sm:$0xff] %v5557_v18 }
 0x5dc   : > { %v5561_v41 = vpop.f32.mrb[156].mxu0 }
 0x5dd   : > { %5816 = vst [vmem:[%s9027_s29 + $0x350] sm:$0x1] %v5561_v41  ;;  %v5563_v63 = vpop.f32.mrb[157].mxu0 }
 0x5de   : > { %5817 = vst [vmem:[%s9027_s29 + $0x358] sm:$0x1] %v5563_v63  ;;  %v5565_v39 = vpop.f32.mrb[158].mxu0 }
 0x5df   : > { %v5566_v59 = vpop.f32.mrb[159].mxu0 }
 0x604   : > { %v5602_v56 = vpop.f32.mrb[160].mxu0 }
 0x605   : > { %5722 = vst [vmem:[%s9027_s29 + $0x60] sm:$0xff] %v5602_v56  ;;  %v5604_v4 = vpop.f32.mrb[161].mxu0 }
 0x606   : > { %5723 = vst [vmem:[%s9027_s29 + $0x68] sm:$0xff] %v5604_v4  ;;  %v5606_v9 = vpop.f32.mrb[162].mxu0 }
 0x607   : > { %5738 = vst [vmem:[%s9027_s29 + $0xe0] sm:$0xff] %v5606_v9  ;;  %v5608_v37 = vpop.f32.mrb[163].mxu0 }
 0x608   : > { %5739 = vst [vmem:[%s9027_s29 + $0xe8] sm:$0xff] %v5608_v37 }
 0x60c   : > { %v5612_v40 = vpop.f32.mrb[164].mxu0 }
 0x60d   : > { %5754 = vst [vmem:[%s9027_s29 + $0x160] sm:$0xff] %v5612_v40  ;;  %v5614_v3 = vpop.f32.mrb[165].mxu0 }
 0x60e   : > { %5755 = vst [vmem:[%s9027_s29 + $0x168] sm:$0xff] %v5614_v3  ;;  %v5616_v38 = vpop.f32.mrb[166].mxu0 }
 0x60f   : > { %5770 = vst [vmem:[%s9027_s29 + $0x1e0] sm:$0xff] %v5616_v38  ;;  %v5618_v42 = vpop.f32.mrb[167].mxu0 }
 0x610   : > { %5771 = vst [vmem:[%s9027_s29 + $0x1e8] sm:$0xff] %v5618_v42 }
 0x614   : > { %v5622_v12 = vpop.f32.mrb[168].mxu0 }
 0x615   : > { %5786 = vst [vmem:[%s9027_s29 + $0x260] sm:$0xff] %v5622_v12  ;;  %v5624_v62 = vpop.f32.mrb[169].mxu0 }
 0x616   : > { %5787 = vst [vmem:[%s9027_s29 + $0x268] sm:$0xff] %v5624_v62  ;;  %v5626_v24 = vpop.f32.mrb[170].mxu0 }
 0x617   : > { %5802 = vst [vmem:[%s9027_s29 + $0x2e0] sm:$0xff] %v5626_v24  ;;  %v5628_v34 = vpop.f32.mrb[171].mxu0 }
 0x618   : > { %5803 = vst [vmem:[%s9027_s29 + $0x2e8] sm:$0xff] %v5628_v34 }
 0x61c   : > { %v5632_v1 = vpop.f32.mrb[172].mxu0 }
 0x61d   : > { %5818 = vst [vmem:[%s9027_s29 + $0x360] sm:$0x1] %v5632_v1  ;;  %v5634_v17 = vpop.f32.mrb[173].mxu0 }
 0x61e   : > { %5819 = vst [vmem:[%s9027_s29 + $0x368] sm:$0x1] %v5634_v17  ;;  %v5636_v53 = vpop.f32.mrb[174].mxu0 }
 0x61f   : > { %v5637_v52 = vpop.f32.mrb[175].mxu0 }
 0x644   : > { %v5673_v6 = vpop.f32.mrb[176].mxu0 }
 0x645   : > { %5724 = vst [vmem:[%s9027_s29 + $0x70] sm:$0xff] %v5673_v6  ;;  %v5675_v16 = vpop.f32.mrb[177].mxu0 }
 0x646   : > { %5725 = vst [vmem:[%s9027_s29 + $0x78] sm:$0xff] %v5675_v16  ;;  %v5677_v8 = vpop.f32.mrb[178].mxu0 }
 0x647   : > { %5740 = vst [vmem:[%s9027_s29 + $0xf0] sm:$0xff] %v5677_v8  ;;  %v5679_v13 = vpop.f32.mrb[179].mxu0 }
 0x648   : > { %5741 = vst [vmem:[%s9027_s29 + $0xf8] sm:$0xff] %v5679_v13 }
 0x64c   : > { %v5683_v50 = vpop.f32.mrb[180].mxu0 }
 0x64d   : > { %5756 = vst [vmem:[%s9027_s29 + $0x170] sm:$0xff] %v5683_v50  ;;  %v5685_v10 = vpop.f32.mrb[181].mxu0 }
 0x64e   : > { %5757 = vst [vmem:[%s9027_s29 + $0x178] sm:$0xff] %v5685_v10  ;;  %v5687_v44 = vpop.f32.mrb[182].mxu0 }
 0x64f   : > { %5772 = vst [vmem:[%s9027_s29 + $0x1f0] sm:$0xff] %v5687_v44  ;;  %v5689_v11 = vpop.f32.mrb[183].mxu0 }
 0x650   : > { %5773 = vst [vmem:[%s9027_s29 + $0x1f8] sm:$0xff] %v5689_v11 }
 0x654   : > { %v5693_v14 = vpop.f32.mrb[184].mxu0 }
 0x655   : > { %5788 = vst [vmem:[%s9027_s29 + $0x270] sm:$0xff] %v5693_v14  ;;  %v5695_v33 = vpop.f32.mrb[185].mxu0 }
 0x656   : > { %5789 = vst [vmem:[%s9027_s29 + $0x278] sm:$0xff] %v5695_v33  ;;  %v5697_v58 = vpop.f32.mrb[186].mxu0 }
 0x657   : > { %5804 = vst [vmem:[%s9027_s29 + $0x2f0] sm:$0xff] %v5697_v58  ;;  %v5699_v54 = vpop.f32.mrb[187].mxu0 }
 0x658   : > { %5805 = vst [vmem:[%s9027_s29 + $0x2f8] sm:$0xff] %v5699_v54 }
 0x65c   : > { %v5703_v25 = vpop.f32.mrb[188].mxu0 }
 0x65d   : > { %5820 = vst [vmem:[%s9027_s29 + $0x370] sm:$0x1] %v5703_v25  ;;  %v5705_v5 = vpop.f32.mrb[189].mxu0 }
 0x65e   : > { %5821 = vst [vmem:[%s9027_s29 + $0x378] sm:$0x1] %v5705_v5  ;;  %v5707_v2 = vpop.f32.mrb[190].mxu0 }
 0x65f   : > { %v5708_v15 = vpop.f32.mrb[191].mxu0 }
 0x660 PF: > { %s15_s18 = sadd.s32 1, %s7666_s18  }
 0x661   : > { %p12_p4 = scmp.ge.s32.totalorder %s15_s18, 4  }
 0x663   :  { %14 = sbr.rel (!%p12_p4) target bundleno = 1 (0x1), region = 70 }

</bundles_post_ra>
